<compile_context>
chip_gen: v7x
topology: tpu7x:2x2x1
jax: 0.10.0
libtpu: 0.0.40
codegen_flags: <defaults>
</compile_context>

<pallas_src>
from functools import partial

import jax
import jax.numpy as jnp
from jax import lax
from jax.experimental import pallas as pl
from jax.experimental.pallas import tpu as pltpu

_EPS = 1e-9

# ---- static parameter vector layout (SMEM) ---------------------------------------------
(P_WPCOEF, P_MANSL, P_KSAT, P_PSI, P_THETAS, P_INVZSOIL,
 P_THETA0, P_F0, P_DRY0, P_MAXCFL0) = range(10)

# ---- per-step forcing table layout (flat SMEM, stride N_FORC) ---------------------------
F_RAIN, F_UPQ, F_PLANEQ, F_DT, F_INVDT, F_CUMRAIN = range(6)
N_FORC = 6

# ---- lanes of the per-step diagnostics row / final scalar-state row ---------------------
D_OUTFLOW, D_INFIL_RATE, D_INFIL_DEPTH = range(3)
S_THETA, S_FCUM, S_DRYING, S_MAXCFL = range(4)


def channel_seq_kernel(params_ref, forc_ref, area_in, depth_in, w0_ref, invdx_ref,
                       area_out, depth_out, q_out, diag_out, scal_out,
                       *, n_valid, n_steps, m_side, unroll):
    """Single invocation: runs all n_steps dt-steps in an in-kernel fori_loop with the
    node state carried in vregs."""
    L = area_out.shape[1]
    f32 = jnp.float32
    eps = f32(_EPS)
    two_thirds = f32(2.0 / 3.0)

    lane = lax.broadcasted_iota(jnp.int32, (1, L), 1)
    dlane = lax.broadcasted_iota(jnp.int32, (1, 128), 1)     # diag / scalar-row lanes
    valid = lane < n_valid                                   # mask off padded lanes
    first_mask = lane == 0
    last_mask = lane == (n_valid - 1)
    inv_n = f32(1.0 / n_valid)

    # ---- static scalar parameters (SMEM) ----
    wp_coef = params_ref[P_WPCOEF]        # sqrt(1+SS1^2) + sqrt(1+SS2^2)
    mansl = params_ref[P_MANSL]           # sqrt(SL) / MAN
    ksat = params_ref[P_KSAT]
    psi = params_ref[P_PSI]
    theta_s = params_ref[P_THETAS]
    inv_zsoil = params_ref[P_INVZSOIL]

    w0 = w0_ref[...]                      # (1, L) bottom widths
    inv_dx = invdx_ref[...]               # (1, L) hoisted 1/dx

    use_quad = m_side > _EPS              # static branch (SS1+SS2 is a compile-time float)
    m_side_f = f32(m_side)
    if use_quad:
        two_m = f32(2.0 * m_side)
        inv_m = f32(1.0 / m_side)
    else:
        inv_w0 = pl.reciprocal(jnp.maximum(w0, eps))         # loop-invariant, computed once

    def depth_from_area(a):
        if use_quad:
            return (jnp.sqrt(w0 * w0 + two_m * a) - w0) * inv_m
        return a * inv_w0

    def manning_q(a, h):
        wp = w0 + h * wp_coef
        r = jnp.maximum(a * pl.reciprocal(jnp.maximum(wp, eps), approx=True), eps)
        # pow(r, 2/3) written as exp(2/3*log(r)) -> pure EUP work
        return a * jnp.exp(two_thirds * jnp.log(r)) * mansl

    # ---- initial state (discharge seeded Manning-consistent from area/depth) ----
    area0 = area_in[...]
    depth0 = depth_in[...]
    q0 = jnp.where(valid, manning_q(area0, depth0), 0.0)

    def as11(x):
        return jnp.full((1, 1), x, f32)

    carry0 = (area0, depth0, q0,
              as11(params_ref[P_THETA0]), as11(params_ref[P_F0]),
              as11(params_ref[P_DRY0]), as11(params_ref[P_MAXCFL0]))

    def step(i, carry):
        area, depth, q_curr, theta_c, F_cum, drying, max_cfl = carry

        base = i * N_FORC
        rain = forc_ref[base + F_RAIN]
        up_q = forc_ref[base + F_UPQ]
        plane_q = forc_ref[base + F_PLANEQ]       # plane lateral Q already per unit length
        dt = forc_ref[base + F_DT]
        inv_dt = forc_ref[base + F_INVDT]
        # TODO(synk): cum_rain_start (forc_ref[base + F_CUMRAIN]) unused — the reference
        # infiltration_step_intermediate drying/redistribution branch is not reproduced.

        # ---- Green-Ampt infiltration per node (simplified potential-rate form) ----
        dtheta = jnp.maximum(theta_s - theta_c, 0.0)                   # (1,1)
        ratio = dtheta / jnp.maximum(F_cum, eps)                       # (1,1)
        f_pot = ksat * (1.0 + (psi + depth) * ratio)                   # (1,L)
        water_avail = rain + depth * inv_dt                            # (1,L)
        infil_rate = jnp.where(valid,
                               jnp.maximum(jnp.minimum(water_avail, f_pot), 0.0), 0.0)
        infil_rate_elem = jnp.sum(infil_rate, axis=1, keepdims=True) * inv_n   # (1,1)
        infil_depth_elem = infil_rate_elem * dt
        F_new = F_cum + infil_depth_elem
        theta_new = jnp.minimum(theta_c + infil_depth_elem * inv_zsoil, theta_s)
        drying_new = drying   # TODO(synk): drying branch carried through unchanged

        # ---- net rainfall -> lateral inflow per unit length ----
        net_rain = jnp.maximum(rain - infil_rate, 0.0)
        avg_h = jnp.sum(jnp.where(valid, depth, 0.0), axis=1, keepdims=True) * inv_n
        q_lat = net_rain * (w0 + avg_h * m_side_f) + plane_q

        # ---- kinematic-wave area update (first-order upwind) ----
        # TODO(synk): explicit_muscl_yu_duan_with_plane_contrib slope limiter not
        # reproduced; a first-order upwind explicit kinematic-wave step is used.
        q_up = pltpu.roll(q_curr, shift=1, axis=1)
        q_up = jnp.where(first_mask, up_q, q_up)                       # upstream boundary
        a_next = area + dt * ((q_up - q_curr) * inv_dx + q_lat)
        a_next = jnp.where(valid, jnp.maximum(a_next, 0.0), 0.0)

        # ---- trapezoid depth, Manning discharge of new state ----
        depth_new = depth_from_area(a_next)
        q_new = jnp.where(valid, manning_q(a_next, depth_new), 0.0)

        # ---- diagnostics: outflow at last real node, running max CFL ----
        outflow = jnp.sum(jnp.where(last_mask, q_new, 0.0), axis=1, keepdims=True)
        vel = q_new * pl.reciprocal(jnp.maximum(a_next, eps), approx=True)
        cfl = jnp.where(a_next > eps, vel * dt * inv_dx, 0.0)
        max_cfl_new = jnp.maximum(
            max_cfl, jnp.max(jnp.where(valid, cfl, 0.0), axis=1, keepdims=True))

        # ---- one lane-dense diagnostics row per step ----
        row = (jnp.where(dlane == D_OUTFLOW, outflow, 0.0)
               + jnp.where(dlane == D_INFIL_RATE, infil_rate_elem, 0.0)
               + jnp.where(dlane == D_INFIL_DEPTH, infil_depth_elem, 0.0))
        diag_out[pl.ds(i, 1), :] = row

        return (a_next, depth_new, q_new, theta_new, F_new, drying_new, max_cfl_new)

    a_f, h_f, q_f, th_f, F_f, dry_f, cfl_f = lax.fori_loop(
        0, n_steps, step, carry0, unroll=unroll)

    # ---- final node state and scalar state written exactly once ----
    area_out[...] = a_f
    depth_out[...] = h_f
    q_out[...] = q_f
    scal_out[...] = (jnp.where(dlane == S_THETA, th_f, 0.0)
                     + jnp.where(dlane == S_FCUM, F_f, 0.0)
                     + jnp.where(dlane == S_DRYING, dry_f, 0.0)
                     + jnp.where(dlane == S_MAXCFL, cfl_f, 0.0))


def channel_element_run(state, forcings, props, soil):
    """Run T fused ChannelElement timesteps (num_nodes >= 2 path) in one pallas_call.
    forcings: dict of shape-(T,) arrays.  Returns ((outflow[T], infil_rate[T],
    infil_depth[T]), new_state)."""
    N = int(props["num_nodes"])
    assert N >= 2  # TODO(synk): num_nodes == 1 analytic path not implemented in the kernel
    f32 = jnp.float32
    L = max(128, ((N + 127) // 128) * 128)        # pad node axis to full 128-lane rows
    T = int(forcings["dt"].shape[0])
    unroll = True if T <= 32 else 8

    # dx at nodes from dx_segments (static glue, mirrors the torch branches)
    dx_seg = jnp.asarray(props["dx_segments"], f32)
    if N > 2:
        dx_nodes = jnp.concatenate([dx_seg[:1], 0.5 * (dx_seg[:-1] + dx_seg[1:]), dx_seg[-1:]])
    else:  # N == 2
        dx_nodes = jnp.concatenate([dx_seg[:1], dx_seg[:1]])

    def pad_row(x, fill):
        x = jnp.asarray(x, f32).reshape(-1)
        return jnp.concatenate([x, jnp.full((L - N,), fill, f32)]).reshape(1, L)

    area_p = pad_row(state["area"], 0.0)
    depth_p = pad_row(state["depth"], 0.0)
    w0_p = pad_row(props["W0_nodes"], 1.0)
    invdx_p = pad_row(1.0 / jnp.maximum(dx_nodes, _EPS), 1.0)   # hoisted reciprocal

    ss1, ss2 = float(props["SS1"]), float(props["SS2"])
    m_side = ss1 + ss2
    wp_coef = (1.0 + ss1 * ss1) ** 0.5 + (1.0 + ss2 * ss2) ** 0.5
    mansl = (float(props["SL"]) ** 0.5) / float(props["MAN"])
    params = jnp.stack([jnp.asarray(v, f32) for v in [
        wp_coef, mansl, soil["Ksat"], soil["psi"], soil["theta_s"],
        1.0 / max(float(soil["z_soil"]), _EPS),
        state["theta_current"], state["F_cumulative"],
        state["drying_cumulative"], state["max_cfl"],
    ]])

    dt_arr = jnp.asarray(forcings["dt"], f32)
    forc = jnp.stack([
        jnp.asarray(forcings["rain_rate"], f32),
        jnp.asarray(forcings["upstream_q"], f32),
        jnp.asarray(forcings["plane_lat_q"], f32) / f32(props["LEN"]),
        dt_arr,
        1.0 / jnp.maximum(dt_arr, _EPS),                        # hoisted 1/dt
        jnp.asarray(forcings["cum_rain_start"], f32),
    ], axis=1).reshape(-1)                                      # flat (T*6,) SMEM table

    smem = pl.BlockSpec(memory_space=pltpu.MemorySpace.SMEM)
    vmem = pl.BlockSpec(memory_space=pltpu.MemorySpace.VMEM)

    out_shapes = (
        jax.ShapeDtypeStruct((1, L), f32),         # final area
        jax.ShapeDtypeStruct((1, L), f32),         # final depth
        jax.ShapeDtypeStruct((1, L), f32),         # final discharge
        jax.ShapeDtypeStruct((T, 128), f32),       # per-step diagnostics rows
        jax.ShapeDtypeStruct((1, 128), f32),       # final scalar state row
    )

    area_new, depth_new, q_new, diag, scal = pl.pallas_call(
        partial(channel_seq_kernel, n_valid=N, n_steps=T, m_side=m_side, unroll=unroll),
        out_shape=out_shapes,
        in_specs=[smem, smem, vmem, vmem, vmem, vmem],
        out_specs=(vmem, vmem, vmem, vmem, vmem),
    )(params, forc, area_p, depth_p, w0_p, invdx_p)

    outflow_series = diag[:, D_OUTFLOW]
    infil_rate_series = diag[:, D_INFIL_RATE]
    infil_depth_series = diag[:, D_INFIL_DEPTH]

    new_state = dict(state)
    new_state.update(
        area=area_new[0, :N],
        depth=depth_new[0, :N],
        discharge=q_new[0, :N],
        theta_current=scal[0, S_THETA],
        F_cumulative=scal[0, S_FCUM],
        drying_cumulative=scal[0, S_DRYING],
        max_cfl=scal[0, S_MAXCFL],
        t_elapsed=state["t_elapsed"] + jnp.sum(dt_arr),
    )
    return (outflow_series, infil_rate_series, infil_depth_series), new_state


if __name__ == "__main__":
    key = jax.random.PRNGKey(0)
    N = 16    # nodes along the channel
    T = 24    # fused timesteps per kernel launch
    k1, k2, k3, k4 = jax.random.split(key, 4)

    W0_nodes = 1.0 + 0.1 * jax.random.uniform(k1, (N,), dtype=jnp.float32)
    dx_segments = 10.0 + jax.random.uniform(k2, (N - 1,), dtype=jnp.float32)
    props = dict(
        num_nodes=N, W0_nodes=W0_nodes, dx_segments=dx_segments,
        SS1=1.0, SS2=1.5, MAN=0.035, SL=0.01, LEN=float(jnp.sum(dx_segments)),
    )
    soil = dict(Ksat=2.0e-6, psi=0.11, theta_s=0.45, theta_init=0.20, z_soil=0.5)

    # module buffers start at zero; seed a small positive wet state so the hot path runs
    area0 = 0.05 * (1.0 + jax.random.uniform(k3, (N,), dtype=jnp.float32))
    m = props["SS1"] + props["SS2"]
    depth0 = (jnp.sqrt(W0_nodes * W0_nodes + 2.0 * m * area0) - W0_nodes) / m
    state = dict(
        area=area0,
        depth=depth0,
        discharge=jnp.zeros((N,), jnp.float32),
        theta_current=jnp.float32(soil["theta_init"]),
        F_cumulative=jnp.float32(1.0e-4),
        drying_cumulative=jnp.float32(0.0),
        t_elapsed=jnp.float32(0.0),
        max_cfl=jnp.float32(0.0),
    )

    rain = 1.0e-5 * (0.5 + jax.random.uniform(k4, (T,), dtype=jnp.float32))
    dt_series = jnp.full((T,), 10.0, jnp.float32)
    forcings = dict(
        rain_rate=rain,
        upstream_q=jnp.full((T,), 0.05, jnp.float32),
        plane_lat_q=jnp.full((T,), 0.02, jnp.float32),
        dt=dt_series,
        cum_rain_start=jnp.cumsum(rain * dt_series),
    )

    (outflow_q, infil_rate_elem, infil_depth_elem), new_state = channel_element_run(
        state, forcings, props, soil)
    jax.block_until_ready((outflow_q, infil_rate_elem, infil_depth_elem,
                           new_state["area"], new_state["discharge"],
                           new_state["theta_current"], new_state["max_cfl"]))
    print("KERNEL_OK")
</pallas_src>

<mosaic_0001>
module attributes {stable_mosaic.version = 11 : i64} {
  func.func @channel_seq_kernel(%arg0: memref<10xf32, #tpu.memory_space<smem>>, %arg1: memref<144xf32, #tpu.memory_space<smem>>, %arg2: memref<1x128xf32, #tpu.memory_space<vmem>>, %arg3: memref<1x128xf32, #tpu.memory_space<vmem>>, %arg4: memref<1x128xf32, #tpu.memory_space<vmem>>, %arg5: memref<1x128xf32, #tpu.memory_space<vmem>>, %arg6: memref<1x128xf32, #tpu.memory_space<vmem>>, %arg7: memref<1x128xf32, #tpu.memory_space<vmem>>, %arg8: memref<1x128xf32, #tpu.memory_space<vmem>>, %arg9: memref<24x128xf32, #tpu.memory_space<vmem>>, %arg10: memref<1x128xf32, #tpu.memory_space<vmem>>) attributes {dimension_semantics = [], scalar_prefetch = 0 : i64, scratch_operands = 0 : i64, tpu.core_type = #tpu.core_type<tc>} {
    %0 = tpu.iota {dimensions = array<i32: 1>} : vector<1x128xi32>
    %1 = tpu.iota {dimensions = array<i32: 1>} : vector<1x128xi32>
    %c16_i32 = arith.constant 16 : i32
    %2 = vector.broadcast %c16_i32 : i32 to vector<1x128xi32>
    %3 = arith.cmpi slt, %0, %2 : vector<1x128xi32>
    %c0_i32 = arith.constant 0 : i32
    %4 = vector.broadcast %c0_i32 : i32 to vector<1x128xi32>
    %5 = arith.cmpi eq, %0, %4 : vector<1x128xi32>
    %c15_i32 = arith.constant 15 : i32
    %6 = vector.broadcast %c15_i32 : i32 to vector<1x128xi32>
    %7 = arith.cmpi eq, %0, %6 : vector<1x128xi32>
    %c0 = arith.constant 0 : index
    %8 = memref.load %arg0[%c0] : memref<10xf32, #tpu.memory_space<smem>>
    %c1 = arith.constant 1 : index
    %9 = memref.load %arg0[%c1] : memref<10xf32, #tpu.memory_space<smem>>
    %c2 = arith.constant 2 : index
    %10 = memref.load %arg0[%c2] : memref<10xf32, #tpu.memory_space<smem>>
    %c3 = arith.constant 3 : index
    %11 = memref.load %arg0[%c3] : memref<10xf32, #tpu.memory_space<smem>>
    %c4 = arith.constant 4 : index
    %12 = memref.load %arg0[%c4] : memref<10xf32, #tpu.memory_space<smem>>
    %c5 = arith.constant 5 : index
    %13 = memref.load %arg0[%c5] : memref<10xf32, #tpu.memory_space<smem>>
    %c0_0 = arith.constant 0 : index
    %c0_1 = arith.constant 0 : index
    %14 = vector.load %arg4[%c0_0, %c0_1] : memref<1x128xf32, #tpu.memory_space<vmem>>, vector<1x128xf32>
    %c0_2 = arith.constant 0 : index
    %c0_3 = arith.constant 0 : index
    %15 = vector.load %arg5[%c0_2, %c0_3] : memref<1x128xf32, #tpu.memory_space<vmem>>, vector<1x128xf32>
    %c0_4 = arith.constant 0 : index
    %c0_5 = arith.constant 0 : index
    %16 = vector.load %arg2[%c0_4, %c0_5] : memref<1x128xf32, #tpu.memory_space<vmem>>, vector<1x128xf32>
    %c0_6 = arith.constant 0 : index
    %c0_7 = arith.constant 0 : index
    %17 = vector.load %arg3[%c0_6, %c0_7] : memref<1x128xf32, #tpu.memory_space<vmem>>, vector<1x128xf32>
    %18 = vector.broadcast %8 : f32 to vector<1x128xf32>
    %19 = arith.mulf %17, %18 : vector<1x128xf32>
    %20 = arith.addf %14, %19 : vector<1x128xf32>
    %cst = arith.constant 9.99999971E-10 : f32
    %21 = vector.broadcast %cst : f32 to vector<1x128xf32>
    %22 = arith.maximumf %20, %21 : vector<1x128xf32>
    %23 = tpu.reciprocal %22 {approx = true} : vector<1x128xf32> -> vector<1x128xf32>
    %24 = arith.mulf %16, %23 : vector<1x128xf32>
    %cst_8 = arith.constant 9.99999971E-10 : f32
    %25 = vector.broadcast %cst_8 : f32 to vector<1x128xf32>
    %26 = arith.maximumf %24, %25 : vector<1x128xf32>
    %27 = math.log %26 : vector<1x128xf32>
    %cst_9 = arith.constant 0.666666686 : f32
    %28 = vector.broadcast %cst_9 : f32 to vector<1x128xf32>
    %29 = arith.mulf %28, %27 : vector<1x128xf32>
    %30 = math.exp %29 : vector<1x128xf32>
    %31 = arith.mulf %16, %30 : vector<1x128xf32>
    %32 = vector.broadcast %9 : f32 to vector<1x128xf32>
    %33 = arith.mulf %31, %32 : vector<1x128xf32>
    %cst_10 = arith.constant 0.000000e+00 : f32
    %34 = vector.broadcast %cst_10 : f32 to vector<1x128xf32>
    %35 = arith.select %3, %33, %34 : vector<1x128xi1>, vector<1x128xf32>
    %c6 = arith.constant 6 : index
    %36 = memref.load %arg0[%c6] : memref<10xf32, #tpu.memory_space<smem>>
    %37 = vector.broadcast %36 : f32 to vector<1x1xf32>
    %c7 = arith.constant 7 : index
    %38 = memref.load %arg0[%c7] : memref<10xf32, #tpu.memory_space<smem>>
    %39 = vector.broadcast %38 : f32 to vector<1x1xf32>
    %c8 = arith.constant 8 : index
    %40 = memref.load %arg0[%c8] : memref<10xf32, #tpu.memory_space<smem>>
    %41 = vector.broadcast %40 : f32 to vector<1x1xf32>
    %c9 = arith.constant 9 : index
    %42 = memref.load %arg0[%c9] : memref<10xf32, #tpu.memory_space<smem>>
    %43 = vector.broadcast %42 : f32 to vector<1x1xf32>
    %cst_11 = arith.constant 9.99999971E-10 : f32
    %cst_12 = arith.constant 6.250000e-02 : f32
    %cst_13 = arith.constant 2.500000e+00 : f32
    %cst_14 = arith.constant 5.000000e+00 : f32
    %cst_15 = arith.constant 4.000000e-01 : f32
    %cst_16 = arith.constant 0.666666686 : f32
    %c0_i32_17 = arith.constant 0 : i32
    %c6_i32 = arith.constant 6 : i32
    %44 = arith.muli %c0_i32_17, %c6_i32 : i32
    %c0_i32_18 = arith.constant 0 : i32
    %45 = arith.addi %44, %c0_i32_18 : i32
    %46 = arith.index_cast %45 : i32 to index
    %47 = memref.load %arg1[%46] : memref<144xf32, #tpu.memory_space<smem>>
    %c1_i32 = arith.constant 1 : i32
    %48 = arith.addi %44, %c1_i32 : i32
    %49 = arith.index_cast %48 : i32 to index
    %50 = memref.load %arg1[%49] : memref<144xf32, #tpu.memory_space<smem>>
    %c2_i32 = arith.constant 2 : i32
    %51 = arith.addi %44, %c2_i32 : i32
    %52 = arith.index_cast %51 : i32 to index
    %53 = memref.load %arg1[%52] : memref<144xf32, #tpu.memory_space<smem>>
    %c3_i32 = arith.constant 3 : i32
    %54 = arith.addi %44, %c3_i32 : i32
    %55 = arith.index_cast %54 : i32 to index
    %56 = memref.load %arg1[%55] : memref<144xf32, #tpu.memory_space<smem>>
    %c4_i32 = arith.constant 4 : i32
    %57 = arith.addi %44, %c4_i32 : i32
    %58 = arith.index_cast %57 : i32 to index
    %59 = memref.load %arg1[%58] : memref<144xf32, #tpu.memory_space<smem>>
    %60 = vector.broadcast %12 : f32 to vector<1x1xf32>
    %61 = arith.subf %60, %37 : vector<1x1xf32>
    %cst_19 = arith.constant 0.000000e+00 : f32
    %62 = vector.broadcast %cst_19 : f32 to vector<1x1xf32>
    %63 = arith.maximumf %61, %62 : vector<1x1xf32>
    %64 = vector.broadcast %cst_11 : f32 to vector<1x1xf32>
    %65 = arith.maximumf %39, %64 : vector<1x1xf32>
    %66 = arith.divf %63, %65 : vector<1x1xf32>
    %67 = vector.broadcast %11 : f32 to vector<1x128xf32>
    %68 = arith.addf %67, %17 : vector<1x128xf32>
    %69 = vector.broadcast %66 : vector<1x1xf32> to vector<1x128xf32>
    %70 = arith.mulf %68, %69 : vector<1x128xf32>
    %cst_20 = arith.constant 1.000000e+00 : f32
    %71 = vector.broadcast %cst_20 : f32 to vector<1x128xf32>
    %72 = arith.addf %71, %70 : vector<1x128xf32>
    %73 = vector.broadcast %10 : f32 to vector<1x128xf32>
    %74 = arith.mulf %73, %72 : vector<1x128xf32>
    %75 = vector.broadcast %59 : f32 to vector<1x128xf32>
    %76 = arith.mulf %17, %75 : vector<1x128xf32>
    %77 = vector.broadcast %47 : f32 to vector<1x128xf32>
    %78 = arith.addf %77, %76 : vector<1x128xf32>
    %79 = arith.minimumf %78, %74 : vector<1x128xf32>
    %cst_21 = arith.constant 0.000000e+00 : f32
    %80 = vector.broadcast %cst_21 : f32 to vector<1x128xf32>
    %81 = arith.maximumf %79, %80 : vector<1x128xf32>
    %cst_22 = arith.constant 0.000000e+00 : f32
    %82 = vector.broadcast %cst_22 : f32 to vector<1x128xf32>
    %83 = arith.select %3, %81, %82 : vector<1x128xi1>, vector<1x128xf32>
    %cst_23 = arith.constant dense<0.000000e+00> : vector<1xf32>
    %84 = vector.multi_reduction <add>, %83, %cst_23 [1] : vector<1x128xf32> to vector<1xf32>
    %85 = vector.shape_cast %84 : vector<1xf32> to vector<1x1xf32>
    %86 = vector.broadcast %cst_12 : f32 to vector<1x1xf32>
    %87 = arith.mulf %85, %86 : vector<1x1xf32>
    %88 = vector.broadcast %56 : f32 to vector<1x1xf32>
    %89 = arith.mulf %87, %88 : vector<1x1xf32>
    %90 = arith.addf %39, %89 : vector<1x1xf32>
    %91 = vector.broadcast %13 : f32 to vector<1x1xf32>
    %92 = arith.mulf %89, %91 : vector<1x1xf32>
    %93 = arith.addf %37, %92 : vector<1x1xf32>
    %94 = vector.broadcast %12 : f32 to vector<1x1xf32>
    %95 = arith.minimumf %93, %94 : vector<1x1xf32>
    %96 = vector.broadcast %47 : f32 to vector<1x128xf32>
    %97 = arith.subf %96, %83 : vector<1x128xf32>
    %cst_24 = arith.constant 0.000000e+00 : f32
    %98 = vector.broadcast %cst_24 : f32 to vector<1x128xf32>
    %99 = arith.maximumf %97, %98 : vector<1x128xf32>
    %cst_25 = arith.constant 0.000000e+00 : f32
    %100 = vector.broadcast %cst_25 : f32 to vector<1x128xf32>
    %101 = arith.select %3, %17, %100 : vector<1x128xi1>, vector<1x128xf32>
    %cst_26 = arith.constant dense<0.000000e+00> : vector<1xf32>
    %102 = vector.multi_reduction <add>, %101, %cst_26 [1] : vector<1x128xf32> to vector<1xf32>
    %103 = vector.shape_cast %102 : vector<1xf32> to vector<1x1xf32>
    %104 = vector.broadcast %cst_12 : f32 to vector<1x1xf32>
    %105 = arith.mulf %103, %104 : vector<1x1xf32>
    %106 = vector.broadcast %cst_13 : f32 to vector<1x1xf32>
    %107 = arith.mulf %105, %106 : vector<1x1xf32>
    %108 = vector.broadcast %107 : vector<1x1xf32> to vector<1x128xf32>
    %109 = arith.addf %14, %108 : vector<1x128xf32>
    %110 = arith.mulf %99, %109 : vector<1x128xf32>
    %111 = vector.broadcast %53 : f32 to vector<1x128xf32>
    %112 = arith.addf %110, %111 : vector<1x128xf32>
    %c1_i32_27 = arith.constant 1 : i32
    %113 = tpu.dynamic_rotate %35 by %c1_i32_27 dim 1 : vector<1x128xf32>, i32 -> vector<1x128xf32>
    %114 = vector.broadcast %50 : f32 to vector<1x128xf32>
    %115 = arith.select %5, %114, %113 : vector<1x128xi1>, vector<1x128xf32>
    %116 = arith.subf %115, %35 : vector<1x128xf32>
    %117 = arith.mulf %116, %15 : vector<1x128xf32>
    %118 = arith.addf %117, %112 : vector<1x128xf32>
    %119 = vector.broadcast %56 : f32 to vector<1x128xf32>
    %120 = arith.mulf %119, %118 : vector<1x128xf32>
    %121 = arith.addf %16, %120 : vector<1x128xf32>
    %cst_28 = arith.constant 0.000000e+00 : f32
    %122 = vector.broadcast %cst_28 : f32 to vector<1x128xf32>
    %123 = arith.maximumf %121, %122 : vector<1x128xf32>
    %cst_29 = arith.constant 0.000000e+00 : f32
    %124 = vector.broadcast %cst_29 : f32 to vector<1x128xf32>
    %125 = arith.select %3, %123, %124 : vector<1x128xi1>, vector<1x128xf32>
    %126 = arith.mulf %14, %14 : vector<1x128xf32>
    %127 = vector.broadcast %cst_14 : f32 to vector<1x128xf32>
    %128 = arith.mulf %127, %125 : vector<1x128xf32>
    %129 = arith.addf %126, %128 : vector<1x128xf32>
    %130 = math.sqrt %129 : vector<1x128xf32>
    %131 = arith.subf %130, %14 : vector<1x128xf32>
    %132 = vector.broadcast %cst_15 : f32 to vector<1x128xf32>
    %133 = arith.mulf %131, %132 : vector<1x128xf32>
    %134 = vector.broadcast %8 : f32 to vector<1x128xf32>
    %135 = arith.mulf %133, %134 : vector<1x128xf32>
    %136 = arith.addf %14, %135 : vector<1x128xf32>
    %137 = vector.broadcast %cst_11 : f32 to vector<1x128xf32>
    %138 = arith.maximumf %136, %137 : vector<1x128xf32>
    %139 = tpu.reciprocal %138 {approx = true} : vector<1x128xf32> -> vector<1x128xf32>
    %140 = arith.mulf %125, %139 : vector<1x128xf32>
    %141 = vector.broadcast %cst_11 : f32 to vector<1x128xf32>
    %142 = arith.maximumf %140, %141 : vector<1x128xf32>
    %143 = math.log %142 : vector<1x128xf32>
    %144 = vector.broadcast %cst_16 : f32 to vector<1x128xf32>
    %145 = arith.mulf %144, %143 : vector<1x128xf32>
    %146 = math.exp %145 : vector<1x128xf32>
    %147 = arith.mulf %125, %146 : vector<1x128xf32>
    %148 = vector.broadcast %9 : f32 to vector<1x128xf32>
    %149 = arith.mulf %147, %148 : vector<1x128xf32>
    %cst_30 = arith.constant 0.000000e+00 : f32
    %150 = vector.broadcast %cst_30 : f32 to vector<1x128xf32>
    %151 = arith.select %3, %149, %150 : vector<1x128xi1>, vector<1x128xf32>
    %cst_31 = arith.constant 0.000000e+00 : f32
    %152 = vector.broadcast %cst_31 : f32 to vector<1x128xf32>
    %153 = arith.select %7, %151, %152 : vector<1x128xi1>, vector<1x128xf32>
    %cst_32 = arith.constant dense<0.000000e+00> : vector<1xf32>
    %154 = vector.multi_reduction <add>, %153, %cst_32 [1] : vector<1x128xf32> to vector<1xf32>
    %155 = vector.shape_cast %154 : vector<1xf32> to vector<1x1xf32>
    %156 = vector.broadcast %cst_11 : f32 to vector<1x128xf32>
    %157 = arith.maximumf %125, %156 : vector<1x128xf32>
    %158 = tpu.reciprocal %157 {approx = true} : vector<1x128xf32> -> vector<1x128xf32>
    %159 = arith.mulf %151, %158 : vector<1x128xf32>
    %160 = vector.broadcast %cst_11 : f32 to vector<1x128xf32>
    %161 = arith.cmpf ogt, %125, %160 : vector<1x128xf32>
    %162 = vector.broadcast %56 : f32 to vector<1x128xf32>
    %163 = arith.mulf %159, %162 : vector<1x128xf32>
    %164 = arith.mulf %163, %15 : vector<1x128xf32>
    %cst_33 = arith.constant 0.000000e+00 : f32
    %165 = vector.broadcast %cst_33 : f32 to vector<1x128xf32>
    %166 = arith.select %161, %164, %165 : vector<1x128xi1>, vector<1x128xf32>
    %cst_34 = arith.constant 0.000000e+00 : f32
    %167 = vector.broadcast %cst_34 : f32 to vector<1x128xf32>
    %168 = arith.select %3, %166, %167 : vector<1x128xi1>, vector<1x128xf32>
    %cst_35 = arith.constant dense<0xFF800000> : vector<1xf32>
    %169 = vector.multi_reduction <maximumf>, %168, %cst_35 [1] : vector<1x128xf32> to vector<1xf32>
    %170 = vector.shape_cast %169 : vector<1xf32> to vector<1x1xf32>
    %171 = arith.maximumf %43, %170 : vector<1x1xf32>
    %c0_i32_36 = arith.constant 0 : i32
    %172 = vector.broadcast %c0_i32_36 : i32 to vector<1x128xi32>
    %173 = arith.cmpi eq, %1, %172 : vector<1x128xi32>
    %cst_37 = arith.constant 0.000000e+00 : f32
    %174 = vector.shape_cast %155 : vector<1x1xf32> to vector<1x1xf32>
    %175 = vector.broadcast %174 : vector<1x1xf32> to vector<1x128xf32>
    %176 = vector.broadcast %cst_37 : f32 to vector<1x128xf32>
    %177 = arith.select %173, %175, %176 : vector<1x128xi1>, vector<1x128xf32>
    %c1_i32_38 = arith.constant 1 : i32
    %178 = vector.broadcast %c1_i32_38 : i32 to vector<1x128xi32>
    %179 = arith.cmpi eq, %1, %178 : vector<1x128xi32>
    %cst_39 = arith.constant 0.000000e+00 : f32
    %180 = vector.shape_cast %87 : vector<1x1xf32> to vector<1x1xf32>
    %181 = vector.broadcast %180 : vector<1x1xf32> to vector<1x128xf32>
    %182 = vector.broadcast %cst_39 : f32 to vector<1x128xf32>
    %183 = arith.select %179, %181, %182 : vector<1x128xi1>, vector<1x128xf32>
    %184 = arith.addf %177, %183 : vector<1x128xf32>
    %c2_i32_40 = arith.constant 2 : i32
    %185 = vector.broadcast %c2_i32_40 : i32 to vector<1x128xi32>
    %186 = arith.cmpi eq, %1, %185 : vector<1x128xi32>
    %cst_41 = arith.constant 0.000000e+00 : f32
    %187 = vector.shape_cast %89 : vector<1x1xf32> to vector<1x1xf32>
    %188 = vector.broadcast %187 : vector<1x1xf32> to vector<1x128xf32>
    %189 = vector.broadcast %cst_41 : f32 to vector<1x128xf32>
    %190 = arith.select %186, %188, %189 : vector<1x128xi1>, vector<1x128xf32>
    %191 = arith.addf %184, %190 : vector<1x128xf32>
    %192 = arith.index_cast %c0_i32_17 : i32 to index
    %c0_42 = arith.constant 0 : index
    %193 = vector.load %arg9[%192, %c0_42] : memref<24x128xf32, #tpu.memory_space<vmem>>, vector<1x128xf32>
    tpu.vector_store %arg9[%192, %c0_42], %191 {strides = array<i32>} : memref<24x128xf32, #tpu.memory_space<vmem>>, vector<1x128xf32>,
    %c1_i32_43 = arith.constant 1 : i32
    %c6_i32_44 = arith.constant 6 : i32
    %194 = arith.muli %c1_i32_43, %c6_i32_44 : i32
    %c0_i32_45 = arith.constant 0 : i32
    %195 = arith.addi %194, %c0_i32_45 : i32
    %196 = arith.index_cast %195 : i32 to index
    %197 = memref.load %arg1[%196] : memref<144xf32, #tpu.memory_space<smem>>
    %c1_i32_46 = arith.constant 1 : i32
    %198 = arith.addi %194, %c1_i32_46 : i32
    %199 = arith.index_cast %198 : i32 to index
    %200 = memref.load %arg1[%199] : memref<144xf32, #tpu.memory_space<smem>>
    %c2_i32_47 = arith.constant 2 : i32
    %201 = arith.addi %194, %c2_i32_47 : i32
    %202 = arith.index_cast %201 : i32 to index
    %203 = memref.load %arg1[%202] : memref<144xf32, #tpu.memory_space<smem>>
    %c3_i32_48 = arith.constant 3 : i32
    %204 = arith.addi %194, %c3_i32_48 : i32
    %205 = arith.index_cast %204 : i32 to index
    %206 = memref.load %arg1[%205] : memref<144xf32, #tpu.memory_space<smem>>
    %c4_i32_49 = arith.constant 4 : i32
    %207 = arith.addi %194, %c4_i32_49 : i32
    %208 = arith.index_cast %207 : i32 to index
    %209 = memref.load %arg1[%208] : memref<144xf32, #tpu.memory_space<smem>>
    %210 = vector.broadcast %12 : f32 to vector<1x1xf32>
    %211 = arith.subf %210, %95 : vector<1x1xf32>
    %cst_50 = arith.constant 0.000000e+00 : f32
    %212 = vector.broadcast %cst_50 : f32 to vector<1x1xf32>
    %213 = arith.maximumf %211, %212 : vector<1x1xf32>
    %214 = vector.broadcast %cst_11 : f32 to vector<1x1xf32>
    %215 = arith.maximumf %90, %214 : vector<1x1xf32>
    %216 = arith.divf %213, %215 : vector<1x1xf32>
    %217 = vector.broadcast %11 : f32 to vector<1x128xf32>
    %218 = arith.addf %217, %133 : vector<1x128xf32>
    %219 = vector.broadcast %216 : vector<1x1xf32> to vector<1x128xf32>
    %220 = arith.mulf %218, %219 : vector<1x128xf32>
    %cst_51 = arith.constant 1.000000e+00 : f32
    %221 = vector.broadcast %cst_51 : f32 to vector<1x128xf32>
    %222 = arith.addf %221, %220 : vector<1x128xf32>
    %223 = vector.broadcast %10 : f32 to vector<1x128xf32>
    %224 = arith.mulf %223, %222 : vector<1x128xf32>
    %225 = vector.broadcast %209 : f32 to vector<1x128xf32>
    %226 = arith.mulf %133, %225 : vector<1x128xf32>
    %227 = vector.broadcast %197 : f32 to vector<1x128xf32>
    %228 = arith.addf %227, %226 : vector<1x128xf32>
    %229 = arith.minimumf %228, %224 : vector<1x128xf32>
    %cst_52 = arith.constant 0.000000e+00 : f32
    %230 = vector.broadcast %cst_52 : f32 to vector<1x128xf32>
    %231 = arith.maximumf %229, %230 : vector<1x128xf32>
    %cst_53 = arith.constant 0.000000e+00 : f32
    %232 = vector.broadcast %cst_53 : f32 to vector<1x128xf32>
    %233 = arith.select %3, %231, %232 : vector<1x128xi1>, vector<1x128xf32>
    %cst_54 = arith.constant dense<0.000000e+00> : vector<1xf32>
    %234 = vector.multi_reduction <add>, %233, %cst_54 [1] : vector<1x128xf32> to vector<1xf32>
    %235 = vector.shape_cast %234 : vector<1xf32> to vector<1x1xf32>
    %236 = vector.broadcast %cst_12 : f32 to vector<1x1xf32>
    %237 = arith.mulf %235, %236 : vector<1x1xf32>
    %238 = vector.broadcast %206 : f32 to vector<1x1xf32>
    %239 = arith.mulf %237, %238 : vector<1x1xf32>
    %240 = arith.addf %90, %239 : vector<1x1xf32>
    %241 = vector.broadcast %13 : f32 to vector<1x1xf32>
    %242 = arith.mulf %239, %241 : vector<1x1xf32>
    %243 = arith.addf %95, %242 : vector<1x1xf32>
    %244 = vector.broadcast %12 : f32 to vector<1x1xf32>
    %245 = arith.minimumf %243, %244 : vector<1x1xf32>
    %246 = vector.broadcast %197 : f32 to vector<1x128xf32>
    %247 = arith.subf %246, %233 : vector<1x128xf32>
    %cst_55 = arith.constant 0.000000e+00 : f32
    %248 = vector.broadcast %cst_55 : f32 to vector<1x128xf32>
    %249 = arith.maximumf %247, %248 : vector<1x128xf32>
    %cst_56 = arith.constant 0.000000e+00 : f32
    %250 = vector.broadcast %cst_56 : f32 to vector<1x128xf32>
    %251 = arith.select %3, %133, %250 : vector<1x128xi1>, vector<1x128xf32>
    %cst_57 = arith.constant dense<0.000000e+00> : vector<1xf32>
    %252 = vector.multi_reduction <add>, %251, %cst_57 [1] : vector<1x128xf32> to vector<1xf32>
    %253 = vector.shape_cast %252 : vector<1xf32> to vector<1x1xf32>
    %254 = vector.broadcast %cst_12 : f32 to vector<1x1xf32>
    %255 = arith.mulf %253, %254 : vector<1x1xf32>
    %256 = vector.broadcast %cst_13 : f32 to vector<1x1xf32>
    %257 = arith.mulf %255, %256 : vector<1x1xf32>
    %258 = vector.broadcast %257 : vector<1x1xf32> to vector<1x128xf32>
    %259 = arith.addf %14, %258 : vector<1x128xf32>
    %260 = arith.mulf %249, %259 : vector<1x128xf32>
    %261 = vector.broadcast %203 : f32 to vector<1x128xf32>
    %262 = arith.addf %260, %261 : vector<1x128xf32>
    %c1_i32_58 = arith.constant 1 : i32
    %263 = tpu.dynamic_rotate %151 by %c1_i32_58 dim 1 : vector<1x128xf32>, i32 -> vector<1x128xf32>
    %264 = vector.broadcast %200 : f32 to vector<1x128xf32>
    %265 = arith.select %5, %264, %263 : vector<1x128xi1>, vector<1x128xf32>
    %266 = arith.subf %265, %151 : vector<1x128xf32>
    %267 = arith.mulf %266, %15 : vector<1x128xf32>
    %268 = arith.addf %267, %262 : vector<1x128xf32>
    %269 = vector.broadcast %206 : f32 to vector<1x128xf32>
    %270 = arith.mulf %269, %268 : vector<1x128xf32>
    %271 = arith.addf %125, %270 : vector<1x128xf32>
    %cst_59 = arith.constant 0.000000e+00 : f32
    %272 = vector.broadcast %cst_59 : f32 to vector<1x128xf32>
    %273 = arith.maximumf %271, %272 : vector<1x128xf32>
    %cst_60 = arith.constant 0.000000e+00 : f32
    %274 = vector.broadcast %cst_60 : f32 to vector<1x128xf32>
    %275 = arith.select %3, %273, %274 : vector<1x128xi1>, vector<1x128xf32>
    %276 = arith.mulf %14, %14 : vector<1x128xf32>
    %277 = vector.broadcast %cst_14 : f32 to vector<1x128xf32>
    %278 = arith.mulf %277, %275 : vector<1x128xf32>
    %279 = arith.addf %276, %278 : vector<1x128xf32>
    %280 = math.sqrt %279 : vector<1x128xf32>
    %281 = arith.subf %280, %14 : vector<1x128xf32>
    %282 = vector.broadcast %cst_15 : f32 to vector<1x128xf32>
    %283 = arith.mulf %281, %282 : vector<1x128xf32>
    %284 = vector.broadcast %8 : f32 to vector<1x128xf32>
    %285 = arith.mulf %283, %284 : vector<1x128xf32>
    %286 = arith.addf %14, %285 : vector<1x128xf32>
    %287 = vector.broadcast %cst_11 : f32 to vector<1x128xf32>
    %288 = arith.maximumf %286, %287 : vector<1x128xf32>
    %289 = tpu.reciprocal %288 {approx = true} : vector<1x128xf32> -> vector<1x128xf32>
    %290 = arith.mulf %275, %289 : vector<1x128xf32>
    %291 = vector.broadcast %cst_11 : f32 to vector<1x128xf32>
    %292 = arith.maximumf %290, %291 : vector<1x128xf32>
    %293 = math.log %292 : vector<1x128xf32>
    %294 = vector.broadcast %cst_16 : f32 to vector<1x128xf32>
    %295 = arith.mulf %294, %293 : vector<1x128xf32>
    %296 = math.exp %295 : vector<1x128xf32>
    %297 = arith.mulf %275, %296 : vector<1x128xf32>
    %298 = vector.broadcast %9 : f32 to vector<1x128xf32>
    %299 = arith.mulf %297, %298 : vector<1x128xf32>
    %cst_61 = arith.constant 0.000000e+00 : f32
    %300 = vector.broadcast %cst_61 : f32 to vector<1x128xf32>
    %301 = arith.select %3, %299, %300 : vector<1x128xi1>, vector<1x128xf32>
    %cst_62 = arith.constant 0.000000e+00 : f32
    %302 = vector.broadcast %cst_62 : f32 to vector<1x128xf32>
    %303 = arith.select %7, %301, %302 : vector<1x128xi1>, vector<1x128xf32>
    %cst_63 = arith.constant dense<0.000000e+00> : vector<1xf32>
    %304 = vector.multi_reduction <add>, %303, %cst_63 [1] : vector<1x128xf32> to vector<1xf32>
    %305 = vector.shape_cast %304 : vector<1xf32> to vector<1x1xf32>
    %306 = vector.broadcast %cst_11 : f32 to vector<1x128xf32>
    %307 = arith.maximumf %275, %306 : vector<1x128xf32>
    %308 = tpu.reciprocal %307 {approx = true} : vector<1x128xf32> -> vector<1x128xf32>
    %309 = arith.mulf %301, %308 : vector<1x128xf32>
    %310 = vector.broadcast %cst_11 : f32 to vector<1x128xf32>
    %311 = arith.cmpf ogt, %275, %310 : vector<1x128xf32>
    %312 = vector.broadcast %206 : f32 to vector<1x128xf32>
    %313 = arith.mulf %309, %312 : vector<1x128xf32>
    %314 = arith.mulf %313, %15 : vector<1x128xf32>
    %cst_64 = arith.constant 0.000000e+00 : f32
    %315 = vector.broadcast %cst_64 : f32 to vector<1x128xf32>
    %316 = arith.select %311, %314, %315 : vector<1x128xi1>, vector<1x128xf32>
    %cst_65 = arith.constant 0.000000e+00 : f32
    %317 = vector.broadcast %cst_65 : f32 to vector<1x128xf32>
    %318 = arith.select %3, %316, %317 : vector<1x128xi1>, vector<1x128xf32>
    %cst_66 = arith.constant dense<0xFF800000> : vector<1xf32>
    %319 = vector.multi_reduction <maximumf>, %318, %cst_66 [1] : vector<1x128xf32> to vector<1xf32>
    %320 = vector.shape_cast %319 : vector<1xf32> to vector<1x1xf32>
    %321 = arith.maximumf %171, %320 : vector<1x1xf32>
    %c0_i32_67 = arith.constant 0 : i32
    %322 = vector.broadcast %c0_i32_67 : i32 to vector<1x128xi32>
    %323 = arith.cmpi eq, %1, %322 : vector<1x128xi32>
    %cst_68 = arith.constant 0.000000e+00 : f32
    %324 = vector.shape_cast %305 : vector<1x1xf32> to vector<1x1xf32>
    %325 = vector.broadcast %324 : vector<1x1xf32> to vector<1x128xf32>
    %326 = vector.broadcast %cst_68 : f32 to vector<1x128xf32>
    %327 = arith.select %323, %325, %326 : vector<1x128xi1>, vector<1x128xf32>
    %c1_i32_69 = arith.constant 1 : i32
    %328 = vector.broadcast %c1_i32_69 : i32 to vector<1x128xi32>
    %329 = arith.cmpi eq, %1, %328 : vector<1x128xi32>
    %cst_70 = arith.constant 0.000000e+00 : f32
    %330 = vector.shape_cast %237 : vector<1x1xf32> to vector<1x1xf32>
    %331 = vector.broadcast %330 : vector<1x1xf32> to vector<1x128xf32>
    %332 = vector.broadcast %cst_70 : f32 to vector<1x128xf32>
    %333 = arith.select %329, %331, %332 : vector<1x128xi1>, vector<1x128xf32>
    %334 = arith.addf %327, %333 : vector<1x128xf32>
    %c2_i32_71 = arith.constant 2 : i32
    %335 = vector.broadcast %c2_i32_71 : i32 to vector<1x128xi32>
    %336 = arith.cmpi eq, %1, %335 : vector<1x128xi32>
    %cst_72 = arith.constant 0.000000e+00 : f32
    %337 = vector.shape_cast %239 : vector<1x1xf32> to vector<1x1xf32>
    %338 = vector.broadcast %337 : vector<1x1xf32> to vector<1x128xf32>
    %339 = vector.broadcast %cst_72 : f32 to vector<1x128xf32>
    %340 = arith.select %336, %338, %339 : vector<1x128xi1>, vector<1x128xf32>
    %341 = arith.addf %334, %340 : vector<1x128xf32>
    %342 = arith.index_cast %c1_i32_43 : i32 to index
    %c0_73 = arith.constant 0 : index
    %343 = vector.load %arg9[%342, %c0_73] : memref<24x128xf32, #tpu.memory_space<vmem>>, vector<1x128xf32>
    tpu.vector_store %arg9[%342, %c0_73], %341 {strides = array<i32>} : memref<24x128xf32, #tpu.memory_space<vmem>>, vector<1x128xf32>,
    %c2_i32_74 = arith.constant 2 : i32
    %c6_i32_75 = arith.constant 6 : i32
    %344 = arith.muli %c2_i32_74, %c6_i32_75 : i32
    %c0_i32_76 = arith.constant 0 : i32
    %345 = arith.addi %344, %c0_i32_76 : i32
    %346 = arith.index_cast %345 : i32 to index
    %347 = memref.load %arg1[%346] : memref<144xf32, #tpu.memory_space<smem>>
    %c1_i32_77 = arith.constant 1 : i32
    %348 = arith.addi %344, %c1_i32_77 : i32
    %349 = arith.index_cast %348 : i32 to index
    %350 = memref.load %arg1[%349] : memref<144xf32, #tpu.memory_space<smem>>
    %c2_i32_78 = arith.constant 2 : i32
    %351 = arith.addi %344, %c2_i32_78 : i32
    %352 = arith.index_cast %351 : i32 to index
    %353 = memref.load %arg1[%352] : memref<144xf32, #tpu.memory_space<smem>>
    %c3_i32_79 = arith.constant 3 : i32
    %354 = arith.addi %344, %c3_i32_79 : i32
    %355 = arith.index_cast %354 : i32 to index
    %356 = memref.load %arg1[%355] : memref<144xf32, #tpu.memory_space<smem>>
    %c4_i32_80 = arith.constant 4 : i32
    %357 = arith.addi %344, %c4_i32_80 : i32
    %358 = arith.index_cast %357 : i32 to index
    %359 = memref.load %arg1[%358] : memref<144xf32, #tpu.memory_space<smem>>
    %360 = vector.broadcast %12 : f32 to vector<1x1xf32>
    %361 = arith.subf %360, %245 : vector<1x1xf32>
    %cst_81 = arith.constant 0.000000e+00 : f32
    %362 = vector.broadcast %cst_81 : f32 to vector<1x1xf32>
    %363 = arith.maximumf %361, %362 : vector<1x1xf32>
    %364 = vector.broadcast %cst_11 : f32 to vector<1x1xf32>
    %365 = arith.maximumf %240, %364 : vector<1x1xf32>
    %366 = arith.divf %363, %365 : vector<1x1xf32>
    %367 = vector.broadcast %11 : f32 to vector<1x128xf32>
    %368 = arith.addf %367, %283 : vector<1x128xf32>
    %369 = vector.broadcast %366 : vector<1x1xf32> to vector<1x128xf32>
    %370 = arith.mulf %368, %369 : vector<1x128xf32>
    %cst_82 = arith.constant 1.000000e+00 : f32
    %371 = vector.broadcast %cst_82 : f32 to vector<1x128xf32>
    %372 = arith.addf %371, %370 : vector<1x128xf32>
    %373 = vector.broadcast %10 : f32 to vector<1x128xf32>
    %374 = arith.mulf %373, %372 : vector<1x128xf32>
    %375 = vector.broadcast %359 : f32 to vector<1x128xf32>
    %376 = arith.mulf %283, %375 : vector<1x128xf32>
    %377 = vector.broadcast %347 : f32 to vector<1x128xf32>
    %378 = arith.addf %377, %376 : vector<1x128xf32>
    %379 = arith.minimumf %378, %374 : vector<1x128xf32>
    %cst_83 = arith.constant 0.000000e+00 : f32
    %380 = vector.broadcast %cst_83 : f32 to vector<1x128xf32>
    %381 = arith.maximumf %379, %380 : vector<1x128xf32>
    %cst_84 = arith.constant 0.000000e+00 : f32
    %382 = vector.broadcast %cst_84 : f32 to vector<1x128xf32>
    %383 = arith.select %3, %381, %382 : vector<1x128xi1>, vector<1x128xf32>
    %cst_85 = arith.constant dense<0.000000e+00> : vector<1xf32>
    %384 = vector.multi_reduction <add>, %383, %cst_85 [1] : vector<1x128xf32> to vector<1xf32>
    %385 = vector.shape_cast %384 : vector<1xf32> to vector<1x1xf32>
    %386 = vector.broadcast %cst_12 : f32 to vector<1x1xf32>
    %387 = arith.mulf %385, %386 : vector<1x1xf32>
    %388 = vector.broadcast %356 : f32 to vector<1x1xf32>
    %389 = arith.mulf %387, %388 : vector<1x1xf32>
    %390 = arith.addf %240, %389 : vector<1x1xf32>
    %391 = vector.broadcast %13 : f32 to vector<1x1xf32>
    %392 = arith.mulf %389, %391 : vector<1x1xf32>
    %393 = arith.addf %245, %392 : vector<1x1xf32>
    %394 = vector.broadcast %12 : f32 to vector<1x1xf32>
    %395 = arith.minimumf %393, %394 : vector<1x1xf32>
    %396 = vector.broadcast %347 : f32 to vector<1x128xf32>
    %397 = arith.subf %396, %383 : vector<1x128xf32>
    %cst_86 = arith.constant 0.000000e+00 : f32
    %398 = vector.broadcast %cst_86 : f32 to vector<1x128xf32>
    %399 = arith.maximumf %397, %398 : vector<1x128xf32>
    %cst_87 = arith.constant 0.000000e+00 : f32
    %400 = vector.broadcast %cst_87 : f32 to vector<1x128xf32>
    %401 = arith.select %3, %283, %400 : vector<1x128xi1>, vector<1x128xf32>
    %cst_88 = arith.constant dense<0.000000e+00> : vector<1xf32>
    %402 = vector.multi_reduction <add>, %401, %cst_88 [1] : vector<1x128xf32> to vector<1xf32>
    %403 = vector.shape_cast %402 : vector<1xf32> to vector<1x1xf32>
    %404 = vector.broadcast %cst_12 : f32 to vector<1x1xf32>
    %405 = arith.mulf %403, %404 : vector<1x1xf32>
    %406 = vector.broadcast %cst_13 : f32 to vector<1x1xf32>
    %407 = arith.mulf %405, %406 : vector<1x1xf32>
    %408 = vector.broadcast %407 : vector<1x1xf32> to vector<1x128xf32>
    %409 = arith.addf %14, %408 : vector<1x128xf32>
    %410 = arith.mulf %399, %409 : vector<1x128xf32>
    %411 = vector.broadcast %353 : f32 to vector<1x128xf32>
    %412 = arith.addf %410, %411 : vector<1x128xf32>
    %c1_i32_89 = arith.constant 1 : i32
    %413 = tpu.dynamic_rotate %301 by %c1_i32_89 dim 1 : vector<1x128xf32>, i32 -> vector<1x128xf32>
    %414 = vector.broadcast %350 : f32 to vector<1x128xf32>
    %415 = arith.select %5, %414, %413 : vector<1x128xi1>, vector<1x128xf32>
    %416 = arith.subf %415, %301 : vector<1x128xf32>
    %417 = arith.mulf %416, %15 : vector<1x128xf32>
    %418 = arith.addf %417, %412 : vector<1x128xf32>
    %419 = vector.broadcast %356 : f32 to vector<1x128xf32>
    %420 = arith.mulf %419, %418 : vector<1x128xf32>
    %421 = arith.addf %275, %420 : vector<1x128xf32>
    %cst_90 = arith.constant 0.000000e+00 : f32
    %422 = vector.broadcast %cst_90 : f32 to vector<1x128xf32>
    %423 = arith.maximumf %421, %422 : vector<1x128xf32>
    %cst_91 = arith.constant 0.000000e+00 : f32
    %424 = vector.broadcast %cst_91 : f32 to vector<1x128xf32>
    %425 = arith.select %3, %423, %424 : vector<1x128xi1>, vector<1x128xf32>
    %426 = arith.mulf %14, %14 : vector<1x128xf32>
    %427 = vector.broadcast %cst_14 : f32 to vector<1x128xf32>
    %428 = arith.mulf %427, %425 : vector<1x128xf32>
    %429 = arith.addf %426, %428 : vector<1x128xf32>
    %430 = math.sqrt %429 : vector<1x128xf32>
    %431 = arith.subf %430, %14 : vector<1x128xf32>
    %432 = vector.broadcast %cst_15 : f32 to vector<1x128xf32>
    %433 = arith.mulf %431, %432 : vector<1x128xf32>
    %434 = vector.broadcast %8 : f32 to vector<1x128xf32>
    %435 = arith.mulf %433, %434 : vector<1x128xf32>
    %436 = arith.addf %14, %435 : vector<1x128xf32>
    %437 = vector.broadcast %cst_11 : f32 to vector<1x128xf32>
    %438 = arith.maximumf %436, %437 : vector<1x128xf32>
    %439 = tpu.reciprocal %438 {approx = true} : vector<1x128xf32> -> vector<1x128xf32>
    %440 = arith.mulf %425, %439 : vector<1x128xf32>
    %441 = vector.broadcast %cst_11 : f32 to vector<1x128xf32>
    %442 = arith.maximumf %440, %441 : vector<1x128xf32>
    %443 = math.log %442 : vector<1x128xf32>
    %444 = vector.broadcast %cst_16 : f32 to vector<1x128xf32>
    %445 = arith.mulf %444, %443 : vector<1x128xf32>
    %446 = math.exp %445 : vector<1x128xf32>
    %447 = arith.mulf %425, %446 : vector<1x128xf32>
    %448 = vector.broadcast %9 : f32 to vector<1x128xf32>
    %449 = arith.mulf %447, %448 : vector<1x128xf32>
    %cst_92 = arith.constant 0.000000e+00 : f32
    %450 = vector.broadcast %cst_92 : f32 to vector<1x128xf32>
    %451 = arith.select %3, %449, %450 : vector<1x128xi1>, vector<1x128xf32>
    %cst_93 = arith.constant 0.000000e+00 : f32
    %452 = vector.broadcast %cst_93 : f32 to vector<1x128xf32>
    %453 = arith.select %7, %451, %452 : vector<1x128xi1>, vector<1x128xf32>
    %cst_94 = arith.constant dense<0.000000e+00> : vector<1xf32>
    %454 = vector.multi_reduction <add>, %453, %cst_94 [1] : vector<1x128xf32> to vector<1xf32>
    %455 = vector.shape_cast %454 : vector<1xf32> to vector<1x1xf32>
    %456 = vector.broadcast %cst_11 : f32 to vector<1x128xf32>
    %457 = arith.maximumf %425, %456 : vector<1x128xf32>
    %458 = tpu.reciprocal %457 {approx = true} : vector<1x128xf32> -> vector<1x128xf32>
    %459 = arith.mulf %451, %458 : vector<1x128xf32>
    %460 = vector.broadcast %cst_11 : f32 to vector<1x128xf32>
    %461 = arith.cmpf ogt, %425, %460 : vector<1x128xf32>
    %462 = vector.broadcast %356 : f32 to vector<1x128xf32>
    %463 = arith.mulf %459, %462 : vector<1x128xf32>
    %464 = arith.mulf %463, %15 : vector<1x128xf32>
    %cst_95 = arith.constant 0.000000e+00 : f32
    %465 = vector.broadcast %cst_95 : f32 to vector<1x128xf32>
    %466 = arith.select %461, %464, %465 : vector<1x128xi1>, vector<1x128xf32>
    %cst_96 = arith.constant 0.000000e+00 : f32
    %467 = vector.broadcast %cst_96 : f32 to vector<1x128xf32>
    %468 = arith.select %3, %466, %467 : vector<1x128xi1>, vector<1x128xf32>
    %cst_97 = arith.constant dense<0xFF800000> : vector<1xf32>
    %469 = vector.multi_reduction <maximumf>, %468, %cst_97 [1] : vector<1x128xf32> to vector<1xf32>
    %470 = vector.shape_cast %469 : vector<1xf32> to vector<1x1xf32>
    %471 = arith.maximumf %321, %470 : vector<1x1xf32>
    %c0_i32_98 = arith.constant 0 : i32
    %472 = vector.broadcast %c0_i32_98 : i32 to vector<1x128xi32>
    %473 = arith.cmpi eq, %1, %472 : vector<1x128xi32>
    %cst_99 = arith.constant 0.000000e+00 : f32
    %474 = vector.shape_cast %455 : vector<1x1xf32> to vector<1x1xf32>
    %475 = vector.broadcast %474 : vector<1x1xf32> to vector<1x128xf32>
    %476 = vector.broadcast %cst_99 : f32 to vector<1x128xf32>
    %477 = arith.select %473, %475, %476 : vector<1x128xi1>, vector<1x128xf32>
    %c1_i32_100 = arith.constant 1 : i32
    %478 = vector.broadcast %c1_i32_100 : i32 to vector<1x128xi32>
    %479 = arith.cmpi eq, %1, %478 : vector<1x128xi32>
    %cst_101 = arith.constant 0.000000e+00 : f32
    %480 = vector.shape_cast %387 : vector<1x1xf32> to vector<1x1xf32>
    %481 = vector.broadcast %480 : vector<1x1xf32> to vector<1x128xf32>
    %482 = vector.broadcast %cst_101 : f32 to vector<1x128xf32>
    %483 = arith.select %479, %481, %482 : vector<1x128xi1>, vector<1x128xf32>
    %484 = arith.addf %477, %483 : vector<1x128xf32>
    %c2_i32_102 = arith.constant 2 : i32
    %485 = vector.broadcast %c2_i32_102 : i32 to vector<1x128xi32>
    %486 = arith.cmpi eq, %1, %485 : vector<1x128xi32>
    %cst_103 = arith.constant 0.000000e+00 : f32
    %487 = vector.shape_cast %389 : vector<1x1xf32> to vector<1x1xf32>
    %488 = vector.broadcast %487 : vector<1x1xf32> to vector<1x128xf32>
    %489 = vector.broadcast %cst_103 : f32 to vector<1x128xf32>
    %490 = arith.select %486, %488, %489 : vector<1x128xi1>, vector<1x128xf32>
    %491 = arith.addf %484, %490 : vector<1x128xf32>
    %492 = arith.index_cast %c2_i32_74 : i32 to index
    %c0_104 = arith.constant 0 : index
    %493 = vector.load %arg9[%492, %c0_104] : memref<24x128xf32, #tpu.memory_space<vmem>>, vector<1x128xf32>
    tpu.vector_store %arg9[%492, %c0_104], %491 {strides = array<i32>} : memref<24x128xf32, #tpu.memory_space<vmem>>, vector<1x128xf32>,
    %c3_i32_105 = arith.constant 3 : i32
    %c6_i32_106 = arith.constant 6 : i32
    %494 = arith.muli %c3_i32_105, %c6_i32_106 : i32
    %c0_i32_107 = arith.constant 0 : i32
    %495 = arith.addi %494, %c0_i32_107 : i32
    %496 = arith.index_cast %495 : i32 to index
    %497 = memref.load %arg1[%496] : memref<144xf32, #tpu.memory_space<smem>>
    %c1_i32_108 = arith.constant 1 : i32
    %498 = arith.addi %494, %c1_i32_108 : i32
    %499 = arith.index_cast %498 : i32 to index
    %500 = memref.load %arg1[%499] : memref<144xf32, #tpu.memory_space<smem>>
    %c2_i32_109 = arith.constant 2 : i32
    %501 = arith.addi %494, %c2_i32_109 : i32
    %502 = arith.index_cast %501 : i32 to index
    %503 = memref.load %arg1[%502] : memref<144xf32, #tpu.memory_space<smem>>
    %c3_i32_110 = arith.constant 3 : i32
    %504 = arith.addi %494, %c3_i32_110 : i32
    %505 = arith.index_cast %504 : i32 to index
    %506 = memref.load %arg1[%505] : memref<144xf32, #tpu.memory_space<smem>>
    %c4_i32_111 = arith.constant 4 : i32
    %507 = arith.addi %494, %c4_i32_111 : i32
    %508 = arith.index_cast %507 : i32 to index
    %509 = memref.load %arg1[%508] : memref<144xf32, #tpu.memory_space<smem>>
    %510 = vector.broadcast %12 : f32 to vector<1x1xf32>
    %511 = arith.subf %510, %395 : vector<1x1xf32>
    %cst_112 = arith.constant 0.000000e+00 : f32
    %512 = vector.broadcast %cst_112 : f32 to vector<1x1xf32>
    %513 = arith.maximumf %511, %512 : vector<1x1xf32>
    %514 = vector.broadcast %cst_11 : f32 to vector<1x1xf32>
    %515 = arith.maximumf %390, %514 : vector<1x1xf32>
    %516 = arith.divf %513, %515 : vector<1x1xf32>
    %517 = vector.broadcast %11 : f32 to vector<1x128xf32>
    %518 = arith.addf %517, %433 : vector<1x128xf32>
    %519 = vector.broadcast %516 : vector<1x1xf32> to vector<1x128xf32>
    %520 = arith.mulf %518, %519 : vector<1x128xf32>
    %cst_113 = arith.constant 1.000000e+00 : f32
    %521 = vector.broadcast %cst_113 : f32 to vector<1x128xf32>
    %522 = arith.addf %521, %520 : vector<1x128xf32>
    %523 = vector.broadcast %10 : f32 to vector<1x128xf32>
    %524 = arith.mulf %523, %522 : vector<1x128xf32>
    %525 = vector.broadcast %509 : f32 to vector<1x128xf32>
    %526 = arith.mulf %433, %525 : vector<1x128xf32>
    %527 = vector.broadcast %497 : f32 to vector<1x128xf32>
    %528 = arith.addf %527, %526 : vector<1x128xf32>
    %529 = arith.minimumf %528, %524 : vector<1x128xf32>
    %cst_114 = arith.constant 0.000000e+00 : f32
    %530 = vector.broadcast %cst_114 : f32 to vector<1x128xf32>
    %531 = arith.maximumf %529, %530 : vector<1x128xf32>
    %cst_115 = arith.constant 0.000000e+00 : f32
    %532 = vector.broadcast %cst_115 : f32 to vector<1x128xf32>
    %533 = arith.select %3, %531, %532 : vector<1x128xi1>, vector<1x128xf32>
    %cst_116 = arith.constant dense<0.000000e+00> : vector<1xf32>
    %534 = vector.multi_reduction <add>, %533, %cst_116 [1] : vector<1x128xf32> to vector<1xf32>
    %535 = vector.shape_cast %534 : vector<1xf32> to vector<1x1xf32>
    %536 = vector.broadcast %cst_12 : f32 to vector<1x1xf32>
    %537 = arith.mulf %535, %536 : vector<1x1xf32>
    %538 = vector.broadcast %506 : f32 to vector<1x1xf32>
    %539 = arith.mulf %537, %538 : vector<1x1xf32>
    %540 = arith.addf %390, %539 : vector<1x1xf32>
    %541 = vector.broadcast %13 : f32 to vector<1x1xf32>
    %542 = arith.mulf %539, %541 : vector<1x1xf32>
    %543 = arith.addf %395, %542 : vector<1x1xf32>
    %544 = vector.broadcast %12 : f32 to vector<1x1xf32>
    %545 = arith.minimumf %543, %544 : vector<1x1xf32>
    %546 = vector.broadcast %497 : f32 to vector<1x128xf32>
    %547 = arith.subf %546, %533 : vector<1x128xf32>
    %cst_117 = arith.constant 0.000000e+00 : f32
    %548 = vector.broadcast %cst_117 : f32 to vector<1x128xf32>
    %549 = arith.maximumf %547, %548 : vector<1x128xf32>
    %cst_118 = arith.constant 0.000000e+00 : f32
    %550 = vector.broadcast %cst_118 : f32 to vector<1x128xf32>
    %551 = arith.select %3, %433, %550 : vector<1x128xi1>, vector<1x128xf32>
    %cst_119 = arith.constant dense<0.000000e+00> : vector<1xf32>
    %552 = vector.multi_reduction <add>, %551, %cst_119 [1] : vector<1x128xf32> to vector<1xf32>
    %553 = vector.shape_cast %552 : vector<1xf32> to vector<1x1xf32>
    %554 = vector.broadcast %cst_12 : f32 to vector<1x1xf32>
    %555 = arith.mulf %553, %554 : vector<1x1xf32>
    %556 = vector.broadcast %cst_13 : f32 to vector<1x1xf32>
    %557 = arith.mulf %555, %556 : vector<1x1xf32>
    %558 = vector.broadcast %557 : vector<1x1xf32> to vector<1x128xf32>
    %559 = arith.addf %14, %558 : vector<1x128xf32>
    %560 = arith.mulf %549, %559 : vector<1x128xf32>
    %561 = vector.broadcast %503 : f32 to vector<1x128xf32>
    %562 = arith.addf %560, %561 : vector<1x128xf32>
    %c1_i32_120 = arith.constant 1 : i32
    %563 = tpu.dynamic_rotate %451 by %c1_i32_120 dim 1 : vector<1x128xf32>, i32 -> vector<1x128xf32>
    %564 = vector.broadcast %500 : f32 to vector<1x128xf32>
    %565 = arith.select %5, %564, %563 : vector<1x128xi1>, vector<1x128xf32>
    %566 = arith.subf %565, %451 : vector<1x128xf32>
    %567 = arith.mulf %566, %15 : vector<1x128xf32>
    %568 = arith.addf %567, %562 : vector<1x128xf32>
    %569 = vector.broadcast %506 : f32 to vector<1x128xf32>
    %570 = arith.mulf %569, %568 : vector<1x128xf32>
    %571 = arith.addf %425, %570 : vector<1x128xf32>
    %cst_121 = arith.constant 0.000000e+00 : f32
    %572 = vector.broadcast %cst_121 : f32 to vector<1x128xf32>
    %573 = arith.maximumf %571, %572 : vector<1x128xf32>
    %cst_122 = arith.constant 0.000000e+00 : f32
    %574 = vector.broadcast %cst_122 : f32 to vector<1x128xf32>
    %575 = arith.select %3, %573, %574 : vector<1x128xi1>, vector<1x128xf32>
    %576 = arith.mulf %14, %14 : vector<1x128xf32>
    %577 = vector.broadcast %cst_14 : f32 to vector<1x128xf32>
    %578 = arith.mulf %577, %575 : vector<1x128xf32>
    %579 = arith.addf %576, %578 : vector<1x128xf32>
    %580 = math.sqrt %579 : vector<1x128xf32>
    %581 = arith.subf %580, %14 : vector<1x128xf32>
    %582 = vector.broadcast %cst_15 : f32 to vector<1x128xf32>
    %583 = arith.mulf %581, %582 : vector<1x128xf32>
    %584 = vector.broadcast %8 : f32 to vector<1x128xf32>
    %585 = arith.mulf %583, %584 : vector<1x128xf32>
    %586 = arith.addf %14, %585 : vector<1x128xf32>
    %587 = vector.broadcast %cst_11 : f32 to vector<1x128xf32>
    %588 = arith.maximumf %586, %587 : vector<1x128xf32>
    %589 = tpu.reciprocal %588 {approx = true} : vector<1x128xf32> -> vector<1x128xf32>
    %590 = arith.mulf %575, %589 : vector<1x128xf32>
    %591 = vector.broadcast %cst_11 : f32 to vector<1x128xf32>
    %592 = arith.maximumf %590, %591 : vector<1x128xf32>
    %593 = math.log %592 : vector<1x128xf32>
    %594 = vector.broadcast %cst_16 : f32 to vector<1x128xf32>
    %595 = arith.mulf %594, %593 : vector<1x128xf32>
    %596 = math.exp %595 : vector<1x128xf32>
    %597 = arith.mulf %575, %596 : vector<1x128xf32>
    %598 = vector.broadcast %9 : f32 to vector<1x128xf32>
    %599 = arith.mulf %597, %598 : vector<1x128xf32>
    %cst_123 = arith.constant 0.000000e+00 : f32
    %600 = vector.broadcast %cst_123 : f32 to vector<1x128xf32>
    %601 = arith.select %3, %599, %600 : vector<1x128xi1>, vector<1x128xf32>
    %cst_124 = arith.constant 0.000000e+00 : f32
    %602 = vector.broadcast %cst_124 : f32 to vector<1x128xf32>
    %603 = arith.select %7, %601, %602 : vector<1x128xi1>, vector<1x128xf32>
    %cst_125 = arith.constant dense<0.000000e+00> : vector<1xf32>
    %604 = vector.multi_reduction <add>, %603, %cst_125 [1] : vector<1x128xf32> to vector<1xf32>
    %605 = vector.shape_cast %604 : vector<1xf32> to vector<1x1xf32>
    %606 = vector.broadcast %cst_11 : f32 to vector<1x128xf32>
    %607 = arith.maximumf %575, %606 : vector<1x128xf32>
    %608 = tpu.reciprocal %607 {approx = true} : vector<1x128xf32> -> vector<1x128xf32>
    %609 = arith.mulf %601, %608 : vector<1x128xf32>
    %610 = vector.broadcast %cst_11 : f32 to vector<1x128xf32>
    %611 = arith.cmpf ogt, %575, %610 : vector<1x128xf32>
    %612 = vector.broadcast %506 : f32 to vector<1x128xf32>
    %613 = arith.mulf %609, %612 : vector<1x128xf32>
    %614 = arith.mulf %613, %15 : vector<1x128xf32>
    %cst_126 = arith.constant 0.000000e+00 : f32
    %615 = vector.broadcast %cst_126 : f32 to vector<1x128xf32>
    %616 = arith.select %611, %614, %615 : vector<1x128xi1>, vector<1x128xf32>
    %cst_127 = arith.constant 0.000000e+00 : f32
    %617 = vector.broadcast %cst_127 : f32 to vector<1x128xf32>
    %618 = arith.select %3, %616, %617 : vector<1x128xi1>, vector<1x128xf32>
    %cst_128 = arith.constant dense<0xFF800000> : vector<1xf32>
    %619 = vector.multi_reduction <maximumf>, %618, %cst_128 [1] : vector<1x128xf32> to vector<1xf32>
    %620 = vector.shape_cast %619 : vector<1xf32> to vector<1x1xf32>
    %621 = arith.maximumf %471, %620 : vector<1x1xf32>
    %c0_i32_129 = arith.constant 0 : i32
    %622 = vector.broadcast %c0_i32_129 : i32 to vector<1x128xi32>
    %623 = arith.cmpi eq, %1, %622 : vector<1x128xi32>
    %cst_130 = arith.constant 0.000000e+00 : f32
    %624 = vector.shape_cast %605 : vector<1x1xf32> to vector<1x1xf32>
    %625 = vector.broadcast %624 : vector<1x1xf32> to vector<1x128xf32>
    %626 = vector.broadcast %cst_130 : f32 to vector<1x128xf32>
    %627 = arith.select %623, %625, %626 : vector<1x128xi1>, vector<1x128xf32>
    %c1_i32_131 = arith.constant 1 : i32
    %628 = vector.broadcast %c1_i32_131 : i32 to vector<1x128xi32>
    %629 = arith.cmpi eq, %1, %628 : vector<1x128xi32>
    %cst_132 = arith.constant 0.000000e+00 : f32
    %630 = vector.shape_cast %537 : vector<1x1xf32> to vector<1x1xf32>
    %631 = vector.broadcast %630 : vector<1x1xf32> to vector<1x128xf32>
    %632 = vector.broadcast %cst_132 : f32 to vector<1x128xf32>
    %633 = arith.select %629, %631, %632 : vector<1x128xi1>, vector<1x128xf32>
    %634 = arith.addf %627, %633 : vector<1x128xf32>
    %c2_i32_133 = arith.constant 2 : i32
    %635 = vector.broadcast %c2_i32_133 : i32 to vector<1x128xi32>
    %636 = arith.cmpi eq, %1, %635 : vector<1x128xi32>
    %cst_134 = arith.constant 0.000000e+00 : f32
    %637 = vector.shape_cast %539 : vector<1x1xf32> to vector<1x1xf32>
    %638 = vector.broadcast %637 : vector<1x1xf32> to vector<1x128xf32>
    %639 = vector.broadcast %cst_134 : f32 to vector<1x128xf32>
    %640 = arith.select %636, %638, %639 : vector<1x128xi1>, vector<1x128xf32>
    %641 = arith.addf %634, %640 : vector<1x128xf32>
    %642 = arith.index_cast %c3_i32_105 : i32 to index
    %c0_135 = arith.constant 0 : index
    %643 = vector.load %arg9[%642, %c0_135] : memref<24x128xf32, #tpu.memory_space<vmem>>, vector<1x128xf32>
    tpu.vector_store %arg9[%642, %c0_135], %641 {strides = array<i32>} : memref<24x128xf32, #tpu.memory_space<vmem>>, vector<1x128xf32>,
    %c4_i32_136 = arith.constant 4 : i32
    %c6_i32_137 = arith.constant 6 : i32
    %644 = arith.muli %c4_i32_136, %c6_i32_137 : i32
    %c0_i32_138 = arith.constant 0 : i32
    %645 = arith.addi %644, %c0_i32_138 : i32
    %646 = arith.index_cast %645 : i32 to index
    %647 = memref.load %arg1[%646] : memref<144xf32, #tpu.memory_space<smem>>
    %c1_i32_139 = arith.constant 1 : i32
    %648 = arith.addi %644, %c1_i32_139 : i32
    %649 = arith.index_cast %648 : i32 to index
    %650 = memref.load %arg1[%649] : memref<144xf32, #tpu.memory_space<smem>>
    %c2_i32_140 = arith.constant 2 : i32
    %651 = arith.addi %644, %c2_i32_140 : i32
    %652 = arith.index_cast %651 : i32 to index
    %653 = memref.load %arg1[%652] : memref<144xf32, #tpu.memory_space<smem>>
    %c3_i32_141 = arith.constant 3 : i32
    %654 = arith.addi %644, %c3_i32_141 : i32
    %655 = arith.index_cast %654 : i32 to index
    %656 = memref.load %arg1[%655] : memref<144xf32, #tpu.memory_space<smem>>
    %c4_i32_142 = arith.constant 4 : i32
    %657 = arith.addi %644, %c4_i32_142 : i32
    %658 = arith.index_cast %657 : i32 to index
    %659 = memref.load %arg1[%658] : memref<144xf32, #tpu.memory_space<smem>>
    %660 = vector.broadcast %12 : f32 to vector<1x1xf32>
    %661 = arith.subf %660, %545 : vector<1x1xf32>
    %cst_143 = arith.constant 0.000000e+00 : f32
    %662 = vector.broadcast %cst_143 : f32 to vector<1x1xf32>
    %663 = arith.maximumf %661, %662 : vector<1x1xf32>
    %664 = vector.broadcast %cst_11 : f32 to vector<1x1xf32>
    %665 = arith.maximumf %540, %664 : vector<1x1xf32>
    %666 = arith.divf %663, %665 : vector<1x1xf32>
    %667 = vector.broadcast %11 : f32 to vector<1x128xf32>
    %668 = arith.addf %667, %583 : vector<1x128xf32>
    %669 = vector.broadcast %666 : vector<1x1xf32> to vector<1x128xf32>
    %670 = arith.mulf %668, %669 : vector<1x128xf32>
    %cst_144 = arith.constant 1.000000e+00 : f32
    %671 = vector.broadcast %cst_144 : f32 to vector<1x128xf32>
    %672 = arith.addf %671, %670 : vector<1x128xf32>
    %673 = vector.broadcast %10 : f32 to vector<1x128xf32>
    %674 = arith.mulf %673, %672 : vector<1x128xf32>
    %675 = vector.broadcast %659 : f32 to vector<1x128xf32>
    %676 = arith.mulf %583, %675 : vector<1x128xf32>
    %677 = vector.broadcast %647 : f32 to vector<1x128xf32>
    %678 = arith.addf %677, %676 : vector<1x128xf32>
    %679 = arith.minimumf %678, %674 : vector<1x128xf32>
    %cst_145 = arith.constant 0.000000e+00 : f32
    %680 = vector.broadcast %cst_145 : f32 to vector<1x128xf32>
    %681 = arith.maximumf %679, %680 : vector<1x128xf32>
    %cst_146 = arith.constant 0.000000e+00 : f32
    %682 = vector.broadcast %cst_146 : f32 to vector<1x128xf32>
    %683 = arith.select %3, %681, %682 : vector<1x128xi1>, vector<1x128xf32>
    %cst_147 = arith.constant dense<0.000000e+00> : vector<1xf32>
    %684 = vector.multi_reduction <add>, %683, %cst_147 [1] : vector<1x128xf32> to vector<1xf32>
    %685 = vector.shape_cast %684 : vector<1xf32> to vector<1x1xf32>
    %686 = vector.broadcast %cst_12 : f32 to vector<1x1xf32>
    %687 = arith.mulf %685, %686 : vector<1x1xf32>
    %688 = vector.broadcast %656 : f32 to vector<1x1xf32>
    %689 = arith.mulf %687, %688 : vector<1x1xf32>
    %690 = arith.addf %540, %689 : vector<1x1xf32>
    %691 = vector.broadcast %13 : f32 to vector<1x1xf32>
    %692 = arith.mulf %689, %691 : vector<1x1xf32>
    %693 = arith.addf %545, %692 : vector<1x1xf32>
    %694 = vector.broadcast %12 : f32 to vector<1x1xf32>
    %695 = arith.minimumf %693, %694 : vector<1x1xf32>
    %696 = vector.broadcast %647 : f32 to vector<1x128xf32>
    %697 = arith.subf %696, %683 : vector<1x128xf32>
    %cst_148 = arith.constant 0.000000e+00 : f32
    %698 = vector.broadcast %cst_148 : f32 to vector<1x128xf32>
    %699 = arith.maximumf %697, %698 : vector<1x128xf32>
    %cst_149 = arith.constant 0.000000e+00 : f32
    %700 = vector.broadcast %cst_149 : f32 to vector<1x128xf32>
    %701 = arith.select %3, %583, %700 : vector<1x128xi1>, vector<1x128xf32>
    %cst_150 = arith.constant dense<0.000000e+00> : vector<1xf32>
    %702 = vector.multi_reduction <add>, %701, %cst_150 [1] : vector<1x128xf32> to vector<1xf32>
    %703 = vector.shape_cast %702 : vector<1xf32> to vector<1x1xf32>
    %704 = vector.broadcast %cst_12 : f32 to vector<1x1xf32>
    %705 = arith.mulf %703, %704 : vector<1x1xf32>
    %706 = vector.broadcast %cst_13 : f32 to vector<1x1xf32>
    %707 = arith.mulf %705, %706 : vector<1x1xf32>
    %708 = vector.broadcast %707 : vector<1x1xf32> to vector<1x128xf32>
    %709 = arith.addf %14, %708 : vector<1x128xf32>
    %710 = arith.mulf %699, %709 : vector<1x128xf32>
    %711 = vector.broadcast %653 : f32 to vector<1x128xf32>
    %712 = arith.addf %710, %711 : vector<1x128xf32>
    %c1_i32_151 = arith.constant 1 : i32
    %713 = tpu.dynamic_rotate %601 by %c1_i32_151 dim 1 : vector<1x128xf32>, i32 -> vector<1x128xf32>
    %714 = vector.broadcast %650 : f32 to vector<1x128xf32>
    %715 = arith.select %5, %714, %713 : vector<1x128xi1>, vector<1x128xf32>
    %716 = arith.subf %715, %601 : vector<1x128xf32>
    %717 = arith.mulf %716, %15 : vector<1x128xf32>
    %718 = arith.addf %717, %712 : vector<1x128xf32>
    %719 = vector.broadcast %656 : f32 to vector<1x128xf32>
    %720 = arith.mulf %719, %718 : vector<1x128xf32>
    %721 = arith.addf %575, %720 : vector<1x128xf32>
    %cst_152 = arith.constant 0.000000e+00 : f32
    %722 = vector.broadcast %cst_152 : f32 to vector<1x128xf32>
    %723 = arith.maximumf %721, %722 : vector<1x128xf32>
    %cst_153 = arith.constant 0.000000e+00 : f32
    %724 = vector.broadcast %cst_153 : f32 to vector<1x128xf32>
    %725 = arith.select %3, %723, %724 : vector<1x128xi1>, vector<1x128xf32>
    %726 = arith.mulf %14, %14 : vector<1x128xf32>
    %727 = vector.broadcast %cst_14 : f32 to vector<1x128xf32>
    %728 = arith.mulf %727, %725 : vector<1x128xf32>
    %729 = arith.addf %726, %728 : vector<1x128xf32>
    %730 = math.sqrt %729 : vector<1x128xf32>
    %731 = arith.subf %730, %14 : vector<1x128xf32>
    %732 = vector.broadcast %cst_15 : f32 to vector<1x128xf32>
    %733 = arith.mulf %731, %732 : vector<1x128xf32>
    %734 = vector.broadcast %8 : f32 to vector<1x128xf32>
    %735 = arith.mulf %733, %734 : vector<1x128xf32>
    %736 = arith.addf %14, %735 : vector<1x128xf32>
    %737 = vector.broadcast %cst_11 : f32 to vector<1x128xf32>
    %738 = arith.maximumf %736, %737 : vector<1x128xf32>
    %739 = tpu.reciprocal %738 {approx = true} : vector<1x128xf32> -> vector<1x128xf32>
    %740 = arith.mulf %725, %739 : vector<1x128xf32>
    %741 = vector.broadcast %cst_11 : f32 to vector<1x128xf32>
    %742 = arith.maximumf %740, %741 : vector<1x128xf32>
    %743 = math.log %742 : vector<1x128xf32>
    %744 = vector.broadcast %cst_16 : f32 to vector<1x128xf32>
    %745 = arith.mulf %744, %743 : vector<1x128xf32>
    %746 = math.exp %745 : vector<1x128xf32>
    %747 = arith.mulf %725, %746 : vector<1x128xf32>
    %748 = vector.broadcast %9 : f32 to vector<1x128xf32>
    %749 = arith.mulf %747, %748 : vector<1x128xf32>
    %cst_154 = arith.constant 0.000000e+00 : f32
    %750 = vector.broadcast %cst_154 : f32 to vector<1x128xf32>
    %751 = arith.select %3, %749, %750 : vector<1x128xi1>, vector<1x128xf32>
    %cst_155 = arith.constant 0.000000e+00 : f32
    %752 = vector.broadcast %cst_155 : f32 to vector<1x128xf32>
    %753 = arith.select %7, %751, %752 : vector<1x128xi1>, vector<1x128xf32>
    %cst_156 = arith.constant dense<0.000000e+00> : vector<1xf32>
    %754 = vector.multi_reduction <add>, %753, %cst_156 [1] : vector<1x128xf32> to vector<1xf32>
    %755 = vector.shape_cast %754 : vector<1xf32> to vector<1x1xf32>
    %756 = vector.broadcast %cst_11 : f32 to vector<1x128xf32>
    %757 = arith.maximumf %725, %756 : vector<1x128xf32>
    %758 = tpu.reciprocal %757 {approx = true} : vector<1x128xf32> -> vector<1x128xf32>
    %759 = arith.mulf %751, %758 : vector<1x128xf32>
    %760 = vector.broadcast %cst_11 : f32 to vector<1x128xf32>
    %761 = arith.cmpf ogt, %725, %760 : vector<1x128xf32>
    %762 = vector.broadcast %656 : f32 to vector<1x128xf32>
    %763 = arith.mulf %759, %762 : vector<1x128xf32>
    %764 = arith.mulf %763, %15 : vector<1x128xf32>
    %cst_157 = arith.constant 0.000000e+00 : f32
    %765 = vector.broadcast %cst_157 : f32 to vector<1x128xf32>
    %766 = arith.select %761, %764, %765 : vector<1x128xi1>, vector<1x128xf32>
    %cst_158 = arith.constant 0.000000e+00 : f32
    %767 = vector.broadcast %cst_158 : f32 to vector<1x128xf32>
    %768 = arith.select %3, %766, %767 : vector<1x128xi1>, vector<1x128xf32>
    %cst_159 = arith.constant dense<0xFF800000> : vector<1xf32>
    %769 = vector.multi_reduction <maximumf>, %768, %cst_159 [1] : vector<1x128xf32> to vector<1xf32>
    %770 = vector.shape_cast %769 : vector<1xf32> to vector<1x1xf32>
    %771 = arith.maximumf %621, %770 : vector<1x1xf32>
    %c0_i32_160 = arith.constant 0 : i32
    %772 = vector.broadcast %c0_i32_160 : i32 to vector<1x128xi32>
    %773 = arith.cmpi eq, %1, %772 : vector<1x128xi32>
    %cst_161 = arith.constant 0.000000e+00 : f32
    %774 = vector.shape_cast %755 : vector<1x1xf32> to vector<1x1xf32>
    %775 = vector.broadcast %774 : vector<1x1xf32> to vector<1x128xf32>
    %776 = vector.broadcast %cst_161 : f32 to vector<1x128xf32>
    %777 = arith.select %773, %775, %776 : vector<1x128xi1>, vector<1x128xf32>
    %c1_i32_162 = arith.constant 1 : i32
    %778 = vector.broadcast %c1_i32_162 : i32 to vector<1x128xi32>
    %779 = arith.cmpi eq, %1, %778 : vector<1x128xi32>
    %cst_163 = arith.constant 0.000000e+00 : f32
    %780 = vector.shape_cast %687 : vector<1x1xf32> to vector<1x1xf32>
    %781 = vector.broadcast %780 : vector<1x1xf32> to vector<1x128xf32>
    %782 = vector.broadcast %cst_163 : f32 to vector<1x128xf32>
    %783 = arith.select %779, %781, %782 : vector<1x128xi1>, vector<1x128xf32>
    %784 = arith.addf %777, %783 : vector<1x128xf32>
    %c2_i32_164 = arith.constant 2 : i32
    %785 = vector.broadcast %c2_i32_164 : i32 to vector<1x128xi32>
    %786 = arith.cmpi eq, %1, %785 : vector<1x128xi32>
    %cst_165 = arith.constant 0.000000e+00 : f32
    %787 = vector.shape_cast %689 : vector<1x1xf32> to vector<1x1xf32>
    %788 = vector.broadcast %787 : vector<1x1xf32> to vector<1x128xf32>
    %789 = vector.broadcast %cst_165 : f32 to vector<1x128xf32>
    %790 = arith.select %786, %788, %789 : vector<1x128xi1>, vector<1x128xf32>
    %791 = arith.addf %784, %790 : vector<1x128xf32>
    %792 = arith.index_cast %c4_i32_136 : i32 to index
    %c0_166 = arith.constant 0 : index
    %793 = vector.load %arg9[%792, %c0_166] : memref<24x128xf32, #tpu.memory_space<vmem>>, vector<1x128xf32>
    tpu.vector_store %arg9[%792, %c0_166], %791 {strides = array<i32>} : memref<24x128xf32, #tpu.memory_space<vmem>>, vector<1x128xf32>,
    %c5_i32 = arith.constant 5 : i32
    %c6_i32_167 = arith.constant 6 : i32
    %794 = arith.muli %c5_i32, %c6_i32_167 : i32
    %c0_i32_168 = arith.constant 0 : i32
    %795 = arith.addi %794, %c0_i32_168 : i32
    %796 = arith.index_cast %795 : i32 to index
    %797 = memref.load %arg1[%796] : memref<144xf32, #tpu.memory_space<smem>>
    %c1_i32_169 = arith.constant 1 : i32
    %798 = arith.addi %794, %c1_i32_169 : i32
    %799 = arith.index_cast %798 : i32 to index
    %800 = memref.load %arg1[%799] : memref<144xf32, #tpu.memory_space<smem>>
    %c2_i32_170 = arith.constant 2 : i32
    %801 = arith.addi %794, %c2_i32_170 : i32
    %802 = arith.index_cast %801 : i32 to index
    %803 = memref.load %arg1[%802] : memref<144xf32, #tpu.memory_space<smem>>
    %c3_i32_171 = arith.constant 3 : i32
    %804 = arith.addi %794, %c3_i32_171 : i32
    %805 = arith.index_cast %804 : i32 to index
    %806 = memref.load %arg1[%805] : memref<144xf32, #tpu.memory_space<smem>>
    %c4_i32_172 = arith.constant 4 : i32
    %807 = arith.addi %794, %c4_i32_172 : i32
    %808 = arith.index_cast %807 : i32 to index
    %809 = memref.load %arg1[%808] : memref<144xf32, #tpu.memory_space<smem>>
    %810 = vector.broadcast %12 : f32 to vector<1x1xf32>
    %811 = arith.subf %810, %695 : vector<1x1xf32>
    %cst_173 = arith.constant 0.000000e+00 : f32
    %812 = vector.broadcast %cst_173 : f32 to vector<1x1xf32>
    %813 = arith.maximumf %811, %812 : vector<1x1xf32>
    %814 = vector.broadcast %cst_11 : f32 to vector<1x1xf32>
    %815 = arith.maximumf %690, %814 : vector<1x1xf32>
    %816 = arith.divf %813, %815 : vector<1x1xf32>
    %817 = vector.broadcast %11 : f32 to vector<1x128xf32>
    %818 = arith.addf %817, %733 : vector<1x128xf32>
    %819 = vector.broadcast %816 : vector<1x1xf32> to vector<1x128xf32>
    %820 = arith.mulf %818, %819 : vector<1x128xf32>
    %cst_174 = arith.constant 1.000000e+00 : f32
    %821 = vector.broadcast %cst_174 : f32 to vector<1x128xf32>
    %822 = arith.addf %821, %820 : vector<1x128xf32>
    %823 = vector.broadcast %10 : f32 to vector<1x128xf32>
    %824 = arith.mulf %823, %822 : vector<1x128xf32>
    %825 = vector.broadcast %809 : f32 to vector<1x128xf32>
    %826 = arith.mulf %733, %825 : vector<1x128xf32>
    %827 = vector.broadcast %797 : f32 to vector<1x128xf32>
    %828 = arith.addf %827, %826 : vector<1x128xf32>
    %829 = arith.minimumf %828, %824 : vector<1x128xf32>
    %cst_175 = arith.constant 0.000000e+00 : f32
    %830 = vector.broadcast %cst_175 : f32 to vector<1x128xf32>
    %831 = arith.maximumf %829, %830 : vector<1x128xf32>
    %cst_176 = arith.constant 0.000000e+00 : f32
    %832 = vector.broadcast %cst_176 : f32 to vector<1x128xf32>
    %833 = arith.select %3, %831, %832 : vector<1x128xi1>, vector<1x128xf32>
    %cst_177 = arith.constant dense<0.000000e+00> : vector<1xf32>
    %834 = vector.multi_reduction <add>, %833, %cst_177 [1] : vector<1x128xf32> to vector<1xf32>
    %835 = vector.shape_cast %834 : vector<1xf32> to vector<1x1xf32>
    %836 = vector.broadcast %cst_12 : f32 to vector<1x1xf32>
    %837 = arith.mulf %835, %836 : vector<1x1xf32>
    %838 = vector.broadcast %806 : f32 to vector<1x1xf32>
    %839 = arith.mulf %837, %838 : vector<1x1xf32>
    %840 = arith.addf %690, %839 : vector<1x1xf32>
    %841 = vector.broadcast %13 : f32 to vector<1x1xf32>
    %842 = arith.mulf %839, %841 : vector<1x1xf32>
    %843 = arith.addf %695, %842 : vector<1x1xf32>
    %844 = vector.broadcast %12 : f32 to vector<1x1xf32>
    %845 = arith.minimumf %843, %844 : vector<1x1xf32>
    %846 = vector.broadcast %797 : f32 to vector<1x128xf32>
    %847 = arith.subf %846, %833 : vector<1x128xf32>
    %cst_178 = arith.constant 0.000000e+00 : f32
    %848 = vector.broadcast %cst_178 : f32 to vector<1x128xf32>
    %849 = arith.maximumf %847, %848 : vector<1x128xf32>
    %cst_179 = arith.constant 0.000000e+00 : f32
    %850 = vector.broadcast %cst_179 : f32 to vector<1x128xf32>
    %851 = arith.select %3, %733, %850 : vector<1x128xi1>, vector<1x128xf32>
    %cst_180 = arith.constant dense<0.000000e+00> : vector<1xf32>
    %852 = vector.multi_reduction <add>, %851, %cst_180 [1] : vector<1x128xf32> to vector<1xf32>
    %853 = vector.shape_cast %852 : vector<1xf32> to vector<1x1xf32>
    %854 = vector.broadcast %cst_12 : f32 to vector<1x1xf32>
    %855 = arith.mulf %853, %854 : vector<1x1xf32>
    %856 = vector.broadcast %cst_13 : f32 to vector<1x1xf32>
    %857 = arith.mulf %855, %856 : vector<1x1xf32>
    %858 = vector.broadcast %857 : vector<1x1xf32> to vector<1x128xf32>
    %859 = arith.addf %14, %858 : vector<1x128xf32>
    %860 = arith.mulf %849, %859 : vector<1x128xf32>
    %861 = vector.broadcast %803 : f32 to vector<1x128xf32>
    %862 = arith.addf %860, %861 : vector<1x128xf32>
    %c1_i32_181 = arith.constant 1 : i32
    %863 = tpu.dynamic_rotate %751 by %c1_i32_181 dim 1 : vector<1x128xf32>, i32 -> vector<1x128xf32>
    %864 = vector.broadcast %800 : f32 to vector<1x128xf32>
    %865 = arith.select %5, %864, %863 : vector<1x128xi1>, vector<1x128xf32>
    %866 = arith.subf %865, %751 : vector<1x128xf32>
    %867 = arith.mulf %866, %15 : vector<1x128xf32>
    %868 = arith.addf %867, %862 : vector<1x128xf32>
    %869 = vector.broadcast %806 : f32 to vector<1x128xf32>
    %870 = arith.mulf %869, %868 : vector<1x128xf32>
    %871 = arith.addf %725, %870 : vector<1x128xf32>
    %cst_182 = arith.constant 0.000000e+00 : f32
    %872 = vector.broadcast %cst_182 : f32 to vector<1x128xf32>
    %873 = arith.maximumf %871, %872 : vector<1x128xf32>
    %cst_183 = arith.constant 0.000000e+00 : f32
    %874 = vector.broadcast %cst_183 : f32 to vector<1x128xf32>
    %875 = arith.select %3, %873, %874 : vector<1x128xi1>, vector<1x128xf32>
    %876 = arith.mulf %14, %14 : vector<1x128xf32>
    %877 = vector.broadcast %cst_14 : f32 to vector<1x128xf32>
    %878 = arith.mulf %877, %875 : vector<1x128xf32>
    %879 = arith.addf %876, %878 : vector<1x128xf32>
    %880 = math.sqrt %879 : vector<1x128xf32>
    %881 = arith.subf %880, %14 : vector<1x128xf32>
    %882 = vector.broadcast %cst_15 : f32 to vector<1x128xf32>
    %883 = arith.mulf %881, %882 : vector<1x128xf32>
    %884 = vector.broadcast %8 : f32 to vector<1x128xf32>
    %885 = arith.mulf %883, %884 : vector<1x128xf32>
    %886 = arith.addf %14, %885 : vector<1x128xf32>
    %887 = vector.broadcast %cst_11 : f32 to vector<1x128xf32>
    %888 = arith.maximumf %886, %887 : vector<1x128xf32>
    %889 = tpu.reciprocal %888 {approx = true} : vector<1x128xf32> -> vector<1x128xf32>
    %890 = arith.mulf %875, %889 : vector<1x128xf32>
    %891 = vector.broadcast %cst_11 : f32 to vector<1x128xf32>
    %892 = arith.maximumf %890, %891 : vector<1x128xf32>
    %893 = math.log %892 : vector<1x128xf32>
    %894 = vector.broadcast %cst_16 : f32 to vector<1x128xf32>
    %895 = arith.mulf %894, %893 : vector<1x128xf32>
    %896 = math.exp %895 : vector<1x128xf32>
    %897 = arith.mulf %875, %896 : vector<1x128xf32>
    %898 = vector.broadcast %9 : f32 to vector<1x128xf32>
    %899 = arith.mulf %897, %898 : vector<1x128xf32>
    %cst_184 = arith.constant 0.000000e+00 : f32
    %900 = vector.broadcast %cst_184 : f32 to vector<1x128xf32>
    %901 = arith.select %3, %899, %900 : vector<1x128xi1>, vector<1x128xf32>
    %cst_185 = arith.constant 0.000000e+00 : f32
    %902 = vector.broadcast %cst_185 : f32 to vector<1x128xf32>
    %903 = arith.select %7, %901, %902 : vector<1x128xi1>, vector<1x128xf32>
    %cst_186 = arith.constant dense<0.000000e+00> : vector<1xf32>
    %904 = vector.multi_reduction <add>, %903, %cst_186 [1] : vector<1x128xf32> to vector<1xf32>
    %905 = vector.shape_cast %904 : vector<1xf32> to vector<1x1xf32>
    %906 = vector.broadcast %cst_11 : f32 to vector<1x128xf32>
    %907 = arith.maximumf %875, %906 : vector<1x128xf32>
    %908 = tpu.reciprocal %907 {approx = true} : vector<1x128xf32> -> vector<1x128xf32>
    %909 = arith.mulf %901, %908 : vector<1x128xf32>
    %910 = vector.broadcast %cst_11 : f32 to vector<1x128xf32>
    %911 = arith.cmpf ogt, %875, %910 : vector<1x128xf32>
    %912 = vector.broadcast %806 : f32 to vector<1x128xf32>
    %913 = arith.mulf %909, %912 : vector<1x128xf32>
    %914 = arith.mulf %913, %15 : vector<1x128xf32>
    %cst_187 = arith.constant 0.000000e+00 : f32
    %915 = vector.broadcast %cst_187 : f32 to vector<1x128xf32>
    %916 = arith.select %911, %914, %915 : vector<1x128xi1>, vector<1x128xf32>
    %cst_188 = arith.constant 0.000000e+00 : f32
    %917 = vector.broadcast %cst_188 : f32 to vector<1x128xf32>
    %918 = arith.select %3, %916, %917 : vector<1x128xi1>, vector<1x128xf32>
    %cst_189 = arith.constant dense<0xFF800000> : vector<1xf32>
    %919 = vector.multi_reduction <maximumf>, %918, %cst_189 [1] : vector<1x128xf32> to vector<1xf32>
    %920 = vector.shape_cast %919 : vector<1xf32> to vector<1x1xf32>
    %921 = arith.maximumf %771, %920 : vector<1x1xf32>
    %c0_i32_190 = arith.constant 0 : i32
    %922 = vector.broadcast %c0_i32_190 : i32 to vector<1x128xi32>
    %923 = arith.cmpi eq, %1, %922 : vector<1x128xi32>
    %cst_191 = arith.constant 0.000000e+00 : f32
    %924 = vector.shape_cast %905 : vector<1x1xf32> to vector<1x1xf32>
    %925 = vector.broadcast %924 : vector<1x1xf32> to vector<1x128xf32>
    %926 = vector.broadcast %cst_191 : f32 to vector<1x128xf32>
    %927 = arith.select %923, %925, %926 : vector<1x128xi1>, vector<1x128xf32>
    %c1_i32_192 = arith.constant 1 : i32
    %928 = vector.broadcast %c1_i32_192 : i32 to vector<1x128xi32>
    %929 = arith.cmpi eq, %1, %928 : vector<1x128xi32>
    %cst_193 = arith.constant 0.000000e+00 : f32
    %930 = vector.shape_cast %837 : vector<1x1xf32> to vector<1x1xf32>
    %931 = vector.broadcast %930 : vector<1x1xf32> to vector<1x128xf32>
    %932 = vector.broadcast %cst_193 : f32 to vector<1x128xf32>
    %933 = arith.select %929, %931, %932 : vector<1x128xi1>, vector<1x128xf32>
    %934 = arith.addf %927, %933 : vector<1x128xf32>
    %c2_i32_194 = arith.constant 2 : i32
    %935 = vector.broadcast %c2_i32_194 : i32 to vector<1x128xi32>
    %936 = arith.cmpi eq, %1, %935 : vector<1x128xi32>
    %cst_195 = arith.constant 0.000000e+00 : f32
    %937 = vector.shape_cast %839 : vector<1x1xf32> to vector<1x1xf32>
    %938 = vector.broadcast %937 : vector<1x1xf32> to vector<1x128xf32>
    %939 = vector.broadcast %cst_195 : f32 to vector<1x128xf32>
    %940 = arith.select %936, %938, %939 : vector<1x128xi1>, vector<1x128xf32>
    %941 = arith.addf %934, %940 : vector<1x128xf32>
    %942 = arith.index_cast %c5_i32 : i32 to index
    %c0_196 = arith.constant 0 : index
    %943 = vector.load %arg9[%942, %c0_196] : memref<24x128xf32, #tpu.memory_space<vmem>>, vector<1x128xf32>
    tpu.vector_store %arg9[%942, %c0_196], %941 {strides = array<i32>} : memref<24x128xf32, #tpu.memory_space<vmem>>, vector<1x128xf32>,
    %c6_i32_197 = arith.constant 6 : i32
    %c6_i32_198 = arith.constant 6 : i32
    %944 = arith.muli %c6_i32_197, %c6_i32_198 : i32
    %c0_i32_199 = arith.constant 0 : i32
    %945 = arith.addi %944, %c0_i32_199 : i32
    %946 = arith.index_cast %945 : i32 to index
    %947 = memref.load %arg1[%946] : memref<144xf32, #tpu.memory_space<smem>>
    %c1_i32_200 = arith.constant 1 : i32
    %948 = arith.addi %944, %c1_i32_200 : i32
    %949 = arith.index_cast %948 : i32 to index
    %950 = memref.load %arg1[%949] : memref<144xf32, #tpu.memory_space<smem>>
    %c2_i32_201 = arith.constant 2 : i32
    %951 = arith.addi %944, %c2_i32_201 : i32
    %952 = arith.index_cast %951 : i32 to index
    %953 = memref.load %arg1[%952] : memref<144xf32, #tpu.memory_space<smem>>
    %c3_i32_202 = arith.constant 3 : i32
    %954 = arith.addi %944, %c3_i32_202 : i32
    %955 = arith.index_cast %954 : i32 to index
    %956 = memref.load %arg1[%955] : memref<144xf32, #tpu.memory_space<smem>>
    %c4_i32_203 = arith.constant 4 : i32
    %957 = arith.addi %944, %c4_i32_203 : i32
    %958 = arith.index_cast %957 : i32 to index
    %959 = memref.load %arg1[%958] : memref<144xf32, #tpu.memory_space<smem>>
    %960 = vector.broadcast %12 : f32 to vector<1x1xf32>
    %961 = arith.subf %960, %845 : vector<1x1xf32>
    %cst_204 = arith.constant 0.000000e+00 : f32
    %962 = vector.broadcast %cst_204 : f32 to vector<1x1xf32>
    %963 = arith.maximumf %961, %962 : vector<1x1xf32>
    %964 = vector.broadcast %cst_11 : f32 to vector<1x1xf32>
    %965 = arith.maximumf %840, %964 : vector<1x1xf32>
    %966 = arith.divf %963, %965 : vector<1x1xf32>
    %967 = vector.broadcast %11 : f32 to vector<1x128xf32>
    %968 = arith.addf %967, %883 : vector<1x128xf32>
    %969 = vector.broadcast %966 : vector<1x1xf32> to vector<1x128xf32>
    %970 = arith.mulf %968, %969 : vector<1x128xf32>
    %cst_205 = arith.constant 1.000000e+00 : f32
    %971 = vector.broadcast %cst_205 : f32 to vector<1x128xf32>
    %972 = arith.addf %971, %970 : vector<1x128xf32>
    %973 = vector.broadcast %10 : f32 to vector<1x128xf32>
    %974 = arith.mulf %973, %972 : vector<1x128xf32>
    %975 = vector.broadcast %959 : f32 to vector<1x128xf32>
    %976 = arith.mulf %883, %975 : vector<1x128xf32>
    %977 = vector.broadcast %947 : f32 to vector<1x128xf32>
    %978 = arith.addf %977, %976 : vector<1x128xf32>
    %979 = arith.minimumf %978, %974 : vector<1x128xf32>
    %cst_206 = arith.constant 0.000000e+00 : f32
    %980 = vector.broadcast %cst_206 : f32 to vector<1x128xf32>
    %981 = arith.maximumf %979, %980 : vector<1x128xf32>
    %cst_207 = arith.constant 0.000000e+00 : f32
    %982 = vector.broadcast %cst_207 : f32 to vector<1x128xf32>
    %983 = arith.select %3, %981, %982 : vector<1x128xi1>, vector<1x128xf32>
    %cst_208 = arith.constant dense<0.000000e+00> : vector<1xf32>
    %984 = vector.multi_reduction <add>, %983, %cst_208 [1] : vector<1x128xf32> to vector<1xf32>
    %985 = vector.shape_cast %984 : vector<1xf32> to vector<1x1xf32>
    %986 = vector.broadcast %cst_12 : f32 to vector<1x1xf32>
    %987 = arith.mulf %985, %986 : vector<1x1xf32>
    %988 = vector.broadcast %956 : f32 to vector<1x1xf32>
    %989 = arith.mulf %987, %988 : vector<1x1xf32>
    %990 = arith.addf %840, %989 : vector<1x1xf32>
    %991 = vector.broadcast %13 : f32 to vector<1x1xf32>
    %992 = arith.mulf %989, %991 : vector<1x1xf32>
    %993 = arith.addf %845, %992 : vector<1x1xf32>
    %994 = vector.broadcast %12 : f32 to vector<1x1xf32>
    %995 = arith.minimumf %993, %994 : vector<1x1xf32>
    %996 = vector.broadcast %947 : f32 to vector<1x128xf32>
    %997 = arith.subf %996, %983 : vector<1x128xf32>
    %cst_209 = arith.constant 0.000000e+00 : f32
    %998 = vector.broadcast %cst_209 : f32 to vector<1x128xf32>
    %999 = arith.maximumf %997, %998 : vector<1x128xf32>
    %cst_210 = arith.constant 0.000000e+00 : f32
    %1000 = vector.broadcast %cst_210 : f32 to vector<1x128xf32>
    %1001 = arith.select %3, %883, %1000 : vector<1x128xi1>, vector<1x128xf32>
    %cst_211 = arith.constant dense<0.000000e+00> : vector<1xf32>
    %1002 = vector.multi_reduction <add>, %1001, %cst_211 [1] : vector<1x128xf32> to vector<1xf32>
    %1003 = vector.shape_cast %1002 : vector<1xf32> to vector<1x1xf32>
    %1004 = vector.broadcast %cst_12 : f32 to vector<1x1xf32>
    %1005 = arith.mulf %1003, %1004 : vector<1x1xf32>
    %1006 = vector.broadcast %cst_13 : f32 to vector<1x1xf32>
    %1007 = arith.mulf %1005, %1006 : vector<1x1xf32>
    %1008 = vector.broadcast %1007 : vector<1x1xf32> to vector<1x128xf32>
    %1009 = arith.addf %14, %1008 : vector<1x128xf32>
    %1010 = arith.mulf %999, %1009 : vector<1x128xf32>
    %1011 = vector.broadcast %953 : f32 to vector<1x128xf32>
    %1012 = arith.addf %1010, %1011 : vector<1x128xf32>
    %c1_i32_212 = arith.constant 1 : i32
    %1013 = tpu.dynamic_rotate %901 by %c1_i32_212 dim 1 : vector<1x128xf32>, i32 -> vector<1x128xf32>
    %1014 = vector.broadcast %950 : f32 to vector<1x128xf32>
    %1015 = arith.select %5, %1014, %1013 : vector<1x128xi1>, vector<1x128xf32>
    %1016 = arith.subf %1015, %901 : vector<1x128xf32>
    %1017 = arith.mulf %1016, %15 : vector<1x128xf32>
    %1018 = arith.addf %1017, %1012 : vector<1x128xf32>
    %1019 = vector.broadcast %956 : f32 to vector<1x128xf32>
    %1020 = arith.mulf %1019, %1018 : vector<1x128xf32>
    %1021 = arith.addf %875, %1020 : vector<1x128xf32>
    %cst_213 = arith.constant 0.000000e+00 : f32
    %1022 = vector.broadcast %cst_213 : f32 to vector<1x128xf32>
    %1023 = arith.maximumf %1021, %1022 : vector<1x128xf32>
    %cst_214 = arith.constant 0.000000e+00 : f32
    %1024 = vector.broadcast %cst_214 : f32 to vector<1x128xf32>
    %1025 = arith.select %3, %1023, %1024 : vector<1x128xi1>, vector<1x128xf32>
    %1026 = arith.mulf %14, %14 : vector<1x128xf32>
    %1027 = vector.broadcast %cst_14 : f32 to vector<1x128xf32>
    %1028 = arith.mulf %1027, %1025 : vector<1x128xf32>
    %1029 = arith.addf %1026, %1028 : vector<1x128xf32>
    %1030 = math.sqrt %1029 : vector<1x128xf32>
    %1031 = arith.subf %1030, %14 : vector<1x128xf32>
    %1032 = vector.broadcast %cst_15 : f32 to vector<1x128xf32>
    %1033 = arith.mulf %1031, %1032 : vector<1x128xf32>
    %1034 = vector.broadcast %8 : f32 to vector<1x128xf32>
    %1035 = arith.mulf %1033, %1034 : vector<1x128xf32>
    %1036 = arith.addf %14, %1035 : vector<1x128xf32>
    %1037 = vector.broadcast %cst_11 : f32 to vector<1x128xf32>
    %1038 = arith.maximumf %1036, %1037 : vector<1x128xf32>
    %1039 = tpu.reciprocal %1038 {approx = true} : vector<1x128xf32> -> vector<1x128xf32>
    %1040 = arith.mulf %1025, %1039 : vector<1x128xf32>
    %1041 = vector.broadcast %cst_11 : f32 to vector<1x128xf32>
    %1042 = arith.maximumf %1040, %1041 : vector<1x128xf32>
    %1043 = math.log %1042 : vector<1x128xf32>
    %1044 = vector.broadcast %cst_16 : f32 to vector<1x128xf32>
    %1045 = arith.mulf %1044, %1043 : vector<1x128xf32>
    %1046 = math.exp %1045 : vector<1x128xf32>
    %1047 = arith.mulf %1025, %1046 : vector<1x128xf32>
    %1048 = vector.broadcast %9 : f32 to vector<1x128xf32>
    %1049 = arith.mulf %1047, %1048 : vector<1x128xf32>
    %cst_215 = arith.constant 0.000000e+00 : f32
    %1050 = vector.broadcast %cst_215 : f32 to vector<1x128xf32>
    %1051 = arith.select %3, %1049, %1050 : vector<1x128xi1>, vector<1x128xf32>
    %cst_216 = arith.constant 0.000000e+00 : f32
    %1052 = vector.broadcast %cst_216 : f32 to vector<1x128xf32>
    %1053 = arith.select %7, %1051, %1052 : vector<1x128xi1>, vector<1x128xf32>
    %cst_217 = arith.constant dense<0.000000e+00> : vector<1xf32>
    %1054 = vector.multi_reduction <add>, %1053, %cst_217 [1] : vector<1x128xf32> to vector<1xf32>
    %1055 = vector.shape_cast %1054 : vector<1xf32> to vector<1x1xf32>
    %1056 = vector.broadcast %cst_11 : f32 to vector<1x128xf32>
    %1057 = arith.maximumf %1025, %1056 : vector<1x128xf32>
    %1058 = tpu.reciprocal %1057 {approx = true} : vector<1x128xf32> -> vector<1x128xf32>
    %1059 = arith.mulf %1051, %1058 : vector<1x128xf32>
    %1060 = vector.broadcast %cst_11 : f32 to vector<1x128xf32>
    %1061 = arith.cmpf ogt, %1025, %1060 : vector<1x128xf32>
    %1062 = vector.broadcast %956 : f32 to vector<1x128xf32>
    %1063 = arith.mulf %1059, %1062 : vector<1x128xf32>
    %1064 = arith.mulf %1063, %15 : vector<1x128xf32>
    %cst_218 = arith.constant 0.000000e+00 : f32
    %1065 = vector.broadcast %cst_218 : f32 to vector<1x128xf32>
    %1066 = arith.select %1061, %1064, %1065 : vector<1x128xi1>, vector<1x128xf32>
    %cst_219 = arith.constant 0.000000e+00 : f32
    %1067 = vector.broadcast %cst_219 : f32 to vector<1x128xf32>
    %1068 = arith.select %3, %1066, %1067 : vector<1x128xi1>, vector<1x128xf32>
    %cst_220 = arith.constant dense<0xFF800000> : vector<1xf32>
    %1069 = vector.multi_reduction <maximumf>, %1068, %cst_220 [1] : vector<1x128xf32> to vector<1xf32>
    %1070 = vector.shape_cast %1069 : vector<1xf32> to vector<1x1xf32>
    %1071 = arith.maximumf %921, %1070 : vector<1x1xf32>
    %c0_i32_221 = arith.constant 0 : i32
    %1072 = vector.broadcast %c0_i32_221 : i32 to vector<1x128xi32>
    %1073 = arith.cmpi eq, %1, %1072 : vector<1x128xi32>
    %cst_222 = arith.constant 0.000000e+00 : f32
    %1074 = vector.shape_cast %1055 : vector<1x1xf32> to vector<1x1xf32>
    %1075 = vector.broadcast %1074 : vector<1x1xf32> to vector<1x128xf32>
    %1076 = vector.broadcast %cst_222 : f32 to vector<1x128xf32>
    %1077 = arith.select %1073, %1075, %1076 : vector<1x128xi1>, vector<1x128xf32>
    %c1_i32_223 = arith.constant 1 : i32
    %1078 = vector.broadcast %c1_i32_223 : i32 to vector<1x128xi32>
    %1079 = arith.cmpi eq, %1, %1078 : vector<1x128xi32>
    %cst_224 = arith.constant 0.000000e+00 : f32
    %1080 = vector.shape_cast %987 : vector<1x1xf32> to vector<1x1xf32>
    %1081 = vector.broadcast %1080 : vector<1x1xf32> to vector<1x128xf32>
    %1082 = vector.broadcast %cst_224 : f32 to vector<1x128xf32>
    %1083 = arith.select %1079, %1081, %1082 : vector<1x128xi1>, vector<1x128xf32>
    %1084 = arith.addf %1077, %1083 : vector<1x128xf32>
    %c2_i32_225 = arith.constant 2 : i32
    %1085 = vector.broadcast %c2_i32_225 : i32 to vector<1x128xi32>
    %1086 = arith.cmpi eq, %1, %1085 : vector<1x128xi32>
    %cst_226 = arith.constant 0.000000e+00 : f32
    %1087 = vector.shape_cast %989 : vector<1x1xf32> to vector<1x1xf32>
    %1088 = vector.broadcast %1087 : vector<1x1xf32> to vector<1x128xf32>
    %1089 = vector.broadcast %cst_226 : f32 to vector<1x128xf32>
    %1090 = arith.select %1086, %1088, %1089 : vector<1x128xi1>, vector<1x128xf32>
    %1091 = arith.addf %1084, %1090 : vector<1x128xf32>
    %1092 = arith.index_cast %c6_i32_197 : i32 to index
    %c0_227 = arith.constant 0 : index
    %1093 = vector.load %arg9[%1092, %c0_227] : memref<24x128xf32, #tpu.memory_space<vmem>>, vector<1x128xf32>
    tpu.vector_store %arg9[%1092, %c0_227], %1091 {strides = array<i32>} : memref<24x128xf32, #tpu.memory_space<vmem>>, vector<1x128xf32>,
    %c7_i32 = arith.constant 7 : i32
    %c6_i32_228 = arith.constant 6 : i32
    %1094 = arith.muli %c7_i32, %c6_i32_228 : i32
    %c0_i32_229 = arith.constant 0 : i32
    %1095 = arith.addi %1094, %c0_i32_229 : i32
    %1096 = arith.index_cast %1095 : i32 to index
    %1097 = memref.load %arg1[%1096] : memref<144xf32, #tpu.memory_space<smem>>
    %c1_i32_230 = arith.constant 1 : i32
    %1098 = arith.addi %1094, %c1_i32_230 : i32
    %1099 = arith.index_cast %1098 : i32 to index
    %1100 = memref.load %arg1[%1099] : memref<144xf32, #tpu.memory_space<smem>>
    %c2_i32_231 = arith.constant 2 : i32
    %1101 = arith.addi %1094, %c2_i32_231 : i32
    %1102 = arith.index_cast %1101 : i32 to index
    %1103 = memref.load %arg1[%1102] : memref<144xf32, #tpu.memory_space<smem>>
    %c3_i32_232 = arith.constant 3 : i32
    %1104 = arith.addi %1094, %c3_i32_232 : i32
    %1105 = arith.index_cast %1104 : i32 to index
    %1106 = memref.load %arg1[%1105] : memref<144xf32, #tpu.memory_space<smem>>
    %c4_i32_233 = arith.constant 4 : i32
    %1107 = arith.addi %1094, %c4_i32_233 : i32
    %1108 = arith.index_cast %1107 : i32 to index
    %1109 = memref.load %arg1[%1108] : memref<144xf32, #tpu.memory_space<smem>>
    %1110 = vector.broadcast %12 : f32 to vector<1x1xf32>
    %1111 = arith.subf %1110, %995 : vector<1x1xf32>
    %cst_234 = arith.constant 0.000000e+00 : f32
    %1112 = vector.broadcast %cst_234 : f32 to vector<1x1xf32>
    %1113 = arith.maximumf %1111, %1112 : vector<1x1xf32>
    %1114 = vector.broadcast %cst_11 : f32 to vector<1x1xf32>
    %1115 = arith.maximumf %990, %1114 : vector<1x1xf32>
    %1116 = arith.divf %1113, %1115 : vector<1x1xf32>
    %1117 = vector.broadcast %11 : f32 to vector<1x128xf32>
    %1118 = arith.addf %1117, %1033 : vector<1x128xf32>
    %1119 = vector.broadcast %1116 : vector<1x1xf32> to vector<1x128xf32>
    %1120 = arith.mulf %1118, %1119 : vector<1x128xf32>
    %cst_235 = arith.constant 1.000000e+00 : f32
    %1121 = vector.broadcast %cst_235 : f32 to vector<1x128xf32>
    %1122 = arith.addf %1121, %1120 : vector<1x128xf32>
    %1123 = vector.broadcast %10 : f32 to vector<1x128xf32>
    %1124 = arith.mulf %1123, %1122 : vector<1x128xf32>
    %1125 = vector.broadcast %1109 : f32 to vector<1x128xf32>
    %1126 = arith.mulf %1033, %1125 : vector<1x128xf32>
    %1127 = vector.broadcast %1097 : f32 to vector<1x128xf32>
    %1128 = arith.addf %1127, %1126 : vector<1x128xf32>
    %1129 = arith.minimumf %1128, %1124 : vector<1x128xf32>
    %cst_236 = arith.constant 0.000000e+00 : f32
    %1130 = vector.broadcast %cst_236 : f32 to vector<1x128xf32>
    %1131 = arith.maximumf %1129, %1130 : vector<1x128xf32>
    %cst_237 = arith.constant 0.000000e+00 : f32
    %1132 = vector.broadcast %cst_237 : f32 to vector<1x128xf32>
    %1133 = arith.select %3, %1131, %1132 : vector<1x128xi1>, vector<1x128xf32>
    %cst_238 = arith.constant dense<0.000000e+00> : vector<1xf32>
    %1134 = vector.multi_reduction <add>, %1133, %cst_238 [1] : vector<1x128xf32> to vector<1xf32>
    %1135 = vector.shape_cast %1134 : vector<1xf32> to vector<1x1xf32>
    %1136 = vector.broadcast %cst_12 : f32 to vector<1x1xf32>
    %1137 = arith.mulf %1135, %1136 : vector<1x1xf32>
    %1138 = vector.broadcast %1106 : f32 to vector<1x1xf32>
    %1139 = arith.mulf %1137, %1138 : vector<1x1xf32>
    %1140 = arith.addf %990, %1139 : vector<1x1xf32>
    %1141 = vector.broadcast %13 : f32 to vector<1x1xf32>
    %1142 = arith.mulf %1139, %1141 : vector<1x1xf32>
    %1143 = arith.addf %995, %1142 : vector<1x1xf32>
    %1144 = vector.broadcast %12 : f32 to vector<1x1xf32>
    %1145 = arith.minimumf %1143, %1144 : vector<1x1xf32>
    %1146 = vector.broadcast %1097 : f32 to vector<1x128xf32>
    %1147 = arith.subf %1146, %1133 : vector<1x128xf32>
    %cst_239 = arith.constant 0.000000e+00 : f32
    %1148 = vector.broadcast %cst_239 : f32 to vector<1x128xf32>
    %1149 = arith.maximumf %1147, %1148 : vector<1x128xf32>
    %cst_240 = arith.constant 0.000000e+00 : f32
    %1150 = vector.broadcast %cst_240 : f32 to vector<1x128xf32>
    %1151 = arith.select %3, %1033, %1150 : vector<1x128xi1>, vector<1x128xf32>
    %cst_241 = arith.constant dense<0.000000e+00> : vector<1xf32>
    %1152 = vector.multi_reduction <add>, %1151, %cst_241 [1] : vector<1x128xf32> to vector<1xf32>
    %1153 = vector.shape_cast %1152 : vector<1xf32> to vector<1x1xf32>
    %1154 = vector.broadcast %cst_12 : f32 to vector<1x1xf32>
    %1155 = arith.mulf %1153, %1154 : vector<1x1xf32>
    %1156 = vector.broadcast %cst_13 : f32 to vector<1x1xf32>
    %1157 = arith.mulf %1155, %1156 : vector<1x1xf32>
    %1158 = vector.broadcast %1157 : vector<1x1xf32> to vector<1x128xf32>
    %1159 = arith.addf %14, %1158 : vector<1x128xf32>
    %1160 = arith.mulf %1149, %1159 : vector<1x128xf32>
    %1161 = vector.broadcast %1103 : f32 to vector<1x128xf32>
    %1162 = arith.addf %1160, %1161 : vector<1x128xf32>
    %c1_i32_242 = arith.constant 1 : i32
    %1163 = tpu.dynamic_rotate %1051 by %c1_i32_242 dim 1 : vector<1x128xf32>, i32 -> vector<1x128xf32>
    %1164 = vector.broadcast %1100 : f32 to vector<1x128xf32>
    %1165 = arith.select %5, %1164, %1163 : vector<1x128xi1>, vector<1x128xf32>
    %1166 = arith.subf %1165, %1051 : vector<1x128xf32>
    %1167 = arith.mulf %1166, %15 : vector<1x128xf32>
    %1168 = arith.addf %1167, %1162 : vector<1x128xf32>
    %1169 = vector.broadcast %1106 : f32 to vector<1x128xf32>
    %1170 = arith.mulf %1169, %1168 : vector<1x128xf32>
    %1171 = arith.addf %1025, %1170 : vector<1x128xf32>
    %cst_243 = arith.constant 0.000000e+00 : f32
    %1172 = vector.broadcast %cst_243 : f32 to vector<1x128xf32>
    %1173 = arith.maximumf %1171, %1172 : vector<1x128xf32>
    %cst_244 = arith.constant 0.000000e+00 : f32
    %1174 = vector.broadcast %cst_244 : f32 to vector<1x128xf32>
    %1175 = arith.select %3, %1173, %1174 : vector<1x128xi1>, vector<1x128xf32>
    %1176 = arith.mulf %14, %14 : vector<1x128xf32>
    %1177 = vector.broadcast %cst_14 : f32 to vector<1x128xf32>
    %1178 = arith.mulf %1177, %1175 : vector<1x128xf32>
    %1179 = arith.addf %1176, %1178 : vector<1x128xf32>
    %1180 = math.sqrt %1179 : vector<1x128xf32>
    %1181 = arith.subf %1180, %14 : vector<1x128xf32>
    %1182 = vector.broadcast %cst_15 : f32 to vector<1x128xf32>
    %1183 = arith.mulf %1181, %1182 : vector<1x128xf32>
    %1184 = vector.broadcast %8 : f32 to vector<1x128xf32>
    %1185 = arith.mulf %1183, %1184 : vector<1x128xf32>
    %1186 = arith.addf %14, %1185 : vector<1x128xf32>
    %1187 = vector.broadcast %cst_11 : f32 to vector<1x128xf32>
    %1188 = arith.maximumf %1186, %1187 : vector<1x128xf32>
    %1189 = tpu.reciprocal %1188 {approx = true} : vector<1x128xf32> -> vector<1x128xf32>
    %1190 = arith.mulf %1175, %1189 : vector<1x128xf32>
    %1191 = vector.broadcast %cst_11 : f32 to vector<1x128xf32>
    %1192 = arith.maximumf %1190, %1191 : vector<1x128xf32>
    %1193 = math.log %1192 : vector<1x128xf32>
    %1194 = vector.broadcast %cst_16 : f32 to vector<1x128xf32>
    %1195 = arith.mulf %1194, %1193 : vector<1x128xf32>
    %1196 = math.exp %1195 : vector<1x128xf32>
    %1197 = arith.mulf %1175, %1196 : vector<1x128xf32>
    %1198 = vector.broadcast %9 : f32 to vector<1x128xf32>
    %1199 = arith.mulf %1197, %1198 : vector<1x128xf32>
    %cst_245 = arith.constant 0.000000e+00 : f32
    %1200 = vector.broadcast %cst_245 : f32 to vector<1x128xf32>
    %1201 = arith.select %3, %1199, %1200 : vector<1x128xi1>, vector<1x128xf32>
    %cst_246 = arith.constant 0.000000e+00 : f32
    %1202 = vector.broadcast %cst_246 : f32 to vector<1x128xf32>
    %1203 = arith.select %7, %1201, %1202 : vector<1x128xi1>, vector<1x128xf32>
    %cst_247 = arith.constant dense<0.000000e+00> : vector<1xf32>
    %1204 = vector.multi_reduction <add>, %1203, %cst_247 [1] : vector<1x128xf32> to vector<1xf32>
    %1205 = vector.shape_cast %1204 : vector<1xf32> to vector<1x1xf32>
    %1206 = vector.broadcast %cst_11 : f32 to vector<1x128xf32>
    %1207 = arith.maximumf %1175, %1206 : vector<1x128xf32>
    %1208 = tpu.reciprocal %1207 {approx = true} : vector<1x128xf32> -> vector<1x128xf32>
    %1209 = arith.mulf %1201, %1208 : vector<1x128xf32>
    %1210 = vector.broadcast %cst_11 : f32 to vector<1x128xf32>
    %1211 = arith.cmpf ogt, %1175, %1210 : vector<1x128xf32>
    %1212 = vector.broadcast %1106 : f32 to vector<1x128xf32>
    %1213 = arith.mulf %1209, %1212 : vector<1x128xf32>
    %1214 = arith.mulf %1213, %15 : vector<1x128xf32>
    %cst_248 = arith.constant 0.000000e+00 : f32
    %1215 = vector.broadcast %cst_248 : f32 to vector<1x128xf32>
    %1216 = arith.select %1211, %1214, %1215 : vector<1x128xi1>, vector<1x128xf32>
    %cst_249 = arith.constant 0.000000e+00 : f32
    %1217 = vector.broadcast %cst_249 : f32 to vector<1x128xf32>
    %1218 = arith.select %3, %1216, %1217 : vector<1x128xi1>, vector<1x128xf32>
    %cst_250 = arith.constant dense<0xFF800000> : vector<1xf32>
    %1219 = vector.multi_reduction <maximumf>, %1218, %cst_250 [1] : vector<1x128xf32> to vector<1xf32>
    %1220 = vector.shape_cast %1219 : vector<1xf32> to vector<1x1xf32>
    %1221 = arith.maximumf %1071, %1220 : vector<1x1xf32>
    %c0_i32_251 = arith.constant 0 : i32
    %1222 = vector.broadcast %c0_i32_251 : i32 to vector<1x128xi32>
    %1223 = arith.cmpi eq, %1, %1222 : vector<1x128xi32>
    %cst_252 = arith.constant 0.000000e+00 : f32
    %1224 = vector.shape_cast %1205 : vector<1x1xf32> to vector<1x1xf32>
    %1225 = vector.broadcast %1224 : vector<1x1xf32> to vector<1x128xf32>
    %1226 = vector.broadcast %cst_252 : f32 to vector<1x128xf32>
    %1227 = arith.select %1223, %1225, %1226 : vector<1x128xi1>, vector<1x128xf32>
    %c1_i32_253 = arith.constant 1 : i32
    %1228 = vector.broadcast %c1_i32_253 : i32 to vector<1x128xi32>
    %1229 = arith.cmpi eq, %1, %1228 : vector<1x128xi32>
    %cst_254 = arith.constant 0.000000e+00 : f32
    %1230 = vector.shape_cast %1137 : vector<1x1xf32> to vector<1x1xf32>
    %1231 = vector.broadcast %1230 : vector<1x1xf32> to vector<1x128xf32>
    %1232 = vector.broadcast %cst_254 : f32 to vector<1x128xf32>
    %1233 = arith.select %1229, %1231, %1232 : vector<1x128xi1>, vector<1x128xf32>
    %1234 = arith.addf %1227, %1233 : vector<1x128xf32>
    %c2_i32_255 = arith.constant 2 : i32
    %1235 = vector.broadcast %c2_i32_255 : i32 to vector<1x128xi32>
    %1236 = arith.cmpi eq, %1, %1235 : vector<1x128xi32>
    %cst_256 = arith.constant 0.000000e+00 : f32
    %1237 = vector.shape_cast %1139 : vector<1x1xf32> to vector<1x1xf32>
    %1238 = vector.broadcast %1237 : vector<1x1xf32> to vector<1x128xf32>
    %1239 = vector.broadcast %cst_256 : f32 to vector<1x128xf32>
    %1240 = arith.select %1236, %1238, %1239 : vector<1x128xi1>, vector<1x128xf32>
    %1241 = arith.addf %1234, %1240 : vector<1x128xf32>
    %1242 = arith.index_cast %c7_i32 : i32 to index
    %c0_257 = arith.constant 0 : index
    %1243 = vector.load %arg9[%1242, %c0_257] : memref<24x128xf32, #tpu.memory_space<vmem>>, vector<1x128xf32>
    tpu.vector_store %arg9[%1242, %c0_257], %1241 {strides = array<i32>} : memref<24x128xf32, #tpu.memory_space<vmem>>, vector<1x128xf32>,
    %c8_i32 = arith.constant 8 : i32
    %c6_i32_258 = arith.constant 6 : i32
    %1244 = arith.muli %c8_i32, %c6_i32_258 : i32
    %c0_i32_259 = arith.constant 0 : i32
    %1245 = arith.addi %1244, %c0_i32_259 : i32
    %1246 = arith.index_cast %1245 : i32 to index
    %1247 = memref.load %arg1[%1246] : memref<144xf32, #tpu.memory_space<smem>>
    %c1_i32_260 = arith.constant 1 : i32
    %1248 = arith.addi %1244, %c1_i32_260 : i32
    %1249 = arith.index_cast %1248 : i32 to index
    %1250 = memref.load %arg1[%1249] : memref<144xf32, #tpu.memory_space<smem>>
    %c2_i32_261 = arith.constant 2 : i32
    %1251 = arith.addi %1244, %c2_i32_261 : i32
    %1252 = arith.index_cast %1251 : i32 to index
    %1253 = memref.load %arg1[%1252] : memref<144xf32, #tpu.memory_space<smem>>
    %c3_i32_262 = arith.constant 3 : i32
    %1254 = arith.addi %1244, %c3_i32_262 : i32
    %1255 = arith.index_cast %1254 : i32 to index
    %1256 = memref.load %arg1[%1255] : memref<144xf32, #tpu.memory_space<smem>>
    %c4_i32_263 = arith.constant 4 : i32
    %1257 = arith.addi %1244, %c4_i32_263 : i32
    %1258 = arith.index_cast %1257 : i32 to index
    %1259 = memref.load %arg1[%1258] : memref<144xf32, #tpu.memory_space<smem>>
    %1260 = vector.broadcast %12 : f32 to vector<1x1xf32>
    %1261 = arith.subf %1260, %1145 : vector<1x1xf32>
    %cst_264 = arith.constant 0.000000e+00 : f32
    %1262 = vector.broadcast %cst_264 : f32 to vector<1x1xf32>
    %1263 = arith.maximumf %1261, %1262 : vector<1x1xf32>
    %1264 = vector.broadcast %cst_11 : f32 to vector<1x1xf32>
    %1265 = arith.maximumf %1140, %1264 : vector<1x1xf32>
    %1266 = arith.divf %1263, %1265 : vector<1x1xf32>
    %1267 = vector.broadcast %11 : f32 to vector<1x128xf32>
    %1268 = arith.addf %1267, %1183 : vector<1x128xf32>
    %1269 = vector.broadcast %1266 : vector<1x1xf32> to vector<1x128xf32>
    %1270 = arith.mulf %1268, %1269 : vector<1x128xf32>
    %cst_265 = arith.constant 1.000000e+00 : f32
    %1271 = vector.broadcast %cst_265 : f32 to vector<1x128xf32>
    %1272 = arith.addf %1271, %1270 : vector<1x128xf32>
    %1273 = vector.broadcast %10 : f32 to vector<1x128xf32>
    %1274 = arith.mulf %1273, %1272 : vector<1x128xf32>
    %1275 = vector.broadcast %1259 : f32 to vector<1x128xf32>
    %1276 = arith.mulf %1183, %1275 : vector<1x128xf32>
    %1277 = vector.broadcast %1247 : f32 to vector<1x128xf32>
    %1278 = arith.addf %1277, %1276 : vector<1x128xf32>
    %1279 = arith.minimumf %1278, %1274 : vector<1x128xf32>
    %cst_266 = arith.constant 0.000000e+00 : f32
    %1280 = vector.broadcast %cst_266 : f32 to vector<1x128xf32>
    %1281 = arith.maximumf %1279, %1280 : vector<1x128xf32>
    %cst_267 = arith.constant 0.000000e+00 : f32
    %1282 = vector.broadcast %cst_267 : f32 to vector<1x128xf32>
    %1283 = arith.select %3, %1281, %1282 : vector<1x128xi1>, vector<1x128xf32>
    %cst_268 = arith.constant dense<0.000000e+00> : vector<1xf32>
    %1284 = vector.multi_reduction <add>, %1283, %cst_268 [1] : vector<1x128xf32> to vector<1xf32>
    %1285 = vector.shape_cast %1284 : vector<1xf32> to vector<1x1xf32>
    %1286 = vector.broadcast %cst_12 : f32 to vector<1x1xf32>
    %1287 = arith.mulf %1285, %1286 : vector<1x1xf32>
    %1288 = vector.broadcast %1256 : f32 to vector<1x1xf32>
    %1289 = arith.mulf %1287, %1288 : vector<1x1xf32>
    %1290 = arith.addf %1140, %1289 : vector<1x1xf32>
    %1291 = vector.broadcast %13 : f32 to vector<1x1xf32>
    %1292 = arith.mulf %1289, %1291 : vector<1x1xf32>
    %1293 = arith.addf %1145, %1292 : vector<1x1xf32>
    %1294 = vector.broadcast %12 : f32 to vector<1x1xf32>
    %1295 = arith.minimumf %1293, %1294 : vector<1x1xf32>
    %1296 = vector.broadcast %1247 : f32 to vector<1x128xf32>
    %1297 = arith.subf %1296, %1283 : vector<1x128xf32>
    %cst_269 = arith.constant 0.000000e+00 : f32
    %1298 = vector.broadcast %cst_269 : f32 to vector<1x128xf32>
    %1299 = arith.maximumf %1297, %1298 : vector<1x128xf32>
    %cst_270 = arith.constant 0.000000e+00 : f32
    %1300 = vector.broadcast %cst_270 : f32 to vector<1x128xf32>
    %1301 = arith.select %3, %1183, %1300 : vector<1x128xi1>, vector<1x128xf32>
    %cst_271 = arith.constant dense<0.000000e+00> : vector<1xf32>
    %1302 = vector.multi_reduction <add>, %1301, %cst_271 [1] : vector<1x128xf32> to vector<1xf32>
    %1303 = vector.shape_cast %1302 : vector<1xf32> to vector<1x1xf32>
    %1304 = vector.broadcast %cst_12 : f32 to vector<1x1xf32>
    %1305 = arith.mulf %1303, %1304 : vector<1x1xf32>
    %1306 = vector.broadcast %cst_13 : f32 to vector<1x1xf32>
    %1307 = arith.mulf %1305, %1306 : vector<1x1xf32>
    %1308 = vector.broadcast %1307 : vector<1x1xf32> to vector<1x128xf32>
    %1309 = arith.addf %14, %1308 : vector<1x128xf32>
    %1310 = arith.mulf %1299, %1309 : vector<1x128xf32>
    %1311 = vector.broadcast %1253 : f32 to vector<1x128xf32>
    %1312 = arith.addf %1310, %1311 : vector<1x128xf32>
    %c1_i32_272 = arith.constant 1 : i32
    %1313 = tpu.dynamic_rotate %1201 by %c1_i32_272 dim 1 : vector<1x128xf32>, i32 -> vector<1x128xf32>
    %1314 = vector.broadcast %1250 : f32 to vector<1x128xf32>
    %1315 = arith.select %5, %1314, %1313 : vector<1x128xi1>, vector<1x128xf32>
    %1316 = arith.subf %1315, %1201 : vector<1x128xf32>
    %1317 = arith.mulf %1316, %15 : vector<1x128xf32>
    %1318 = arith.addf %1317, %1312 : vector<1x128xf32>
    %1319 = vector.broadcast %1256 : f32 to vector<1x128xf32>
    %1320 = arith.mulf %1319, %1318 : vector<1x128xf32>
    %1321 = arith.addf %1175, %1320 : vector<1x128xf32>
    %cst_273 = arith.constant 0.000000e+00 : f32
    %1322 = vector.broadcast %cst_273 : f32 to vector<1x128xf32>
    %1323 = arith.maximumf %1321, %1322 : vector<1x128xf32>
    %cst_274 = arith.constant 0.000000e+00 : f32
    %1324 = vector.broadcast %cst_274 : f32 to vector<1x128xf32>
    %1325 = arith.select %3, %1323, %1324 : vector<1x128xi1>, vector<1x128xf32>
    %1326 = arith.mulf %14, %14 : vector<1x128xf32>
    %1327 = vector.broadcast %cst_14 : f32 to vector<1x128xf32>
    %1328 = arith.mulf %1327, %1325 : vector<1x128xf32>
    %1329 = arith.addf %1326, %1328 : vector<1x128xf32>
    %1330 = math.sqrt %1329 : vector<1x128xf32>
    %1331 = arith.subf %1330, %14 : vector<1x128xf32>
    %1332 = vector.broadcast %cst_15 : f32 to vector<1x128xf32>
    %1333 = arith.mulf %1331, %1332 : vector<1x128xf32>
    %1334 = vector.broadcast %8 : f32 to vector<1x128xf32>
    %1335 = arith.mulf %1333, %1334 : vector<1x128xf32>
    %1336 = arith.addf %14, %1335 : vector<1x128xf32>
    %1337 = vector.broadcast %cst_11 : f32 to vector<1x128xf32>
    %1338 = arith.maximumf %1336, %1337 : vector<1x128xf32>
    %1339 = tpu.reciprocal %1338 {approx = true} : vector<1x128xf32> -> vector<1x128xf32>
    %1340 = arith.mulf %1325, %1339 : vector<1x128xf32>
    %1341 = vector.broadcast %cst_11 : f32 to vector<1x128xf32>
    %1342 = arith.maximumf %1340, %1341 : vector<1x128xf32>
    %1343 = math.log %1342 : vector<1x128xf32>
    %1344 = vector.broadcast %cst_16 : f32 to vector<1x128xf32>
    %1345 = arith.mulf %1344, %1343 : vector<1x128xf32>
    %1346 = math.exp %1345 : vector<1x128xf32>
    %1347 = arith.mulf %1325, %1346 : vector<1x128xf32>
    %1348 = vector.broadcast %9 : f32 to vector<1x128xf32>
    %1349 = arith.mulf %1347, %1348 : vector<1x128xf32>
    %cst_275 = arith.constant 0.000000e+00 : f32
    %1350 = vector.broadcast %cst_275 : f32 to vector<1x128xf32>
    %1351 = arith.select %3, %1349, %1350 : vector<1x128xi1>, vector<1x128xf32>
    %cst_276 = arith.constant 0.000000e+00 : f32
    %1352 = vector.broadcast %cst_276 : f32 to vector<1x128xf32>
    %1353 = arith.select %7, %1351, %1352 : vector<1x128xi1>, vector<1x128xf32>
    %cst_277 = arith.constant dense<0.000000e+00> : vector<1xf32>
    %1354 = vector.multi_reduction <add>, %1353, %cst_277 [1] : vector<1x128xf32> to vector<1xf32>
    %1355 = vector.shape_cast %1354 : vector<1xf32> to vector<1x1xf32>
    %1356 = vector.broadcast %cst_11 : f32 to vector<1x128xf32>
    %1357 = arith.maximumf %1325, %1356 : vector<1x128xf32>
    %1358 = tpu.reciprocal %1357 {approx = true} : vector<1x128xf32> -> vector<1x128xf32>
    %1359 = arith.mulf %1351, %1358 : vector<1x128xf32>
    %1360 = vector.broadcast %cst_11 : f32 to vector<1x128xf32>
    %1361 = arith.cmpf ogt, %1325, %1360 : vector<1x128xf32>
    %1362 = vector.broadcast %1256 : f32 to vector<1x128xf32>
    %1363 = arith.mulf %1359, %1362 : vector<1x128xf32>
    %1364 = arith.mulf %1363, %15 : vector<1x128xf32>
    %cst_278 = arith.constant 0.000000e+00 : f32
    %1365 = vector.broadcast %cst_278 : f32 to vector<1x128xf32>
    %1366 = arith.select %1361, %1364, %1365 : vector<1x128xi1>, vector<1x128xf32>
    %cst_279 = arith.constant 0.000000e+00 : f32
    %1367 = vector.broadcast %cst_279 : f32 to vector<1x128xf32>
    %1368 = arith.select %3, %1366, %1367 : vector<1x128xi1>, vector<1x128xf32>
    %cst_280 = arith.constant dense<0xFF800000> : vector<1xf32>
    %1369 = vector.multi_reduction <maximumf>, %1368, %cst_280 [1] : vector<1x128xf32> to vector<1xf32>
    %1370 = vector.shape_cast %1369 : vector<1xf32> to vector<1x1xf32>
    %1371 = arith.maximumf %1221, %1370 : vector<1x1xf32>
    %c0_i32_281 = arith.constant 0 : i32
    %1372 = vector.broadcast %c0_i32_281 : i32 to vector<1x128xi32>
    %1373 = arith.cmpi eq, %1, %1372 : vector<1x128xi32>
    %cst_282 = arith.constant 0.000000e+00 : f32
    %1374 = vector.shape_cast %1355 : vector<1x1xf32> to vector<1x1xf32>
    %1375 = vector.broadcast %1374 : vector<1x1xf32> to vector<1x128xf32>
    %1376 = vector.broadcast %cst_282 : f32 to vector<1x128xf32>
    %1377 = arith.select %1373, %1375, %1376 : vector<1x128xi1>, vector<1x128xf32>
    %c1_i32_283 = arith.constant 1 : i32
    %1378 = vector.broadcast %c1_i32_283 : i32 to vector<1x128xi32>
    %1379 = arith.cmpi eq, %1, %1378 : vector<1x128xi32>
    %cst_284 = arith.constant 0.000000e+00 : f32
    %1380 = vector.shape_cast %1287 : vector<1x1xf32> to vector<1x1xf32>
    %1381 = vector.broadcast %1380 : vector<1x1xf32> to vector<1x128xf32>
    %1382 = vector.broadcast %cst_284 : f32 to vector<1x128xf32>
    %1383 = arith.select %1379, %1381, %1382 : vector<1x128xi1>, vector<1x128xf32>
    %1384 = arith.addf %1377, %1383 : vector<1x128xf32>
    %c2_i32_285 = arith.constant 2 : i32
    %1385 = vector.broadcast %c2_i32_285 : i32 to vector<1x128xi32>
    %1386 = arith.cmpi eq, %1, %1385 : vector<1x128xi32>
    %cst_286 = arith.constant 0.000000e+00 : f32
    %1387 = vector.shape_cast %1289 : vector<1x1xf32> to vector<1x1xf32>
    %1388 = vector.broadcast %1387 : vector<1x1xf32> to vector<1x128xf32>
    %1389 = vector.broadcast %cst_286 : f32 to vector<1x128xf32>
    %1390 = arith.select %1386, %1388, %1389 : vector<1x128xi1>, vector<1x128xf32>
    %1391 = arith.addf %1384, %1390 : vector<1x128xf32>
    %1392 = arith.index_cast %c8_i32 : i32 to index
    %c0_287 = arith.constant 0 : index
    %1393 = vector.load %arg9[%1392, %c0_287] : memref<24x128xf32, #tpu.memory_space<vmem>>, vector<1x128xf32>
    tpu.vector_store %arg9[%1392, %c0_287], %1391 {strides = array<i32>} : memref<24x128xf32, #tpu.memory_space<vmem>>, vector<1x128xf32>,
    %c9_i32 = arith.constant 9 : i32
    %c6_i32_288 = arith.constant 6 : i32
    %1394 = arith.muli %c9_i32, %c6_i32_288 : i32
    %c0_i32_289 = arith.constant 0 : i32
    %1395 = arith.addi %1394, %c0_i32_289 : i32
    %1396 = arith.index_cast %1395 : i32 to index
    %1397 = memref.load %arg1[%1396] : memref<144xf32, #tpu.memory_space<smem>>
    %c1_i32_290 = arith.constant 1 : i32
    %1398 = arith.addi %1394, %c1_i32_290 : i32
    %1399 = arith.index_cast %1398 : i32 to index
    %1400 = memref.load %arg1[%1399] : memref<144xf32, #tpu.memory_space<smem>>
    %c2_i32_291 = arith.constant 2 : i32
    %1401 = arith.addi %1394, %c2_i32_291 : i32
    %1402 = arith.index_cast %1401 : i32 to index
    %1403 = memref.load %arg1[%1402] : memref<144xf32, #tpu.memory_space<smem>>
    %c3_i32_292 = arith.constant 3 : i32
    %1404 = arith.addi %1394, %c3_i32_292 : i32
    %1405 = arith.index_cast %1404 : i32 to index
    %1406 = memref.load %arg1[%1405] : memref<144xf32, #tpu.memory_space<smem>>
    %c4_i32_293 = arith.constant 4 : i32
    %1407 = arith.addi %1394, %c4_i32_293 : i32
    %1408 = arith.index_cast %1407 : i32 to index
    %1409 = memref.load %arg1[%1408] : memref<144xf32, #tpu.memory_space<smem>>
    %1410 = vector.broadcast %12 : f32 to vector<1x1xf32>
    %1411 = arith.subf %1410, %1295 : vector<1x1xf32>
    %cst_294 = arith.constant 0.000000e+00 : f32
    %1412 = vector.broadcast %cst_294 : f32 to vector<1x1xf32>
    %1413 = arith.maximumf %1411, %1412 : vector<1x1xf32>
    %1414 = vector.broadcast %cst_11 : f32 to vector<1x1xf32>
    %1415 = arith.maximumf %1290, %1414 : vector<1x1xf32>
    %1416 = arith.divf %1413, %1415 : vector<1x1xf32>
    %1417 = vector.broadcast %11 : f32 to vector<1x128xf32>
    %1418 = arith.addf %1417, %1333 : vector<1x128xf32>
    %1419 = vector.broadcast %1416 : vector<1x1xf32> to vector<1x128xf32>
    %1420 = arith.mulf %1418, %1419 : vector<1x128xf32>
    %cst_295 = arith.constant 1.000000e+00 : f32
    %1421 = vector.broadcast %cst_295 : f32 to vector<1x128xf32>
    %1422 = arith.addf %1421, %1420 : vector<1x128xf32>
    %1423 = vector.broadcast %10 : f32 to vector<1x128xf32>
    %1424 = arith.mulf %1423, %1422 : vector<1x128xf32>
    %1425 = vector.broadcast %1409 : f32 to vector<1x128xf32>
    %1426 = arith.mulf %1333, %1425 : vector<1x128xf32>
    %1427 = vector.broadcast %1397 : f32 to vector<1x128xf32>
    %1428 = arith.addf %1427, %1426 : vector<1x128xf32>
    %1429 = arith.minimumf %1428, %1424 : vector<1x128xf32>
    %cst_296 = arith.constant 0.000000e+00 : f32
    %1430 = vector.broadcast %cst_296 : f32 to vector<1x128xf32>
    %1431 = arith.maximumf %1429, %1430 : vector<1x128xf32>
    %cst_297 = arith.constant 0.000000e+00 : f32
    %1432 = vector.broadcast %cst_297 : f32 to vector<1x128xf32>
    %1433 = arith.select %3, %1431, %1432 : vector<1x128xi1>, vector<1x128xf32>
    %cst_298 = arith.constant dense<0.000000e+00> : vector<1xf32>
    %1434 = vector.multi_reduction <add>, %1433, %cst_298 [1] : vector<1x128xf32> to vector<1xf32>
    %1435 = vector.shape_cast %1434 : vector<1xf32> to vector<1x1xf32>
    %1436 = vector.broadcast %cst_12 : f32 to vector<1x1xf32>
    %1437 = arith.mulf %1435, %1436 : vector<1x1xf32>
    %1438 = vector.broadcast %1406 : f32 to vector<1x1xf32>
    %1439 = arith.mulf %1437, %1438 : vector<1x1xf32>
    %1440 = arith.addf %1290, %1439 : vector<1x1xf32>
    %1441 = vector.broadcast %13 : f32 to vector<1x1xf32>
    %1442 = arith.mulf %1439, %1441 : vector<1x1xf32>
    %1443 = arith.addf %1295, %1442 : vector<1x1xf32>
    %1444 = vector.broadcast %12 : f32 to vector<1x1xf32>
    %1445 = arith.minimumf %1443, %1444 : vector<1x1xf32>
    %1446 = vector.broadcast %1397 : f32 to vector<1x128xf32>
    %1447 = arith.subf %1446, %1433 : vector<1x128xf32>
    %cst_299 = arith.constant 0.000000e+00 : f32
    %1448 = vector.broadcast %cst_299 : f32 to vector<1x128xf32>
    %1449 = arith.maximumf %1447, %1448 : vector<1x128xf32>
    %cst_300 = arith.constant 0.000000e+00 : f32
    %1450 = vector.broadcast %cst_300 : f32 to vector<1x128xf32>
    %1451 = arith.select %3, %1333, %1450 : vector<1x128xi1>, vector<1x128xf32>
    %cst_301 = arith.constant dense<0.000000e+00> : vector<1xf32>
    %1452 = vector.multi_reduction <add>, %1451, %cst_301 [1] : vector<1x128xf32> to vector<1xf32>
    %1453 = vector.shape_cast %1452 : vector<1xf32> to vector<1x1xf32>
    %1454 = vector.broadcast %cst_12 : f32 to vector<1x1xf32>
    %1455 = arith.mulf %1453, %1454 : vector<1x1xf32>
    %1456 = vector.broadcast %cst_13 : f32 to vector<1x1xf32>
    %1457 = arith.mulf %1455, %1456 : vector<1x1xf32>
    %1458 = vector.broadcast %1457 : vector<1x1xf32> to vector<1x128xf32>
    %1459 = arith.addf %14, %1458 : vector<1x128xf32>
    %1460 = arith.mulf %1449, %1459 : vector<1x128xf32>
    %1461 = vector.broadcast %1403 : f32 to vector<1x128xf32>
    %1462 = arith.addf %1460, %1461 : vector<1x128xf32>
    %c1_i32_302 = arith.constant 1 : i32
    %1463 = tpu.dynamic_rotate %1351 by %c1_i32_302 dim 1 : vector<1x128xf32>, i32 -> vector<1x128xf32>
    %1464 = vector.broadcast %1400 : f32 to vector<1x128xf32>
    %1465 = arith.select %5, %1464, %1463 : vector<1x128xi1>, vector<1x128xf32>
    %1466 = arith.subf %1465, %1351 : vector<1x128xf32>
    %1467 = arith.mulf %1466, %15 : vector<1x128xf32>
    %1468 = arith.addf %1467, %1462 : vector<1x128xf32>
    %1469 = vector.broadcast %1406 : f32 to vector<1x128xf32>
    %1470 = arith.mulf %1469, %1468 : vector<1x128xf32>
    %1471 = arith.addf %1325, %1470 : vector<1x128xf32>
    %cst_303 = arith.constant 0.000000e+00 : f32
    %1472 = vector.broadcast %cst_303 : f32 to vector<1x128xf32>
    %1473 = arith.maximumf %1471, %1472 : vector<1x128xf32>
    %cst_304 = arith.constant 0.000000e+00 : f32
    %1474 = vector.broadcast %cst_304 : f32 to vector<1x128xf32>
    %1475 = arith.select %3, %1473, %1474 : vector<1x128xi1>, vector<1x128xf32>
    %1476 = arith.mulf %14, %14 : vector<1x128xf32>
    %1477 = vector.broadcast %cst_14 : f32 to vector<1x128xf32>
    %1478 = arith.mulf %1477, %1475 : vector<1x128xf32>
    %1479 = arith.addf %1476, %1478 : vector<1x128xf32>
    %1480 = math.sqrt %1479 : vector<1x128xf32>
    %1481 = arith.subf %1480, %14 : vector<1x128xf32>
    %1482 = vector.broadcast %cst_15 : f32 to vector<1x128xf32>
    %1483 = arith.mulf %1481, %1482 : vector<1x128xf32>
    %1484 = vector.broadcast %8 : f32 to vector<1x128xf32>
    %1485 = arith.mulf %1483, %1484 : vector<1x128xf32>
    %1486 = arith.addf %14, %1485 : vector<1x128xf32>
    %1487 = vector.broadcast %cst_11 : f32 to vector<1x128xf32>
    %1488 = arith.maximumf %1486, %1487 : vector<1x128xf32>
    %1489 = tpu.reciprocal %1488 {approx = true} : vector<1x128xf32> -> vector<1x128xf32>
    %1490 = arith.mulf %1475, %1489 : vector<1x128xf32>
    %1491 = vector.broadcast %cst_11 : f32 to vector<1x128xf32>
    %1492 = arith.maximumf %1490, %1491 : vector<1x128xf32>
    %1493 = math.log %1492 : vector<1x128xf32>
    %1494 = vector.broadcast %cst_16 : f32 to vector<1x128xf32>
    %1495 = arith.mulf %1494, %1493 : vector<1x128xf32>
    %1496 = math.exp %1495 : vector<1x128xf32>
    %1497 = arith.mulf %1475, %1496 : vector<1x128xf32>
    %1498 = vector.broadcast %9 : f32 to vector<1x128xf32>
    %1499 = arith.mulf %1497, %1498 : vector<1x128xf32>
    %cst_305 = arith.constant 0.000000e+00 : f32
    %1500 = vector.broadcast %cst_305 : f32 to vector<1x128xf32>
    %1501 = arith.select %3, %1499, %1500 : vector<1x128xi1>, vector<1x128xf32>
    %cst_306 = arith.constant 0.000000e+00 : f32
    %1502 = vector.broadcast %cst_306 : f32 to vector<1x128xf32>
    %1503 = arith.select %7, %1501, %1502 : vector<1x128xi1>, vector<1x128xf32>
    %cst_307 = arith.constant dense<0.000000e+00> : vector<1xf32>
    %1504 = vector.multi_reduction <add>, %1503, %cst_307 [1] : vector<1x128xf32> to vector<1xf32>
    %1505 = vector.shape_cast %1504 : vector<1xf32> to vector<1x1xf32>
    %1506 = vector.broadcast %cst_11 : f32 to vector<1x128xf32>
    %1507 = arith.maximumf %1475, %1506 : vector<1x128xf32>
    %1508 = tpu.reciprocal %1507 {approx = true} : vector<1x128xf32> -> vector<1x128xf32>
    %1509 = arith.mulf %1501, %1508 : vector<1x128xf32>
    %1510 = vector.broadcast %cst_11 : f32 to vector<1x128xf32>
    %1511 = arith.cmpf ogt, %1475, %1510 : vector<1x128xf32>
    %1512 = vector.broadcast %1406 : f32 to vector<1x128xf32>
    %1513 = arith.mulf %1509, %1512 : vector<1x128xf32>
    %1514 = arith.mulf %1513, %15 : vector<1x128xf32>
    %cst_308 = arith.constant 0.000000e+00 : f32
    %1515 = vector.broadcast %cst_308 : f32 to vector<1x128xf32>
    %1516 = arith.select %1511, %1514, %1515 : vector<1x128xi1>, vector<1x128xf32>
    %cst_309 = arith.constant 0.000000e+00 : f32
    %1517 = vector.broadcast %cst_309 : f32 to vector<1x128xf32>
    %1518 = arith.select %3, %1516, %1517 : vector<1x128xi1>, vector<1x128xf32>
    %cst_310 = arith.constant dense<0xFF800000> : vector<1xf32>
    %1519 = vector.multi_reduction <maximumf>, %1518, %cst_310 [1] : vector<1x128xf32> to vector<1xf32>
    %1520 = vector.shape_cast %1519 : vector<1xf32> to vector<1x1xf32>
    %1521 = arith.maximumf %1371, %1520 : vector<1x1xf32>
    %c0_i32_311 = arith.constant 0 : i32
    %1522 = vector.broadcast %c0_i32_311 : i32 to vector<1x128xi32>
    %1523 = arith.cmpi eq, %1, %1522 : vector<1x128xi32>
    %cst_312 = arith.constant 0.000000e+00 : f32
    %1524 = vector.shape_cast %1505 : vector<1x1xf32> to vector<1x1xf32>
    %1525 = vector.broadcast %1524 : vector<1x1xf32> to vector<1x128xf32>
    %1526 = vector.broadcast %cst_312 : f32 to vector<1x128xf32>
    %1527 = arith.select %1523, %1525, %1526 : vector<1x128xi1>, vector<1x128xf32>
    %c1_i32_313 = arith.constant 1 : i32
    %1528 = vector.broadcast %c1_i32_313 : i32 to vector<1x128xi32>
    %1529 = arith.cmpi eq, %1, %1528 : vector<1x128xi32>
    %cst_314 = arith.constant 0.000000e+00 : f32
    %1530 = vector.shape_cast %1437 : vector<1x1xf32> to vector<1x1xf32>
    %1531 = vector.broadcast %1530 : vector<1x1xf32> to vector<1x128xf32>
    %1532 = vector.broadcast %cst_314 : f32 to vector<1x128xf32>
    %1533 = arith.select %1529, %1531, %1532 : vector<1x128xi1>, vector<1x128xf32>
    %1534 = arith.addf %1527, %1533 : vector<1x128xf32>
    %c2_i32_315 = arith.constant 2 : i32
    %1535 = vector.broadcast %c2_i32_315 : i32 to vector<1x128xi32>
    %1536 = arith.cmpi eq, %1, %1535 : vector<1x128xi32>
    %cst_316 = arith.constant 0.000000e+00 : f32
    %1537 = vector.shape_cast %1439 : vector<1x1xf32> to vector<1x1xf32>
    %1538 = vector.broadcast %1537 : vector<1x1xf32> to vector<1x128xf32>
    %1539 = vector.broadcast %cst_316 : f32 to vector<1x128xf32>
    %1540 = arith.select %1536, %1538, %1539 : vector<1x128xi1>, vector<1x128xf32>
    %1541 = arith.addf %1534, %1540 : vector<1x128xf32>
    %1542 = arith.index_cast %c9_i32 : i32 to index
    %c0_317 = arith.constant 0 : index
    %1543 = vector.load %arg9[%1542, %c0_317] : memref<24x128xf32, #tpu.memory_space<vmem>>, vector<1x128xf32>
    tpu.vector_store %arg9[%1542, %c0_317], %1541 {strides = array<i32>} : memref<24x128xf32, #tpu.memory_space<vmem>>, vector<1x128xf32>,
    %c10_i32 = arith.constant 10 : i32
    %c6_i32_318 = arith.constant 6 : i32
    %1544 = arith.muli %c10_i32, %c6_i32_318 : i32
    %c0_i32_319 = arith.constant 0 : i32
    %1545 = arith.addi %1544, %c0_i32_319 : i32
    %1546 = arith.index_cast %1545 : i32 to index
    %1547 = memref.load %arg1[%1546] : memref<144xf32, #tpu.memory_space<smem>>
    %c1_i32_320 = arith.constant 1 : i32
    %1548 = arith.addi %1544, %c1_i32_320 : i32
    %1549 = arith.index_cast %1548 : i32 to index
    %1550 = memref.load %arg1[%1549] : memref<144xf32, #tpu.memory_space<smem>>
    %c2_i32_321 = arith.constant 2 : i32
    %1551 = arith.addi %1544, %c2_i32_321 : i32
    %1552 = arith.index_cast %1551 : i32 to index
    %1553 = memref.load %arg1[%1552] : memref<144xf32, #tpu.memory_space<smem>>
    %c3_i32_322 = arith.constant 3 : i32
    %1554 = arith.addi %1544, %c3_i32_322 : i32
    %1555 = arith.index_cast %1554 : i32 to index
    %1556 = memref.load %arg1[%1555] : memref<144xf32, #tpu.memory_space<smem>>
    %c4_i32_323 = arith.constant 4 : i32
    %1557 = arith.addi %1544, %c4_i32_323 : i32
    %1558 = arith.index_cast %1557 : i32 to index
    %1559 = memref.load %arg1[%1558] : memref<144xf32, #tpu.memory_space<smem>>
    %1560 = vector.broadcast %12 : f32 to vector<1x1xf32>
    %1561 = arith.subf %1560, %1445 : vector<1x1xf32>
    %cst_324 = arith.constant 0.000000e+00 : f32
    %1562 = vector.broadcast %cst_324 : f32 to vector<1x1xf32>
    %1563 = arith.maximumf %1561, %1562 : vector<1x1xf32>
    %1564 = vector.broadcast %cst_11 : f32 to vector<1x1xf32>
    %1565 = arith.maximumf %1440, %1564 : vector<1x1xf32>
    %1566 = arith.divf %1563, %1565 : vector<1x1xf32>
    %1567 = vector.broadcast %11 : f32 to vector<1x128xf32>
    %1568 = arith.addf %1567, %1483 : vector<1x128xf32>
    %1569 = vector.broadcast %1566 : vector<1x1xf32> to vector<1x128xf32>
    %1570 = arith.mulf %1568, %1569 : vector<1x128xf32>
    %cst_325 = arith.constant 1.000000e+00 : f32
    %1571 = vector.broadcast %cst_325 : f32 to vector<1x128xf32>
    %1572 = arith.addf %1571, %1570 : vector<1x128xf32>
    %1573 = vector.broadcast %10 : f32 to vector<1x128xf32>
    %1574 = arith.mulf %1573, %1572 : vector<1x128xf32>
    %1575 = vector.broadcast %1559 : f32 to vector<1x128xf32>
    %1576 = arith.mulf %1483, %1575 : vector<1x128xf32>
    %1577 = vector.broadcast %1547 : f32 to vector<1x128xf32>
    %1578 = arith.addf %1577, %1576 : vector<1x128xf32>
    %1579 = arith.minimumf %1578, %1574 : vector<1x128xf32>
    %cst_326 = arith.constant 0.000000e+00 : f32
    %1580 = vector.broadcast %cst_326 : f32 to vector<1x128xf32>
    %1581 = arith.maximumf %1579, %1580 : vector<1x128xf32>
    %cst_327 = arith.constant 0.000000e+00 : f32
    %1582 = vector.broadcast %cst_327 : f32 to vector<1x128xf32>
    %1583 = arith.select %3, %1581, %1582 : vector<1x128xi1>, vector<1x128xf32>
    %cst_328 = arith.constant dense<0.000000e+00> : vector<1xf32>
    %1584 = vector.multi_reduction <add>, %1583, %cst_328 [1] : vector<1x128xf32> to vector<1xf32>
    %1585 = vector.shape_cast %1584 : vector<1xf32> to vector<1x1xf32>
    %1586 = vector.broadcast %cst_12 : f32 to vector<1x1xf32>
    %1587 = arith.mulf %1585, %1586 : vector<1x1xf32>
    %1588 = vector.broadcast %1556 : f32 to vector<1x1xf32>
    %1589 = arith.mulf %1587, %1588 : vector<1x1xf32>
    %1590 = arith.addf %1440, %1589 : vector<1x1xf32>
    %1591 = vector.broadcast %13 : f32 to vector<1x1xf32>
    %1592 = arith.mulf %1589, %1591 : vector<1x1xf32>
    %1593 = arith.addf %1445, %1592 : vector<1x1xf32>
    %1594 = vector.broadcast %12 : f32 to vector<1x1xf32>
    %1595 = arith.minimumf %1593, %1594 : vector<1x1xf32>
    %1596 = vector.broadcast %1547 : f32 to vector<1x128xf32>
    %1597 = arith.subf %1596, %1583 : vector<1x128xf32>
    %cst_329 = arith.constant 0.000000e+00 : f32
    %1598 = vector.broadcast %cst_329 : f32 to vector<1x128xf32>
    %1599 = arith.maximumf %1597, %1598 : vector<1x128xf32>
    %cst_330 = arith.constant 0.000000e+00 : f32
    %1600 = vector.broadcast %cst_330 : f32 to vector<1x128xf32>
    %1601 = arith.select %3, %1483, %1600 : vector<1x128xi1>, vector<1x128xf32>
    %cst_331 = arith.constant dense<0.000000e+00> : vector<1xf32>
    %1602 = vector.multi_reduction <add>, %1601, %cst_331 [1] : vector<1x128xf32> to vector<1xf32>
    %1603 = vector.shape_cast %1602 : vector<1xf32> to vector<1x1xf32>
    %1604 = vector.broadcast %cst_12 : f32 to vector<1x1xf32>
    %1605 = arith.mulf %1603, %1604 : vector<1x1xf32>
    %1606 = vector.broadcast %cst_13 : f32 to vector<1x1xf32>
    %1607 = arith.mulf %1605, %1606 : vector<1x1xf32>
    %1608 = vector.broadcast %1607 : vector<1x1xf32> to vector<1x128xf32>
    %1609 = arith.addf %14, %1608 : vector<1x128xf32>
    %1610 = arith.mulf %1599, %1609 : vector<1x128xf32>
    %1611 = vector.broadcast %1553 : f32 to vector<1x128xf32>
    %1612 = arith.addf %1610, %1611 : vector<1x128xf32>
    %c1_i32_332 = arith.constant 1 : i32
    %1613 = tpu.dynamic_rotate %1501 by %c1_i32_332 dim 1 : vector<1x128xf32>, i32 -> vector<1x128xf32>
    %1614 = vector.broadcast %1550 : f32 to vector<1x128xf32>
    %1615 = arith.select %5, %1614, %1613 : vector<1x128xi1>, vector<1x128xf32>
    %1616 = arith.subf %1615, %1501 : vector<1x128xf32>
    %1617 = arith.mulf %1616, %15 : vector<1x128xf32>
    %1618 = arith.addf %1617, %1612 : vector<1x128xf32>
    %1619 = vector.broadcast %1556 : f32 to vector<1x128xf32>
    %1620 = arith.mulf %1619, %1618 : vector<1x128xf32>
    %1621 = arith.addf %1475, %1620 : vector<1x128xf32>
    %cst_333 = arith.constant 0.000000e+00 : f32
    %1622 = vector.broadcast %cst_333 : f32 to vector<1x128xf32>
    %1623 = arith.maximumf %1621, %1622 : vector<1x128xf32>
    %cst_334 = arith.constant 0.000000e+00 : f32
    %1624 = vector.broadcast %cst_334 : f32 to vector<1x128xf32>
    %1625 = arith.select %3, %1623, %1624 : vector<1x128xi1>, vector<1x128xf32>
    %1626 = arith.mulf %14, %14 : vector<1x128xf32>
    %1627 = vector.broadcast %cst_14 : f32 to vector<1x128xf32>
    %1628 = arith.mulf %1627, %1625 : vector<1x128xf32>
    %1629 = arith.addf %1626, %1628 : vector<1x128xf32>
    %1630 = math.sqrt %1629 : vector<1x128xf32>
    %1631 = arith.subf %1630, %14 : vector<1x128xf32>
    %1632 = vector.broadcast %cst_15 : f32 to vector<1x128xf32>
    %1633 = arith.mulf %1631, %1632 : vector<1x128xf32>
    %1634 = vector.broadcast %8 : f32 to vector<1x128xf32>
    %1635 = arith.mulf %1633, %1634 : vector<1x128xf32>
    %1636 = arith.addf %14, %1635 : vector<1x128xf32>
    %1637 = vector.broadcast %cst_11 : f32 to vector<1x128xf32>
    %1638 = arith.maximumf %1636, %1637 : vector<1x128xf32>
    %1639 = tpu.reciprocal %1638 {approx = true} : vector<1x128xf32> -> vector<1x128xf32>
    %1640 = arith.mulf %1625, %1639 : vector<1x128xf32>
    %1641 = vector.broadcast %cst_11 : f32 to vector<1x128xf32>
    %1642 = arith.maximumf %1640, %1641 : vector<1x128xf32>
    %1643 = math.log %1642 : vector<1x128xf32>
    %1644 = vector.broadcast %cst_16 : f32 to vector<1x128xf32>
    %1645 = arith.mulf %1644, %1643 : vector<1x128xf32>
    %1646 = math.exp %1645 : vector<1x128xf32>
    %1647 = arith.mulf %1625, %1646 : vector<1x128xf32>
    %1648 = vector.broadcast %9 : f32 to vector<1x128xf32>
    %1649 = arith.mulf %1647, %1648 : vector<1x128xf32>
    %cst_335 = arith.constant 0.000000e+00 : f32
    %1650 = vector.broadcast %cst_335 : f32 to vector<1x128xf32>
    %1651 = arith.select %3, %1649, %1650 : vector<1x128xi1>, vector<1x128xf32>
    %cst_336 = arith.constant 0.000000e+00 : f32
    %1652 = vector.broadcast %cst_336 : f32 to vector<1x128xf32>
    %1653 = arith.select %7, %1651, %1652 : vector<1x128xi1>, vector<1x128xf32>
    %cst_337 = arith.constant dense<0.000000e+00> : vector<1xf32>
    %1654 = vector.multi_reduction <add>, %1653, %cst_337 [1] : vector<1x128xf32> to vector<1xf32>
    %1655 = vector.shape_cast %1654 : vector<1xf32> to vector<1x1xf32>
    %1656 = vector.broadcast %cst_11 : f32 to vector<1x128xf32>
    %1657 = arith.maximumf %1625, %1656 : vector<1x128xf32>
    %1658 = tpu.reciprocal %1657 {approx = true} : vector<1x128xf32> -> vector<1x128xf32>
    %1659 = arith.mulf %1651, %1658 : vector<1x128xf32>
    %1660 = vector.broadcast %cst_11 : f32 to vector<1x128xf32>
    %1661 = arith.cmpf ogt, %1625, %1660 : vector<1x128xf32>
    %1662 = vector.broadcast %1556 : f32 to vector<1x128xf32>
    %1663 = arith.mulf %1659, %1662 : vector<1x128xf32>
    %1664 = arith.mulf %1663, %15 : vector<1x128xf32>
    %cst_338 = arith.constant 0.000000e+00 : f32
    %1665 = vector.broadcast %cst_338 : f32 to vector<1x128xf32>
    %1666 = arith.select %1661, %1664, %1665 : vector<1x128xi1>, vector<1x128xf32>
    %cst_339 = arith.constant 0.000000e+00 : f32
    %1667 = vector.broadcast %cst_339 : f32 to vector<1x128xf32>
    %1668 = arith.select %3, %1666, %1667 : vector<1x128xi1>, vector<1x128xf32>
    %cst_340 = arith.constant dense<0xFF800000> : vector<1xf32>
    %1669 = vector.multi_reduction <maximumf>, %1668, %cst_340 [1] : vector<1x128xf32> to vector<1xf32>
    %1670 = vector.shape_cast %1669 : vector<1xf32> to vector<1x1xf32>
    %1671 = arith.maximumf %1521, %1670 : vector<1x1xf32>
    %c0_i32_341 = arith.constant 0 : i32
    %1672 = vector.broadcast %c0_i32_341 : i32 to vector<1x128xi32>
    %1673 = arith.cmpi eq, %1, %1672 : vector<1x128xi32>
    %cst_342 = arith.constant 0.000000e+00 : f32
    %1674 = vector.shape_cast %1655 : vector<1x1xf32> to vector<1x1xf32>
    %1675 = vector.broadcast %1674 : vector<1x1xf32> to vector<1x128xf32>
    %1676 = vector.broadcast %cst_342 : f32 to vector<1x128xf32>
    %1677 = arith.select %1673, %1675, %1676 : vector<1x128xi1>, vector<1x128xf32>
    %c1_i32_343 = arith.constant 1 : i32
    %1678 = vector.broadcast %c1_i32_343 : i32 to vector<1x128xi32>
    %1679 = arith.cmpi eq, %1, %1678 : vector<1x128xi32>
    %cst_344 = arith.constant 0.000000e+00 : f32
    %1680 = vector.shape_cast %1587 : vector<1x1xf32> to vector<1x1xf32>
    %1681 = vector.broadcast %1680 : vector<1x1xf32> to vector<1x128xf32>
    %1682 = vector.broadcast %cst_344 : f32 to vector<1x128xf32>
    %1683 = arith.select %1679, %1681, %1682 : vector<1x128xi1>, vector<1x128xf32>
    %1684 = arith.addf %1677, %1683 : vector<1x128xf32>
    %c2_i32_345 = arith.constant 2 : i32
    %1685 = vector.broadcast %c2_i32_345 : i32 to vector<1x128xi32>
    %1686 = arith.cmpi eq, %1, %1685 : vector<1x128xi32>
    %cst_346 = arith.constant 0.000000e+00 : f32
    %1687 = vector.shape_cast %1589 : vector<1x1xf32> to vector<1x1xf32>
    %1688 = vector.broadcast %1687 : vector<1x1xf32> to vector<1x128xf32>
    %1689 = vector.broadcast %cst_346 : f32 to vector<1x128xf32>
    %1690 = arith.select %1686, %1688, %1689 : vector<1x128xi1>, vector<1x128xf32>
    %1691 = arith.addf %1684, %1690 : vector<1x128xf32>
    %1692 = arith.index_cast %c10_i32 : i32 to index
    %c0_347 = arith.constant 0 : index
    %1693 = vector.load %arg9[%1692, %c0_347] : memref<24x128xf32, #tpu.memory_space<vmem>>, vector<1x128xf32>
    tpu.vector_store %arg9[%1692, %c0_347], %1691 {strides = array<i32>} : memref<24x128xf32, #tpu.memory_space<vmem>>, vector<1x128xf32>,
    %c11_i32 = arith.constant 11 : i32
    %c6_i32_348 = arith.constant 6 : i32
    %1694 = arith.muli %c11_i32, %c6_i32_348 : i32
    %c0_i32_349 = arith.constant 0 : i32
    %1695 = arith.addi %1694, %c0_i32_349 : i32
    %1696 = arith.index_cast %1695 : i32 to index
    %1697 = memref.load %arg1[%1696] : memref<144xf32, #tpu.memory_space<smem>>
    %c1_i32_350 = arith.constant 1 : i32
    %1698 = arith.addi %1694, %c1_i32_350 : i32
    %1699 = arith.index_cast %1698 : i32 to index
    %1700 = memref.load %arg1[%1699] : memref<144xf32, #tpu.memory_space<smem>>
    %c2_i32_351 = arith.constant 2 : i32
    %1701 = arith.addi %1694, %c2_i32_351 : i32
    %1702 = arith.index_cast %1701 : i32 to index
    %1703 = memref.load %arg1[%1702] : memref<144xf32, #tpu.memory_space<smem>>
    %c3_i32_352 = arith.constant 3 : i32
    %1704 = arith.addi %1694, %c3_i32_352 : i32
    %1705 = arith.index_cast %1704 : i32 to index
    %1706 = memref.load %arg1[%1705] : memref<144xf32, #tpu.memory_space<smem>>
    %c4_i32_353 = arith.constant 4 : i32
    %1707 = arith.addi %1694, %c4_i32_353 : i32
    %1708 = arith.index_cast %1707 : i32 to index
    %1709 = memref.load %arg1[%1708] : memref<144xf32, #tpu.memory_space<smem>>
    %1710 = vector.broadcast %12 : f32 to vector<1x1xf32>
    %1711 = arith.subf %1710, %1595 : vector<1x1xf32>
    %cst_354 = arith.constant 0.000000e+00 : f32
    %1712 = vector.broadcast %cst_354 : f32 to vector<1x1xf32>
    %1713 = arith.maximumf %1711, %1712 : vector<1x1xf32>
    %1714 = vector.broadcast %cst_11 : f32 to vector<1x1xf32>
    %1715 = arith.maximumf %1590, %1714 : vector<1x1xf32>
    %1716 = arith.divf %1713, %1715 : vector<1x1xf32>
    %1717 = vector.broadcast %11 : f32 to vector<1x128xf32>
    %1718 = arith.addf %1717, %1633 : vector<1x128xf32>
    %1719 = vector.broadcast %1716 : vector<1x1xf32> to vector<1x128xf32>
    %1720 = arith.mulf %1718, %1719 : vector<1x128xf32>
    %cst_355 = arith.constant 1.000000e+00 : f32
    %1721 = vector.broadcast %cst_355 : f32 to vector<1x128xf32>
    %1722 = arith.addf %1721, %1720 : vector<1x128xf32>
    %1723 = vector.broadcast %10 : f32 to vector<1x128xf32>
    %1724 = arith.mulf %1723, %1722 : vector<1x128xf32>
    %1725 = vector.broadcast %1709 : f32 to vector<1x128xf32>
    %1726 = arith.mulf %1633, %1725 : vector<1x128xf32>
    %1727 = vector.broadcast %1697 : f32 to vector<1x128xf32>
    %1728 = arith.addf %1727, %1726 : vector<1x128xf32>
    %1729 = arith.minimumf %1728, %1724 : vector<1x128xf32>
    %cst_356 = arith.constant 0.000000e+00 : f32
    %1730 = vector.broadcast %cst_356 : f32 to vector<1x128xf32>
    %1731 = arith.maximumf %1729, %1730 : vector<1x128xf32>
    %cst_357 = arith.constant 0.000000e+00 : f32
    %1732 = vector.broadcast %cst_357 : f32 to vector<1x128xf32>
    %1733 = arith.select %3, %1731, %1732 : vector<1x128xi1>, vector<1x128xf32>
    %cst_358 = arith.constant dense<0.000000e+00> : vector<1xf32>
    %1734 = vector.multi_reduction <add>, %1733, %cst_358 [1] : vector<1x128xf32> to vector<1xf32>
    %1735 = vector.shape_cast %1734 : vector<1xf32> to vector<1x1xf32>
    %1736 = vector.broadcast %cst_12 : f32 to vector<1x1xf32>
    %1737 = arith.mulf %1735, %1736 : vector<1x1xf32>
    %1738 = vector.broadcast %1706 : f32 to vector<1x1xf32>
    %1739 = arith.mulf %1737, %1738 : vector<1x1xf32>
    %1740 = arith.addf %1590, %1739 : vector<1x1xf32>
    %1741 = vector.broadcast %13 : f32 to vector<1x1xf32>
    %1742 = arith.mulf %1739, %1741 : vector<1x1xf32>
    %1743 = arith.addf %1595, %1742 : vector<1x1xf32>
    %1744 = vector.broadcast %12 : f32 to vector<1x1xf32>
    %1745 = arith.minimumf %1743, %1744 : vector<1x1xf32>
    %1746 = vector.broadcast %1697 : f32 to vector<1x128xf32>
    %1747 = arith.subf %1746, %1733 : vector<1x128xf32>
    %cst_359 = arith.constant 0.000000e+00 : f32
    %1748 = vector.broadcast %cst_359 : f32 to vector<1x128xf32>
    %1749 = arith.maximumf %1747, %1748 : vector<1x128xf32>
    %cst_360 = arith.constant 0.000000e+00 : f32
    %1750 = vector.broadcast %cst_360 : f32 to vector<1x128xf32>
    %1751 = arith.select %3, %1633, %1750 : vector<1x128xi1>, vector<1x128xf32>
    %cst_361 = arith.constant dense<0.000000e+00> : vector<1xf32>
    %1752 = vector.multi_reduction <add>, %1751, %cst_361 [1] : vector<1x128xf32> to vector<1xf32>
    %1753 = vector.shape_cast %1752 : vector<1xf32> to vector<1x1xf32>
    %1754 = vector.broadcast %cst_12 : f32 to vector<1x1xf32>
    %1755 = arith.mulf %1753, %1754 : vector<1x1xf32>
    %1756 = vector.broadcast %cst_13 : f32 to vector<1x1xf32>
    %1757 = arith.mulf %1755, %1756 : vector<1x1xf32>
    %1758 = vector.broadcast %1757 : vector<1x1xf32> to vector<1x128xf32>
    %1759 = arith.addf %14, %1758 : vector<1x128xf32>
    %1760 = arith.mulf %1749, %1759 : vector<1x128xf32>
    %1761 = vector.broadcast %1703 : f32 to vector<1x128xf32>
    %1762 = arith.addf %1760, %1761 : vector<1x128xf32>
    %c1_i32_362 = arith.constant 1 : i32
    %1763 = tpu.dynamic_rotate %1651 by %c1_i32_362 dim 1 : vector<1x128xf32>, i32 -> vector<1x128xf32>
    %1764 = vector.broadcast %1700 : f32 to vector<1x128xf32>
    %1765 = arith.select %5, %1764, %1763 : vector<1x128xi1>, vector<1x128xf32>
    %1766 = arith.subf %1765, %1651 : vector<1x128xf32>
    %1767 = arith.mulf %1766, %15 : vector<1x128xf32>
    %1768 = arith.addf %1767, %1762 : vector<1x128xf32>
    %1769 = vector.broadcast %1706 : f32 to vector<1x128xf32>
    %1770 = arith.mulf %1769, %1768 : vector<1x128xf32>
    %1771 = arith.addf %1625, %1770 : vector<1x128xf32>
    %cst_363 = arith.constant 0.000000e+00 : f32
    %1772 = vector.broadcast %cst_363 : f32 to vector<1x128xf32>
    %1773 = arith.maximumf %1771, %1772 : vector<1x128xf32>
    %cst_364 = arith.constant 0.000000e+00 : f32
    %1774 = vector.broadcast %cst_364 : f32 to vector<1x128xf32>
    %1775 = arith.select %3, %1773, %1774 : vector<1x128xi1>, vector<1x128xf32>
    %1776 = arith.mulf %14, %14 : vector<1x128xf32>
    %1777 = vector.broadcast %cst_14 : f32 to vector<1x128xf32>
    %1778 = arith.mulf %1777, %1775 : vector<1x128xf32>
    %1779 = arith.addf %1776, %1778 : vector<1x128xf32>
    %1780 = math.sqrt %1779 : vector<1x128xf32>
    %1781 = arith.subf %1780, %14 : vector<1x128xf32>
    %1782 = vector.broadcast %cst_15 : f32 to vector<1x128xf32>
    %1783 = arith.mulf %1781, %1782 : vector<1x128xf32>
    %1784 = vector.broadcast %8 : f32 to vector<1x128xf32>
    %1785 = arith.mulf %1783, %1784 : vector<1x128xf32>
    %1786 = arith.addf %14, %1785 : vector<1x128xf32>
    %1787 = vector.broadcast %cst_11 : f32 to vector<1x128xf32>
    %1788 = arith.maximumf %1786, %1787 : vector<1x128xf32>
    %1789 = tpu.reciprocal %1788 {approx = true} : vector<1x128xf32> -> vector<1x128xf32>
    %1790 = arith.mulf %1775, %1789 : vector<1x128xf32>
    %1791 = vector.broadcast %cst_11 : f32 to vector<1x128xf32>
    %1792 = arith.maximumf %1790, %1791 : vector<1x128xf32>
    %1793 = math.log %1792 : vector<1x128xf32>
    %1794 = vector.broadcast %cst_16 : f32 to vector<1x128xf32>
    %1795 = arith.mulf %1794, %1793 : vector<1x128xf32>
    %1796 = math.exp %1795 : vector<1x128xf32>
    %1797 = arith.mulf %1775, %1796 : vector<1x128xf32>
    %1798 = vector.broadcast %9 : f32 to vector<1x128xf32>
    %1799 = arith.mulf %1797, %1798 : vector<1x128xf32>
    %cst_365 = arith.constant 0.000000e+00 : f32
    %1800 = vector.broadcast %cst_365 : f32 to vector<1x128xf32>
    %1801 = arith.select %3, %1799, %1800 : vector<1x128xi1>, vector<1x128xf32>
    %cst_366 = arith.constant 0.000000e+00 : f32
    %1802 = vector.broadcast %cst_366 : f32 to vector<1x128xf32>
    %1803 = arith.select %7, %1801, %1802 : vector<1x128xi1>, vector<1x128xf32>
    %cst_367 = arith.constant dense<0.000000e+00> : vector<1xf32>
    %1804 = vector.multi_reduction <add>, %1803, %cst_367 [1] : vector<1x128xf32> to vector<1xf32>
    %1805 = vector.shape_cast %1804 : vector<1xf32> to vector<1x1xf32>
    %1806 = vector.broadcast %cst_11 : f32 to vector<1x128xf32>
    %1807 = arith.maximumf %1775, %1806 : vector<1x128xf32>
    %1808 = tpu.reciprocal %1807 {approx = true} : vector<1x128xf32> -> vector<1x128xf32>
    %1809 = arith.mulf %1801, %1808 : vector<1x128xf32>
    %1810 = vector.broadcast %cst_11 : f32 to vector<1x128xf32>
    %1811 = arith.cmpf ogt, %1775, %1810 : vector<1x128xf32>
    %1812 = vector.broadcast %1706 : f32 to vector<1x128xf32>
    %1813 = arith.mulf %1809, %1812 : vector<1x128xf32>
    %1814 = arith.mulf %1813, %15 : vector<1x128xf32>
    %cst_368 = arith.constant 0.000000e+00 : f32
    %1815 = vector.broadcast %cst_368 : f32 to vector<1x128xf32>
    %1816 = arith.select %1811, %1814, %1815 : vector<1x128xi1>, vector<1x128xf32>
    %cst_369 = arith.constant 0.000000e+00 : f32
    %1817 = vector.broadcast %cst_369 : f32 to vector<1x128xf32>
    %1818 = arith.select %3, %1816, %1817 : vector<1x128xi1>, vector<1x128xf32>
    %cst_370 = arith.constant dense<0xFF800000> : vector<1xf32>
    %1819 = vector.multi_reduction <maximumf>, %1818, %cst_370 [1] : vector<1x128xf32> to vector<1xf32>
    %1820 = vector.shape_cast %1819 : vector<1xf32> to vector<1x1xf32>
    %1821 = arith.maximumf %1671, %1820 : vector<1x1xf32>
    %c0_i32_371 = arith.constant 0 : i32
    %1822 = vector.broadcast %c0_i32_371 : i32 to vector<1x128xi32>
    %1823 = arith.cmpi eq, %1, %1822 : vector<1x128xi32>
    %cst_372 = arith.constant 0.000000e+00 : f32
    %1824 = vector.shape_cast %1805 : vector<1x1xf32> to vector<1x1xf32>
    %1825 = vector.broadcast %1824 : vector<1x1xf32> to vector<1x128xf32>
    %1826 = vector.broadcast %cst_372 : f32 to vector<1x128xf32>
    %1827 = arith.select %1823, %1825, %1826 : vector<1x128xi1>, vector<1x128xf32>
    %c1_i32_373 = arith.constant 1 : i32
    %1828 = vector.broadcast %c1_i32_373 : i32 to vector<1x128xi32>
    %1829 = arith.cmpi eq, %1, %1828 : vector<1x128xi32>
    %cst_374 = arith.constant 0.000000e+00 : f32
    %1830 = vector.shape_cast %1737 : vector<1x1xf32> to vector<1x1xf32>
    %1831 = vector.broadcast %1830 : vector<1x1xf32> to vector<1x128xf32>
    %1832 = vector.broadcast %cst_374 : f32 to vector<1x128xf32>
    %1833 = arith.select %1829, %1831, %1832 : vector<1x128xi1>, vector<1x128xf32>
    %1834 = arith.addf %1827, %1833 : vector<1x128xf32>
    %c2_i32_375 = arith.constant 2 : i32
    %1835 = vector.broadcast %c2_i32_375 : i32 to vector<1x128xi32>
    %1836 = arith.cmpi eq, %1, %1835 : vector<1x128xi32>
    %cst_376 = arith.constant 0.000000e+00 : f32
    %1837 = vector.shape_cast %1739 : vector<1x1xf32> to vector<1x1xf32>
    %1838 = vector.broadcast %1837 : vector<1x1xf32> to vector<1x128xf32>
    %1839 = vector.broadcast %cst_376 : f32 to vector<1x128xf32>
    %1840 = arith.select %1836, %1838, %1839 : vector<1x128xi1>, vector<1x128xf32>
    %1841 = arith.addf %1834, %1840 : vector<1x128xf32>
    %1842 = arith.index_cast %c11_i32 : i32 to index
    %c0_377 = arith.constant 0 : index
    %1843 = vector.load %arg9[%1842, %c0_377] : memref<24x128xf32, #tpu.memory_space<vmem>>, vector<1x128xf32>
    tpu.vector_store %arg9[%1842, %c0_377], %1841 {strides = array<i32>} : memref<24x128xf32, #tpu.memory_space<vmem>>, vector<1x128xf32>,
    %c12_i32 = arith.constant 12 : i32
    %c6_i32_378 = arith.constant 6 : i32
    %1844 = arith.muli %c12_i32, %c6_i32_378 : i32
    %c0_i32_379 = arith.constant 0 : i32
    %1845 = arith.addi %1844, %c0_i32_379 : i32
    %1846 = arith.index_cast %1845 : i32 to index
    %1847 = memref.load %arg1[%1846] : memref<144xf32, #tpu.memory_space<smem>>
    %c1_i32_380 = arith.constant 1 : i32
    %1848 = arith.addi %1844, %c1_i32_380 : i32
    %1849 = arith.index_cast %1848 : i32 to index
    %1850 = memref.load %arg1[%1849] : memref<144xf32, #tpu.memory_space<smem>>
    %c2_i32_381 = arith.constant 2 : i32
    %1851 = arith.addi %1844, %c2_i32_381 : i32
    %1852 = arith.index_cast %1851 : i32 to index
    %1853 = memref.load %arg1[%1852] : memref<144xf32, #tpu.memory_space<smem>>
    %c3_i32_382 = arith.constant 3 : i32
    %1854 = arith.addi %1844, %c3_i32_382 : i32
    %1855 = arith.index_cast %1854 : i32 to index
    %1856 = memref.load %arg1[%1855] : memref<144xf32, #tpu.memory_space<smem>>
    %c4_i32_383 = arith.constant 4 : i32
    %1857 = arith.addi %1844, %c4_i32_383 : i32
    %1858 = arith.index_cast %1857 : i32 to index
    %1859 = memref.load %arg1[%1858] : memref<144xf32, #tpu.memory_space<smem>>
    %1860 = vector.broadcast %12 : f32 to vector<1x1xf32>
    %1861 = arith.subf %1860, %1745 : vector<1x1xf32>
    %cst_384 = arith.constant 0.000000e+00 : f32
    %1862 = vector.broadcast %cst_384 : f32 to vector<1x1xf32>
    %1863 = arith.maximumf %1861, %1862 : vector<1x1xf32>
    %1864 = vector.broadcast %cst_11 : f32 to vector<1x1xf32>
    %1865 = arith.maximumf %1740, %1864 : vector<1x1xf32>
    %1866 = arith.divf %1863, %1865 : vector<1x1xf32>
    %1867 = vector.broadcast %11 : f32 to vector<1x128xf32>
    %1868 = arith.addf %1867, %1783 : vector<1x128xf32>
    %1869 = vector.broadcast %1866 : vector<1x1xf32> to vector<1x128xf32>
    %1870 = arith.mulf %1868, %1869 : vector<1x128xf32>
    %cst_385 = arith.constant 1.000000e+00 : f32
    %1871 = vector.broadcast %cst_385 : f32 to vector<1x128xf32>
    %1872 = arith.addf %1871, %1870 : vector<1x128xf32>
    %1873 = vector.broadcast %10 : f32 to vector<1x128xf32>
    %1874 = arith.mulf %1873, %1872 : vector<1x128xf32>
    %1875 = vector.broadcast %1859 : f32 to vector<1x128xf32>
    %1876 = arith.mulf %1783, %1875 : vector<1x128xf32>
    %1877 = vector.broadcast %1847 : f32 to vector<1x128xf32>
    %1878 = arith.addf %1877, %1876 : vector<1x128xf32>
    %1879 = arith.minimumf %1878, %1874 : vector<1x128xf32>
    %cst_386 = arith.constant 0.000000e+00 : f32
    %1880 = vector.broadcast %cst_386 : f32 to vector<1x128xf32>
    %1881 = arith.maximumf %1879, %1880 : vector<1x128xf32>
    %cst_387 = arith.constant 0.000000e+00 : f32
    %1882 = vector.broadcast %cst_387 : f32 to vector<1x128xf32>
    %1883 = arith.select %3, %1881, %1882 : vector<1x128xi1>, vector<1x128xf32>
    %cst_388 = arith.constant dense<0.000000e+00> : vector<1xf32>
    %1884 = vector.multi_reduction <add>, %1883, %cst_388 [1] : vector<1x128xf32> to vector<1xf32>
    %1885 = vector.shape_cast %1884 : vector<1xf32> to vector<1x1xf32>
    %1886 = vector.broadcast %cst_12 : f32 to vector<1x1xf32>
    %1887 = arith.mulf %1885, %1886 : vector<1x1xf32>
    %1888 = vector.broadcast %1856 : f32 to vector<1x1xf32>
    %1889 = arith.mulf %1887, %1888 : vector<1x1xf32>
    %1890 = arith.addf %1740, %1889 : vector<1x1xf32>
    %1891 = vector.broadcast %13 : f32 to vector<1x1xf32>
    %1892 = arith.mulf %1889, %1891 : vector<1x1xf32>
    %1893 = arith.addf %1745, %1892 : vector<1x1xf32>
    %1894 = vector.broadcast %12 : f32 to vector<1x1xf32>
    %1895 = arith.minimumf %1893, %1894 : vector<1x1xf32>
    %1896 = vector.broadcast %1847 : f32 to vector<1x128xf32>
    %1897 = arith.subf %1896, %1883 : vector<1x128xf32>
    %cst_389 = arith.constant 0.000000e+00 : f32
    %1898 = vector.broadcast %cst_389 : f32 to vector<1x128xf32>
    %1899 = arith.maximumf %1897, %1898 : vector<1x128xf32>
    %cst_390 = arith.constant 0.000000e+00 : f32
    %1900 = vector.broadcast %cst_390 : f32 to vector<1x128xf32>
    %1901 = arith.select %3, %1783, %1900 : vector<1x128xi1>, vector<1x128xf32>
    %cst_391 = arith.constant dense<0.000000e+00> : vector<1xf32>
    %1902 = vector.multi_reduction <add>, %1901, %cst_391 [1] : vector<1x128xf32> to vector<1xf32>
    %1903 = vector.shape_cast %1902 : vector<1xf32> to vector<1x1xf32>
    %1904 = vector.broadcast %cst_12 : f32 to vector<1x1xf32>
    %1905 = arith.mulf %1903, %1904 : vector<1x1xf32>
    %1906 = vector.broadcast %cst_13 : f32 to vector<1x1xf32>
    %1907 = arith.mulf %1905, %1906 : vector<1x1xf32>
    %1908 = vector.broadcast %1907 : vector<1x1xf32> to vector<1x128xf32>
    %1909 = arith.addf %14, %1908 : vector<1x128xf32>
    %1910 = arith.mulf %1899, %1909 : vector<1x128xf32>
    %1911 = vector.broadcast %1853 : f32 to vector<1x128xf32>
    %1912 = arith.addf %1910, %1911 : vector<1x128xf32>
    %c1_i32_392 = arith.constant 1 : i32
    %1913 = tpu.dynamic_rotate %1801 by %c1_i32_392 dim 1 : vector<1x128xf32>, i32 -> vector<1x128xf32>
    %1914 = vector.broadcast %1850 : f32 to vector<1x128xf32>
    %1915 = arith.select %5, %1914, %1913 : vector<1x128xi1>, vector<1x128xf32>
    %1916 = arith.subf %1915, %1801 : vector<1x128xf32>
    %1917 = arith.mulf %1916, %15 : vector<1x128xf32>
    %1918 = arith.addf %1917, %1912 : vector<1x128xf32>
    %1919 = vector.broadcast %1856 : f32 to vector<1x128xf32>
    %1920 = arith.mulf %1919, %1918 : vector<1x128xf32>
    %1921 = arith.addf %1775, %1920 : vector<1x128xf32>
    %cst_393 = arith.constant 0.000000e+00 : f32
    %1922 = vector.broadcast %cst_393 : f32 to vector<1x128xf32>
    %1923 = arith.maximumf %1921, %1922 : vector<1x128xf32>
    %cst_394 = arith.constant 0.000000e+00 : f32
    %1924 = vector.broadcast %cst_394 : f32 to vector<1x128xf32>
    %1925 = arith.select %3, %1923, %1924 : vector<1x128xi1>, vector<1x128xf32>
    %1926 = arith.mulf %14, %14 : vector<1x128xf32>
    %1927 = vector.broadcast %cst_14 : f32 to vector<1x128xf32>
    %1928 = arith.mulf %1927, %1925 : vector<1x128xf32>
    %1929 = arith.addf %1926, %1928 : vector<1x128xf32>
    %1930 = math.sqrt %1929 : vector<1x128xf32>
    %1931 = arith.subf %1930, %14 : vector<1x128xf32>
    %1932 = vector.broadcast %cst_15 : f32 to vector<1x128xf32>
    %1933 = arith.mulf %1931, %1932 : vector<1x128xf32>
    %1934 = vector.broadcast %8 : f32 to vector<1x128xf32>
    %1935 = arith.mulf %1933, %1934 : vector<1x128xf32>
    %1936 = arith.addf %14, %1935 : vector<1x128xf32>
    %1937 = vector.broadcast %cst_11 : f32 to vector<1x128xf32>
    %1938 = arith.maximumf %1936, %1937 : vector<1x128xf32>
    %1939 = tpu.reciprocal %1938 {approx = true} : vector<1x128xf32> -> vector<1x128xf32>
    %1940 = arith.mulf %1925, %1939 : vector<1x128xf32>
    %1941 = vector.broadcast %cst_11 : f32 to vector<1x128xf32>
    %1942 = arith.maximumf %1940, %1941 : vector<1x128xf32>
    %1943 = math.log %1942 : vector<1x128xf32>
    %1944 = vector.broadcast %cst_16 : f32 to vector<1x128xf32>
    %1945 = arith.mulf %1944, %1943 : vector<1x128xf32>
    %1946 = math.exp %1945 : vector<1x128xf32>
    %1947 = arith.mulf %1925, %1946 : vector<1x128xf32>
    %1948 = vector.broadcast %9 : f32 to vector<1x128xf32>
    %1949 = arith.mulf %1947, %1948 : vector<1x128xf32>
    %cst_395 = arith.constant 0.000000e+00 : f32
    %1950 = vector.broadcast %cst_395 : f32 to vector<1x128xf32>
    %1951 = arith.select %3, %1949, %1950 : vector<1x128xi1>, vector<1x128xf32>
    %cst_396 = arith.constant 0.000000e+00 : f32
    %1952 = vector.broadcast %cst_396 : f32 to vector<1x128xf32>
    %1953 = arith.select %7, %1951, %1952 : vector<1x128xi1>, vector<1x128xf32>
    %cst_397 = arith.constant dense<0.000000e+00> : vector<1xf32>
    %1954 = vector.multi_reduction <add>, %1953, %cst_397 [1] : vector<1x128xf32> to vector<1xf32>
    %1955 = vector.shape_cast %1954 : vector<1xf32> to vector<1x1xf32>
    %1956 = vector.broadcast %cst_11 : f32 to vector<1x128xf32>
    %1957 = arith.maximumf %1925, %1956 : vector<1x128xf32>
    %1958 = tpu.reciprocal %1957 {approx = true} : vector<1x128xf32> -> vector<1x128xf32>
    %1959 = arith.mulf %1951, %1958 : vector<1x128xf32>
    %1960 = vector.broadcast %cst_11 : f32 to vector<1x128xf32>
    %1961 = arith.cmpf ogt, %1925, %1960 : vector<1x128xf32>
    %1962 = vector.broadcast %1856 : f32 to vector<1x128xf32>
    %1963 = arith.mulf %1959, %1962 : vector<1x128xf32>
    %1964 = arith.mulf %1963, %15 : vector<1x128xf32>
    %cst_398 = arith.constant 0.000000e+00 : f32
    %1965 = vector.broadcast %cst_398 : f32 to vector<1x128xf32>
    %1966 = arith.select %1961, %1964, %1965 : vector<1x128xi1>, vector<1x128xf32>
    %cst_399 = arith.constant 0.000000e+00 : f32
    %1967 = vector.broadcast %cst_399 : f32 to vector<1x128xf32>
    %1968 = arith.select %3, %1966, %1967 : vector<1x128xi1>, vector<1x128xf32>
    %cst_400 = arith.constant dense<0xFF800000> : vector<1xf32>
    %1969 = vector.multi_reduction <maximumf>, %1968, %cst_400 [1] : vector<1x128xf32> to vector<1xf32>
    %1970 = vector.shape_cast %1969 : vector<1xf32> to vector<1x1xf32>
    %1971 = arith.maximumf %1821, %1970 : vector<1x1xf32>
    %c0_i32_401 = arith.constant 0 : i32
    %1972 = vector.broadcast %c0_i32_401 : i32 to vector<1x128xi32>
    %1973 = arith.cmpi eq, %1, %1972 : vector<1x128xi32>
    %cst_402 = arith.constant 0.000000e+00 : f32
    %1974 = vector.shape_cast %1955 : vector<1x1xf32> to vector<1x1xf32>
    %1975 = vector.broadcast %1974 : vector<1x1xf32> to vector<1x128xf32>
    %1976 = vector.broadcast %cst_402 : f32 to vector<1x128xf32>
    %1977 = arith.select %1973, %1975, %1976 : vector<1x128xi1>, vector<1x128xf32>
    %c1_i32_403 = arith.constant 1 : i32
    %1978 = vector.broadcast %c1_i32_403 : i32 to vector<1x128xi32>
    %1979 = arith.cmpi eq, %1, %1978 : vector<1x128xi32>
    %cst_404 = arith.constant 0.000000e+00 : f32
    %1980 = vector.shape_cast %1887 : vector<1x1xf32> to vector<1x1xf32>
    %1981 = vector.broadcast %1980 : vector<1x1xf32> to vector<1x128xf32>
    %1982 = vector.broadcast %cst_404 : f32 to vector<1x128xf32>
    %1983 = arith.select %1979, %1981, %1982 : vector<1x128xi1>, vector<1x128xf32>
    %1984 = arith.addf %1977, %1983 : vector<1x128xf32>
    %c2_i32_405 = arith.constant 2 : i32
    %1985 = vector.broadcast %c2_i32_405 : i32 to vector<1x128xi32>
    %1986 = arith.cmpi eq, %1, %1985 : vector<1x128xi32>
    %cst_406 = arith.constant 0.000000e+00 : f32
    %1987 = vector.shape_cast %1889 : vector<1x1xf32> to vector<1x1xf32>
    %1988 = vector.broadcast %1987 : vector<1x1xf32> to vector<1x128xf32>
    %1989 = vector.broadcast %cst_406 : f32 to vector<1x128xf32>
    %1990 = arith.select %1986, %1988, %1989 : vector<1x128xi1>, vector<1x128xf32>
    %1991 = arith.addf %1984, %1990 : vector<1x128xf32>
    %1992 = arith.index_cast %c12_i32 : i32 to index
    %c0_407 = arith.constant 0 : index
    %1993 = vector.load %arg9[%1992, %c0_407] : memref<24x128xf32, #tpu.memory_space<vmem>>, vector<1x128xf32>
    tpu.vector_store %arg9[%1992, %c0_407], %1991 {strides = array<i32>} : memref<24x128xf32, #tpu.memory_space<vmem>>, vector<1x128xf32>,
    %c13_i32 = arith.constant 13 : i32
    %c6_i32_408 = arith.constant 6 : i32
    %1994 = arith.muli %c13_i32, %c6_i32_408 : i32
    %c0_i32_409 = arith.constant 0 : i32
    %1995 = arith.addi %1994, %c0_i32_409 : i32
    %1996 = arith.index_cast %1995 : i32 to index
    %1997 = memref.load %arg1[%1996] : memref<144xf32, #tpu.memory_space<smem>>
    %c1_i32_410 = arith.constant 1 : i32
    %1998 = arith.addi %1994, %c1_i32_410 : i32
    %1999 = arith.index_cast %1998 : i32 to index
    %2000 = memref.load %arg1[%1999] : memref<144xf32, #tpu.memory_space<smem>>
    %c2_i32_411 = arith.constant 2 : i32
    %2001 = arith.addi %1994, %c2_i32_411 : i32
    %2002 = arith.index_cast %2001 : i32 to index
    %2003 = memref.load %arg1[%2002] : memref<144xf32, #tpu.memory_space<smem>>
    %c3_i32_412 = arith.constant 3 : i32
    %2004 = arith.addi %1994, %c3_i32_412 : i32
    %2005 = arith.index_cast %2004 : i32 to index
    %2006 = memref.load %arg1[%2005] : memref<144xf32, #tpu.memory_space<smem>>
    %c4_i32_413 = arith.constant 4 : i32
    %2007 = arith.addi %1994, %c4_i32_413 : i32
    %2008 = arith.index_cast %2007 : i32 to index
    %2009 = memref.load %arg1[%2008] : memref<144xf32, #tpu.memory_space<smem>>
    %2010 = vector.broadcast %12 : f32 to vector<1x1xf32>
    %2011 = arith.subf %2010, %1895 : vector<1x1xf32>
    %cst_414 = arith.constant 0.000000e+00 : f32
    %2012 = vector.broadcast %cst_414 : f32 to vector<1x1xf32>
    %2013 = arith.maximumf %2011, %2012 : vector<1x1xf32>
    %2014 = vector.broadcast %cst_11 : f32 to vector<1x1xf32>
    %2015 = arith.maximumf %1890, %2014 : vector<1x1xf32>
    %2016 = arith.divf %2013, %2015 : vector<1x1xf32>
    %2017 = vector.broadcast %11 : f32 to vector<1x128xf32>
    %2018 = arith.addf %2017, %1933 : vector<1x128xf32>
    %2019 = vector.broadcast %2016 : vector<1x1xf32> to vector<1x128xf32>
    %2020 = arith.mulf %2018, %2019 : vector<1x128xf32>
    %cst_415 = arith.constant 1.000000e+00 : f32
    %2021 = vector.broadcast %cst_415 : f32 to vector<1x128xf32>
    %2022 = arith.addf %2021, %2020 : vector<1x128xf32>
    %2023 = vector.broadcast %10 : f32 to vector<1x128xf32>
    %2024 = arith.mulf %2023, %2022 : vector<1x128xf32>
    %2025 = vector.broadcast %2009 : f32 to vector<1x128xf32>
    %2026 = arith.mulf %1933, %2025 : vector<1x128xf32>
    %2027 = vector.broadcast %1997 : f32 to vector<1x128xf32>
    %2028 = arith.addf %2027, %2026 : vector<1x128xf32>
    %2029 = arith.minimumf %2028, %2024 : vector<1x128xf32>
    %cst_416 = arith.constant 0.000000e+00 : f32
    %2030 = vector.broadcast %cst_416 : f32 to vector<1x128xf32>
    %2031 = arith.maximumf %2029, %2030 : vector<1x128xf32>
    %cst_417 = arith.constant 0.000000e+00 : f32
    %2032 = vector.broadcast %cst_417 : f32 to vector<1x128xf32>
    %2033 = arith.select %3, %2031, %2032 : vector<1x128xi1>, vector<1x128xf32>
    %cst_418 = arith.constant dense<0.000000e+00> : vector<1xf32>
    %2034 = vector.multi_reduction <add>, %2033, %cst_418 [1] : vector<1x128xf32> to vector<1xf32>
    %2035 = vector.shape_cast %2034 : vector<1xf32> to vector<1x1xf32>
    %2036 = vector.broadcast %cst_12 : f32 to vector<1x1xf32>
    %2037 = arith.mulf %2035, %2036 : vector<1x1xf32>
    %2038 = vector.broadcast %2006 : f32 to vector<1x1xf32>
    %2039 = arith.mulf %2037, %2038 : vector<1x1xf32>
    %2040 = arith.addf %1890, %2039 : vector<1x1xf32>
    %2041 = vector.broadcast %13 : f32 to vector<1x1xf32>
    %2042 = arith.mulf %2039, %2041 : vector<1x1xf32>
    %2043 = arith.addf %1895, %2042 : vector<1x1xf32>
    %2044 = vector.broadcast %12 : f32 to vector<1x1xf32>
    %2045 = arith.minimumf %2043, %2044 : vector<1x1xf32>
    %2046 = vector.broadcast %1997 : f32 to vector<1x128xf32>
    %2047 = arith.subf %2046, %2033 : vector<1x128xf32>
    %cst_419 = arith.constant 0.000000e+00 : f32
    %2048 = vector.broadcast %cst_419 : f32 to vector<1x128xf32>
    %2049 = arith.maximumf %2047, %2048 : vector<1x128xf32>
    %cst_420 = arith.constant 0.000000e+00 : f32
    %2050 = vector.broadcast %cst_420 : f32 to vector<1x128xf32>
    %2051 = arith.select %3, %1933, %2050 : vector<1x128xi1>, vector<1x128xf32>
    %cst_421 = arith.constant dense<0.000000e+00> : vector<1xf32>
    %2052 = vector.multi_reduction <add>, %2051, %cst_421 [1] : vector<1x128xf32> to vector<1xf32>
    %2053 = vector.shape_cast %2052 : vector<1xf32> to vector<1x1xf32>
    %2054 = vector.broadcast %cst_12 : f32 to vector<1x1xf32>
    %2055 = arith.mulf %2053, %2054 : vector<1x1xf32>
    %2056 = vector.broadcast %cst_13 : f32 to vector<1x1xf32>
    %2057 = arith.mulf %2055, %2056 : vector<1x1xf32>
    %2058 = vector.broadcast %2057 : vector<1x1xf32> to vector<1x128xf32>
    %2059 = arith.addf %14, %2058 : vector<1x128xf32>
    %2060 = arith.mulf %2049, %2059 : vector<1x128xf32>
    %2061 = vector.broadcast %2003 : f32 to vector<1x128xf32>
    %2062 = arith.addf %2060, %2061 : vector<1x128xf32>
    %c1_i32_422 = arith.constant 1 : i32
    %2063 = tpu.dynamic_rotate %1951 by %c1_i32_422 dim 1 : vector<1x128xf32>, i32 -> vector<1x128xf32>
    %2064 = vector.broadcast %2000 : f32 to vector<1x128xf32>
    %2065 = arith.select %5, %2064, %2063 : vector<1x128xi1>, vector<1x128xf32>
    %2066 = arith.subf %2065, %1951 : vector<1x128xf32>
    %2067 = arith.mulf %2066, %15 : vector<1x128xf32>
    %2068 = arith.addf %2067, %2062 : vector<1x128xf32>
    %2069 = vector.broadcast %2006 : f32 to vector<1x128xf32>
    %2070 = arith.mulf %2069, %2068 : vector<1x128xf32>
    %2071 = arith.addf %1925, %2070 : vector<1x128xf32>
    %cst_423 = arith.constant 0.000000e+00 : f32
    %2072 = vector.broadcast %cst_423 : f32 to vector<1x128xf32>
    %2073 = arith.maximumf %2071, %2072 : vector<1x128xf32>
    %cst_424 = arith.constant 0.000000e+00 : f32
    %2074 = vector.broadcast %cst_424 : f32 to vector<1x128xf32>
    %2075 = arith.select %3, %2073, %2074 : vector<1x128xi1>, vector<1x128xf32>
    %2076 = arith.mulf %14, %14 : vector<1x128xf32>
    %2077 = vector.broadcast %cst_14 : f32 to vector<1x128xf32>
    %2078 = arith.mulf %2077, %2075 : vector<1x128xf32>
    %2079 = arith.addf %2076, %2078 : vector<1x128xf32>
    %2080 = math.sqrt %2079 : vector<1x128xf32>
    %2081 = arith.subf %2080, %14 : vector<1x128xf32>
    %2082 = vector.broadcast %cst_15 : f32 to vector<1x128xf32>
    %2083 = arith.mulf %2081, %2082 : vector<1x128xf32>
    %2084 = vector.broadcast %8 : f32 to vector<1x128xf32>
    %2085 = arith.mulf %2083, %2084 : vector<1x128xf32>
    %2086 = arith.addf %14, %2085 : vector<1x128xf32>
    %2087 = vector.broadcast %cst_11 : f32 to vector<1x128xf32>
    %2088 = arith.maximumf %2086, %2087 : vector<1x128xf32>
    %2089 = tpu.reciprocal %2088 {approx = true} : vector<1x128xf32> -> vector<1x128xf32>
    %2090 = arith.mulf %2075, %2089 : vector<1x128xf32>
    %2091 = vector.broadcast %cst_11 : f32 to vector<1x128xf32>
    %2092 = arith.maximumf %2090, %2091 : vector<1x128xf32>
    %2093 = math.log %2092 : vector<1x128xf32>
    %2094 = vector.broadcast %cst_16 : f32 to vector<1x128xf32>
    %2095 = arith.mulf %2094, %2093 : vector<1x128xf32>
    %2096 = math.exp %2095 : vector<1x128xf32>
    %2097 = arith.mulf %2075, %2096 : vector<1x128xf32>
    %2098 = vector.broadcast %9 : f32 to vector<1x128xf32>
    %2099 = arith.mulf %2097, %2098 : vector<1x128xf32>
    %cst_425 = arith.constant 0.000000e+00 : f32
    %2100 = vector.broadcast %cst_425 : f32 to vector<1x128xf32>
    %2101 = arith.select %3, %2099, %2100 : vector<1x128xi1>, vector<1x128xf32>
    %cst_426 = arith.constant 0.000000e+00 : f32
    %2102 = vector.broadcast %cst_426 : f32 to vector<1x128xf32>
    %2103 = arith.select %7, %2101, %2102 : vector<1x128xi1>, vector<1x128xf32>
    %cst_427 = arith.constant dense<0.000000e+00> : vector<1xf32>
    %2104 = vector.multi_reduction <add>, %2103, %cst_427 [1] : vector<1x128xf32> to vector<1xf32>
    %2105 = vector.shape_cast %2104 : vector<1xf32> to vector<1x1xf32>
    %2106 = vector.broadcast %cst_11 : f32 to vector<1x128xf32>
    %2107 = arith.maximumf %2075, %2106 : vector<1x128xf32>
    %2108 = tpu.reciprocal %2107 {approx = true} : vector<1x128xf32> -> vector<1x128xf32>
    %2109 = arith.mulf %2101, %2108 : vector<1x128xf32>
    %2110 = vector.broadcast %cst_11 : f32 to vector<1x128xf32>
    %2111 = arith.cmpf ogt, %2075, %2110 : vector<1x128xf32>
    %2112 = vector.broadcast %2006 : f32 to vector<1x128xf32>
    %2113 = arith.mulf %2109, %2112 : vector<1x128xf32>
    %2114 = arith.mulf %2113, %15 : vector<1x128xf32>
    %cst_428 = arith.constant 0.000000e+00 : f32
    %2115 = vector.broadcast %cst_428 : f32 to vector<1x128xf32>
    %2116 = arith.select %2111, %2114, %2115 : vector<1x128xi1>, vector<1x128xf32>
    %cst_429 = arith.constant 0.000000e+00 : f32
    %2117 = vector.broadcast %cst_429 : f32 to vector<1x128xf32>
    %2118 = arith.select %3, %2116, %2117 : vector<1x128xi1>, vector<1x128xf32>
    %cst_430 = arith.constant dense<0xFF800000> : vector<1xf32>
    %2119 = vector.multi_reduction <maximumf>, %2118, %cst_430 [1] : vector<1x128xf32> to vector<1xf32>
    %2120 = vector.shape_cast %2119 : vector<1xf32> to vector<1x1xf32>
    %2121 = arith.maximumf %1971, %2120 : vector<1x1xf32>
    %c0_i32_431 = arith.constant 0 : i32
    %2122 = vector.broadcast %c0_i32_431 : i32 to vector<1x128xi32>
    %2123 = arith.cmpi eq, %1, %2122 : vector<1x128xi32>
    %cst_432 = arith.constant 0.000000e+00 : f32
    %2124 = vector.shape_cast %2105 : vector<1x1xf32> to vector<1x1xf32>
    %2125 = vector.broadcast %2124 : vector<1x1xf32> to vector<1x128xf32>
    %2126 = vector.broadcast %cst_432 : f32 to vector<1x128xf32>
    %2127 = arith.select %2123, %2125, %2126 : vector<1x128xi1>, vector<1x128xf32>
    %c1_i32_433 = arith.constant 1 : i32
    %2128 = vector.broadcast %c1_i32_433 : i32 to vector<1x128xi32>
    %2129 = arith.cmpi eq, %1, %2128 : vector<1x128xi32>
    %cst_434 = arith.constant 0.000000e+00 : f32
    %2130 = vector.shape_cast %2037 : vector<1x1xf32> to vector<1x1xf32>
    %2131 = vector.broadcast %2130 : vector<1x1xf32> to vector<1x128xf32>
    %2132 = vector.broadcast %cst_434 : f32 to vector<1x128xf32>
    %2133 = arith.select %2129, %2131, %2132 : vector<1x128xi1>, vector<1x128xf32>
    %2134 = arith.addf %2127, %2133 : vector<1x128xf32>
    %c2_i32_435 = arith.constant 2 : i32
    %2135 = vector.broadcast %c2_i32_435 : i32 to vector<1x128xi32>
    %2136 = arith.cmpi eq, %1, %2135 : vector<1x128xi32>
    %cst_436 = arith.constant 0.000000e+00 : f32
    %2137 = vector.shape_cast %2039 : vector<1x1xf32> to vector<1x1xf32>
    %2138 = vector.broadcast %2137 : vector<1x1xf32> to vector<1x128xf32>
    %2139 = vector.broadcast %cst_436 : f32 to vector<1x128xf32>
    %2140 = arith.select %2136, %2138, %2139 : vector<1x128xi1>, vector<1x128xf32>
    %2141 = arith.addf %2134, %2140 : vector<1x128xf32>
    %2142 = arith.index_cast %c13_i32 : i32 to index
    %c0_437 = arith.constant 0 : index
    %2143 = vector.load %arg9[%2142, %c0_437] : memref<24x128xf32, #tpu.memory_space<vmem>>, vector<1x128xf32>
    tpu.vector_store %arg9[%2142, %c0_437], %2141 {strides = array<i32>} : memref<24x128xf32, #tpu.memory_space<vmem>>, vector<1x128xf32>,
    %c14_i32 = arith.constant 14 : i32
    %c6_i32_438 = arith.constant 6 : i32
    %2144 = arith.muli %c14_i32, %c6_i32_438 : i32
    %c0_i32_439 = arith.constant 0 : i32
    %2145 = arith.addi %2144, %c0_i32_439 : i32
    %2146 = arith.index_cast %2145 : i32 to index
    %2147 = memref.load %arg1[%2146] : memref<144xf32, #tpu.memory_space<smem>>
    %c1_i32_440 = arith.constant 1 : i32
    %2148 = arith.addi %2144, %c1_i32_440 : i32
    %2149 = arith.index_cast %2148 : i32 to index
    %2150 = memref.load %arg1[%2149] : memref<144xf32, #tpu.memory_space<smem>>
    %c2_i32_441 = arith.constant 2 : i32
    %2151 = arith.addi %2144, %c2_i32_441 : i32
    %2152 = arith.index_cast %2151 : i32 to index
    %2153 = memref.load %arg1[%2152] : memref<144xf32, #tpu.memory_space<smem>>
    %c3_i32_442 = arith.constant 3 : i32
    %2154 = arith.addi %2144, %c3_i32_442 : i32
    %2155 = arith.index_cast %2154 : i32 to index
    %2156 = memref.load %arg1[%2155] : memref<144xf32, #tpu.memory_space<smem>>
    %c4_i32_443 = arith.constant 4 : i32
    %2157 = arith.addi %2144, %c4_i32_443 : i32
    %2158 = arith.index_cast %2157 : i32 to index
    %2159 = memref.load %arg1[%2158] : memref<144xf32, #tpu.memory_space<smem>>
    %2160 = vector.broadcast %12 : f32 to vector<1x1xf32>
    %2161 = arith.subf %2160, %2045 : vector<1x1xf32>
    %cst_444 = arith.constant 0.000000e+00 : f32
    %2162 = vector.broadcast %cst_444 : f32 to vector<1x1xf32>
    %2163 = arith.maximumf %2161, %2162 : vector<1x1xf32>
    %2164 = vector.broadcast %cst_11 : f32 to vector<1x1xf32>
    %2165 = arith.maximumf %2040, %2164 : vector<1x1xf32>
    %2166 = arith.divf %2163, %2165 : vector<1x1xf32>
    %2167 = vector.broadcast %11 : f32 to vector<1x128xf32>
    %2168 = arith.addf %2167, %2083 : vector<1x128xf32>
    %2169 = vector.broadcast %2166 : vector<1x1xf32> to vector<1x128xf32>
    %2170 = arith.mulf %2168, %2169 : vector<1x128xf32>
    %cst_445 = arith.constant 1.000000e+00 : f32
    %2171 = vector.broadcast %cst_445 : f32 to vector<1x128xf32>
    %2172 = arith.addf %2171, %2170 : vector<1x128xf32>
    %2173 = vector.broadcast %10 : f32 to vector<1x128xf32>
    %2174 = arith.mulf %2173, %2172 : vector<1x128xf32>
    %2175 = vector.broadcast %2159 : f32 to vector<1x128xf32>
    %2176 = arith.mulf %2083, %2175 : vector<1x128xf32>
    %2177 = vector.broadcast %2147 : f32 to vector<1x128xf32>
    %2178 = arith.addf %2177, %2176 : vector<1x128xf32>
    %2179 = arith.minimumf %2178, %2174 : vector<1x128xf32>
    %cst_446 = arith.constant 0.000000e+00 : f32
    %2180 = vector.broadcast %cst_446 : f32 to vector<1x128xf32>
    %2181 = arith.maximumf %2179, %2180 : vector<1x128xf32>
    %cst_447 = arith.constant 0.000000e+00 : f32
    %2182 = vector.broadcast %cst_447 : f32 to vector<1x128xf32>
    %2183 = arith.select %3, %2181, %2182 : vector<1x128xi1>, vector<1x128xf32>
    %cst_448 = arith.constant dense<0.000000e+00> : vector<1xf32>
    %2184 = vector.multi_reduction <add>, %2183, %cst_448 [1] : vector<1x128xf32> to vector<1xf32>
    %2185 = vector.shape_cast %2184 : vector<1xf32> to vector<1x1xf32>
    %2186 = vector.broadcast %cst_12 : f32 to vector<1x1xf32>
    %2187 = arith.mulf %2185, %2186 : vector<1x1xf32>
    %2188 = vector.broadcast %2156 : f32 to vector<1x1xf32>
    %2189 = arith.mulf %2187, %2188 : vector<1x1xf32>
    %2190 = arith.addf %2040, %2189 : vector<1x1xf32>
    %2191 = vector.broadcast %13 : f32 to vector<1x1xf32>
    %2192 = arith.mulf %2189, %2191 : vector<1x1xf32>
    %2193 = arith.addf %2045, %2192 : vector<1x1xf32>
    %2194 = vector.broadcast %12 : f32 to vector<1x1xf32>
    %2195 = arith.minimumf %2193, %2194 : vector<1x1xf32>
    %2196 = vector.broadcast %2147 : f32 to vector<1x128xf32>
    %2197 = arith.subf %2196, %2183 : vector<1x128xf32>
    %cst_449 = arith.constant 0.000000e+00 : f32
    %2198 = vector.broadcast %cst_449 : f32 to vector<1x128xf32>
    %2199 = arith.maximumf %2197, %2198 : vector<1x128xf32>
    %cst_450 = arith.constant 0.000000e+00 : f32
    %2200 = vector.broadcast %cst_450 : f32 to vector<1x128xf32>
    %2201 = arith.select %3, %2083, %2200 : vector<1x128xi1>, vector<1x128xf32>
    %cst_451 = arith.constant dense<0.000000e+00> : vector<1xf32>
    %2202 = vector.multi_reduction <add>, %2201, %cst_451 [1] : vector<1x128xf32> to vector<1xf32>
    %2203 = vector.shape_cast %2202 : vector<1xf32> to vector<1x1xf32>
    %2204 = vector.broadcast %cst_12 : f32 to vector<1x1xf32>
    %2205 = arith.mulf %2203, %2204 : vector<1x1xf32>
    %2206 = vector.broadcast %cst_13 : f32 to vector<1x1xf32>
    %2207 = arith.mulf %2205, %2206 : vector<1x1xf32>
    %2208 = vector.broadcast %2207 : vector<1x1xf32> to vector<1x128xf32>
    %2209 = arith.addf %14, %2208 : vector<1x128xf32>
    %2210 = arith.mulf %2199, %2209 : vector<1x128xf32>
    %2211 = vector.broadcast %2153 : f32 to vector<1x128xf32>
    %2212 = arith.addf %2210, %2211 : vector<1x128xf32>
    %c1_i32_452 = arith.constant 1 : i32
    %2213 = tpu.dynamic_rotate %2101 by %c1_i32_452 dim 1 : vector<1x128xf32>, i32 -> vector<1x128xf32>
    %2214 = vector.broadcast %2150 : f32 to vector<1x128xf32>
    %2215 = arith.select %5, %2214, %2213 : vector<1x128xi1>, vector<1x128xf32>
    %2216 = arith.subf %2215, %2101 : vector<1x128xf32>
    %2217 = arith.mulf %2216, %15 : vector<1x128xf32>
    %2218 = arith.addf %2217, %2212 : vector<1x128xf32>
    %2219 = vector.broadcast %2156 : f32 to vector<1x128xf32>
    %2220 = arith.mulf %2219, %2218 : vector<1x128xf32>
    %2221 = arith.addf %2075, %2220 : vector<1x128xf32>
    %cst_453 = arith.constant 0.000000e+00 : f32
    %2222 = vector.broadcast %cst_453 : f32 to vector<1x128xf32>
    %2223 = arith.maximumf %2221, %2222 : vector<1x128xf32>
    %cst_454 = arith.constant 0.000000e+00 : f32
    %2224 = vector.broadcast %cst_454 : f32 to vector<1x128xf32>
    %2225 = arith.select %3, %2223, %2224 : vector<1x128xi1>, vector<1x128xf32>
    %2226 = arith.mulf %14, %14 : vector<1x128xf32>
    %2227 = vector.broadcast %cst_14 : f32 to vector<1x128xf32>
    %2228 = arith.mulf %2227, %2225 : vector<1x128xf32>
    %2229 = arith.addf %2226, %2228 : vector<1x128xf32>
    %2230 = math.sqrt %2229 : vector<1x128xf32>
    %2231 = arith.subf %2230, %14 : vector<1x128xf32>
    %2232 = vector.broadcast %cst_15 : f32 to vector<1x128xf32>
    %2233 = arith.mulf %2231, %2232 : vector<1x128xf32>
    %2234 = vector.broadcast %8 : f32 to vector<1x128xf32>
    %2235 = arith.mulf %2233, %2234 : vector<1x128xf32>
    %2236 = arith.addf %14, %2235 : vector<1x128xf32>
    %2237 = vector.broadcast %cst_11 : f32 to vector<1x128xf32>
    %2238 = arith.maximumf %2236, %2237 : vector<1x128xf32>
    %2239 = tpu.reciprocal %2238 {approx = true} : vector<1x128xf32> -> vector<1x128xf32>
    %2240 = arith.mulf %2225, %2239 : vector<1x128xf32>
    %2241 = vector.broadcast %cst_11 : f32 to vector<1x128xf32>
    %2242 = arith.maximumf %2240, %2241 : vector<1x128xf32>
    %2243 = math.log %2242 : vector<1x128xf32>
    %2244 = vector.broadcast %cst_16 : f32 to vector<1x128xf32>
    %2245 = arith.mulf %2244, %2243 : vector<1x128xf32>
    %2246 = math.exp %2245 : vector<1x128xf32>
    %2247 = arith.mulf %2225, %2246 : vector<1x128xf32>
    %2248 = vector.broadcast %9 : f32 to vector<1x128xf32>
    %2249 = arith.mulf %2247, %2248 : vector<1x128xf32>
    %cst_455 = arith.constant 0.000000e+00 : f32
    %2250 = vector.broadcast %cst_455 : f32 to vector<1x128xf32>
    %2251 = arith.select %3, %2249, %2250 : vector<1x128xi1>, vector<1x128xf32>
    %cst_456 = arith.constant 0.000000e+00 : f32
    %2252 = vector.broadcast %cst_456 : f32 to vector<1x128xf32>
    %2253 = arith.select %7, %2251, %2252 : vector<1x128xi1>, vector<1x128xf32>
    %cst_457 = arith.constant dense<0.000000e+00> : vector<1xf32>
    %2254 = vector.multi_reduction <add>, %2253, %cst_457 [1] : vector<1x128xf32> to vector<1xf32>
    %2255 = vector.shape_cast %2254 : vector<1xf32> to vector<1x1xf32>
    %2256 = vector.broadcast %cst_11 : f32 to vector<1x128xf32>
    %2257 = arith.maximumf %2225, %2256 : vector<1x128xf32>
    %2258 = tpu.reciprocal %2257 {approx = true} : vector<1x128xf32> -> vector<1x128xf32>
    %2259 = arith.mulf %2251, %2258 : vector<1x128xf32>
    %2260 = vector.broadcast %cst_11 : f32 to vector<1x128xf32>
    %2261 = arith.cmpf ogt, %2225, %2260 : vector<1x128xf32>
    %2262 = vector.broadcast %2156 : f32 to vector<1x128xf32>
    %2263 = arith.mulf %2259, %2262 : vector<1x128xf32>
    %2264 = arith.mulf %2263, %15 : vector<1x128xf32>
    %cst_458 = arith.constant 0.000000e+00 : f32
    %2265 = vector.broadcast %cst_458 : f32 to vector<1x128xf32>
    %2266 = arith.select %2261, %2264, %2265 : vector<1x128xi1>, vector<1x128xf32>
    %cst_459 = arith.constant 0.000000e+00 : f32
    %2267 = vector.broadcast %cst_459 : f32 to vector<1x128xf32>
    %2268 = arith.select %3, %2266, %2267 : vector<1x128xi1>, vector<1x128xf32>
    %cst_460 = arith.constant dense<0xFF800000> : vector<1xf32>
    %2269 = vector.multi_reduction <maximumf>, %2268, %cst_460 [1] : vector<1x128xf32> to vector<1xf32>
    %2270 = vector.shape_cast %2269 : vector<1xf32> to vector<1x1xf32>
    %2271 = arith.maximumf %2121, %2270 : vector<1x1xf32>
    %c0_i32_461 = arith.constant 0 : i32
    %2272 = vector.broadcast %c0_i32_461 : i32 to vector<1x128xi32>
    %2273 = arith.cmpi eq, %1, %2272 : vector<1x128xi32>
    %cst_462 = arith.constant 0.000000e+00 : f32
    %2274 = vector.shape_cast %2255 : vector<1x1xf32> to vector<1x1xf32>
    %2275 = vector.broadcast %2274 : vector<1x1xf32> to vector<1x128xf32>
    %2276 = vector.broadcast %cst_462 : f32 to vector<1x128xf32>
    %2277 = arith.select %2273, %2275, %2276 : vector<1x128xi1>, vector<1x128xf32>
    %c1_i32_463 = arith.constant 1 : i32
    %2278 = vector.broadcast %c1_i32_463 : i32 to vector<1x128xi32>
    %2279 = arith.cmpi eq, %1, %2278 : vector<1x128xi32>
    %cst_464 = arith.constant 0.000000e+00 : f32
    %2280 = vector.shape_cast %2187 : vector<1x1xf32> to vector<1x1xf32>
    %2281 = vector.broadcast %2280 : vector<1x1xf32> to vector<1x128xf32>
    %2282 = vector.broadcast %cst_464 : f32 to vector<1x128xf32>
    %2283 = arith.select %2279, %2281, %2282 : vector<1x128xi1>, vector<1x128xf32>
    %2284 = arith.addf %2277, %2283 : vector<1x128xf32>
    %c2_i32_465 = arith.constant 2 : i32
    %2285 = vector.broadcast %c2_i32_465 : i32 to vector<1x128xi32>
    %2286 = arith.cmpi eq, %1, %2285 : vector<1x128xi32>
    %cst_466 = arith.constant 0.000000e+00 : f32
    %2287 = vector.shape_cast %2189 : vector<1x1xf32> to vector<1x1xf32>
    %2288 = vector.broadcast %2287 : vector<1x1xf32> to vector<1x128xf32>
    %2289 = vector.broadcast %cst_466 : f32 to vector<1x128xf32>
    %2290 = arith.select %2286, %2288, %2289 : vector<1x128xi1>, vector<1x128xf32>
    %2291 = arith.addf %2284, %2290 : vector<1x128xf32>
    %2292 = arith.index_cast %c14_i32 : i32 to index
    %c0_467 = arith.constant 0 : index
    %2293 = vector.load %arg9[%2292, %c0_467] : memref<24x128xf32, #tpu.memory_space<vmem>>, vector<1x128xf32>
    tpu.vector_store %arg9[%2292, %c0_467], %2291 {strides = array<i32>} : memref<24x128xf32, #tpu.memory_space<vmem>>, vector<1x128xf32>,
    %c15_i32_468 = arith.constant 15 : i32
    %c6_i32_469 = arith.constant 6 : i32
    %2294 = arith.muli %c15_i32_468, %c6_i32_469 : i32
    %c0_i32_470 = arith.constant 0 : i32
    %2295 = arith.addi %2294, %c0_i32_470 : i32
    %2296 = arith.index_cast %2295 : i32 to index
    %2297 = memref.load %arg1[%2296] : memref<144xf32, #tpu.memory_space<smem>>
    %c1_i32_471 = arith.constant 1 : i32
    %2298 = arith.addi %2294, %c1_i32_471 : i32
    %2299 = arith.index_cast %2298 : i32 to index
    %2300 = memref.load %arg1[%2299] : memref<144xf32, #tpu.memory_space<smem>>
    %c2_i32_472 = arith.constant 2 : i32
    %2301 = arith.addi %2294, %c2_i32_472 : i32
    %2302 = arith.index_cast %2301 : i32 to index
    %2303 = memref.load %arg1[%2302] : memref<144xf32, #tpu.memory_space<smem>>
    %c3_i32_473 = arith.constant 3 : i32
    %2304 = arith.addi %2294, %c3_i32_473 : i32
    %2305 = arith.index_cast %2304 : i32 to index
    %2306 = memref.load %arg1[%2305] : memref<144xf32, #tpu.memory_space<smem>>
    %c4_i32_474 = arith.constant 4 : i32
    %2307 = arith.addi %2294, %c4_i32_474 : i32
    %2308 = arith.index_cast %2307 : i32 to index
    %2309 = memref.load %arg1[%2308] : memref<144xf32, #tpu.memory_space<smem>>
    %2310 = vector.broadcast %12 : f32 to vector<1x1xf32>
    %2311 = arith.subf %2310, %2195 : vector<1x1xf32>
    %cst_475 = arith.constant 0.000000e+00 : f32
    %2312 = vector.broadcast %cst_475 : f32 to vector<1x1xf32>
    %2313 = arith.maximumf %2311, %2312 : vector<1x1xf32>
    %2314 = vector.broadcast %cst_11 : f32 to vector<1x1xf32>
    %2315 = arith.maximumf %2190, %2314 : vector<1x1xf32>
    %2316 = arith.divf %2313, %2315 : vector<1x1xf32>
    %2317 = vector.broadcast %11 : f32 to vector<1x128xf32>
    %2318 = arith.addf %2317, %2233 : vector<1x128xf32>
    %2319 = vector.broadcast %2316 : vector<1x1xf32> to vector<1x128xf32>
    %2320 = arith.mulf %2318, %2319 : vector<1x128xf32>
    %cst_476 = arith.constant 1.000000e+00 : f32
    %2321 = vector.broadcast %cst_476 : f32 to vector<1x128xf32>
    %2322 = arith.addf %2321, %2320 : vector<1x128xf32>
    %2323 = vector.broadcast %10 : f32 to vector<1x128xf32>
    %2324 = arith.mulf %2323, %2322 : vector<1x128xf32>
    %2325 = vector.broadcast %2309 : f32 to vector<1x128xf32>
    %2326 = arith.mulf %2233, %2325 : vector<1x128xf32>
    %2327 = vector.broadcast %2297 : f32 to vector<1x128xf32>
    %2328 = arith.addf %2327, %2326 : vector<1x128xf32>
    %2329 = arith.minimumf %2328, %2324 : vector<1x128xf32>
    %cst_477 = arith.constant 0.000000e+00 : f32
    %2330 = vector.broadcast %cst_477 : f32 to vector<1x128xf32>
    %2331 = arith.maximumf %2329, %2330 : vector<1x128xf32>
    %cst_478 = arith.constant 0.000000e+00 : f32
    %2332 = vector.broadcast %cst_478 : f32 to vector<1x128xf32>
    %2333 = arith.select %3, %2331, %2332 : vector<1x128xi1>, vector<1x128xf32>
    %cst_479 = arith.constant dense<0.000000e+00> : vector<1xf32>
    %2334 = vector.multi_reduction <add>, %2333, %cst_479 [1] : vector<1x128xf32> to vector<1xf32>
    %2335 = vector.shape_cast %2334 : vector<1xf32> to vector<1x1xf32>
    %2336 = vector.broadcast %cst_12 : f32 to vector<1x1xf32>
    %2337 = arith.mulf %2335, %2336 : vector<1x1xf32>
    %2338 = vector.broadcast %2306 : f32 to vector<1x1xf32>
    %2339 = arith.mulf %2337, %2338 : vector<1x1xf32>
    %2340 = arith.addf %2190, %2339 : vector<1x1xf32>
    %2341 = vector.broadcast %13 : f32 to vector<1x1xf32>
    %2342 = arith.mulf %2339, %2341 : vector<1x1xf32>
    %2343 = arith.addf %2195, %2342 : vector<1x1xf32>
    %2344 = vector.broadcast %12 : f32 to vector<1x1xf32>
    %2345 = arith.minimumf %2343, %2344 : vector<1x1xf32>
    %2346 = vector.broadcast %2297 : f32 to vector<1x128xf32>
    %2347 = arith.subf %2346, %2333 : vector<1x128xf32>
    %cst_480 = arith.constant 0.000000e+00 : f32
    %2348 = vector.broadcast %cst_480 : f32 to vector<1x128xf32>
    %2349 = arith.maximumf %2347, %2348 : vector<1x128xf32>
    %cst_481 = arith.constant 0.000000e+00 : f32
    %2350 = vector.broadcast %cst_481 : f32 to vector<1x128xf32>
    %2351 = arith.select %3, %2233, %2350 : vector<1x128xi1>, vector<1x128xf32>
    %cst_482 = arith.constant dense<0.000000e+00> : vector<1xf32>
    %2352 = vector.multi_reduction <add>, %2351, %cst_482 [1] : vector<1x128xf32> to vector<1xf32>
    %2353 = vector.shape_cast %2352 : vector<1xf32> to vector<1x1xf32>
    %2354 = vector.broadcast %cst_12 : f32 to vector<1x1xf32>
    %2355 = arith.mulf %2353, %2354 : vector<1x1xf32>
    %2356 = vector.broadcast %cst_13 : f32 to vector<1x1xf32>
    %2357 = arith.mulf %2355, %2356 : vector<1x1xf32>
    %2358 = vector.broadcast %2357 : vector<1x1xf32> to vector<1x128xf32>
    %2359 = arith.addf %14, %2358 : vector<1x128xf32>
    %2360 = arith.mulf %2349, %2359 : vector<1x128xf32>
    %2361 = vector.broadcast %2303 : f32 to vector<1x128xf32>
    %2362 = arith.addf %2360, %2361 : vector<1x128xf32>
    %c1_i32_483 = arith.constant 1 : i32
    %2363 = tpu.dynamic_rotate %2251 by %c1_i32_483 dim 1 : vector<1x128xf32>, i32 -> vector<1x128xf32>
    %2364 = vector.broadcast %2300 : f32 to vector<1x128xf32>
    %2365 = arith.select %5, %2364, %2363 : vector<1x128xi1>, vector<1x128xf32>
    %2366 = arith.subf %2365, %2251 : vector<1x128xf32>
    %2367 = arith.mulf %2366, %15 : vector<1x128xf32>
    %2368 = arith.addf %2367, %2362 : vector<1x128xf32>
    %2369 = vector.broadcast %2306 : f32 to vector<1x128xf32>
    %2370 = arith.mulf %2369, %2368 : vector<1x128xf32>
    %2371 = arith.addf %2225, %2370 : vector<1x128xf32>
    %cst_484 = arith.constant 0.000000e+00 : f32
    %2372 = vector.broadcast %cst_484 : f32 to vector<1x128xf32>
    %2373 = arith.maximumf %2371, %2372 : vector<1x128xf32>
    %cst_485 = arith.constant 0.000000e+00 : f32
    %2374 = vector.broadcast %cst_485 : f32 to vector<1x128xf32>
    %2375 = arith.select %3, %2373, %2374 : vector<1x128xi1>, vector<1x128xf32>
    %2376 = arith.mulf %14, %14 : vector<1x128xf32>
    %2377 = vector.broadcast %cst_14 : f32 to vector<1x128xf32>
    %2378 = arith.mulf %2377, %2375 : vector<1x128xf32>
    %2379 = arith.addf %2376, %2378 : vector<1x128xf32>
    %2380 = math.sqrt %2379 : vector<1x128xf32>
    %2381 = arith.subf %2380, %14 : vector<1x128xf32>
    %2382 = vector.broadcast %cst_15 : f32 to vector<1x128xf32>
    %2383 = arith.mulf %2381, %2382 : vector<1x128xf32>
    %2384 = vector.broadcast %8 : f32 to vector<1x128xf32>
    %2385 = arith.mulf %2383, %2384 : vector<1x128xf32>
    %2386 = arith.addf %14, %2385 : vector<1x128xf32>
    %2387 = vector.broadcast %cst_11 : f32 to vector<1x128xf32>
    %2388 = arith.maximumf %2386, %2387 : vector<1x128xf32>
    %2389 = tpu.reciprocal %2388 {approx = true} : vector<1x128xf32> -> vector<1x128xf32>
    %2390 = arith.mulf %2375, %2389 : vector<1x128xf32>
    %2391 = vector.broadcast %cst_11 : f32 to vector<1x128xf32>
    %2392 = arith.maximumf %2390, %2391 : vector<1x128xf32>
    %2393 = math.log %2392 : vector<1x128xf32>
    %2394 = vector.broadcast %cst_16 : f32 to vector<1x128xf32>
    %2395 = arith.mulf %2394, %2393 : vector<1x128xf32>
    %2396 = math.exp %2395 : vector<1x128xf32>
    %2397 = arith.mulf %2375, %2396 : vector<1x128xf32>
    %2398 = vector.broadcast %9 : f32 to vector<1x128xf32>
    %2399 = arith.mulf %2397, %2398 : vector<1x128xf32>
    %cst_486 = arith.constant 0.000000e+00 : f32
    %2400 = vector.broadcast %cst_486 : f32 to vector<1x128xf32>
    %2401 = arith.select %3, %2399, %2400 : vector<1x128xi1>, vector<1x128xf32>
    %cst_487 = arith.constant 0.000000e+00 : f32
    %2402 = vector.broadcast %cst_487 : f32 to vector<1x128xf32>
    %2403 = arith.select %7, %2401, %2402 : vector<1x128xi1>, vector<1x128xf32>
    %cst_488 = arith.constant dense<0.000000e+00> : vector<1xf32>
    %2404 = vector.multi_reduction <add>, %2403, %cst_488 [1] : vector<1x128xf32> to vector<1xf32>
    %2405 = vector.shape_cast %2404 : vector<1xf32> to vector<1x1xf32>
    %2406 = vector.broadcast %cst_11 : f32 to vector<1x128xf32>
    %2407 = arith.maximumf %2375, %2406 : vector<1x128xf32>
    %2408 = tpu.reciprocal %2407 {approx = true} : vector<1x128xf32> -> vector<1x128xf32>
    %2409 = arith.mulf %2401, %2408 : vector<1x128xf32>
    %2410 = vector.broadcast %cst_11 : f32 to vector<1x128xf32>
    %2411 = arith.cmpf ogt, %2375, %2410 : vector<1x128xf32>
    %2412 = vector.broadcast %2306 : f32 to vector<1x128xf32>
    %2413 = arith.mulf %2409, %2412 : vector<1x128xf32>
    %2414 = arith.mulf %2413, %15 : vector<1x128xf32>
    %cst_489 = arith.constant 0.000000e+00 : f32
    %2415 = vector.broadcast %cst_489 : f32 to vector<1x128xf32>
    %2416 = arith.select %2411, %2414, %2415 : vector<1x128xi1>, vector<1x128xf32>
    %cst_490 = arith.constant 0.000000e+00 : f32
    %2417 = vector.broadcast %cst_490 : f32 to vector<1x128xf32>
    %2418 = arith.select %3, %2416, %2417 : vector<1x128xi1>, vector<1x128xf32>
    %cst_491 = arith.constant dense<0xFF800000> : vector<1xf32>
    %2419 = vector.multi_reduction <maximumf>, %2418, %cst_491 [1] : vector<1x128xf32> to vector<1xf32>
    %2420 = vector.shape_cast %2419 : vector<1xf32> to vector<1x1xf32>
    %2421 = arith.maximumf %2271, %2420 : vector<1x1xf32>
    %c0_i32_492 = arith.constant 0 : i32
    %2422 = vector.broadcast %c0_i32_492 : i32 to vector<1x128xi32>
    %2423 = arith.cmpi eq, %1, %2422 : vector<1x128xi32>
    %cst_493 = arith.constant 0.000000e+00 : f32
    %2424 = vector.shape_cast %2405 : vector<1x1xf32> to vector<1x1xf32>
    %2425 = vector.broadcast %2424 : vector<1x1xf32> to vector<1x128xf32>
    %2426 = vector.broadcast %cst_493 : f32 to vector<1x128xf32>
    %2427 = arith.select %2423, %2425, %2426 : vector<1x128xi1>, vector<1x128xf32>
    %c1_i32_494 = arith.constant 1 : i32
    %2428 = vector.broadcast %c1_i32_494 : i32 to vector<1x128xi32>
    %2429 = arith.cmpi eq, %1, %2428 : vector<1x128xi32>
    %cst_495 = arith.constant 0.000000e+00 : f32
    %2430 = vector.shape_cast %2337 : vector<1x1xf32> to vector<1x1xf32>
    %2431 = vector.broadcast %2430 : vector<1x1xf32> to vector<1x128xf32>
    %2432 = vector.broadcast %cst_495 : f32 to vector<1x128xf32>
    %2433 = arith.select %2429, %2431, %2432 : vector<1x128xi1>, vector<1x128xf32>
    %2434 = arith.addf %2427, %2433 : vector<1x128xf32>
    %c2_i32_496 = arith.constant 2 : i32
    %2435 = vector.broadcast %c2_i32_496 : i32 to vector<1x128xi32>
    %2436 = arith.cmpi eq, %1, %2435 : vector<1x128xi32>
    %cst_497 = arith.constant 0.000000e+00 : f32
    %2437 = vector.shape_cast %2339 : vector<1x1xf32> to vector<1x1xf32>
    %2438 = vector.broadcast %2437 : vector<1x1xf32> to vector<1x128xf32>
    %2439 = vector.broadcast %cst_497 : f32 to vector<1x128xf32>
    %2440 = arith.select %2436, %2438, %2439 : vector<1x128xi1>, vector<1x128xf32>
    %2441 = arith.addf %2434, %2440 : vector<1x128xf32>
    %2442 = arith.index_cast %c15_i32_468 : i32 to index
    %c0_498 = arith.constant 0 : index
    %2443 = vector.load %arg9[%2442, %c0_498] : memref<24x128xf32, #tpu.memory_space<vmem>>, vector<1x128xf32>
    tpu.vector_store %arg9[%2442, %c0_498], %2441 {strides = array<i32>} : memref<24x128xf32, #tpu.memory_space<vmem>>, vector<1x128xf32>,
    %c16_i32_499 = arith.constant 16 : i32
    %c6_i32_500 = arith.constant 6 : i32
    %2444 = arith.muli %c16_i32_499, %c6_i32_500 : i32
    %c0_i32_501 = arith.constant 0 : i32
    %2445 = arith.addi %2444, %c0_i32_501 : i32
    %2446 = arith.index_cast %2445 : i32 to index
    %2447 = memref.load %arg1[%2446] : memref<144xf32, #tpu.memory_space<smem>>
    %c1_i32_502 = arith.constant 1 : i32
    %2448 = arith.addi %2444, %c1_i32_502 : i32
    %2449 = arith.index_cast %2448 : i32 to index
    %2450 = memref.load %arg1[%2449] : memref<144xf32, #tpu.memory_space<smem>>
    %c2_i32_503 = arith.constant 2 : i32
    %2451 = arith.addi %2444, %c2_i32_503 : i32
    %2452 = arith.index_cast %2451 : i32 to index
    %2453 = memref.load %arg1[%2452] : memref<144xf32, #tpu.memory_space<smem>>
    %c3_i32_504 = arith.constant 3 : i32
    %2454 = arith.addi %2444, %c3_i32_504 : i32
    %2455 = arith.index_cast %2454 : i32 to index
    %2456 = memref.load %arg1[%2455] : memref<144xf32, #tpu.memory_space<smem>>
    %c4_i32_505 = arith.constant 4 : i32
    %2457 = arith.addi %2444, %c4_i32_505 : i32
    %2458 = arith.index_cast %2457 : i32 to index
    %2459 = memref.load %arg1[%2458] : memref<144xf32, #tpu.memory_space<smem>>
    %2460 = vector.broadcast %12 : f32 to vector<1x1xf32>
    %2461 = arith.subf %2460, %2345 : vector<1x1xf32>
    %cst_506 = arith.constant 0.000000e+00 : f32
    %2462 = vector.broadcast %cst_506 : f32 to vector<1x1xf32>
    %2463 = arith.maximumf %2461, %2462 : vector<1x1xf32>
    %2464 = vector.broadcast %cst_11 : f32 to vector<1x1xf32>
    %2465 = arith.maximumf %2340, %2464 : vector<1x1xf32>
    %2466 = arith.divf %2463, %2465 : vector<1x1xf32>
    %2467 = vector.broadcast %11 : f32 to vector<1x128xf32>
    %2468 = arith.addf %2467, %2383 : vector<1x128xf32>
    %2469 = vector.broadcast %2466 : vector<1x1xf32> to vector<1x128xf32>
    %2470 = arith.mulf %2468, %2469 : vector<1x128xf32>
    %cst_507 = arith.constant 1.000000e+00 : f32
    %2471 = vector.broadcast %cst_507 : f32 to vector<1x128xf32>
    %2472 = arith.addf %2471, %2470 : vector<1x128xf32>
    %2473 = vector.broadcast %10 : f32 to vector<1x128xf32>
    %2474 = arith.mulf %2473, %2472 : vector<1x128xf32>
    %2475 = vector.broadcast %2459 : f32 to vector<1x128xf32>
    %2476 = arith.mulf %2383, %2475 : vector<1x128xf32>
    %2477 = vector.broadcast %2447 : f32 to vector<1x128xf32>
    %2478 = arith.addf %2477, %2476 : vector<1x128xf32>
    %2479 = arith.minimumf %2478, %2474 : vector<1x128xf32>
    %cst_508 = arith.constant 0.000000e+00 : f32
    %2480 = vector.broadcast %cst_508 : f32 to vector<1x128xf32>
    %2481 = arith.maximumf %2479, %2480 : vector<1x128xf32>
    %cst_509 = arith.constant 0.000000e+00 : f32
    %2482 = vector.broadcast %cst_509 : f32 to vector<1x128xf32>
    %2483 = arith.select %3, %2481, %2482 : vector<1x128xi1>, vector<1x128xf32>
    %cst_510 = arith.constant dense<0.000000e+00> : vector<1xf32>
    %2484 = vector.multi_reduction <add>, %2483, %cst_510 [1] : vector<1x128xf32> to vector<1xf32>
    %2485 = vector.shape_cast %2484 : vector<1xf32> to vector<1x1xf32>
    %2486 = vector.broadcast %cst_12 : f32 to vector<1x1xf32>
    %2487 = arith.mulf %2485, %2486 : vector<1x1xf32>
    %2488 = vector.broadcast %2456 : f32 to vector<1x1xf32>
    %2489 = arith.mulf %2487, %2488 : vector<1x1xf32>
    %2490 = arith.addf %2340, %2489 : vector<1x1xf32>
    %2491 = vector.broadcast %13 : f32 to vector<1x1xf32>
    %2492 = arith.mulf %2489, %2491 : vector<1x1xf32>
    %2493 = arith.addf %2345, %2492 : vector<1x1xf32>
    %2494 = vector.broadcast %12 : f32 to vector<1x1xf32>
    %2495 = arith.minimumf %2493, %2494 : vector<1x1xf32>
    %2496 = vector.broadcast %2447 : f32 to vector<1x128xf32>
    %2497 = arith.subf %2496, %2483 : vector<1x128xf32>
    %cst_511 = arith.constant 0.000000e+00 : f32
    %2498 = vector.broadcast %cst_511 : f32 to vector<1x128xf32>
    %2499 = arith.maximumf %2497, %2498 : vector<1x128xf32>
    %cst_512 = arith.constant 0.000000e+00 : f32
    %2500 = vector.broadcast %cst_512 : f32 to vector<1x128xf32>
    %2501 = arith.select %3, %2383, %2500 : vector<1x128xi1>, vector<1x128xf32>
    %cst_513 = arith.constant dense<0.000000e+00> : vector<1xf32>
    %2502 = vector.multi_reduction <add>, %2501, %cst_513 [1] : vector<1x128xf32> to vector<1xf32>
    %2503 = vector.shape_cast %2502 : vector<1xf32> to vector<1x1xf32>
    %2504 = vector.broadcast %cst_12 : f32 to vector<1x1xf32>
    %2505 = arith.mulf %2503, %2504 : vector<1x1xf32>
    %2506 = vector.broadcast %cst_13 : f32 to vector<1x1xf32>
    %2507 = arith.mulf %2505, %2506 : vector<1x1xf32>
    %2508 = vector.broadcast %2507 : vector<1x1xf32> to vector<1x128xf32>
    %2509 = arith.addf %14, %2508 : vector<1x128xf32>
    %2510 = arith.mulf %2499, %2509 : vector<1x128xf32>
    %2511 = vector.broadcast %2453 : f32 to vector<1x128xf32>
    %2512 = arith.addf %2510, %2511 : vector<1x128xf32>
    %c1_i32_514 = arith.constant 1 : i32
    %2513 = tpu.dynamic_rotate %2401 by %c1_i32_514 dim 1 : vector<1x128xf32>, i32 -> vector<1x128xf32>
    %2514 = vector.broadcast %2450 : f32 to vector<1x128xf32>
    %2515 = arith.select %5, %2514, %2513 : vector<1x128xi1>, vector<1x128xf32>
    %2516 = arith.subf %2515, %2401 : vector<1x128xf32>
    %2517 = arith.mulf %2516, %15 : vector<1x128xf32>
    %2518 = arith.addf %2517, %2512 : vector<1x128xf32>
    %2519 = vector.broadcast %2456 : f32 to vector<1x128xf32>
    %2520 = arith.mulf %2519, %2518 : vector<1x128xf32>
    %2521 = arith.addf %2375, %2520 : vector<1x128xf32>
    %cst_515 = arith.constant 0.000000e+00 : f32
    %2522 = vector.broadcast %cst_515 : f32 to vector<1x128xf32>
    %2523 = arith.maximumf %2521, %2522 : vector<1x128xf32>
    %cst_516 = arith.constant 0.000000e+00 : f32
    %2524 = vector.broadcast %cst_516 : f32 to vector<1x128xf32>
    %2525 = arith.select %3, %2523, %2524 : vector<1x128xi1>, vector<1x128xf32>
    %2526 = arith.mulf %14, %14 : vector<1x128xf32>
    %2527 = vector.broadcast %cst_14 : f32 to vector<1x128xf32>
    %2528 = arith.mulf %2527, %2525 : vector<1x128xf32>
    %2529 = arith.addf %2526, %2528 : vector<1x128xf32>
    %2530 = math.sqrt %2529 : vector<1x128xf32>
    %2531 = arith.subf %2530, %14 : vector<1x128xf32>
    %2532 = vector.broadcast %cst_15 : f32 to vector<1x128xf32>
    %2533 = arith.mulf %2531, %2532 : vector<1x128xf32>
    %2534 = vector.broadcast %8 : f32 to vector<1x128xf32>
    %2535 = arith.mulf %2533, %2534 : vector<1x128xf32>
    %2536 = arith.addf %14, %2535 : vector<1x128xf32>
    %2537 = vector.broadcast %cst_11 : f32 to vector<1x128xf32>
    %2538 = arith.maximumf %2536, %2537 : vector<1x128xf32>
    %2539 = tpu.reciprocal %2538 {approx = true} : vector<1x128xf32> -> vector<1x128xf32>
    %2540 = arith.mulf %2525, %2539 : vector<1x128xf32>
    %2541 = vector.broadcast %cst_11 : f32 to vector<1x128xf32>
    %2542 = arith.maximumf %2540, %2541 : vector<1x128xf32>
    %2543 = math.log %2542 : vector<1x128xf32>
    %2544 = vector.broadcast %cst_16 : f32 to vector<1x128xf32>
    %2545 = arith.mulf %2544, %2543 : vector<1x128xf32>
    %2546 = math.exp %2545 : vector<1x128xf32>
    %2547 = arith.mulf %2525, %2546 : vector<1x128xf32>
    %2548 = vector.broadcast %9 : f32 to vector<1x128xf32>
    %2549 = arith.mulf %2547, %2548 : vector<1x128xf32>
    %cst_517 = arith.constant 0.000000e+00 : f32
    %2550 = vector.broadcast %cst_517 : f32 to vector<1x128xf32>
    %2551 = arith.select %3, %2549, %2550 : vector<1x128xi1>, vector<1x128xf32>
    %cst_518 = arith.constant 0.000000e+00 : f32
    %2552 = vector.broadcast %cst_518 : f32 to vector<1x128xf32>
    %2553 = arith.select %7, %2551, %2552 : vector<1x128xi1>, vector<1x128xf32>
    %cst_519 = arith.constant dense<0.000000e+00> : vector<1xf32>
    %2554 = vector.multi_reduction <add>, %2553, %cst_519 [1] : vector<1x128xf32> to vector<1xf32>
    %2555 = vector.shape_cast %2554 : vector<1xf32> to vector<1x1xf32>
    %2556 = vector.broadcast %cst_11 : f32 to vector<1x128xf32>
    %2557 = arith.maximumf %2525, %2556 : vector<1x128xf32>
    %2558 = tpu.reciprocal %2557 {approx = true} : vector<1x128xf32> -> vector<1x128xf32>
    %2559 = arith.mulf %2551, %2558 : vector<1x128xf32>
    %2560 = vector.broadcast %cst_11 : f32 to vector<1x128xf32>
    %2561 = arith.cmpf ogt, %2525, %2560 : vector<1x128xf32>
    %2562 = vector.broadcast %2456 : f32 to vector<1x128xf32>
    %2563 = arith.mulf %2559, %2562 : vector<1x128xf32>
    %2564 = arith.mulf %2563, %15 : vector<1x128xf32>
    %cst_520 = arith.constant 0.000000e+00 : f32
    %2565 = vector.broadcast %cst_520 : f32 to vector<1x128xf32>
    %2566 = arith.select %2561, %2564, %2565 : vector<1x128xi1>, vector<1x128xf32>
    %cst_521 = arith.constant 0.000000e+00 : f32
    %2567 = vector.broadcast %cst_521 : f32 to vector<1x128xf32>
    %2568 = arith.select %3, %2566, %2567 : vector<1x128xi1>, vector<1x128xf32>
    %cst_522 = arith.constant dense<0xFF800000> : vector<1xf32>
    %2569 = vector.multi_reduction <maximumf>, %2568, %cst_522 [1] : vector<1x128xf32> to vector<1xf32>
    %2570 = vector.shape_cast %2569 : vector<1xf32> to vector<1x1xf32>
    %2571 = arith.maximumf %2421, %2570 : vector<1x1xf32>
    %c0_i32_523 = arith.constant 0 : i32
    %2572 = vector.broadcast %c0_i32_523 : i32 to vector<1x128xi32>
    %2573 = arith.cmpi eq, %1, %2572 : vector<1x128xi32>
    %cst_524 = arith.constant 0.000000e+00 : f32
    %2574 = vector.shape_cast %2555 : vector<1x1xf32> to vector<1x1xf32>
    %2575 = vector.broadcast %2574 : vector<1x1xf32> to vector<1x128xf32>
    %2576 = vector.broadcast %cst_524 : f32 to vector<1x128xf32>
    %2577 = arith.select %2573, %2575, %2576 : vector<1x128xi1>, vector<1x128xf32>
    %c1_i32_525 = arith.constant 1 : i32
    %2578 = vector.broadcast %c1_i32_525 : i32 to vector<1x128xi32>
    %2579 = arith.cmpi eq, %1, %2578 : vector<1x128xi32>
    %cst_526 = arith.constant 0.000000e+00 : f32
    %2580 = vector.shape_cast %2487 : vector<1x1xf32> to vector<1x1xf32>
    %2581 = vector.broadcast %2580 : vector<1x1xf32> to vector<1x128xf32>
    %2582 = vector.broadcast %cst_526 : f32 to vector<1x128xf32>
    %2583 = arith.select %2579, %2581, %2582 : vector<1x128xi1>, vector<1x128xf32>
    %2584 = arith.addf %2577, %2583 : vector<1x128xf32>
    %c2_i32_527 = arith.constant 2 : i32
    %2585 = vector.broadcast %c2_i32_527 : i32 to vector<1x128xi32>
    %2586 = arith.cmpi eq, %1, %2585 : vector<1x128xi32>
    %cst_528 = arith.constant 0.000000e+00 : f32
    %2587 = vector.shape_cast %2489 : vector<1x1xf32> to vector<1x1xf32>
    %2588 = vector.broadcast %2587 : vector<1x1xf32> to vector<1x128xf32>
    %2589 = vector.broadcast %cst_528 : f32 to vector<1x128xf32>
    %2590 = arith.select %2586, %2588, %2589 : vector<1x128xi1>, vector<1x128xf32>
    %2591 = arith.addf %2584, %2590 : vector<1x128xf32>
    %2592 = arith.index_cast %c16_i32_499 : i32 to index
    %c0_529 = arith.constant 0 : index
    %2593 = vector.load %arg9[%2592, %c0_529] : memref<24x128xf32, #tpu.memory_space<vmem>>, vector<1x128xf32>
    tpu.vector_store %arg9[%2592, %c0_529], %2591 {strides = array<i32>} : memref<24x128xf32, #tpu.memory_space<vmem>>, vector<1x128xf32>,
    %c17_i32 = arith.constant 17 : i32
    %c6_i32_530 = arith.constant 6 : i32
    %2594 = arith.muli %c17_i32, %c6_i32_530 : i32
    %c0_i32_531 = arith.constant 0 : i32
    %2595 = arith.addi %2594, %c0_i32_531 : i32
    %2596 = arith.index_cast %2595 : i32 to index
    %2597 = memref.load %arg1[%2596] : memref<144xf32, #tpu.memory_space<smem>>
    %c1_i32_532 = arith.constant 1 : i32
    %2598 = arith.addi %2594, %c1_i32_532 : i32
    %2599 = arith.index_cast %2598 : i32 to index
    %2600 = memref.load %arg1[%2599] : memref<144xf32, #tpu.memory_space<smem>>
    %c2_i32_533 = arith.constant 2 : i32
    %2601 = arith.addi %2594, %c2_i32_533 : i32
    %2602 = arith.index_cast %2601 : i32 to index
    %2603 = memref.load %arg1[%2602] : memref<144xf32, #tpu.memory_space<smem>>
    %c3_i32_534 = arith.constant 3 : i32
    %2604 = arith.addi %2594, %c3_i32_534 : i32
    %2605 = arith.index_cast %2604 : i32 to index
    %2606 = memref.load %arg1[%2605] : memref<144xf32, #tpu.memory_space<smem>>
    %c4_i32_535 = arith.constant 4 : i32
    %2607 = arith.addi %2594, %c4_i32_535 : i32
    %2608 = arith.index_cast %2607 : i32 to index
    %2609 = memref.load %arg1[%2608] : memref<144xf32, #tpu.memory_space<smem>>
    %2610 = vector.broadcast %12 : f32 to vector<1x1xf32>
    %2611 = arith.subf %2610, %2495 : vector<1x1xf32>
    %cst_536 = arith.constant 0.000000e+00 : f32
    %2612 = vector.broadcast %cst_536 : f32 to vector<1x1xf32>
    %2613 = arith.maximumf %2611, %2612 : vector<1x1xf32>
    %2614 = vector.broadcast %cst_11 : f32 to vector<1x1xf32>
    %2615 = arith.maximumf %2490, %2614 : vector<1x1xf32>
    %2616 = arith.divf %2613, %2615 : vector<1x1xf32>
    %2617 = vector.broadcast %11 : f32 to vector<1x128xf32>
    %2618 = arith.addf %2617, %2533 : vector<1x128xf32>
    %2619 = vector.broadcast %2616 : vector<1x1xf32> to vector<1x128xf32>
    %2620 = arith.mulf %2618, %2619 : vector<1x128xf32>
    %cst_537 = arith.constant 1.000000e+00 : f32
    %2621 = vector.broadcast %cst_537 : f32 to vector<1x128xf32>
    %2622 = arith.addf %2621, %2620 : vector<1x128xf32>
    %2623 = vector.broadcast %10 : f32 to vector<1x128xf32>
    %2624 = arith.mulf %2623, %2622 : vector<1x128xf32>
    %2625 = vector.broadcast %2609 : f32 to vector<1x128xf32>
    %2626 = arith.mulf %2533, %2625 : vector<1x128xf32>
    %2627 = vector.broadcast %2597 : f32 to vector<1x128xf32>
    %2628 = arith.addf %2627, %2626 : vector<1x128xf32>
    %2629 = arith.minimumf %2628, %2624 : vector<1x128xf32>
    %cst_538 = arith.constant 0.000000e+00 : f32
    %2630 = vector.broadcast %cst_538 : f32 to vector<1x128xf32>
    %2631 = arith.maximumf %2629, %2630 : vector<1x128xf32>
    %cst_539 = arith.constant 0.000000e+00 : f32
    %2632 = vector.broadcast %cst_539 : f32 to vector<1x128xf32>
    %2633 = arith.select %3, %2631, %2632 : vector<1x128xi1>, vector<1x128xf32>
    %cst_540 = arith.constant dense<0.000000e+00> : vector<1xf32>
    %2634 = vector.multi_reduction <add>, %2633, %cst_540 [1] : vector<1x128xf32> to vector<1xf32>
    %2635 = vector.shape_cast %2634 : vector<1xf32> to vector<1x1xf32>
    %2636 = vector.broadcast %cst_12 : f32 to vector<1x1xf32>
    %2637 = arith.mulf %2635, %2636 : vector<1x1xf32>
    %2638 = vector.broadcast %2606 : f32 to vector<1x1xf32>
    %2639 = arith.mulf %2637, %2638 : vector<1x1xf32>
    %2640 = arith.addf %2490, %2639 : vector<1x1xf32>
    %2641 = vector.broadcast %13 : f32 to vector<1x1xf32>
    %2642 = arith.mulf %2639, %2641 : vector<1x1xf32>
    %2643 = arith.addf %2495, %2642 : vector<1x1xf32>
    %2644 = vector.broadcast %12 : f32 to vector<1x1xf32>
    %2645 = arith.minimumf %2643, %2644 : vector<1x1xf32>
    %2646 = vector.broadcast %2597 : f32 to vector<1x128xf32>
    %2647 = arith.subf %2646, %2633 : vector<1x128xf32>
    %cst_541 = arith.constant 0.000000e+00 : f32
    %2648 = vector.broadcast %cst_541 : f32 to vector<1x128xf32>
    %2649 = arith.maximumf %2647, %2648 : vector<1x128xf32>
    %cst_542 = arith.constant 0.000000e+00 : f32
    %2650 = vector.broadcast %cst_542 : f32 to vector<1x128xf32>
    %2651 = arith.select %3, %2533, %2650 : vector<1x128xi1>, vector<1x128xf32>
    %cst_543 = arith.constant dense<0.000000e+00> : vector<1xf32>
    %2652 = vector.multi_reduction <add>, %2651, %cst_543 [1] : vector<1x128xf32> to vector<1xf32>
    %2653 = vector.shape_cast %2652 : vector<1xf32> to vector<1x1xf32>
    %2654 = vector.broadcast %cst_12 : f32 to vector<1x1xf32>
    %2655 = arith.mulf %2653, %2654 : vector<1x1xf32>
    %2656 = vector.broadcast %cst_13 : f32 to vector<1x1xf32>
    %2657 = arith.mulf %2655, %2656 : vector<1x1xf32>
    %2658 = vector.broadcast %2657 : vector<1x1xf32> to vector<1x128xf32>
    %2659 = arith.addf %14, %2658 : vector<1x128xf32>
    %2660 = arith.mulf %2649, %2659 : vector<1x128xf32>
    %2661 = vector.broadcast %2603 : f32 to vector<1x128xf32>
    %2662 = arith.addf %2660, %2661 : vector<1x128xf32>
    %c1_i32_544 = arith.constant 1 : i32
    %2663 = tpu.dynamic_rotate %2551 by %c1_i32_544 dim 1 : vector<1x128xf32>, i32 -> vector<1x128xf32>
    %2664 = vector.broadcast %2600 : f32 to vector<1x128xf32>
    %2665 = arith.select %5, %2664, %2663 : vector<1x128xi1>, vector<1x128xf32>
    %2666 = arith.subf %2665, %2551 : vector<1x128xf32>
    %2667 = arith.mulf %2666, %15 : vector<1x128xf32>
    %2668 = arith.addf %2667, %2662 : vector<1x128xf32>
    %2669 = vector.broadcast %2606 : f32 to vector<1x128xf32>
    %2670 = arith.mulf %2669, %2668 : vector<1x128xf32>
    %2671 = arith.addf %2525, %2670 : vector<1x128xf32>
    %cst_545 = arith.constant 0.000000e+00 : f32
    %2672 = vector.broadcast %cst_545 : f32 to vector<1x128xf32>
    %2673 = arith.maximumf %2671, %2672 : vector<1x128xf32>
    %cst_546 = arith.constant 0.000000e+00 : f32
    %2674 = vector.broadcast %cst_546 : f32 to vector<1x128xf32>
    %2675 = arith.select %3, %2673, %2674 : vector<1x128xi1>, vector<1x128xf32>
    %2676 = arith.mulf %14, %14 : vector<1x128xf32>
    %2677 = vector.broadcast %cst_14 : f32 to vector<1x128xf32>
    %2678 = arith.mulf %2677, %2675 : vector<1x128xf32>
    %2679 = arith.addf %2676, %2678 : vector<1x128xf32>
    %2680 = math.sqrt %2679 : vector<1x128xf32>
    %2681 = arith.subf %2680, %14 : vector<1x128xf32>
    %2682 = vector.broadcast %cst_15 : f32 to vector<1x128xf32>
    %2683 = arith.mulf %2681, %2682 : vector<1x128xf32>
    %2684 = vector.broadcast %8 : f32 to vector<1x128xf32>
    %2685 = arith.mulf %2683, %2684 : vector<1x128xf32>
    %2686 = arith.addf %14, %2685 : vector<1x128xf32>
    %2687 = vector.broadcast %cst_11 : f32 to vector<1x128xf32>
    %2688 = arith.maximumf %2686, %2687 : vector<1x128xf32>
    %2689 = tpu.reciprocal %2688 {approx = true} : vector<1x128xf32> -> vector<1x128xf32>
    %2690 = arith.mulf %2675, %2689 : vector<1x128xf32>
    %2691 = vector.broadcast %cst_11 : f32 to vector<1x128xf32>
    %2692 = arith.maximumf %2690, %2691 : vector<1x128xf32>
    %2693 = math.log %2692 : vector<1x128xf32>
    %2694 = vector.broadcast %cst_16 : f32 to vector<1x128xf32>
    %2695 = arith.mulf %2694, %2693 : vector<1x128xf32>
    %2696 = math.exp %2695 : vector<1x128xf32>
    %2697 = arith.mulf %2675, %2696 : vector<1x128xf32>
    %2698 = vector.broadcast %9 : f32 to vector<1x128xf32>
    %2699 = arith.mulf %2697, %2698 : vector<1x128xf32>
    %cst_547 = arith.constant 0.000000e+00 : f32
    %2700 = vector.broadcast %cst_547 : f32 to vector<1x128xf32>
    %2701 = arith.select %3, %2699, %2700 : vector<1x128xi1>, vector<1x128xf32>
    %cst_548 = arith.constant 0.000000e+00 : f32
    %2702 = vector.broadcast %cst_548 : f32 to vector<1x128xf32>
    %2703 = arith.select %7, %2701, %2702 : vector<1x128xi1>, vector<1x128xf32>
    %cst_549 = arith.constant dense<0.000000e+00> : vector<1xf32>
    %2704 = vector.multi_reduction <add>, %2703, %cst_549 [1] : vector<1x128xf32> to vector<1xf32>
    %2705 = vector.shape_cast %2704 : vector<1xf32> to vector<1x1xf32>
    %2706 = vector.broadcast %cst_11 : f32 to vector<1x128xf32>
    %2707 = arith.maximumf %2675, %2706 : vector<1x128xf32>
    %2708 = tpu.reciprocal %2707 {approx = true} : vector<1x128xf32> -> vector<1x128xf32>
    %2709 = arith.mulf %2701, %2708 : vector<1x128xf32>
    %2710 = vector.broadcast %cst_11 : f32 to vector<1x128xf32>
    %2711 = arith.cmpf ogt, %2675, %2710 : vector<1x128xf32>
    %2712 = vector.broadcast %2606 : f32 to vector<1x128xf32>
    %2713 = arith.mulf %2709, %2712 : vector<1x128xf32>
    %2714 = arith.mulf %2713, %15 : vector<1x128xf32>
    %cst_550 = arith.constant 0.000000e+00 : f32
    %2715 = vector.broadcast %cst_550 : f32 to vector<1x128xf32>
    %2716 = arith.select %2711, %2714, %2715 : vector<1x128xi1>, vector<1x128xf32>
    %cst_551 = arith.constant 0.000000e+00 : f32
    %2717 = vector.broadcast %cst_551 : f32 to vector<1x128xf32>
    %2718 = arith.select %3, %2716, %2717 : vector<1x128xi1>, vector<1x128xf32>
    %cst_552 = arith.constant dense<0xFF800000> : vector<1xf32>
    %2719 = vector.multi_reduction <maximumf>, %2718, %cst_552 [1] : vector<1x128xf32> to vector<1xf32>
    %2720 = vector.shape_cast %2719 : vector<1xf32> to vector<1x1xf32>
    %2721 = arith.maximumf %2571, %2720 : vector<1x1xf32>
    %c0_i32_553 = arith.constant 0 : i32
    %2722 = vector.broadcast %c0_i32_553 : i32 to vector<1x128xi32>
    %2723 = arith.cmpi eq, %1, %2722 : vector<1x128xi32>
    %cst_554 = arith.constant 0.000000e+00 : f32
    %2724 = vector.shape_cast %2705 : vector<1x1xf32> to vector<1x1xf32>
    %2725 = vector.broadcast %2724 : vector<1x1xf32> to vector<1x128xf32>
    %2726 = vector.broadcast %cst_554 : f32 to vector<1x128xf32>
    %2727 = arith.select %2723, %2725, %2726 : vector<1x128xi1>, vector<1x128xf32>
    %c1_i32_555 = arith.constant 1 : i32
    %2728 = vector.broadcast %c1_i32_555 : i32 to vector<1x128xi32>
    %2729 = arith.cmpi eq, %1, %2728 : vector<1x128xi32>
    %cst_556 = arith.constant 0.000000e+00 : f32
    %2730 = vector.shape_cast %2637 : vector<1x1xf32> to vector<1x1xf32>
    %2731 = vector.broadcast %2730 : vector<1x1xf32> to vector<1x128xf32>
    %2732 = vector.broadcast %cst_556 : f32 to vector<1x128xf32>
    %2733 = arith.select %2729, %2731, %2732 : vector<1x128xi1>, vector<1x128xf32>
    %2734 = arith.addf %2727, %2733 : vector<1x128xf32>
    %c2_i32_557 = arith.constant 2 : i32
    %2735 = vector.broadcast %c2_i32_557 : i32 to vector<1x128xi32>
    %2736 = arith.cmpi eq, %1, %2735 : vector<1x128xi32>
    %cst_558 = arith.constant 0.000000e+00 : f32
    %2737 = vector.shape_cast %2639 : vector<1x1xf32> to vector<1x1xf32>
    %2738 = vector.broadcast %2737 : vector<1x1xf32> to vector<1x128xf32>
    %2739 = vector.broadcast %cst_558 : f32 to vector<1x128xf32>
    %2740 = arith.select %2736, %2738, %2739 : vector<1x128xi1>, vector<1x128xf32>
    %2741 = arith.addf %2734, %2740 : vector<1x128xf32>
    %2742 = arith.index_cast %c17_i32 : i32 to index
    %c0_559 = arith.constant 0 : index
    %2743 = vector.load %arg9[%2742, %c0_559] : memref<24x128xf32, #tpu.memory_space<vmem>>, vector<1x128xf32>
    tpu.vector_store %arg9[%2742, %c0_559], %2741 {strides = array<i32>} : memref<24x128xf32, #tpu.memory_space<vmem>>, vector<1x128xf32>,
    %c18_i32 = arith.constant 18 : i32
    %c6_i32_560 = arith.constant 6 : i32
    %2744 = arith.muli %c18_i32, %c6_i32_560 : i32
    %c0_i32_561 = arith.constant 0 : i32
    %2745 = arith.addi %2744, %c0_i32_561 : i32
    %2746 = arith.index_cast %2745 : i32 to index
    %2747 = memref.load %arg1[%2746] : memref<144xf32, #tpu.memory_space<smem>>
    %c1_i32_562 = arith.constant 1 : i32
    %2748 = arith.addi %2744, %c1_i32_562 : i32
    %2749 = arith.index_cast %2748 : i32 to index
    %2750 = memref.load %arg1[%2749] : memref<144xf32, #tpu.memory_space<smem>>
    %c2_i32_563 = arith.constant 2 : i32
    %2751 = arith.addi %2744, %c2_i32_563 : i32
    %2752 = arith.index_cast %2751 : i32 to index
    %2753 = memref.load %arg1[%2752] : memref<144xf32, #tpu.memory_space<smem>>
    %c3_i32_564 = arith.constant 3 : i32
    %2754 = arith.addi %2744, %c3_i32_564 : i32
    %2755 = arith.index_cast %2754 : i32 to index
    %2756 = memref.load %arg1[%2755] : memref<144xf32, #tpu.memory_space<smem>>
    %c4_i32_565 = arith.constant 4 : i32
    %2757 = arith.addi %2744, %c4_i32_565 : i32
    %2758 = arith.index_cast %2757 : i32 to index
    %2759 = memref.load %arg1[%2758] : memref<144xf32, #tpu.memory_space<smem>>
    %2760 = vector.broadcast %12 : f32 to vector<1x1xf32>
    %2761 = arith.subf %2760, %2645 : vector<1x1xf32>
    %cst_566 = arith.constant 0.000000e+00 : f32
    %2762 = vector.broadcast %cst_566 : f32 to vector<1x1xf32>
    %2763 = arith.maximumf %2761, %2762 : vector<1x1xf32>
    %2764 = vector.broadcast %cst_11 : f32 to vector<1x1xf32>
    %2765 = arith.maximumf %2640, %2764 : vector<1x1xf32>
    %2766 = arith.divf %2763, %2765 : vector<1x1xf32>
    %2767 = vector.broadcast %11 : f32 to vector<1x128xf32>
    %2768 = arith.addf %2767, %2683 : vector<1x128xf32>
    %2769 = vector.broadcast %2766 : vector<1x1xf32> to vector<1x128xf32>
    %2770 = arith.mulf %2768, %2769 : vector<1x128xf32>
    %cst_567 = arith.constant 1.000000e+00 : f32
    %2771 = vector.broadcast %cst_567 : f32 to vector<1x128xf32>
    %2772 = arith.addf %2771, %2770 : vector<1x128xf32>
    %2773 = vector.broadcast %10 : f32 to vector<1x128xf32>
    %2774 = arith.mulf %2773, %2772 : vector<1x128xf32>
    %2775 = vector.broadcast %2759 : f32 to vector<1x128xf32>
    %2776 = arith.mulf %2683, %2775 : vector<1x128xf32>
    %2777 = vector.broadcast %2747 : f32 to vector<1x128xf32>
    %2778 = arith.addf %2777, %2776 : vector<1x128xf32>
    %2779 = arith.minimumf %2778, %2774 : vector<1x128xf32>
    %cst_568 = arith.constant 0.000000e+00 : f32
    %2780 = vector.broadcast %cst_568 : f32 to vector<1x128xf32>
    %2781 = arith.maximumf %2779, %2780 : vector<1x128xf32>
    %cst_569 = arith.constant 0.000000e+00 : f32
    %2782 = vector.broadcast %cst_569 : f32 to vector<1x128xf32>
    %2783 = arith.select %3, %2781, %2782 : vector<1x128xi1>, vector<1x128xf32>
    %cst_570 = arith.constant dense<0.000000e+00> : vector<1xf32>
    %2784 = vector.multi_reduction <add>, %2783, %cst_570 [1] : vector<1x128xf32> to vector<1xf32>
    %2785 = vector.shape_cast %2784 : vector<1xf32> to vector<1x1xf32>
    %2786 = vector.broadcast %cst_12 : f32 to vector<1x1xf32>
    %2787 = arith.mulf %2785, %2786 : vector<1x1xf32>
    %2788 = vector.broadcast %2756 : f32 to vector<1x1xf32>
    %2789 = arith.mulf %2787, %2788 : vector<1x1xf32>
    %2790 = arith.addf %2640, %2789 : vector<1x1xf32>
    %2791 = vector.broadcast %13 : f32 to vector<1x1xf32>
    %2792 = arith.mulf %2789, %2791 : vector<1x1xf32>
    %2793 = arith.addf %2645, %2792 : vector<1x1xf32>
    %2794 = vector.broadcast %12 : f32 to vector<1x1xf32>
    %2795 = arith.minimumf %2793, %2794 : vector<1x1xf32>
    %2796 = vector.broadcast %2747 : f32 to vector<1x128xf32>
    %2797 = arith.subf %2796, %2783 : vector<1x128xf32>
    %cst_571 = arith.constant 0.000000e+00 : f32
    %2798 = vector.broadcast %cst_571 : f32 to vector<1x128xf32>
    %2799 = arith.maximumf %2797, %2798 : vector<1x128xf32>
    %cst_572 = arith.constant 0.000000e+00 : f32
    %2800 = vector.broadcast %cst_572 : f32 to vector<1x128xf32>
    %2801 = arith.select %3, %2683, %2800 : vector<1x128xi1>, vector<1x128xf32>
    %cst_573 = arith.constant dense<0.000000e+00> : vector<1xf32>
    %2802 = vector.multi_reduction <add>, %2801, %cst_573 [1] : vector<1x128xf32> to vector<1xf32>
    %2803 = vector.shape_cast %2802 : vector<1xf32> to vector<1x1xf32>
    %2804 = vector.broadcast %cst_12 : f32 to vector<1x1xf32>
    %2805 = arith.mulf %2803, %2804 : vector<1x1xf32>
    %2806 = vector.broadcast %cst_13 : f32 to vector<1x1xf32>
    %2807 = arith.mulf %2805, %2806 : vector<1x1xf32>
    %2808 = vector.broadcast %2807 : vector<1x1xf32> to vector<1x128xf32>
    %2809 = arith.addf %14, %2808 : vector<1x128xf32>
    %2810 = arith.mulf %2799, %2809 : vector<1x128xf32>
    %2811 = vector.broadcast %2753 : f32 to vector<1x128xf32>
    %2812 = arith.addf %2810, %2811 : vector<1x128xf32>
    %c1_i32_574 = arith.constant 1 : i32
    %2813 = tpu.dynamic_rotate %2701 by %c1_i32_574 dim 1 : vector<1x128xf32>, i32 -> vector<1x128xf32>
    %2814 = vector.broadcast %2750 : f32 to vector<1x128xf32>
    %2815 = arith.select %5, %2814, %2813 : vector<1x128xi1>, vector<1x128xf32>
    %2816 = arith.subf %2815, %2701 : vector<1x128xf32>
    %2817 = arith.mulf %2816, %15 : vector<1x128xf32>
    %2818 = arith.addf %2817, %2812 : vector<1x128xf32>
    %2819 = vector.broadcast %2756 : f32 to vector<1x128xf32>
    %2820 = arith.mulf %2819, %2818 : vector<1x128xf32>
    %2821 = arith.addf %2675, %2820 : vector<1x128xf32>
    %cst_575 = arith.constant 0.000000e+00 : f32
    %2822 = vector.broadcast %cst_575 : f32 to vector<1x128xf32>
    %2823 = arith.maximumf %2821, %2822 : vector<1x128xf32>
    %cst_576 = arith.constant 0.000000e+00 : f32
    %2824 = vector.broadcast %cst_576 : f32 to vector<1x128xf32>
    %2825 = arith.select %3, %2823, %2824 : vector<1x128xi1>, vector<1x128xf32>
    %2826 = arith.mulf %14, %14 : vector<1x128xf32>
    %2827 = vector.broadcast %cst_14 : f32 to vector<1x128xf32>
    %2828 = arith.mulf %2827, %2825 : vector<1x128xf32>
    %2829 = arith.addf %2826, %2828 : vector<1x128xf32>
    %2830 = math.sqrt %2829 : vector<1x128xf32>
    %2831 = arith.subf %2830, %14 : vector<1x128xf32>
    %2832 = vector.broadcast %cst_15 : f32 to vector<1x128xf32>
    %2833 = arith.mulf %2831, %2832 : vector<1x128xf32>
    %2834 = vector.broadcast %8 : f32 to vector<1x128xf32>
    %2835 = arith.mulf %2833, %2834 : vector<1x128xf32>
    %2836 = arith.addf %14, %2835 : vector<1x128xf32>
    %2837 = vector.broadcast %cst_11 : f32 to vector<1x128xf32>
    %2838 = arith.maximumf %2836, %2837 : vector<1x128xf32>
    %2839 = tpu.reciprocal %2838 {approx = true} : vector<1x128xf32> -> vector<1x128xf32>
    %2840 = arith.mulf %2825, %2839 : vector<1x128xf32>
    %2841 = vector.broadcast %cst_11 : f32 to vector<1x128xf32>
    %2842 = arith.maximumf %2840, %2841 : vector<1x128xf32>
    %2843 = math.log %2842 : vector<1x128xf32>
    %2844 = vector.broadcast %cst_16 : f32 to vector<1x128xf32>
    %2845 = arith.mulf %2844, %2843 : vector<1x128xf32>
    %2846 = math.exp %2845 : vector<1x128xf32>
    %2847 = arith.mulf %2825, %2846 : vector<1x128xf32>
    %2848 = vector.broadcast %9 : f32 to vector<1x128xf32>
    %2849 = arith.mulf %2847, %2848 : vector<1x128xf32>
    %cst_577 = arith.constant 0.000000e+00 : f32
    %2850 = vector.broadcast %cst_577 : f32 to vector<1x128xf32>
    %2851 = arith.select %3, %2849, %2850 : vector<1x128xi1>, vector<1x128xf32>
    %cst_578 = arith.constant 0.000000e+00 : f32
    %2852 = vector.broadcast %cst_578 : f32 to vector<1x128xf32>
    %2853 = arith.select %7, %2851, %2852 : vector<1x128xi1>, vector<1x128xf32>
    %cst_579 = arith.constant dense<0.000000e+00> : vector<1xf32>
    %2854 = vector.multi_reduction <add>, %2853, %cst_579 [1] : vector<1x128xf32> to vector<1xf32>
    %2855 = vector.shape_cast %2854 : vector<1xf32> to vector<1x1xf32>
    %2856 = vector.broadcast %cst_11 : f32 to vector<1x128xf32>
    %2857 = arith.maximumf %2825, %2856 : vector<1x128xf32>
    %2858 = tpu.reciprocal %2857 {approx = true} : vector<1x128xf32> -> vector<1x128xf32>
    %2859 = arith.mulf %2851, %2858 : vector<1x128xf32>
    %2860 = vector.broadcast %cst_11 : f32 to vector<1x128xf32>
    %2861 = arith.cmpf ogt, %2825, %2860 : vector<1x128xf32>
    %2862 = vector.broadcast %2756 : f32 to vector<1x128xf32>
    %2863 = arith.mulf %2859, %2862 : vector<1x128xf32>
    %2864 = arith.mulf %2863, %15 : vector<1x128xf32>
    %cst_580 = arith.constant 0.000000e+00 : f32
    %2865 = vector.broadcast %cst_580 : f32 to vector<1x128xf32>
    %2866 = arith.select %2861, %2864, %2865 : vector<1x128xi1>, vector<1x128xf32>
    %cst_581 = arith.constant 0.000000e+00 : f32
    %2867 = vector.broadcast %cst_581 : f32 to vector<1x128xf32>
    %2868 = arith.select %3, %2866, %2867 : vector<1x128xi1>, vector<1x128xf32>
    %cst_582 = arith.constant dense<0xFF800000> : vector<1xf32>
    %2869 = vector.multi_reduction <maximumf>, %2868, %cst_582 [1] : vector<1x128xf32> to vector<1xf32>
    %2870 = vector.shape_cast %2869 : vector<1xf32> to vector<1x1xf32>
    %2871 = arith.maximumf %2721, %2870 : vector<1x1xf32>
    %c0_i32_583 = arith.constant 0 : i32
    %2872 = vector.broadcast %c0_i32_583 : i32 to vector<1x128xi32>
    %2873 = arith.cmpi eq, %1, %2872 : vector<1x128xi32>
    %cst_584 = arith.constant 0.000000e+00 : f32
    %2874 = vector.shape_cast %2855 : vector<1x1xf32> to vector<1x1xf32>
    %2875 = vector.broadcast %2874 : vector<1x1xf32> to vector<1x128xf32>
    %2876 = vector.broadcast %cst_584 : f32 to vector<1x128xf32>
    %2877 = arith.select %2873, %2875, %2876 : vector<1x128xi1>, vector<1x128xf32>
    %c1_i32_585 = arith.constant 1 : i32
    %2878 = vector.broadcast %c1_i32_585 : i32 to vector<1x128xi32>
    %2879 = arith.cmpi eq, %1, %2878 : vector<1x128xi32>
    %cst_586 = arith.constant 0.000000e+00 : f32
    %2880 = vector.shape_cast %2787 : vector<1x1xf32> to vector<1x1xf32>
    %2881 = vector.broadcast %2880 : vector<1x1xf32> to vector<1x128xf32>
    %2882 = vector.broadcast %cst_586 : f32 to vector<1x128xf32>
    %2883 = arith.select %2879, %2881, %2882 : vector<1x128xi1>, vector<1x128xf32>
    %2884 = arith.addf %2877, %2883 : vector<1x128xf32>
    %c2_i32_587 = arith.constant 2 : i32
    %2885 = vector.broadcast %c2_i32_587 : i32 to vector<1x128xi32>
    %2886 = arith.cmpi eq, %1, %2885 : vector<1x128xi32>
    %cst_588 = arith.constant 0.000000e+00 : f32
    %2887 = vector.shape_cast %2789 : vector<1x1xf32> to vector<1x1xf32>
    %2888 = vector.broadcast %2887 : vector<1x1xf32> to vector<1x128xf32>
    %2889 = vector.broadcast %cst_588 : f32 to vector<1x128xf32>
    %2890 = arith.select %2886, %2888, %2889 : vector<1x128xi1>, vector<1x128xf32>
    %2891 = arith.addf %2884, %2890 : vector<1x128xf32>
    %2892 = arith.index_cast %c18_i32 : i32 to index
    %c0_589 = arith.constant 0 : index
    %2893 = vector.load %arg9[%2892, %c0_589] : memref<24x128xf32, #tpu.memory_space<vmem>>, vector<1x128xf32>
    tpu.vector_store %arg9[%2892, %c0_589], %2891 {strides = array<i32>} : memref<24x128xf32, #tpu.memory_space<vmem>>, vector<1x128xf32>,
    %c19_i32 = arith.constant 19 : i32
    %c6_i32_590 = arith.constant 6 : i32
    %2894 = arith.muli %c19_i32, %c6_i32_590 : i32
    %c0_i32_591 = arith.constant 0 : i32
    %2895 = arith.addi %2894, %c0_i32_591 : i32
    %2896 = arith.index_cast %2895 : i32 to index
    %2897 = memref.load %arg1[%2896] : memref<144xf32, #tpu.memory_space<smem>>
    %c1_i32_592 = arith.constant 1 : i32
    %2898 = arith.addi %2894, %c1_i32_592 : i32
    %2899 = arith.index_cast %2898 : i32 to index
    %2900 = memref.load %arg1[%2899] : memref<144xf32, #tpu.memory_space<smem>>
    %c2_i32_593 = arith.constant 2 : i32
    %2901 = arith.addi %2894, %c2_i32_593 : i32
    %2902 = arith.index_cast %2901 : i32 to index
    %2903 = memref.load %arg1[%2902] : memref<144xf32, #tpu.memory_space<smem>>
    %c3_i32_594 = arith.constant 3 : i32
    %2904 = arith.addi %2894, %c3_i32_594 : i32
    %2905 = arith.index_cast %2904 : i32 to index
    %2906 = memref.load %arg1[%2905] : memref<144xf32, #tpu.memory_space<smem>>
    %c4_i32_595 = arith.constant 4 : i32
    %2907 = arith.addi %2894, %c4_i32_595 : i32
    %2908 = arith.index_cast %2907 : i32 to index
    %2909 = memref.load %arg1[%2908] : memref<144xf32, #tpu.memory_space<smem>>
    %2910 = vector.broadcast %12 : f32 to vector<1x1xf32>
    %2911 = arith.subf %2910, %2795 : vector<1x1xf32>
    %cst_596 = arith.constant 0.000000e+00 : f32
    %2912 = vector.broadcast %cst_596 : f32 to vector<1x1xf32>
    %2913 = arith.maximumf %2911, %2912 : vector<1x1xf32>
    %2914 = vector.broadcast %cst_11 : f32 to vector<1x1xf32>
    %2915 = arith.maximumf %2790, %2914 : vector<1x1xf32>
    %2916 = arith.divf %2913, %2915 : vector<1x1xf32>
    %2917 = vector.broadcast %11 : f32 to vector<1x128xf32>
    %2918 = arith.addf %2917, %2833 : vector<1x128xf32>
    %2919 = vector.broadcast %2916 : vector<1x1xf32> to vector<1x128xf32>
    %2920 = arith.mulf %2918, %2919 : vector<1x128xf32>
    %cst_597 = arith.constant 1.000000e+00 : f32
    %2921 = vector.broadcast %cst_597 : f32 to vector<1x128xf32>
    %2922 = arith.addf %2921, %2920 : vector<1x128xf32>
    %2923 = vector.broadcast %10 : f32 to vector<1x128xf32>
    %2924 = arith.mulf %2923, %2922 : vector<1x128xf32>
    %2925 = vector.broadcast %2909 : f32 to vector<1x128xf32>
    %2926 = arith.mulf %2833, %2925 : vector<1x128xf32>
    %2927 = vector.broadcast %2897 : f32 to vector<1x128xf32>
    %2928 = arith.addf %2927, %2926 : vector<1x128xf32>
    %2929 = arith.minimumf %2928, %2924 : vector<1x128xf32>
    %cst_598 = arith.constant 0.000000e+00 : f32
    %2930 = vector.broadcast %cst_598 : f32 to vector<1x128xf32>
    %2931 = arith.maximumf %2929, %2930 : vector<1x128xf32>
    %cst_599 = arith.constant 0.000000e+00 : f32
    %2932 = vector.broadcast %cst_599 : f32 to vector<1x128xf32>
    %2933 = arith.select %3, %2931, %2932 : vector<1x128xi1>, vector<1x128xf32>
    %cst_600 = arith.constant dense<0.000000e+00> : vector<1xf32>
    %2934 = vector.multi_reduction <add>, %2933, %cst_600 [1] : vector<1x128xf32> to vector<1xf32>
    %2935 = vector.shape_cast %2934 : vector<1xf32> to vector<1x1xf32>
    %2936 = vector.broadcast %cst_12 : f32 to vector<1x1xf32>
    %2937 = arith.mulf %2935, %2936 : vector<1x1xf32>
    %2938 = vector.broadcast %2906 : f32 to vector<1x1xf32>
    %2939 = arith.mulf %2937, %2938 : vector<1x1xf32>
    %2940 = arith.addf %2790, %2939 : vector<1x1xf32>
    %2941 = vector.broadcast %13 : f32 to vector<1x1xf32>
    %2942 = arith.mulf %2939, %2941 : vector<1x1xf32>
    %2943 = arith.addf %2795, %2942 : vector<1x1xf32>
    %2944 = vector.broadcast %12 : f32 to vector<1x1xf32>
    %2945 = arith.minimumf %2943, %2944 : vector<1x1xf32>
    %2946 = vector.broadcast %2897 : f32 to vector<1x128xf32>
    %2947 = arith.subf %2946, %2933 : vector<1x128xf32>
    %cst_601 = arith.constant 0.000000e+00 : f32
    %2948 = vector.broadcast %cst_601 : f32 to vector<1x128xf32>
    %2949 = arith.maximumf %2947, %2948 : vector<1x128xf32>
    %cst_602 = arith.constant 0.000000e+00 : f32
    %2950 = vector.broadcast %cst_602 : f32 to vector<1x128xf32>
    %2951 = arith.select %3, %2833, %2950 : vector<1x128xi1>, vector<1x128xf32>
    %cst_603 = arith.constant dense<0.000000e+00> : vector<1xf32>
    %2952 = vector.multi_reduction <add>, %2951, %cst_603 [1] : vector<1x128xf32> to vector<1xf32>
    %2953 = vector.shape_cast %2952 : vector<1xf32> to vector<1x1xf32>
    %2954 = vector.broadcast %cst_12 : f32 to vector<1x1xf32>
    %2955 = arith.mulf %2953, %2954 : vector<1x1xf32>
    %2956 = vector.broadcast %cst_13 : f32 to vector<1x1xf32>
    %2957 = arith.mulf %2955, %2956 : vector<1x1xf32>
    %2958 = vector.broadcast %2957 : vector<1x1xf32> to vector<1x128xf32>
    %2959 = arith.addf %14, %2958 : vector<1x128xf32>
    %2960 = arith.mulf %2949, %2959 : vector<1x128xf32>
    %2961 = vector.broadcast %2903 : f32 to vector<1x128xf32>
    %2962 = arith.addf %2960, %2961 : vector<1x128xf32>
    %c1_i32_604 = arith.constant 1 : i32
    %2963 = tpu.dynamic_rotate %2851 by %c1_i32_604 dim 1 : vector<1x128xf32>, i32 -> vector<1x128xf32>
    %2964 = vector.broadcast %2900 : f32 to vector<1x128xf32>
    %2965 = arith.select %5, %2964, %2963 : vector<1x128xi1>, vector<1x128xf32>
    %2966 = arith.subf %2965, %2851 : vector<1x128xf32>
    %2967 = arith.mulf %2966, %15 : vector<1x128xf32>
    %2968 = arith.addf %2967, %2962 : vector<1x128xf32>
    %2969 = vector.broadcast %2906 : f32 to vector<1x128xf32>
    %2970 = arith.mulf %2969, %2968 : vector<1x128xf32>
    %2971 = arith.addf %2825, %2970 : vector<1x128xf32>
    %cst_605 = arith.constant 0.000000e+00 : f32
    %2972 = vector.broadcast %cst_605 : f32 to vector<1x128xf32>
    %2973 = arith.maximumf %2971, %2972 : vector<1x128xf32>
    %cst_606 = arith.constant 0.000000e+00 : f32
    %2974 = vector.broadcast %cst_606 : f32 to vector<1x128xf32>
    %2975 = arith.select %3, %2973, %2974 : vector<1x128xi1>, vector<1x128xf32>
    %2976 = arith.mulf %14, %14 : vector<1x128xf32>
    %2977 = vector.broadcast %cst_14 : f32 to vector<1x128xf32>
    %2978 = arith.mulf %2977, %2975 : vector<1x128xf32>
    %2979 = arith.addf %2976, %2978 : vector<1x128xf32>
    %2980 = math.sqrt %2979 : vector<1x128xf32>
    %2981 = arith.subf %2980, %14 : vector<1x128xf32>
    %2982 = vector.broadcast %cst_15 : f32 to vector<1x128xf32>
    %2983 = arith.mulf %2981, %2982 : vector<1x128xf32>
    %2984 = vector.broadcast %8 : f32 to vector<1x128xf32>
    %2985 = arith.mulf %2983, %2984 : vector<1x128xf32>
    %2986 = arith.addf %14, %2985 : vector<1x128xf32>
    %2987 = vector.broadcast %cst_11 : f32 to vector<1x128xf32>
    %2988 = arith.maximumf %2986, %2987 : vector<1x128xf32>
    %2989 = tpu.reciprocal %2988 {approx = true} : vector<1x128xf32> -> vector<1x128xf32>
    %2990 = arith.mulf %2975, %2989 : vector<1x128xf32>
    %2991 = vector.broadcast %cst_11 : f32 to vector<1x128xf32>
    %2992 = arith.maximumf %2990, %2991 : vector<1x128xf32>
    %2993 = math.log %2992 : vector<1x128xf32>
    %2994 = vector.broadcast %cst_16 : f32 to vector<1x128xf32>
    %2995 = arith.mulf %2994, %2993 : vector<1x128xf32>
    %2996 = math.exp %2995 : vector<1x128xf32>
    %2997 = arith.mulf %2975, %2996 : vector<1x128xf32>
    %2998 = vector.broadcast %9 : f32 to vector<1x128xf32>
    %2999 = arith.mulf %2997, %2998 : vector<1x128xf32>
    %cst_607 = arith.constant 0.000000e+00 : f32
    %3000 = vector.broadcast %cst_607 : f32 to vector<1x128xf32>
    %3001 = arith.select %3, %2999, %3000 : vector<1x128xi1>, vector<1x128xf32>
    %cst_608 = arith.constant 0.000000e+00 : f32
    %3002 = vector.broadcast %cst_608 : f32 to vector<1x128xf32>
    %3003 = arith.select %7, %3001, %3002 : vector<1x128xi1>, vector<1x128xf32>
    %cst_609 = arith.constant dense<0.000000e+00> : vector<1xf32>
    %3004 = vector.multi_reduction <add>, %3003, %cst_609 [1] : vector<1x128xf32> to vector<1xf32>
    %3005 = vector.shape_cast %3004 : vector<1xf32> to vector<1x1xf32>
    %3006 = vector.broadcast %cst_11 : f32 to vector<1x128xf32>
    %3007 = arith.maximumf %2975, %3006 : vector<1x128xf32>
    %3008 = tpu.reciprocal %3007 {approx = true} : vector<1x128xf32> -> vector<1x128xf32>
    %3009 = arith.mulf %3001, %3008 : vector<1x128xf32>
    %3010 = vector.broadcast %cst_11 : f32 to vector<1x128xf32>
    %3011 = arith.cmpf ogt, %2975, %3010 : vector<1x128xf32>
    %3012 = vector.broadcast %2906 : f32 to vector<1x128xf32>
    %3013 = arith.mulf %3009, %3012 : vector<1x128xf32>
    %3014 = arith.mulf %3013, %15 : vector<1x128xf32>
    %cst_610 = arith.constant 0.000000e+00 : f32
    %3015 = vector.broadcast %cst_610 : f32 to vector<1x128xf32>
    %3016 = arith.select %3011, %3014, %3015 : vector<1x128xi1>, vector<1x128xf32>
    %cst_611 = arith.constant 0.000000e+00 : f32
    %3017 = vector.broadcast %cst_611 : f32 to vector<1x128xf32>
    %3018 = arith.select %3, %3016, %3017 : vector<1x128xi1>, vector<1x128xf32>
    %cst_612 = arith.constant dense<0xFF800000> : vector<1xf32>
    %3019 = vector.multi_reduction <maximumf>, %3018, %cst_612 [1] : vector<1x128xf32> to vector<1xf32>
    %3020 = vector.shape_cast %3019 : vector<1xf32> to vector<1x1xf32>
    %3021 = arith.maximumf %2871, %3020 : vector<1x1xf32>
    %c0_i32_613 = arith.constant 0 : i32
    %3022 = vector.broadcast %c0_i32_613 : i32 to vector<1x128xi32>
    %3023 = arith.cmpi eq, %1, %3022 : vector<1x128xi32>
    %cst_614 = arith.constant 0.000000e+00 : f32
    %3024 = vector.shape_cast %3005 : vector<1x1xf32> to vector<1x1xf32>
    %3025 = vector.broadcast %3024 : vector<1x1xf32> to vector<1x128xf32>
    %3026 = vector.broadcast %cst_614 : f32 to vector<1x128xf32>
    %3027 = arith.select %3023, %3025, %3026 : vector<1x128xi1>, vector<1x128xf32>
    %c1_i32_615 = arith.constant 1 : i32
    %3028 = vector.broadcast %c1_i32_615 : i32 to vector<1x128xi32>
    %3029 = arith.cmpi eq, %1, %3028 : vector<1x128xi32>
    %cst_616 = arith.constant 0.000000e+00 : f32
    %3030 = vector.shape_cast %2937 : vector<1x1xf32> to vector<1x1xf32>
    %3031 = vector.broadcast %3030 : vector<1x1xf32> to vector<1x128xf32>
    %3032 = vector.broadcast %cst_616 : f32 to vector<1x128xf32>
    %3033 = arith.select %3029, %3031, %3032 : vector<1x128xi1>, vector<1x128xf32>
    %3034 = arith.addf %3027, %3033 : vector<1x128xf32>
    %c2_i32_617 = arith.constant 2 : i32
    %3035 = vector.broadcast %c2_i32_617 : i32 to vector<1x128xi32>
    %3036 = arith.cmpi eq, %1, %3035 : vector<1x128xi32>
    %cst_618 = arith.constant 0.000000e+00 : f32
    %3037 = vector.shape_cast %2939 : vector<1x1xf32> to vector<1x1xf32>
    %3038 = vector.broadcast %3037 : vector<1x1xf32> to vector<1x128xf32>
    %3039 = vector.broadcast %cst_618 : f32 to vector<1x128xf32>
    %3040 = arith.select %3036, %3038, %3039 : vector<1x128xi1>, vector<1x128xf32>
    %3041 = arith.addf %3034, %3040 : vector<1x128xf32>
    %3042 = arith.index_cast %c19_i32 : i32 to index
    %c0_619 = arith.constant 0 : index
    %3043 = vector.load %arg9[%3042, %c0_619] : memref<24x128xf32, #tpu.memory_space<vmem>>, vector<1x128xf32>
    tpu.vector_store %arg9[%3042, %c0_619], %3041 {strides = array<i32>} : memref<24x128xf32, #tpu.memory_space<vmem>>, vector<1x128xf32>,
    %c20_i32 = arith.constant 20 : i32
    %c6_i32_620 = arith.constant 6 : i32
    %3044 = arith.muli %c20_i32, %c6_i32_620 : i32
    %c0_i32_621 = arith.constant 0 : i32
    %3045 = arith.addi %3044, %c0_i32_621 : i32
    %3046 = arith.index_cast %3045 : i32 to index
    %3047 = memref.load %arg1[%3046] : memref<144xf32, #tpu.memory_space<smem>>
    %c1_i32_622 = arith.constant 1 : i32
    %3048 = arith.addi %3044, %c1_i32_622 : i32
    %3049 = arith.index_cast %3048 : i32 to index
    %3050 = memref.load %arg1[%3049] : memref<144xf32, #tpu.memory_space<smem>>
    %c2_i32_623 = arith.constant 2 : i32
    %3051 = arith.addi %3044, %c2_i32_623 : i32
    %3052 = arith.index_cast %3051 : i32 to index
    %3053 = memref.load %arg1[%3052] : memref<144xf32, #tpu.memory_space<smem>>
    %c3_i32_624 = arith.constant 3 : i32
    %3054 = arith.addi %3044, %c3_i32_624 : i32
    %3055 = arith.index_cast %3054 : i32 to index
    %3056 = memref.load %arg1[%3055] : memref<144xf32, #tpu.memory_space<smem>>
    %c4_i32_625 = arith.constant 4 : i32
    %3057 = arith.addi %3044, %c4_i32_625 : i32
    %3058 = arith.index_cast %3057 : i32 to index
    %3059 = memref.load %arg1[%3058] : memref<144xf32, #tpu.memory_space<smem>>
    %3060 = vector.broadcast %12 : f32 to vector<1x1xf32>
    %3061 = arith.subf %3060, %2945 : vector<1x1xf32>
    %cst_626 = arith.constant 0.000000e+00 : f32
    %3062 = vector.broadcast %cst_626 : f32 to vector<1x1xf32>
    %3063 = arith.maximumf %3061, %3062 : vector<1x1xf32>
    %3064 = vector.broadcast %cst_11 : f32 to vector<1x1xf32>
    %3065 = arith.maximumf %2940, %3064 : vector<1x1xf32>
    %3066 = arith.divf %3063, %3065 : vector<1x1xf32>
    %3067 = vector.broadcast %11 : f32 to vector<1x128xf32>
    %3068 = arith.addf %3067, %2983 : vector<1x128xf32>
    %3069 = vector.broadcast %3066 : vector<1x1xf32> to vector<1x128xf32>
    %3070 = arith.mulf %3068, %3069 : vector<1x128xf32>
    %cst_627 = arith.constant 1.000000e+00 : f32
    %3071 = vector.broadcast %cst_627 : f32 to vector<1x128xf32>
    %3072 = arith.addf %3071, %3070 : vector<1x128xf32>
    %3073 = vector.broadcast %10 : f32 to vector<1x128xf32>
    %3074 = arith.mulf %3073, %3072 : vector<1x128xf32>
    %3075 = vector.broadcast %3059 : f32 to vector<1x128xf32>
    %3076 = arith.mulf %2983, %3075 : vector<1x128xf32>
    %3077 = vector.broadcast %3047 : f32 to vector<1x128xf32>
    %3078 = arith.addf %3077, %3076 : vector<1x128xf32>
    %3079 = arith.minimumf %3078, %3074 : vector<1x128xf32>
    %cst_628 = arith.constant 0.000000e+00 : f32
    %3080 = vector.broadcast %cst_628 : f32 to vector<1x128xf32>
    %3081 = arith.maximumf %3079, %3080 : vector<1x128xf32>
    %cst_629 = arith.constant 0.000000e+00 : f32
    %3082 = vector.broadcast %cst_629 : f32 to vector<1x128xf32>
    %3083 = arith.select %3, %3081, %3082 : vector<1x128xi1>, vector<1x128xf32>
    %cst_630 = arith.constant dense<0.000000e+00> : vector<1xf32>
    %3084 = vector.multi_reduction <add>, %3083, %cst_630 [1] : vector<1x128xf32> to vector<1xf32>
    %3085 = vector.shape_cast %3084 : vector<1xf32> to vector<1x1xf32>
    %3086 = vector.broadcast %cst_12 : f32 to vector<1x1xf32>
    %3087 = arith.mulf %3085, %3086 : vector<1x1xf32>
    %3088 = vector.broadcast %3056 : f32 to vector<1x1xf32>
    %3089 = arith.mulf %3087, %3088 : vector<1x1xf32>
    %3090 = arith.addf %2940, %3089 : vector<1x1xf32>
    %3091 = vector.broadcast %13 : f32 to vector<1x1xf32>
    %3092 = arith.mulf %3089, %3091 : vector<1x1xf32>
    %3093 = arith.addf %2945, %3092 : vector<1x1xf32>
    %3094 = vector.broadcast %12 : f32 to vector<1x1xf32>
    %3095 = arith.minimumf %3093, %3094 : vector<1x1xf32>
    %3096 = vector.broadcast %3047 : f32 to vector<1x128xf32>
    %3097 = arith.subf %3096, %3083 : vector<1x128xf32>
    %cst_631 = arith.constant 0.000000e+00 : f32
    %3098 = vector.broadcast %cst_631 : f32 to vector<1x128xf32>
    %3099 = arith.maximumf %3097, %3098 : vector<1x128xf32>
    %cst_632 = arith.constant 0.000000e+00 : f32
    %3100 = vector.broadcast %cst_632 : f32 to vector<1x128xf32>
    %3101 = arith.select %3, %2983, %3100 : vector<1x128xi1>, vector<1x128xf32>
    %cst_633 = arith.constant dense<0.000000e+00> : vector<1xf32>
    %3102 = vector.multi_reduction <add>, %3101, %cst_633 [1] : vector<1x128xf32> to vector<1xf32>
    %3103 = vector.shape_cast %3102 : vector<1xf32> to vector<1x1xf32>
    %3104 = vector.broadcast %cst_12 : f32 to vector<1x1xf32>
    %3105 = arith.mulf %3103, %3104 : vector<1x1xf32>
    %3106 = vector.broadcast %cst_13 : f32 to vector<1x1xf32>
    %3107 = arith.mulf %3105, %3106 : vector<1x1xf32>
    %3108 = vector.broadcast %3107 : vector<1x1xf32> to vector<1x128xf32>
    %3109 = arith.addf %14, %3108 : vector<1x128xf32>
    %3110 = arith.mulf %3099, %3109 : vector<1x128xf32>
    %3111 = vector.broadcast %3053 : f32 to vector<1x128xf32>
    %3112 = arith.addf %3110, %3111 : vector<1x128xf32>
    %c1_i32_634 = arith.constant 1 : i32
    %3113 = tpu.dynamic_rotate %3001 by %c1_i32_634 dim 1 : vector<1x128xf32>, i32 -> vector<1x128xf32>
    %3114 = vector.broadcast %3050 : f32 to vector<1x128xf32>
    %3115 = arith.select %5, %3114, %3113 : vector<1x128xi1>, vector<1x128xf32>
    %3116 = arith.subf %3115, %3001 : vector<1x128xf32>
    %3117 = arith.mulf %3116, %15 : vector<1x128xf32>
    %3118 = arith.addf %3117, %3112 : vector<1x128xf32>
    %3119 = vector.broadcast %3056 : f32 to vector<1x128xf32>
    %3120 = arith.mulf %3119, %3118 : vector<1x128xf32>
    %3121 = arith.addf %2975, %3120 : vector<1x128xf32>
    %cst_635 = arith.constant 0.000000e+00 : f32
    %3122 = vector.broadcast %cst_635 : f32 to vector<1x128xf32>
    %3123 = arith.maximumf %3121, %3122 : vector<1x128xf32>
    %cst_636 = arith.constant 0.000000e+00 : f32
    %3124 = vector.broadcast %cst_636 : f32 to vector<1x128xf32>
    %3125 = arith.select %3, %3123, %3124 : vector<1x128xi1>, vector<1x128xf32>
    %3126 = arith.mulf %14, %14 : vector<1x128xf32>
    %3127 = vector.broadcast %cst_14 : f32 to vector<1x128xf32>
    %3128 = arith.mulf %3127, %3125 : vector<1x128xf32>
    %3129 = arith.addf %3126, %3128 : vector<1x128xf32>
    %3130 = math.sqrt %3129 : vector<1x128xf32>
    %3131 = arith.subf %3130, %14 : vector<1x128xf32>
    %3132 = vector.broadcast %cst_15 : f32 to vector<1x128xf32>
    %3133 = arith.mulf %3131, %3132 : vector<1x128xf32>
    %3134 = vector.broadcast %8 : f32 to vector<1x128xf32>
    %3135 = arith.mulf %3133, %3134 : vector<1x128xf32>
    %3136 = arith.addf %14, %3135 : vector<1x128xf32>
    %3137 = vector.broadcast %cst_11 : f32 to vector<1x128xf32>
    %3138 = arith.maximumf %3136, %3137 : vector<1x128xf32>
    %3139 = tpu.reciprocal %3138 {approx = true} : vector<1x128xf32> -> vector<1x128xf32>
    %3140 = arith.mulf %3125, %3139 : vector<1x128xf32>
    %3141 = vector.broadcast %cst_11 : f32 to vector<1x128xf32>
    %3142 = arith.maximumf %3140, %3141 : vector<1x128xf32>
    %3143 = math.log %3142 : vector<1x128xf32>
    %3144 = vector.broadcast %cst_16 : f32 to vector<1x128xf32>
    %3145 = arith.mulf %3144, %3143 : vector<1x128xf32>
    %3146 = math.exp %3145 : vector<1x128xf32>
    %3147 = arith.mulf %3125, %3146 : vector<1x128xf32>
    %3148 = vector.broadcast %9 : f32 to vector<1x128xf32>
    %3149 = arith.mulf %3147, %3148 : vector<1x128xf32>
    %cst_637 = arith.constant 0.000000e+00 : f32
    %3150 = vector.broadcast %cst_637 : f32 to vector<1x128xf32>
    %3151 = arith.select %3, %3149, %3150 : vector<1x128xi1>, vector<1x128xf32>
    %cst_638 = arith.constant 0.000000e+00 : f32
    %3152 = vector.broadcast %cst_638 : f32 to vector<1x128xf32>
    %3153 = arith.select %7, %3151, %3152 : vector<1x128xi1>, vector<1x128xf32>
    %cst_639 = arith.constant dense<0.000000e+00> : vector<1xf32>
    %3154 = vector.multi_reduction <add>, %3153, %cst_639 [1] : vector<1x128xf32> to vector<1xf32>
    %3155 = vector.shape_cast %3154 : vector<1xf32> to vector<1x1xf32>
    %3156 = vector.broadcast %cst_11 : f32 to vector<1x128xf32>
    %3157 = arith.maximumf %3125, %3156 : vector<1x128xf32>
    %3158 = tpu.reciprocal %3157 {approx = true} : vector<1x128xf32> -> vector<1x128xf32>
    %3159 = arith.mulf %3151, %3158 : vector<1x128xf32>
    %3160 = vector.broadcast %cst_11 : f32 to vector<1x128xf32>
    %3161 = arith.cmpf ogt, %3125, %3160 : vector<1x128xf32>
    %3162 = vector.broadcast %3056 : f32 to vector<1x128xf32>
    %3163 = arith.mulf %3159, %3162 : vector<1x128xf32>
    %3164 = arith.mulf %3163, %15 : vector<1x128xf32>
    %cst_640 = arith.constant 0.000000e+00 : f32
    %3165 = vector.broadcast %cst_640 : f32 to vector<1x128xf32>
    %3166 = arith.select %3161, %3164, %3165 : vector<1x128xi1>, vector<1x128xf32>
    %cst_641 = arith.constant 0.000000e+00 : f32
    %3167 = vector.broadcast %cst_641 : f32 to vector<1x128xf32>
    %3168 = arith.select %3, %3166, %3167 : vector<1x128xi1>, vector<1x128xf32>
    %cst_642 = arith.constant dense<0xFF800000> : vector<1xf32>
    %3169 = vector.multi_reduction <maximumf>, %3168, %cst_642 [1] : vector<1x128xf32> to vector<1xf32>
    %3170 = vector.shape_cast %3169 : vector<1xf32> to vector<1x1xf32>
    %3171 = arith.maximumf %3021, %3170 : vector<1x1xf32>
    %c0_i32_643 = arith.constant 0 : i32
    %3172 = vector.broadcast %c0_i32_643 : i32 to vector<1x128xi32>
    %3173 = arith.cmpi eq, %1, %3172 : vector<1x128xi32>
    %cst_644 = arith.constant 0.000000e+00 : f32
    %3174 = vector.shape_cast %3155 : vector<1x1xf32> to vector<1x1xf32>
    %3175 = vector.broadcast %3174 : vector<1x1xf32> to vector<1x128xf32>
    %3176 = vector.broadcast %cst_644 : f32 to vector<1x128xf32>
    %3177 = arith.select %3173, %3175, %3176 : vector<1x128xi1>, vector<1x128xf32>
    %c1_i32_645 = arith.constant 1 : i32
    %3178 = vector.broadcast %c1_i32_645 : i32 to vector<1x128xi32>
    %3179 = arith.cmpi eq, %1, %3178 : vector<1x128xi32>
    %cst_646 = arith.constant 0.000000e+00 : f32
    %3180 = vector.shape_cast %3087 : vector<1x1xf32> to vector<1x1xf32>
    %3181 = vector.broadcast %3180 : vector<1x1xf32> to vector<1x128xf32>
    %3182 = vector.broadcast %cst_646 : f32 to vector<1x128xf32>
    %3183 = arith.select %3179, %3181, %3182 : vector<1x128xi1>, vector<1x128xf32>
    %3184 = arith.addf %3177, %3183 : vector<1x128xf32>
    %c2_i32_647 = arith.constant 2 : i32
    %3185 = vector.broadcast %c2_i32_647 : i32 to vector<1x128xi32>
    %3186 = arith.cmpi eq, %1, %3185 : vector<1x128xi32>
    %cst_648 = arith.constant 0.000000e+00 : f32
    %3187 = vector.shape_cast %3089 : vector<1x1xf32> to vector<1x1xf32>
    %3188 = vector.broadcast %3187 : vector<1x1xf32> to vector<1x128xf32>
    %3189 = vector.broadcast %cst_648 : f32 to vector<1x128xf32>
    %3190 = arith.select %3186, %3188, %3189 : vector<1x128xi1>, vector<1x128xf32>
    %3191 = arith.addf %3184, %3190 : vector<1x128xf32>
    %3192 = arith.index_cast %c20_i32 : i32 to index
    %c0_649 = arith.constant 0 : index
    %3193 = vector.load %arg9[%3192, %c0_649] : memref<24x128xf32, #tpu.memory_space<vmem>>, vector<1x128xf32>
    tpu.vector_store %arg9[%3192, %c0_649], %3191 {strides = array<i32>} : memref<24x128xf32, #tpu.memory_space<vmem>>, vector<1x128xf32>,
    %c21_i32 = arith.constant 21 : i32
    %c6_i32_650 = arith.constant 6 : i32
    %3194 = arith.muli %c21_i32, %c6_i32_650 : i32
    %c0_i32_651 = arith.constant 0 : i32
    %3195 = arith.addi %3194, %c0_i32_651 : i32
    %3196 = arith.index_cast %3195 : i32 to index
    %3197 = memref.load %arg1[%3196] : memref<144xf32, #tpu.memory_space<smem>>
    %c1_i32_652 = arith.constant 1 : i32
    %3198 = arith.addi %3194, %c1_i32_652 : i32
    %3199 = arith.index_cast %3198 : i32 to index
    %3200 = memref.load %arg1[%3199] : memref<144xf32, #tpu.memory_space<smem>>
    %c2_i32_653 = arith.constant 2 : i32
    %3201 = arith.addi %3194, %c2_i32_653 : i32
    %3202 = arith.index_cast %3201 : i32 to index
    %3203 = memref.load %arg1[%3202] : memref<144xf32, #tpu.memory_space<smem>>
    %c3_i32_654 = arith.constant 3 : i32
    %3204 = arith.addi %3194, %c3_i32_654 : i32
    %3205 = arith.index_cast %3204 : i32 to index
    %3206 = memref.load %arg1[%3205] : memref<144xf32, #tpu.memory_space<smem>>
    %c4_i32_655 = arith.constant 4 : i32
    %3207 = arith.addi %3194, %c4_i32_655 : i32
    %3208 = arith.index_cast %3207 : i32 to index
    %3209 = memref.load %arg1[%3208] : memref<144xf32, #tpu.memory_space<smem>>
    %3210 = vector.broadcast %12 : f32 to vector<1x1xf32>
    %3211 = arith.subf %3210, %3095 : vector<1x1xf32>
    %cst_656 = arith.constant 0.000000e+00 : f32
    %3212 = vector.broadcast %cst_656 : f32 to vector<1x1xf32>
    %3213 = arith.maximumf %3211, %3212 : vector<1x1xf32>
    %3214 = vector.broadcast %cst_11 : f32 to vector<1x1xf32>
    %3215 = arith.maximumf %3090, %3214 : vector<1x1xf32>
    %3216 = arith.divf %3213, %3215 : vector<1x1xf32>
    %3217 = vector.broadcast %11 : f32 to vector<1x128xf32>
    %3218 = arith.addf %3217, %3133 : vector<1x128xf32>
    %3219 = vector.broadcast %3216 : vector<1x1xf32> to vector<1x128xf32>
    %3220 = arith.mulf %3218, %3219 : vector<1x128xf32>
    %cst_657 = arith.constant 1.000000e+00 : f32
    %3221 = vector.broadcast %cst_657 : f32 to vector<1x128xf32>
    %3222 = arith.addf %3221, %3220 : vector<1x128xf32>
    %3223 = vector.broadcast %10 : f32 to vector<1x128xf32>
    %3224 = arith.mulf %3223, %3222 : vector<1x128xf32>
    %3225 = vector.broadcast %3209 : f32 to vector<1x128xf32>
    %3226 = arith.mulf %3133, %3225 : vector<1x128xf32>
    %3227 = vector.broadcast %3197 : f32 to vector<1x128xf32>
    %3228 = arith.addf %3227, %3226 : vector<1x128xf32>
    %3229 = arith.minimumf %3228, %3224 : vector<1x128xf32>
    %cst_658 = arith.constant 0.000000e+00 : f32
    %3230 = vector.broadcast %cst_658 : f32 to vector<1x128xf32>
    %3231 = arith.maximumf %3229, %3230 : vector<1x128xf32>
    %cst_659 = arith.constant 0.000000e+00 : f32
    %3232 = vector.broadcast %cst_659 : f32 to vector<1x128xf32>
    %3233 = arith.select %3, %3231, %3232 : vector<1x128xi1>, vector<1x128xf32>
    %cst_660 = arith.constant dense<0.000000e+00> : vector<1xf32>
    %3234 = vector.multi_reduction <add>, %3233, %cst_660 [1] : vector<1x128xf32> to vector<1xf32>
    %3235 = vector.shape_cast %3234 : vector<1xf32> to vector<1x1xf32>
    %3236 = vector.broadcast %cst_12 : f32 to vector<1x1xf32>
    %3237 = arith.mulf %3235, %3236 : vector<1x1xf32>
    %3238 = vector.broadcast %3206 : f32 to vector<1x1xf32>
    %3239 = arith.mulf %3237, %3238 : vector<1x1xf32>
    %3240 = arith.addf %3090, %3239 : vector<1x1xf32>
    %3241 = vector.broadcast %13 : f32 to vector<1x1xf32>
    %3242 = arith.mulf %3239, %3241 : vector<1x1xf32>
    %3243 = arith.addf %3095, %3242 : vector<1x1xf32>
    %3244 = vector.broadcast %12 : f32 to vector<1x1xf32>
    %3245 = arith.minimumf %3243, %3244 : vector<1x1xf32>
    %3246 = vector.broadcast %3197 : f32 to vector<1x128xf32>
    %3247 = arith.subf %3246, %3233 : vector<1x128xf32>
    %cst_661 = arith.constant 0.000000e+00 : f32
    %3248 = vector.broadcast %cst_661 : f32 to vector<1x128xf32>
    %3249 = arith.maximumf %3247, %3248 : vector<1x128xf32>
    %cst_662 = arith.constant 0.000000e+00 : f32
    %3250 = vector.broadcast %cst_662 : f32 to vector<1x128xf32>
    %3251 = arith.select %3, %3133, %3250 : vector<1x128xi1>, vector<1x128xf32>
    %cst_663 = arith.constant dense<0.000000e+00> : vector<1xf32>
    %3252 = vector.multi_reduction <add>, %3251, %cst_663 [1] : vector<1x128xf32> to vector<1xf32>
    %3253 = vector.shape_cast %3252 : vector<1xf32> to vector<1x1xf32>
    %3254 = vector.broadcast %cst_12 : f32 to vector<1x1xf32>
    %3255 = arith.mulf %3253, %3254 : vector<1x1xf32>
    %3256 = vector.broadcast %cst_13 : f32 to vector<1x1xf32>
    %3257 = arith.mulf %3255, %3256 : vector<1x1xf32>
    %3258 = vector.broadcast %3257 : vector<1x1xf32> to vector<1x128xf32>
    %3259 = arith.addf %14, %3258 : vector<1x128xf32>
    %3260 = arith.mulf %3249, %3259 : vector<1x128xf32>
    %3261 = vector.broadcast %3203 : f32 to vector<1x128xf32>
    %3262 = arith.addf %3260, %3261 : vector<1x128xf32>
    %c1_i32_664 = arith.constant 1 : i32
    %3263 = tpu.dynamic_rotate %3151 by %c1_i32_664 dim 1 : vector<1x128xf32>, i32 -> vector<1x128xf32>
    %3264 = vector.broadcast %3200 : f32 to vector<1x128xf32>
    %3265 = arith.select %5, %3264, %3263 : vector<1x128xi1>, vector<1x128xf32>
    %3266 = arith.subf %3265, %3151 : vector<1x128xf32>
    %3267 = arith.mulf %3266, %15 : vector<1x128xf32>
    %3268 = arith.addf %3267, %3262 : vector<1x128xf32>
    %3269 = vector.broadcast %3206 : f32 to vector<1x128xf32>
    %3270 = arith.mulf %3269, %3268 : vector<1x128xf32>
    %3271 = arith.addf %3125, %3270 : vector<1x128xf32>
    %cst_665 = arith.constant 0.000000e+00 : f32
    %3272 = vector.broadcast %cst_665 : f32 to vector<1x128xf32>
    %3273 = arith.maximumf %3271, %3272 : vector<1x128xf32>
    %cst_666 = arith.constant 0.000000e+00 : f32
    %3274 = vector.broadcast %cst_666 : f32 to vector<1x128xf32>
    %3275 = arith.select %3, %3273, %3274 : vector<1x128xi1>, vector<1x128xf32>
    %3276 = arith.mulf %14, %14 : vector<1x128xf32>
    %3277 = vector.broadcast %cst_14 : f32 to vector<1x128xf32>
    %3278 = arith.mulf %3277, %3275 : vector<1x128xf32>
    %3279 = arith.addf %3276, %3278 : vector<1x128xf32>
    %3280 = math.sqrt %3279 : vector<1x128xf32>
    %3281 = arith.subf %3280, %14 : vector<1x128xf32>
    %3282 = vector.broadcast %cst_15 : f32 to vector<1x128xf32>
    %3283 = arith.mulf %3281, %3282 : vector<1x128xf32>
    %3284 = vector.broadcast %8 : f32 to vector<1x128xf32>
    %3285 = arith.mulf %3283, %3284 : vector<1x128xf32>
    %3286 = arith.addf %14, %3285 : vector<1x128xf32>
    %3287 = vector.broadcast %cst_11 : f32 to vector<1x128xf32>
    %3288 = arith.maximumf %3286, %3287 : vector<1x128xf32>
    %3289 = tpu.reciprocal %3288 {approx = true} : vector<1x128xf32> -> vector<1x128xf32>
    %3290 = arith.mulf %3275, %3289 : vector<1x128xf32>
    %3291 = vector.broadcast %cst_11 : f32 to vector<1x128xf32>
    %3292 = arith.maximumf %3290, %3291 : vector<1x128xf32>
    %3293 = math.log %3292 : vector<1x128xf32>
    %3294 = vector.broadcast %cst_16 : f32 to vector<1x128xf32>
    %3295 = arith.mulf %3294, %3293 : vector<1x128xf32>
    %3296 = math.exp %3295 : vector<1x128xf32>
    %3297 = arith.mulf %3275, %3296 : vector<1x128xf32>
    %3298 = vector.broadcast %9 : f32 to vector<1x128xf32>
    %3299 = arith.mulf %3297, %3298 : vector<1x128xf32>
    %cst_667 = arith.constant 0.000000e+00 : f32
    %3300 = vector.broadcast %cst_667 : f32 to vector<1x128xf32>
    %3301 = arith.select %3, %3299, %3300 : vector<1x128xi1>, vector<1x128xf32>
    %cst_668 = arith.constant 0.000000e+00 : f32
    %3302 = vector.broadcast %cst_668 : f32 to vector<1x128xf32>
    %3303 = arith.select %7, %3301, %3302 : vector<1x128xi1>, vector<1x128xf32>
    %cst_669 = arith.constant dense<0.000000e+00> : vector<1xf32>
    %3304 = vector.multi_reduction <add>, %3303, %cst_669 [1] : vector<1x128xf32> to vector<1xf32>
    %3305 = vector.shape_cast %3304 : vector<1xf32> to vector<1x1xf32>
    %3306 = vector.broadcast %cst_11 : f32 to vector<1x128xf32>
    %3307 = arith.maximumf %3275, %3306 : vector<1x128xf32>
    %3308 = tpu.reciprocal %3307 {approx = true} : vector<1x128xf32> -> vector<1x128xf32>
    %3309 = arith.mulf %3301, %3308 : vector<1x128xf32>
    %3310 = vector.broadcast %cst_11 : f32 to vector<1x128xf32>
    %3311 = arith.cmpf ogt, %3275, %3310 : vector<1x128xf32>
    %3312 = vector.broadcast %3206 : f32 to vector<1x128xf32>
    %3313 = arith.mulf %3309, %3312 : vector<1x128xf32>
    %3314 = arith.mulf %3313, %15 : vector<1x128xf32>
    %cst_670 = arith.constant 0.000000e+00 : f32
    %3315 = vector.broadcast %cst_670 : f32 to vector<1x128xf32>
    %3316 = arith.select %3311, %3314, %3315 : vector<1x128xi1>, vector<1x128xf32>
    %cst_671 = arith.constant 0.000000e+00 : f32
    %3317 = vector.broadcast %cst_671 : f32 to vector<1x128xf32>
    %3318 = arith.select %3, %3316, %3317 : vector<1x128xi1>, vector<1x128xf32>
    %cst_672 = arith.constant dense<0xFF800000> : vector<1xf32>
    %3319 = vector.multi_reduction <maximumf>, %3318, %cst_672 [1] : vector<1x128xf32> to vector<1xf32>
    %3320 = vector.shape_cast %3319 : vector<1xf32> to vector<1x1xf32>
    %3321 = arith.maximumf %3171, %3320 : vector<1x1xf32>
    %c0_i32_673 = arith.constant 0 : i32
    %3322 = vector.broadcast %c0_i32_673 : i32 to vector<1x128xi32>
    %3323 = arith.cmpi eq, %1, %3322 : vector<1x128xi32>
    %cst_674 = arith.constant 0.000000e+00 : f32
    %3324 = vector.shape_cast %3305 : vector<1x1xf32> to vector<1x1xf32>
    %3325 = vector.broadcast %3324 : vector<1x1xf32> to vector<1x128xf32>
    %3326 = vector.broadcast %cst_674 : f32 to vector<1x128xf32>
    %3327 = arith.select %3323, %3325, %3326 : vector<1x128xi1>, vector<1x128xf32>
    %c1_i32_675 = arith.constant 1 : i32
    %3328 = vector.broadcast %c1_i32_675 : i32 to vector<1x128xi32>
    %3329 = arith.cmpi eq, %1, %3328 : vector<1x128xi32>
    %cst_676 = arith.constant 0.000000e+00 : f32
    %3330 = vector.shape_cast %3237 : vector<1x1xf32> to vector<1x1xf32>
    %3331 = vector.broadcast %3330 : vector<1x1xf32> to vector<1x128xf32>
    %3332 = vector.broadcast %cst_676 : f32 to vector<1x128xf32>
    %3333 = arith.select %3329, %3331, %3332 : vector<1x128xi1>, vector<1x128xf32>
    %3334 = arith.addf %3327, %3333 : vector<1x128xf32>
    %c2_i32_677 = arith.constant 2 : i32
    %3335 = vector.broadcast %c2_i32_677 : i32 to vector<1x128xi32>
    %3336 = arith.cmpi eq, %1, %3335 : vector<1x128xi32>
    %cst_678 = arith.constant 0.000000e+00 : f32
    %3337 = vector.shape_cast %3239 : vector<1x1xf32> to vector<1x1xf32>
    %3338 = vector.broadcast %3337 : vector<1x1xf32> to vector<1x128xf32>
    %3339 = vector.broadcast %cst_678 : f32 to vector<1x128xf32>
    %3340 = arith.select %3336, %3338, %3339 : vector<1x128xi1>, vector<1x128xf32>
    %3341 = arith.addf %3334, %3340 : vector<1x128xf32>
    %3342 = arith.index_cast %c21_i32 : i32 to index
    %c0_679 = arith.constant 0 : index
    %3343 = vector.load %arg9[%3342, %c0_679] : memref<24x128xf32, #tpu.memory_space<vmem>>, vector<1x128xf32>
    tpu.vector_store %arg9[%3342, %c0_679], %3341 {strides = array<i32>} : memref<24x128xf32, #tpu.memory_space<vmem>>, vector<1x128xf32>,
    %c22_i32 = arith.constant 22 : i32
    %c6_i32_680 = arith.constant 6 : i32
    %3344 = arith.muli %c22_i32, %c6_i32_680 : i32
    %c0_i32_681 = arith.constant 0 : i32
    %3345 = arith.addi %3344, %c0_i32_681 : i32
    %3346 = arith.index_cast %3345 : i32 to index
    %3347 = memref.load %arg1[%3346] : memref<144xf32, #tpu.memory_space<smem>>
    %c1_i32_682 = arith.constant 1 : i32
    %3348 = arith.addi %3344, %c1_i32_682 : i32
    %3349 = arith.index_cast %3348 : i32 to index
    %3350 = memref.load %arg1[%3349] : memref<144xf32, #tpu.memory_space<smem>>
    %c2_i32_683 = arith.constant 2 : i32
    %3351 = arith.addi %3344, %c2_i32_683 : i32
    %3352 = arith.index_cast %3351 : i32 to index
    %3353 = memref.load %arg1[%3352] : memref<144xf32, #tpu.memory_space<smem>>
    %c3_i32_684 = arith.constant 3 : i32
    %3354 = arith.addi %3344, %c3_i32_684 : i32
    %3355 = arith.index_cast %3354 : i32 to index
    %3356 = memref.load %arg1[%3355] : memref<144xf32, #tpu.memory_space<smem>>
    %c4_i32_685 = arith.constant 4 : i32
    %3357 = arith.addi %3344, %c4_i32_685 : i32
    %3358 = arith.index_cast %3357 : i32 to index
    %3359 = memref.load %arg1[%3358] : memref<144xf32, #tpu.memory_space<smem>>
    %3360 = vector.broadcast %12 : f32 to vector<1x1xf32>
    %3361 = arith.subf %3360, %3245 : vector<1x1xf32>
    %cst_686 = arith.constant 0.000000e+00 : f32
    %3362 = vector.broadcast %cst_686 : f32 to vector<1x1xf32>
    %3363 = arith.maximumf %3361, %3362 : vector<1x1xf32>
    %3364 = vector.broadcast %cst_11 : f32 to vector<1x1xf32>
    %3365 = arith.maximumf %3240, %3364 : vector<1x1xf32>
    %3366 = arith.divf %3363, %3365 : vector<1x1xf32>
    %3367 = vector.broadcast %11 : f32 to vector<1x128xf32>
    %3368 = arith.addf %3367, %3283 : vector<1x128xf32>
    %3369 = vector.broadcast %3366 : vector<1x1xf32> to vector<1x128xf32>
    %3370 = arith.mulf %3368, %3369 : vector<1x128xf32>
    %cst_687 = arith.constant 1.000000e+00 : f32
    %3371 = vector.broadcast %cst_687 : f32 to vector<1x128xf32>
    %3372 = arith.addf %3371, %3370 : vector<1x128xf32>
    %3373 = vector.broadcast %10 : f32 to vector<1x128xf32>
    %3374 = arith.mulf %3373, %3372 : vector<1x128xf32>
    %3375 = vector.broadcast %3359 : f32 to vector<1x128xf32>
    %3376 = arith.mulf %3283, %3375 : vector<1x128xf32>
    %3377 = vector.broadcast %3347 : f32 to vector<1x128xf32>
    %3378 = arith.addf %3377, %3376 : vector<1x128xf32>
    %3379 = arith.minimumf %3378, %3374 : vector<1x128xf32>
    %cst_688 = arith.constant 0.000000e+00 : f32
    %3380 = vector.broadcast %cst_688 : f32 to vector<1x128xf32>
    %3381 = arith.maximumf %3379, %3380 : vector<1x128xf32>
    %cst_689 = arith.constant 0.000000e+00 : f32
    %3382 = vector.broadcast %cst_689 : f32 to vector<1x128xf32>
    %3383 = arith.select %3, %3381, %3382 : vector<1x128xi1>, vector<1x128xf32>
    %cst_690 = arith.constant dense<0.000000e+00> : vector<1xf32>
    %3384 = vector.multi_reduction <add>, %3383, %cst_690 [1] : vector<1x128xf32> to vector<1xf32>
    %3385 = vector.shape_cast %3384 : vector<1xf32> to vector<1x1xf32>
    %3386 = vector.broadcast %cst_12 : f32 to vector<1x1xf32>
    %3387 = arith.mulf %3385, %3386 : vector<1x1xf32>
    %3388 = vector.broadcast %3356 : f32 to vector<1x1xf32>
    %3389 = arith.mulf %3387, %3388 : vector<1x1xf32>
    %3390 = arith.addf %3240, %3389 : vector<1x1xf32>
    %3391 = vector.broadcast %13 : f32 to vector<1x1xf32>
    %3392 = arith.mulf %3389, %3391 : vector<1x1xf32>
    %3393 = arith.addf %3245, %3392 : vector<1x1xf32>
    %3394 = vector.broadcast %12 : f32 to vector<1x1xf32>
    %3395 = arith.minimumf %3393, %3394 : vector<1x1xf32>
    %3396 = vector.broadcast %3347 : f32 to vector<1x128xf32>
    %3397 = arith.subf %3396, %3383 : vector<1x128xf32>
    %cst_691 = arith.constant 0.000000e+00 : f32
    %3398 = vector.broadcast %cst_691 : f32 to vector<1x128xf32>
    %3399 = arith.maximumf %3397, %3398 : vector<1x128xf32>
    %cst_692 = arith.constant 0.000000e+00 : f32
    %3400 = vector.broadcast %cst_692 : f32 to vector<1x128xf32>
    %3401 = arith.select %3, %3283, %3400 : vector<1x128xi1>, vector<1x128xf32>
    %cst_693 = arith.constant dense<0.000000e+00> : vector<1xf32>
    %3402 = vector.multi_reduction <add>, %3401, %cst_693 [1] : vector<1x128xf32> to vector<1xf32>
    %3403 = vector.shape_cast %3402 : vector<1xf32> to vector<1x1xf32>
    %3404 = vector.broadcast %cst_12 : f32 to vector<1x1xf32>
    %3405 = arith.mulf %3403, %3404 : vector<1x1xf32>
    %3406 = vector.broadcast %cst_13 : f32 to vector<1x1xf32>
    %3407 = arith.mulf %3405, %3406 : vector<1x1xf32>
    %3408 = vector.broadcast %3407 : vector<1x1xf32> to vector<1x128xf32>
    %3409 = arith.addf %14, %3408 : vector<1x128xf32>
    %3410 = arith.mulf %3399, %3409 : vector<1x128xf32>
    %3411 = vector.broadcast %3353 : f32 to vector<1x128xf32>
    %3412 = arith.addf %3410, %3411 : vector<1x128xf32>
    %c1_i32_694 = arith.constant 1 : i32
    %3413 = tpu.dynamic_rotate %3301 by %c1_i32_694 dim 1 : vector<1x128xf32>, i32 -> vector<1x128xf32>
    %3414 = vector.broadcast %3350 : f32 to vector<1x128xf32>
    %3415 = arith.select %5, %3414, %3413 : vector<1x128xi1>, vector<1x128xf32>
    %3416 = arith.subf %3415, %3301 : vector<1x128xf32>
    %3417 = arith.mulf %3416, %15 : vector<1x128xf32>
    %3418 = arith.addf %3417, %3412 : vector<1x128xf32>
    %3419 = vector.broadcast %3356 : f32 to vector<1x128xf32>
    %3420 = arith.mulf %3419, %3418 : vector<1x128xf32>
    %3421 = arith.addf %3275, %3420 : vector<1x128xf32>
    %cst_695 = arith.constant 0.000000e+00 : f32
    %3422 = vector.broadcast %cst_695 : f32 to vector<1x128xf32>
    %3423 = arith.maximumf %3421, %3422 : vector<1x128xf32>
    %cst_696 = arith.constant 0.000000e+00 : f32
    %3424 = vector.broadcast %cst_696 : f32 to vector<1x128xf32>
    %3425 = arith.select %3, %3423, %3424 : vector<1x128xi1>, vector<1x128xf32>
    %3426 = arith.mulf %14, %14 : vector<1x128xf32>
    %3427 = vector.broadcast %cst_14 : f32 to vector<1x128xf32>
    %3428 = arith.mulf %3427, %3425 : vector<1x128xf32>
    %3429 = arith.addf %3426, %3428 : vector<1x128xf32>
    %3430 = math.sqrt %3429 : vector<1x128xf32>
    %3431 = arith.subf %3430, %14 : vector<1x128xf32>
    %3432 = vector.broadcast %cst_15 : f32 to vector<1x128xf32>
    %3433 = arith.mulf %3431, %3432 : vector<1x128xf32>
    %3434 = vector.broadcast %8 : f32 to vector<1x128xf32>
    %3435 = arith.mulf %3433, %3434 : vector<1x128xf32>
    %3436 = arith.addf %14, %3435 : vector<1x128xf32>
    %3437 = vector.broadcast %cst_11 : f32 to vector<1x128xf32>
    %3438 = arith.maximumf %3436, %3437 : vector<1x128xf32>
    %3439 = tpu.reciprocal %3438 {approx = true} : vector<1x128xf32> -> vector<1x128xf32>
    %3440 = arith.mulf %3425, %3439 : vector<1x128xf32>
    %3441 = vector.broadcast %cst_11 : f32 to vector<1x128xf32>
    %3442 = arith.maximumf %3440, %3441 : vector<1x128xf32>
    %3443 = math.log %3442 : vector<1x128xf32>
    %3444 = vector.broadcast %cst_16 : f32 to vector<1x128xf32>
    %3445 = arith.mulf %3444, %3443 : vector<1x128xf32>
    %3446 = math.exp %3445 : vector<1x128xf32>
    %3447 = arith.mulf %3425, %3446 : vector<1x128xf32>
    %3448 = vector.broadcast %9 : f32 to vector<1x128xf32>
    %3449 = arith.mulf %3447, %3448 : vector<1x128xf32>
    %cst_697 = arith.constant 0.000000e+00 : f32
    %3450 = vector.broadcast %cst_697 : f32 to vector<1x128xf32>
    %3451 = arith.select %3, %3449, %3450 : vector<1x128xi1>, vector<1x128xf32>
    %cst_698 = arith.constant 0.000000e+00 : f32
    %3452 = vector.broadcast %cst_698 : f32 to vector<1x128xf32>
    %3453 = arith.select %7, %3451, %3452 : vector<1x128xi1>, vector<1x128xf32>
    %cst_699 = arith.constant dense<0.000000e+00> : vector<1xf32>
    %3454 = vector.multi_reduction <add>, %3453, %cst_699 [1] : vector<1x128xf32> to vector<1xf32>
    %3455 = vector.shape_cast %3454 : vector<1xf32> to vector<1x1xf32>
    %3456 = vector.broadcast %cst_11 : f32 to vector<1x128xf32>
    %3457 = arith.maximumf %3425, %3456 : vector<1x128xf32>
    %3458 = tpu.reciprocal %3457 {approx = true} : vector<1x128xf32> -> vector<1x128xf32>
    %3459 = arith.mulf %3451, %3458 : vector<1x128xf32>
    %3460 = vector.broadcast %cst_11 : f32 to vector<1x128xf32>
    %3461 = arith.cmpf ogt, %3425, %3460 : vector<1x128xf32>
    %3462 = vector.broadcast %3356 : f32 to vector<1x128xf32>
    %3463 = arith.mulf %3459, %3462 : vector<1x128xf32>
    %3464 = arith.mulf %3463, %15 : vector<1x128xf32>
    %cst_700 = arith.constant 0.000000e+00 : f32
    %3465 = vector.broadcast %cst_700 : f32 to vector<1x128xf32>
    %3466 = arith.select %3461, %3464, %3465 : vector<1x128xi1>, vector<1x128xf32>
    %cst_701 = arith.constant 0.000000e+00 : f32
    %3467 = vector.broadcast %cst_701 : f32 to vector<1x128xf32>
    %3468 = arith.select %3, %3466, %3467 : vector<1x128xi1>, vector<1x128xf32>
    %cst_702 = arith.constant dense<0xFF800000> : vector<1xf32>
    %3469 = vector.multi_reduction <maximumf>, %3468, %cst_702 [1] : vector<1x128xf32> to vector<1xf32>
    %3470 = vector.shape_cast %3469 : vector<1xf32> to vector<1x1xf32>
    %3471 = arith.maximumf %3321, %3470 : vector<1x1xf32>
    %c0_i32_703 = arith.constant 0 : i32
    %3472 = vector.broadcast %c0_i32_703 : i32 to vector<1x128xi32>
    %3473 = arith.cmpi eq, %1, %3472 : vector<1x128xi32>
    %cst_704 = arith.constant 0.000000e+00 : f32
    %3474 = vector.shape_cast %3455 : vector<1x1xf32> to vector<1x1xf32>
    %3475 = vector.broadcast %3474 : vector<1x1xf32> to vector<1x128xf32>
    %3476 = vector.broadcast %cst_704 : f32 to vector<1x128xf32>
    %3477 = arith.select %3473, %3475, %3476 : vector<1x128xi1>, vector<1x128xf32>
    %c1_i32_705 = arith.constant 1 : i32
    %3478 = vector.broadcast %c1_i32_705 : i32 to vector<1x128xi32>
    %3479 = arith.cmpi eq, %1, %3478 : vector<1x128xi32>
    %cst_706 = arith.constant 0.000000e+00 : f32
    %3480 = vector.shape_cast %3387 : vector<1x1xf32> to vector<1x1xf32>
    %3481 = vector.broadcast %3480 : vector<1x1xf32> to vector<1x128xf32>
    %3482 = vector.broadcast %cst_706 : f32 to vector<1x128xf32>
    %3483 = arith.select %3479, %3481, %3482 : vector<1x128xi1>, vector<1x128xf32>
    %3484 = arith.addf %3477, %3483 : vector<1x128xf32>
    %c2_i32_707 = arith.constant 2 : i32
    %3485 = vector.broadcast %c2_i32_707 : i32 to vector<1x128xi32>
    %3486 = arith.cmpi eq, %1, %3485 : vector<1x128xi32>
    %cst_708 = arith.constant 0.000000e+00 : f32
    %3487 = vector.shape_cast %3389 : vector<1x1xf32> to vector<1x1xf32>
    %3488 = vector.broadcast %3487 : vector<1x1xf32> to vector<1x128xf32>
    %3489 = vector.broadcast %cst_708 : f32 to vector<1x128xf32>
    %3490 = arith.select %3486, %3488, %3489 : vector<1x128xi1>, vector<1x128xf32>
    %3491 = arith.addf %3484, %3490 : vector<1x128xf32>
    %3492 = arith.index_cast %c22_i32 : i32 to index
    %c0_709 = arith.constant 0 : index
    %3493 = vector.load %arg9[%3492, %c0_709] : memref<24x128xf32, #tpu.memory_space<vmem>>, vector<1x128xf32>
    tpu.vector_store %arg9[%3492, %c0_709], %3491 {strides = array<i32>} : memref<24x128xf32, #tpu.memory_space<vmem>>, vector<1x128xf32>,
    %c23_i32 = arith.constant 23 : i32
    %c6_i32_710 = arith.constant 6 : i32
    %3494 = arith.muli %c23_i32, %c6_i32_710 : i32
    %c0_i32_711 = arith.constant 0 : i32
    %3495 = arith.addi %3494, %c0_i32_711 : i32
    %3496 = arith.index_cast %3495 : i32 to index
    %3497 = memref.load %arg1[%3496] : memref<144xf32, #tpu.memory_space<smem>>
    %c1_i32_712 = arith.constant 1 : i32
    %3498 = arith.addi %3494, %c1_i32_712 : i32
    %3499 = arith.index_cast %3498 : i32 to index
    %3500 = memref.load %arg1[%3499] : memref<144xf32, #tpu.memory_space<smem>>
    %c2_i32_713 = arith.constant 2 : i32
    %3501 = arith.addi %3494, %c2_i32_713 : i32
    %3502 = arith.index_cast %3501 : i32 to index
    %3503 = memref.load %arg1[%3502] : memref<144xf32, #tpu.memory_space<smem>>
    %c3_i32_714 = arith.constant 3 : i32
    %3504 = arith.addi %3494, %c3_i32_714 : i32
    %3505 = arith.index_cast %3504 : i32 to index
    %3506 = memref.load %arg1[%3505] : memref<144xf32, #tpu.memory_space<smem>>
    %c4_i32_715 = arith.constant 4 : i32
    %3507 = arith.addi %3494, %c4_i32_715 : i32
    %3508 = arith.index_cast %3507 : i32 to index
    %3509 = memref.load %arg1[%3508] : memref<144xf32, #tpu.memory_space<smem>>
    %3510 = vector.broadcast %12 : f32 to vector<1x1xf32>
    %3511 = arith.subf %3510, %3395 : vector<1x1xf32>
    %cst_716 = arith.constant 0.000000e+00 : f32
    %3512 = vector.broadcast %cst_716 : f32 to vector<1x1xf32>
    %3513 = arith.maximumf %3511, %3512 : vector<1x1xf32>
    %3514 = vector.broadcast %cst_11 : f32 to vector<1x1xf32>
    %3515 = arith.maximumf %3390, %3514 : vector<1x1xf32>
    %3516 = arith.divf %3513, %3515 : vector<1x1xf32>
    %3517 = vector.broadcast %11 : f32 to vector<1x128xf32>
    %3518 = arith.addf %3517, %3433 : vector<1x128xf32>
    %3519 = vector.broadcast %3516 : vector<1x1xf32> to vector<1x128xf32>
    %3520 = arith.mulf %3518, %3519 : vector<1x128xf32>
    %cst_717 = arith.constant 1.000000e+00 : f32
    %3521 = vector.broadcast %cst_717 : f32 to vector<1x128xf32>
    %3522 = arith.addf %3521, %3520 : vector<1x128xf32>
    %3523 = vector.broadcast %10 : f32 to vector<1x128xf32>
    %3524 = arith.mulf %3523, %3522 : vector<1x128xf32>
    %3525 = vector.broadcast %3509 : f32 to vector<1x128xf32>
    %3526 = arith.mulf %3433, %3525 : vector<1x128xf32>
    %3527 = vector.broadcast %3497 : f32 to vector<1x128xf32>
    %3528 = arith.addf %3527, %3526 : vector<1x128xf32>
    %3529 = arith.minimumf %3528, %3524 : vector<1x128xf32>
    %cst_718 = arith.constant 0.000000e+00 : f32
    %3530 = vector.broadcast %cst_718 : f32 to vector<1x128xf32>
    %3531 = arith.maximumf %3529, %3530 : vector<1x128xf32>
    %cst_719 = arith.constant 0.000000e+00 : f32
    %3532 = vector.broadcast %cst_719 : f32 to vector<1x128xf32>
    %3533 = arith.select %3, %3531, %3532 : vector<1x128xi1>, vector<1x128xf32>
    %cst_720 = arith.constant dense<0.000000e+00> : vector<1xf32>
    %3534 = vector.multi_reduction <add>, %3533, %cst_720 [1] : vector<1x128xf32> to vector<1xf32>
    %3535 = vector.shape_cast %3534 : vector<1xf32> to vector<1x1xf32>
    %3536 = vector.broadcast %cst_12 : f32 to vector<1x1xf32>
    %3537 = arith.mulf %3535, %3536 : vector<1x1xf32>
    %3538 = vector.broadcast %3506 : f32 to vector<1x1xf32>
    %3539 = arith.mulf %3537, %3538 : vector<1x1xf32>
    %3540 = arith.addf %3390, %3539 : vector<1x1xf32>
    %3541 = vector.broadcast %13 : f32 to vector<1x1xf32>
    %3542 = arith.mulf %3539, %3541 : vector<1x1xf32>
    %3543 = arith.addf %3395, %3542 : vector<1x1xf32>
    %3544 = vector.broadcast %12 : f32 to vector<1x1xf32>
    %3545 = arith.minimumf %3543, %3544 : vector<1x1xf32>
    %3546 = vector.broadcast %3497 : f32 to vector<1x128xf32>
    %3547 = arith.subf %3546, %3533 : vector<1x128xf32>
    %cst_721 = arith.constant 0.000000e+00 : f32
    %3548 = vector.broadcast %cst_721 : f32 to vector<1x128xf32>
    %3549 = arith.maximumf %3547, %3548 : vector<1x128xf32>
    %cst_722 = arith.constant 0.000000e+00 : f32
    %3550 = vector.broadcast %cst_722 : f32 to vector<1x128xf32>
    %3551 = arith.select %3, %3433, %3550 : vector<1x128xi1>, vector<1x128xf32>
    %cst_723 = arith.constant dense<0.000000e+00> : vector<1xf32>
    %3552 = vector.multi_reduction <add>, %3551, %cst_723 [1] : vector<1x128xf32> to vector<1xf32>
    %3553 = vector.shape_cast %3552 : vector<1xf32> to vector<1x1xf32>
    %3554 = vector.broadcast %cst_12 : f32 to vector<1x1xf32>
    %3555 = arith.mulf %3553, %3554 : vector<1x1xf32>
    %3556 = vector.broadcast %cst_13 : f32 to vector<1x1xf32>
    %3557 = arith.mulf %3555, %3556 : vector<1x1xf32>
    %3558 = vector.broadcast %3557 : vector<1x1xf32> to vector<1x128xf32>
    %3559 = arith.addf %14, %3558 : vector<1x128xf32>
    %3560 = arith.mulf %3549, %3559 : vector<1x128xf32>
    %3561 = vector.broadcast %3503 : f32 to vector<1x128xf32>
    %3562 = arith.addf %3560, %3561 : vector<1x128xf32>
    %c1_i32_724 = arith.constant 1 : i32
    %3563 = tpu.dynamic_rotate %3451 by %c1_i32_724 dim 1 : vector<1x128xf32>, i32 -> vector<1x128xf32>
    %3564 = vector.broadcast %3500 : f32 to vector<1x128xf32>
    %3565 = arith.select %5, %3564, %3563 : vector<1x128xi1>, vector<1x128xf32>
    %3566 = arith.subf %3565, %3451 : vector<1x128xf32>
    %3567 = arith.mulf %3566, %15 : vector<1x128xf32>
    %3568 = arith.addf %3567, %3562 : vector<1x128xf32>
    %3569 = vector.broadcast %3506 : f32 to vector<1x128xf32>
    %3570 = arith.mulf %3569, %3568 : vector<1x128xf32>
    %3571 = arith.addf %3425, %3570 : vector<1x128xf32>
    %cst_725 = arith.constant 0.000000e+00 : f32
    %3572 = vector.broadcast %cst_725 : f32 to vector<1x128xf32>
    %3573 = arith.maximumf %3571, %3572 : vector<1x128xf32>
    %cst_726 = arith.constant 0.000000e+00 : f32
    %3574 = vector.broadcast %cst_726 : f32 to vector<1x128xf32>
    %3575 = arith.select %3, %3573, %3574 : vector<1x128xi1>, vector<1x128xf32>
    %3576 = arith.mulf %14, %14 : vector<1x128xf32>
    %3577 = vector.broadcast %cst_14 : f32 to vector<1x128xf32>
    %3578 = arith.mulf %3577, %3575 : vector<1x128xf32>
    %3579 = arith.addf %3576, %3578 : vector<1x128xf32>
    %3580 = math.sqrt %3579 : vector<1x128xf32>
    %3581 = arith.subf %3580, %14 : vector<1x128xf32>
    %3582 = vector.broadcast %cst_15 : f32 to vector<1x128xf32>
    %3583 = arith.mulf %3581, %3582 : vector<1x128xf32>
    %3584 = vector.broadcast %8 : f32 to vector<1x128xf32>
    %3585 = arith.mulf %3583, %3584 : vector<1x128xf32>
    %3586 = arith.addf %14, %3585 : vector<1x128xf32>
    %3587 = vector.broadcast %cst_11 : f32 to vector<1x128xf32>
    %3588 = arith.maximumf %3586, %3587 : vector<1x128xf32>
    %3589 = tpu.reciprocal %3588 {approx = true} : vector<1x128xf32> -> vector<1x128xf32>
    %3590 = arith.mulf %3575, %3589 : vector<1x128xf32>
    %3591 = vector.broadcast %cst_11 : f32 to vector<1x128xf32>
    %3592 = arith.maximumf %3590, %3591 : vector<1x128xf32>
    %3593 = math.log %3592 : vector<1x128xf32>
    %3594 = vector.broadcast %cst_16 : f32 to vector<1x128xf32>
    %3595 = arith.mulf %3594, %3593 : vector<1x128xf32>
    %3596 = math.exp %3595 : vector<1x128xf32>
    %3597 = arith.mulf %3575, %3596 : vector<1x128xf32>
    %3598 = vector.broadcast %9 : f32 to vector<1x128xf32>
    %3599 = arith.mulf %3597, %3598 : vector<1x128xf32>
    %cst_727 = arith.constant 0.000000e+00 : f32
    %3600 = vector.broadcast %cst_727 : f32 to vector<1x128xf32>
    %3601 = arith.select %3, %3599, %3600 : vector<1x128xi1>, vector<1x128xf32>
    %cst_728 = arith.constant 0.000000e+00 : f32
    %3602 = vector.broadcast %cst_728 : f32 to vector<1x128xf32>
    %3603 = arith.select %7, %3601, %3602 : vector<1x128xi1>, vector<1x128xf32>
    %cst_729 = arith.constant dense<0.000000e+00> : vector<1xf32>
    %3604 = vector.multi_reduction <add>, %3603, %cst_729 [1] : vector<1x128xf32> to vector<1xf32>
    %3605 = vector.shape_cast %3604 : vector<1xf32> to vector<1x1xf32>
    %3606 = vector.broadcast %cst_11 : f32 to vector<1x128xf32>
    %3607 = arith.maximumf %3575, %3606 : vector<1x128xf32>
    %3608 = tpu.reciprocal %3607 {approx = true} : vector<1x128xf32> -> vector<1x128xf32>
    %3609 = arith.mulf %3601, %3608 : vector<1x128xf32>
    %3610 = vector.broadcast %cst_11 : f32 to vector<1x128xf32>
    %3611 = arith.cmpf ogt, %3575, %3610 : vector<1x128xf32>
    %3612 = vector.broadcast %3506 : f32 to vector<1x128xf32>
    %3613 = arith.mulf %3609, %3612 : vector<1x128xf32>
    %3614 = arith.mulf %3613, %15 : vector<1x128xf32>
    %cst_730 = arith.constant 0.000000e+00 : f32
    %3615 = vector.broadcast %cst_730 : f32 to vector<1x128xf32>
    %3616 = arith.select %3611, %3614, %3615 : vector<1x128xi1>, vector<1x128xf32>
    %cst_731 = arith.constant 0.000000e+00 : f32
    %3617 = vector.broadcast %cst_731 : f32 to vector<1x128xf32>
    %3618 = arith.select %3, %3616, %3617 : vector<1x128xi1>, vector<1x128xf32>
    %cst_732 = arith.constant dense<0xFF800000> : vector<1xf32>
    %3619 = vector.multi_reduction <maximumf>, %3618, %cst_732 [1] : vector<1x128xf32> to vector<1xf32>
    %3620 = vector.shape_cast %3619 : vector<1xf32> to vector<1x1xf32>
    %3621 = arith.maximumf %3471, %3620 : vector<1x1xf32>
    %c0_i32_733 = arith.constant 0 : i32
    %3622 = vector.broadcast %c0_i32_733 : i32 to vector<1x128xi32>
    %3623 = arith.cmpi eq, %1, %3622 : vector<1x128xi32>
    %cst_734 = arith.constant 0.000000e+00 : f32
    %3624 = vector.shape_cast %3605 : vector<1x1xf32> to vector<1x1xf32>
    %3625 = vector.broadcast %3624 : vector<1x1xf32> to vector<1x128xf32>
    %3626 = vector.broadcast %cst_734 : f32 to vector<1x128xf32>
    %3627 = arith.select %3623, %3625, %3626 : vector<1x128xi1>, vector<1x128xf32>
    %c1_i32_735 = arith.constant 1 : i32
    %3628 = vector.broadcast %c1_i32_735 : i32 to vector<1x128xi32>
    %3629 = arith.cmpi eq, %1, %3628 : vector<1x128xi32>
    %cst_736 = arith.constant 0.000000e+00 : f32
    %3630 = vector.shape_cast %3537 : vector<1x1xf32> to vector<1x1xf32>
    %3631 = vector.broadcast %3630 : vector<1x1xf32> to vector<1x128xf32>
    %3632 = vector.broadcast %cst_736 : f32 to vector<1x128xf32>
    %3633 = arith.select %3629, %3631, %3632 : vector<1x128xi1>, vector<1x128xf32>
    %3634 = arith.addf %3627, %3633 : vector<1x128xf32>
    %c2_i32_737 = arith.constant 2 : i32
    %3635 = vector.broadcast %c2_i32_737 : i32 to vector<1x128xi32>
    %3636 = arith.cmpi eq, %1, %3635 : vector<1x128xi32>
    %cst_738 = arith.constant 0.000000e+00 : f32
    %3637 = vector.shape_cast %3539 : vector<1x1xf32> to vector<1x1xf32>
    %3638 = vector.broadcast %3637 : vector<1x1xf32> to vector<1x128xf32>
    %3639 = vector.broadcast %cst_738 : f32 to vector<1x128xf32>
    %3640 = arith.select %3636, %3638, %3639 : vector<1x128xi1>, vector<1x128xf32>
    %3641 = arith.addf %3634, %3640 : vector<1x128xf32>
    %3642 = arith.index_cast %c23_i32 : i32 to index
    %c0_739 = arith.constant 0 : index
    %3643 = vector.load %arg9[%3642, %c0_739] : memref<24x128xf32, #tpu.memory_space<vmem>>, vector<1x128xf32>
    tpu.vector_store %arg9[%3642, %c0_739], %3641 {strides = array<i32>} : memref<24x128xf32, #tpu.memory_space<vmem>>, vector<1x128xf32>,
    %c24_i32 = arith.constant 24 : i32
    %c0_740 = arith.constant 0 : index
    %c0_741 = arith.constant 0 : index
    %3644 = vector.load %arg6[%c0_740, %c0_741] : memref<1x128xf32, #tpu.memory_space<vmem>>, vector<1x128xf32>
    tpu.vector_store %arg6[%c0_740, %c0_741], %3575 {strides = array<i32>} : memref<1x128xf32, #tpu.memory_space<vmem>>, vector<1x128xf32>,
    %c0_742 = arith.constant 0 : index
    %c0_743 = arith.constant 0 : index
    %3645 = vector.load %arg7[%c0_742, %c0_743] : memref<1x128xf32, #tpu.memory_space<vmem>>, vector<1x128xf32>
    tpu.vector_store %arg7[%c0_742, %c0_743], %3583 {strides = array<i32>} : memref<1x128xf32, #tpu.memory_space<vmem>>, vector<1x128xf32>,
    %c0_744 = arith.constant 0 : index
    %c0_745 = arith.constant 0 : index
    %3646 = vector.load %arg8[%c0_744, %c0_745] : memref<1x128xf32, #tpu.memory_space<vmem>>, vector<1x128xf32>
    tpu.vector_store %arg8[%c0_744, %c0_745], %3601 {strides = array<i32>} : memref<1x128xf32, #tpu.memory_space<vmem>>, vector<1x128xf32>,
    %c0_i32_746 = arith.constant 0 : i32
    %3647 = vector.broadcast %c0_i32_746 : i32 to vector<1x128xi32>
    %3648 = arith.cmpi eq, %1, %3647 : vector<1x128xi32>
    %cst_747 = arith.constant 0.000000e+00 : f32
    %3649 = vector.shape_cast %3545 : vector<1x1xf32> to vector<1x1xf32>
    %3650 = vector.broadcast %3649 : vector<1x1xf32> to vector<1x128xf32>
    %3651 = vector.broadcast %cst_747 : f32 to vector<1x128xf32>
    %3652 = arith.select %3648, %3650, %3651 : vector<1x128xi1>, vector<1x128xf32>
    %c1_i32_748 = arith.constant 1 : i32
    %3653 = vector.broadcast %c1_i32_748 : i32 to vector<1x128xi32>
    %3654 = arith.cmpi eq, %1, %3653 : vector<1x128xi32>
    %cst_749 = arith.constant 0.000000e+00 : f32
    %3655 = vector.shape_cast %3540 : vector<1x1xf32> to vector<1x1xf32>
    %3656 = vector.broadcast %3655 : vector<1x1xf32> to vector<1x128xf32>
    %3657 = vector.broadcast %cst_749 : f32 to vector<1x128xf32>
    %3658 = arith.select %3654, %3656, %3657 : vector<1x128xi1>, vector<1x128xf32>
    %3659 = arith.addf %3652, %3658 : vector<1x128xf32>
    %c2_i32_750 = arith.constant 2 : i32
    %3660 = vector.broadcast %c2_i32_750 : i32 to vector<1x128xi32>
    %3661 = arith.cmpi eq, %1, %3660 : vector<1x128xi32>
    %cst_751 = arith.constant 0.000000e+00 : f32
    %3662 = vector.shape_cast %41 : vector<1x1xf32> to vector<1x1xf32>
    %3663 = vector.broadcast %3662 : vector<1x1xf32> to vector<1x128xf32>
    %3664 = vector.broadcast %cst_751 : f32 to vector<1x128xf32>
    %3665 = arith.select %3661, %3663, %3664 : vector<1x128xi1>, vector<1x128xf32>
    %3666 = arith.addf %3659, %3665 : vector<1x128xf32>
    %c3_i32_752 = arith.constant 3 : i32
    %3667 = vector.broadcast %c3_i32_752 : i32 to vector<1x128xi32>
    %3668 = arith.cmpi eq, %1, %3667 : vector<1x128xi32>
    %cst_753 = arith.constant 0.000000e+00 : f32
    %3669 = vector.shape_cast %3621 : vector<1x1xf32> to vector<1x1xf32>
    %3670 = vector.broadcast %3669 : vector<1x1xf32> to vector<1x128xf32>
    %3671 = vector.broadcast %cst_753 : f32 to vector<1x128xf32>
    %3672 = arith.select %3668, %3670, %3671 : vector<1x128xi1>, vector<1x128xf32>
    %3673 = arith.addf %3666, %3672 : vector<1x128xf32>
    %c0_754 = arith.constant 0 : index
    %c0_755 = arith.constant 0 : index
    %3674 = vector.load %arg10[%c0_754, %c0_755] : memref<1x128xf32, #tpu.memory_space<vmem>>, vector<1x128xf32>
    tpu.vector_store %arg10[%c0_754, %c0_755], %3673 {strides = array<i32>} : memref<1x128xf32, #tpu.memory_space<vmem>>, vector<1x128xf32>,
    return
  }
}

</mosaic_0001>

<bundles_post_ra>
// kernel: tpu_custom_call.1
= control target key start
LH: loop header
LB: loop body
LE: loop exit
PB: predicated region body
PF: predicated region fallthrough
CT: control target
= control target key end

     0   :  { %16 = vsyncpa [#allocation4], 0  ;;  %s5228_s0 = inlined_call_operand.hbm [shape: f32[10], index: 0, kind: input, shape index: {}]   ;;  %s5229_s1 = inlined_call_operand.vmem [shape: f32[144], index: 1, kind: input, shape index: {}]   ;;  %s5230_s2 = inlined_call_operand.vmem [shape: f32[1,128], index: 2, kind: input, shape index: {}]   ;;  %s5231_s3 = inlined_call_operand.vmem [shape: f32[1,128], index: 3, kind: input, shape index: {}]   ;;  %s5232_s4 = inlined_call_operand.vmem [shape: f32[1,128], index: 4, kind: input, shape index: {}]   ;;  %s5233_s5 = inlined_call_operand.vmem [shape: f32[1,128], index: 5, kind: input, shape index: {}]   ;;  %s5234_s6 = inlined_call_operand.hbm [shape: f32[1,128], index: 6, kind: output, shape index: {0}]   ;;  %s5235_s7 = inlined_call_operand.hbm [shape: f32[1,128], index: 7, kind: output, shape index: {1}]   ;;  %s5236_s8 = inlined_call_operand.hbm [shape: f32[1,128], index: 8, kind: output, shape index: {2}]   ;;  %s5237_s9 = inlined_call_operand.hbm [shape: f32[24,128], index: 9, kind: output, shape index: {3}]   ;;  %s5238_s10 = inlined_call_operand.hbm [shape: f32[1,128], index: 10, kind: output, shape index: {4}]  }
   0x1   :  { %17 = vsyncpa [#allocation5], 0 }
   0x2   :  { %18 = vsyncpa [#allocation3], 0 }
   0x3   :  { %19 = vsyncpa [#allocation9], 0 }
   0x4   :  { %20 = vsyncpa [#allocation12], 0  ;;  %s35_s15 = sshll.u32 %s5229_s1, 4  ;;  %s3049_s18 = scalar_lea.hbm %s5228_s0, 16  ;;  %s36_s15 = int_to_ptr.vmem [resolvable:$true] %s35_s15 }
   0x5   :  { %p3050_p0 = scmp.ne.s32.totalorder %s5228_s0, %s3049_s18  ;;  %p3053_p1 = scmp.lt.u32.totalorder %s3049_s18, %s5228_s0 }
   0x7   :  { %p3055_p2 = pnand %p3053_p1, %p3050_p0 }
   0x9   :  { %3058 = shalt.err (!%p3055_p2)
}
   0xa   :  { %s3191_s23 = smov [#allocation2]   ;;  %s3059_s1 = scalar_lea.vmem %s36_s15, 32 }
   0xb   :  { %28 = dma.hbm_to_smem %s5228_s0, 16, %s3191_s23, [#allocation4]  }
   0xc   :  { %p3060_p3 = scmp.ne.s32.totalorder %s36_s15, %s3059_s1  ;;  %p3064_p4 = scmp.lt.s32.totalorder %s36_s15, %s36_s15 }
   0xd   :  { %p3065_p5 = scmp.lt.s32.totalorder %s3059_s1, %s3059_s1 }
   0xf   :  { %p3066_p6 = por %p3065_p5, %p3064_p4 }
  0x11   :  { %p3067_p7 = pnand %p3066_p6, %p3060_p3 }
  0x13   :  { %3070 = shalt.err (!%p3067_p7)
}
  0x14   :  { %s3192_s26 = smov [#allocation6]  }
  0x15   :  { %38 = dma.vmem_to_smem %s36_s15, 32, %s3192_s26, [#allocation5]  }
  0x16   :  { %3181 = dma.done.wait [#allocation4], 16  }
  0x17   :  { %3182 = vsyncadd [#allocation4], 4294967280 }
  0x18   :  { %3183 = dma.done.wait [#allocation5], 32  }
  0x19   :  { %3184 = vsyncadd [#allocation5], 4294967264 }
  0x1a   :  { %53 = sfence }
  0x1b   :  { %v54_v0 = vlaneseq  ;;  %s59_s27 = sld [smem:[#allocation2]]  ;;  %v68_v2 = vld [vmem:[%s5231_s3] sm:$0x1]  ;;  %vm116_vm0 = vcmask 1040384   ;;  %s3276_s29 = sld [smem:[#allocation2 + $0x7]] }
  0x1c   :  { %s2612_s30 = sld [smem:[#allocation2 + $0x4]]  ;;  %s3279_s11 = sld [smem:[#allocation2 + $0x6]]  ;;  %v3286_v4 = vld [vmem:[%s5232_s4] sm:$0x1] }
  0x1d   :  { %v3271_v1 = vand.u32 127, %v54_v0  ;;  %s2611_s3 = sld [smem:[#allocation2 + $0x3]]  ;;  %s2621_s14 = sld [smem:[#allocation6 + $0x4]]  ;;  %v67_v19 = vld [vmem:[%s5230_s2] sm:$0x1] }
  0x1e   :  { %s92_s15 = sld [smem:[#allocation6]]  ;;  %s2610_s16 = sld [smem:[#allocation2 + $0x2]]  ;;  %v3325_v55 = vld [vmem:[%s5233_s5] sm:$0x1] }
  0x1f   :  { %vm56_vm1 = vcmp.lt.s32.totalorder %v3271_v1, 16  ;;  %s2609_s2 = sld [smem:[#allocation2 + $0x1]]  ;;  %s3193_s19 = smov 1   ;;  %vm57_vm2 = vcmp.eq.s32.totalorder %v3271_v1, 0 }
  0x20   :  { %v130_v3 = vsel %vm56_vm1, %v68_v2, 0.0  ;;  %s2618_s20 = sld [smem:[#allocation6 + $0x1]]  ;;  %s2619_s21 = sld [smem:[#allocation6 + $0x2]] }
  0x21   :  { %v3288_v5 = vstv %s59_s27  ;;  %v131_v6 = vsel %vm116_vm0, %v130_v3, 0.0  ;;  %v88_v9 = vstv %s3276_s29  ;;  %s2620_s22 = sld [smem:[#allocation6 + $0x3]]  ;;  %s2613_s25 = sld [smem:[#allocation2 + $0x5]] }
  0x22   :  { %v70_v7 = vmul.f32 %v3288_v5, %v68_v2  ;;  %132 = vadd.xlane.f32.xlu0 %v131_v6  ;;  %v100_v10 = vmax.f32 %v88_v9, 1e-09  ;;  %v86_v12 = vstv %s3279_s11  ;;  %v3297_v13 = vstv %s2612_s30  ;;  %s2626_s1 = sld [smem:[#allocation6 + $0xa]]  ;;  %s2622_s26 = sld [smem:[#allocation6 + $0x6]] }
  0x23   :  { %v98_v14 = vsub.f32 %v3297_v13, %v86_v12  ;;  %v3302_v15 = vstv %s2611_s3  ;;  %v109_v17 = vstv %s2621_s14  ;;  %s2623_s27 = sld [smem:[#allocation6 + $0x7]]  ;;  %s2624_s0 = sld [smem:[#allocation6 + $0x8]] }
  0x24   :  { %v71_v8 = vadd.f32 %v70_v7, %v3286_v4  ;;  %2747 = vrcp.f32 %v100_v10  ;;  %v104_v18 = vadd.f32 %v3302_v15, %v68_v2  ;;  %v110_v23 = vmul.f32 %v109_v17, %v68_v2  ;;  %s2625_s28 = sld [smem:[#allocation6 + $0x9]]  ;;  %s2631_s29 = sld [smem:[#allocation6 + $0x10]] }
  0x25   :  { %v99_v16 = vmax.f32 %v98_v14, 0.0  ;;  %v111_v24 = vstv %s92_s15  ;;  %v3308_v27 = vstv %s2610_s16  ;;  %v3314_v42 = vstv %s2609_s2  ;;  %s2627_s30 = sld [smem:[#allocation6 + $0xc]]  ;;  %s2628_s11 = sld [smem:[#allocation6 + $0xd]] }
  0x26   :  { %v72_v11 = vmax.f32 %v71_v8, 1e-09  ;;  %v112_v30 = vadd.f32 %v111_v24, %v110_v23  ;;  %v142_v52 = vstv %s2618_s20  ;;  %v138_v53 = vstv %s2619_s21  ;;  %s2629_s12 = sld [smem:[#allocation6 + $0xe]]  ;;  %s2630_s13 = sld [smem:[#allocation6 + $0xf]] }
  0x27   :  { %v3330_v61 = vstv %s2620_s22  ;;  %v3339_v7 = vstv %s2613_s25  ;;  %v3343_v8 = vmul.f32 %v3286_v4, %v3286_v4  ;;  %s2636_s3 = sld [smem:[#allocation6 + $0x16]]  ;;  %s2632_s14 = sld [smem:[#allocation6 + $0x12]] }
  0x28   :  { %2749 = vrcp.f32 %v72_v11  ;;  %5332 = vst [vmem:[#allocation19_spill] sm:$0xff] %v3330_v61  ;;  %s2633_s15 = sld [smem:[#allocation6 + $0x13]]  ;;  %s2634_s16 = sld [smem:[#allocation6 + $0x14]] }
  0x29   :  { %5335 = vst [vmem:[#allocation22_spill] sm:$0xff] %v3343_v8  ;;  %s2635_s17 = sld [smem:[#allocation6 + $0x15]]  ;;  %s2641_s18 = sld [smem:[#allocation6 + $0x1c]] }
  0x2a   :  { %s2637_s2 = sld [smem:[#allocation6 + $0x18]]  ;;  %s2638_s20 = sld [smem:[#allocation6 + $0x19]] }
  0x2b   :  { %s2639_s21 = sld [smem:[#allocation6 + $0x1a]]  ;;  %s2640_s22 = sld [smem:[#allocation6 + $0x1b]] }
  0x2c   :  { %s2646_s23 = sld [smem:[#allocation6 + $0x22]]  ;;  %s2642_s24 = sld [smem:[#allocation6 + $0x1e]] }
  0x2d   :  { %s2643_s25 = sld [smem:[#allocation6 + $0x1f]] }
  0x2e   :  { %v2748_v20 = vpop.eup %2747 }
  0x2f   :  { %v102_v22 = vmul.f32 %v2748_v20, %v99_v16 }
  0x31   :  { %v105_v26 = vmul.f32 %v104_v18, %v102_v22 }
  0x32   :  { %v2750_v21 = vpop.eup %2749 }
  0x33   :  { %v74_v25 = vmul.f32 %v2750_v21, %v67_v19  ;;  %v106_v29 = vadd.f32 1.0, %v105_v26 }
  0x35   :  { %v75_v28 = vmax.f32 %v74_v25, 1e-09  ;;  %v108_v31 = vmul.f32 %v3308_v27, %v106_v29 }
  0x37   :  { %2751 = vlog2.f32 %v75_v28  ;;  %v113_v32 = vmin.f32 %v112_v30, %v108_v31  ;;  %v215_v31 = vstv %s2626_s1  ;;  %s2644_s1 = sld [smem:[#allocation6 + $0x20]] }
  0x39   :  { %v114_v33 = vmax.f32 %v113_v32, 0.0 }
  0x3b   :  { %v115_v34 = vsel %vm56_vm1, %v114_v33, 0.0 }
  0x3c   :  { %v117_v35 = vsel %vm116_vm0, %v115_v34, 0.0  ;;  %v128_v36 = vsub.f32 %v111_v24, %v115_v34 }
  0x3d   :  { %118 = vadd.xlane.f32.xlu1 %v117_v35 }
  0x3e   :  { %v129_v49 = vmax.f32 %v128_v36, 0.0 }
  0x41   :  { %v2752_v37 = vpop.eup %2751 }
  0x42   :  { %v77_v38 = vmul.f32 0.6931472, %v2752_v37 }
  0x44   :  { %v78_v39 = vmul.f32 0.6666667, %v77_v38 }
  0x46   :  { %v79_v40 = vmul.f32 1.442695, %v78_v39  ;;  %v217_v39 = vstv %s2622_s26  ;;  %s2645_s26 = sld [smem:[#allocation6 + $0x21]] }
  0x48   :  { %2753 = vpow2.f32 %v79_v40 }
  0x52   :  { %v2754_v41 = vpop.eup %2753 }
  0x53   :  { %v81_v43 = vmul.f32 %v2754_v41, %v67_v19 }
  0x55   :  { %v83_v44 = vmul.f32 %v3314_v42, %v81_v43 }
  0x57   :  { %v84_v45 = vsel %vm56_vm1, %v83_v44, 0.0 }
  0x58   :  { %140 = vrot.lane.b32.xlu0 %v84_v45, %s3193_s19 }
  0xaf   :  { %v133_v46 = vpop.xlane.xlu0 %132 }
  0xb0   :  { %v134_v47 = vmul.f32 0.0625, %v133_v46 }
  0xb2   :  { %v135_v48 = vmul.f32 2.5, %v134_v47 }
  0xb4   :  { %v136_v50 = vadd.f32 %v135_v48, %v3286_v4 }
  0xb6   :  { %v137_v51 = vmul.f32 %v136_v50, %v129_v49 }
  0xb8   :  { %v139_v57 = vadd.f32 %v138_v53, %v137_v51 }
  0xca   :  { %v141_v54 = vpop.permute.xlu0 %140  ;;  %v119_v60 = vpop.xlane.xlu1 %118 }
  0xcb   :  { %v143_v56 = vsel %vm57_vm2, %v142_v52, %v141_v54  ;;  %v3332_v63 = vmul.f32 0.0625, %v119_v60 }
  0xcc   :  { %v144_v58 = vsub.f32 %v143_v56, %v84_v45 }
  0xcd   :  { %5333 = vst [vmem:[#allocation20_spill] sm:$0xff] %v3332_v63  ;;  %v3337_v3 = vmul.f32 %v3330_v61, %v3332_v63 }
  0xce   :  { %v145_v59 = vmul.f32 %v144_v58, %v3325_v55 }
  0xcf   :  { %5334 = vst [vmem:[#allocation21_spill] sm:$0xff] %v3337_v3  ;;  %v3352_v11 = vadd.f32 %v3337_v3, %v88_v9  ;;  %v125_v16 = vmul.f32 %v3339_v7, %v3337_v3 }
  0xd0   :  { %v146_v62 = vadd.f32 %v145_v59, %v139_v57 }
  0xd1   :  { %v208_v18 = vmax.f32 %v3352_v11, 1e-09 }
  0xd2   :  { %v147_v0 = vmul.f32 %v146_v62, %v3330_v61 }
  0xd4   :  { %v148_v2 = vadd.f32 %v147_v0, %v67_v19  ;;  %v126_v19 = vadd.f32 %v125_v16, %v86_v12 }
  0xd6   :  { %v149_v6 = vmax.f32 %v148_v2, 0.0  ;;  %v3362_v20 = vmin.f32 %v126_v19, %v3297_v13 }
  0xd8   :  { %v3347_v10 = vsel %vm56_vm1, %v149_v6, 0.0  ;;  %v206_v9 = vsub.f32 %v3297_v13, %v3362_v20 }
  0xd9   :  { %5336 = vst [vmem:[#allocation23_spill] sm:$0xff] %v3347_v10  ;;  %v152_v14 = vmul.f32 5.0, %v3347_v10 }
  0xda   :  { %v207_v25 = vmax.f32 %v206_v9, 0.0  ;;  %v242_v9 = vstv %s2624_s0  ;;  %s2647_s0 = sld [smem:[#allocation6 + $0x24]] }
  0xdb   :  { %v153_v17 = vadd.f32 %v152_v14, %v3343_v8 }
  0xdd   :  { %2755 = vrsqrt.f32 %v153_v17  ;;  %vm156_vm3 = vcmp.eq.f32.partialorder %v153_v17, inf  ;;  %v159_v23 = vand.u32 2147483648, %v153_v17  ;;  %vm158_vm4 = vcmp.eq.f32.partialorder %v153_v17, 0.0 }
  0xde   :  { %2757 = vrcp.f32 %v208_v18 }
  0xe7   :  { %v2756_v21 = vpop.eup %2755 }
  0xe8   :  { %v155_v22 = vmul.f32 %v2756_v21, %v153_v17  ;;  %v2758_v26 = vpop.eup %2757 }
  0xe9   :  { %v210_v30 = vmul.f32 %v2758_v26, %v207_v25  ;;  %v3391_v25 = vstv %s2625_s28  ;;  %s2667_s28 = sld [smem:[#allocation6 + $0x3c]] }
  0xea   :  { %v157_v24 = vsel %vm156_vm3, %v153_v17, %v155_v22  ;;  %v246_v17 = vstv %s2623_s27  ;;  %s2651_s27 = sld [smem:[#allocation6 + $0x28]] }
  0xeb   :  { %v160_v28 = vsel %vm158_vm4, %v159_v23, %v157_v24 }
  0xec   :  { %v161_v12 = vsub.f32 %v160_v28, %v3286_v4 }
  0xee   :  { %v162_v29 = vmul.f32 0.4, %v161_v12 }
  0xf0   :  { %v234_v32 = vsel %vm56_vm1, %v162_v29, 0.0  ;;  %v163_v33 = vmul.f32 %v162_v29, %v3288_v5  ;;  %v211_v34 = vadd.f32 %v162_v29, %v3302_v15  ;;  %v216_v38 = vmul.f32 %v215_v31, %v162_v29 }
  0xf1   :  { %v235_v35 = vsel %vm116_vm0, %v234_v32, 0.0 }
  0xf2   :  { %236 = vadd.xlane.f32.xlu1 %v235_v35  ;;  %v164_v36 = vadd.f32 %v163_v33, %v3286_v4  ;;  %v212_v37 = vmul.f32 %v211_v34, %v210_v30  ;;  %v218_v44 = vadd.f32 %v217_v39, %v216_v38 }
  0xf4   :  { %v165_v40 = vmax.f32 %v164_v36, 1e-09  ;;  %v213_v41 = vadd.f32 1.0, %v212_v37 }
  0xf6   :  { %2759 = vrcp.f32 %v165_v40  ;;  %v214_v43 = vmul.f32 %v213_v41, %v3308_v27 }
  0xf8   :  { %v219_v45 = vmin.f32 %v218_v44, %v214_v43 }
  0xfa   :  { %v220_v46 = vmax.f32 %v219_v45, 0.0 }
  0xfc   :  { %v221_v47 = vsel %vm56_vm1, %v220_v46, 0.0 }
  0xfd   :  { %v232_v48 = vsub.f32 %v217_v39, %v221_v47  ;;  %v222_v62 = vsel %vm116_vm0, %v221_v47, 0.0 }
  0xff   :  { %v233_v16 = vmax.f32 %v232_v48, 0.0 }
 0x100   :  { %v2760_v49 = vpop.eup %2759 }
 0x101   :  { %v167_v50 = vmul.f32 %v2760_v49, %v3347_v10 }
 0x103   :  { %v168_v51 = vmax.f32 %v167_v50, 1e-09 }
 0x105   :  { %2761 = vlog2.f32 %v168_v51 }
 0x10f   :  { %v2762_v52 = vpop.eup %2761 }
 0x110   :  { %v170_v53 = vmul.f32 0.6931472, %v2762_v52 }
 0x112   :  { %v171_v54 = vmul.f32 0.6666667, %v170_v53 }
 0x114   :  { %v172_v56 = vmul.f32 1.442695, %v171_v54 }
 0x116   :  { %2763 = vpow2.f32 %v172_v56 }
 0x120   :  { %v2764_v57 = vpop.eup %2763 }
 0x121   :  { %v174_v58 = vmul.f32 %v2764_v57, %v3347_v10 }
 0x123   :  { %v175_v59 = vmul.f32 %v174_v58, %v3314_v42 }
 0x125   :  { %v3381_v60 = vsel %vm56_vm1, %v175_v59, 0.0 }
 0x126   :  { %5337 = vst [vmem:[#allocation24_spill] sm:$0xff] %v3381_v60  ;;  %244 = vrot.lane.b32.xlu1 %v3381_v60, %s3193_s19 }
 0x14a   :  { %223 = vadd.xlane.f32.xlu1 %v222_v62 }
 0x17f   :  { %v237_v0 = vpop.xlane.xlu1 %236 }
 0x180   :  { %v238_v2 = vmul.f32 0.0625, %v237_v0 }
 0x182   :  { %v239_v6 = vmul.f32 2.5, %v238_v2 }
 0x184   :  { %v240_v14 = vadd.f32 %v239_v6, %v3286_v4 }
 0x186   :  { %v241_v18 = vmul.f32 %v240_v14, %v233_v16  ;;  %v316_v14 = vstv %s2631_s29  ;;  %s2668_s29 = sld [smem:[#allocation6 + $0x3d]] }
 0x188   :  { %v243_v23 = vadd.f32 %v242_v9, %v241_v18  ;;  %v318_v9 = vstv %s2627_s30  ;;  %s2648_s30 = sld [smem:[#allocation6 + $0x25]] }
 0x198   :  { %v245_v19 = vpop.permute.xlu1 %244 }
 0x199   :  { %v247_v21 = vsel %vm57_vm2, %v246_v17, %v245_v19 }
 0x19a   :  { %v248_v22 = vsub.f32 %v247_v21, %v3381_v60 }
 0x19c   :  { %v249_v24 = vmul.f32 %v248_v22, %v3325_v55 }
 0x19e   :  { %v250_v26 = vadd.f32 %v249_v24, %v243_v23 }
 0x1a0   :  { %v251_v28 = vmul.f32 %v250_v26, %v3391_v25 }
 0x1a2   :  { %v252_v12 = vadd.f32 %v251_v28, %v3347_v10 }
 0x1a4   :  { %v253_v29 = vmax.f32 %v252_v12, 0.0 }
 0x1a6   :  { %v3397_v30 = vsel %vm56_vm1, %v253_v29, 0.0 }
 0x1a7   :  { %v255_v31 = vmul.f32 5.0, %v3397_v30 }
 0x1a9   :  { %v256_v32 = vadd.f32 %v255_v31, %v3343_v8 }
 0x1ab   :  { %2765 = vrsqrt.f32 %v256_v32  ;;  %vm259_vm5 = vcmp.eq.f32.partialorder %v256_v32, inf  ;;  %v262_v35 = vand.u32 2147483648, %v256_v32  ;;  %vm261_vm6 = vcmp.eq.f32.partialorder %v256_v32, 0.0 }
 0x1b5   :  { %v2766_v33 = vpop.eup %2765 }
 0x1b6   :  { %v258_v34 = vmul.f32 %v2766_v33, %v256_v32 }
 0x1b8   :  { %v260_v36 = vsel %vm259_vm5, %v256_v32, %v258_v34 }
 0x1b9   :  { %v263_v37 = vsel %vm261_vm6, %v262_v35, %v260_v36 }
 0x1ba   :  { %v264_v38 = vsub.f32 %v263_v37, %v3286_v4 }
 0x1bc   :  { %v265_v39 = vmul.f32 0.4, %v264_v38 }
 0x1be   :  { %v335_v40 = vsel %vm56_vm1, %v265_v39, 0.0  ;;  %v266_v41 = vmul.f32 %v265_v39, %v3288_v5  ;;  %v317_v18 = vmul.f32 %v316_v14, %v265_v39 }
 0x1bf   :  { %v336_v43 = vsel %vm116_vm0, %v335_v40, 0.0 }
 0x1c0   :  { %337 = vadd.xlane.f32.xlu0 %v336_v43  ;;  %v267_v44 = vadd.f32 %v266_v41, %v3286_v4  ;;  %v319_v26 = vadd.f32 %v318_v9, %v317_v18  ;;  %v343_v43 = vstv %s2629_s12  ;;  %s2650_s12 = sld [smem:[#allocation6 + $0x27]] }
 0x1c2   :  { %v268_v45 = vmax.f32 %v267_v44, 1e-09 }
 0x1c4   :  { %2767 = vrcp.f32 %v268_v45 }
 0x1ce   :  { %v2768_v46 = vpop.eup %2767 }
 0x1cf   :  { %v270_v47 = vmul.f32 %v2768_v46, %v3397_v30 }
 0x1d1   :  { %v271_v48 = vmax.f32 %v270_v47, 1e-09 }
 0x1d3   :  { %2769 = vlog2.f32 %v271_v48  ;;  %v3445_v48 = vstv %s2630_s13  ;;  %s2656_s13 = sld [smem:[#allocation6 + $0x2e]] }
 0x1d7   :  { %v224_v49 = vpop.xlane.xlu1 %223 }
 0x1d8   :  { %v3408_v50 = vmul.f32 0.0625, %v224_v49 }
 0x1da   :  { %5338 = vst [vmem:[#allocation25_spill] sm:$0xff] %v3408_v50  ;;  %v3412_v51 = vmul.f32 %v3391_v25, %v3408_v50 }
 0x1dc   :  { %5339 = vst [vmem:[#allocation26_spill] sm:$0xff] %v3412_v51  ;;  %v3416_v52 = vadd.f32 %v3412_v51, %v3352_v11  ;;  %v229_v53 = vmul.f32 %v3412_v51, %v3339_v7 }
 0x1dd   :  { %v2770_v54 = vpop.eup %2769 }
 0x1de   :  { %v230_v56 = vadd.f32 %v229_v53, %v3362_v20  ;;  %v309_v57 = vmax.f32 %v3416_v52, 1e-09  ;;  %v273_v58 = vmul.f32 0.6931472, %v2770_v54  ;;  %v312_v20 = vadd.f32 %v265_v39, %v3302_v15 }
 0x1df   :  { %v347_v39 = vstv %s2628_s11  ;;  %s2649_s11 = sld [smem:[#allocation6 + $0x26]] }
 0x1e0   :  { %2771 = vrcp.f32 %v309_v57  ;;  %v274_v59 = vmul.f32 0.6666667, %v273_v58  ;;  %v3423_v62 = vmin.f32 %v230_v56, %v3297_v13 }
 0x1e2   :  { %v275_v0 = vmul.f32 1.442695, %v274_v59  ;;  %v307_v11 = vsub.f32 %v3297_v13, %v3423_v62 }
 0x1e4   :  { %2773 = vpow2.f32 %v275_v0  ;;  %v308_v2 = vmax.f32 %v307_v11, 0.0 }
 0x1ea   :  { %v2772_v6 = vpop.eup %2771 }
 0x1eb   :  { %v311_v16 = vmul.f32 %v2772_v6, %v308_v2 }
 0x1ed   :  { %v313_v17 = vmul.f32 %v312_v20, %v311_v16 }
 0x1ee   :  { %v2774_v19 = vpop.eup %2773 }
 0x1ef   :  { %v277_v21 = vmul.f32 %v2774_v19, %v3397_v30  ;;  %v314_v22 = vadd.f32 1.0, %v313_v17 }
 0x1f1   :  { %v278_v23 = vmul.f32 %v277_v21, %v3314_v42  ;;  %v315_v24 = vmul.f32 %v314_v22, %v3308_v27 }
 0x1f3   :  { %v3433_v28 = vsel %vm56_vm1, %v278_v23, 0.0  ;;  %v320_v12 = vmin.f32 %v319_v26, %v315_v24 }
 0x1f4   :  { %345 = vrot.lane.b32.xlu0 %v3433_v28, %s3193_s19 }
 0x1f5   :  { %v321_v29 = vmax.f32 %v320_v12, 0.0 }
 0x1f7   :  { %v322_v31 = vsel %vm56_vm1, %v321_v29, 0.0 }
 0x1f8   :  { %v323_v32 = vsel %vm116_vm0, %v322_v31, 0.0  ;;  %v333_v33 = vsub.f32 %v318_v9, %v322_v31 }
 0x1f9   :  { %324 = vadd.xlane.f32.xlu1 %v323_v32 }
 0x1fa   :  { %v334_v38 = vmax.f32 %v333_v33, 0.0 }
 0x24d   :  { %v338_v34 = vpop.xlane.xlu0 %337 }
 0x24e   :  { %v339_v35 = vmul.f32 0.0625, %v338_v34  ;;  %v417_v34 = vstv %s2636_s3  ;;  %s2652_s3 = sld [smem:[#allocation6 + $0x2a]] }
 0x250   :  { %v340_v36 = vmul.f32 2.5, %v339_v35 }
 0x252   :  { %v341_v37 = vadd.f32 %v340_v36, %v3286_v4 }
 0x254   :  { %v342_v40 = vmul.f32 %v341_v37, %v334_v38 }
 0x256   :  { %v344_v46 = vadd.f32 %v343_v43, %v342_v40  ;;  %v419_v40 = vstv %s2632_s14  ;;  %s2653_s14 = sld [smem:[#allocation6 + $0x2b]] }
 0x266   :  { %v346_v41 = vpop.permute.xlu0 %345 }
 0x267   :  { %v348_v44 = vsel %vm57_vm2, %v347_v39, %v346_v41 }
 0x268   :  { %v349_v45 = vsub.f32 %v348_v44, %v3433_v28 }
 0x26a   :  { %v350_v47 = vmul.f32 %v349_v45, %v3325_v55 }
 0x26c   :  { %v351_v49 = vadd.f32 %v350_v47, %v344_v46 }
 0x26e   :  { %v352_v53 = vmul.f32 %v351_v49, %v3445_v48 }
 0x270   :  { %v353_v54 = vadd.f32 %v352_v53, %v3397_v30 }
 0x272   :  { %v354_v56 = vmax.f32 %v353_v54, 0.0 }
 0x274   :  { %v3451_v57 = vsel %vm56_vm1, %v354_v56, 0.0 }
 0x275   :  { %v356_v58 = vmul.f32 5.0, %v3451_v57 }
 0x277   :  { %v357_v59 = vadd.f32 %v356_v58, %v3343_v8 }
 0x279   :  { %2775 = vrsqrt.f32 %v357_v59  ;;  %vm360_vm7 = vcmp.eq.f32.partialorder %v357_v59, inf  ;;  %v363_v2 = vand.u32 2147483648, %v357_v59  ;;  %vm362_vm8 = vcmp.eq.f32.partialorder %v357_v59, 0.0 }
 0x283   :  { %v2776_v0 = vpop.eup %2775 }
 0x284   :  { %v359_v11 = vmul.f32 %v2776_v0, %v357_v59 }
 0x286   :  { %v325_v6 = vpop.xlane.xlu1 %324  ;;  %v361_v14 = vsel %vm360_vm7, %v357_v59, %v359_v11 }
 0x287   :  { %v3455_v16 = vmul.f32 0.0625, %v325_v6  ;;  %v364_v20 = vsel %vm362_vm8, %v363_v2, %v361_v14 }
 0x288   :  { %v365_v17 = vsub.f32 %v364_v20, %v3286_v4 }
 0x289   :  { %5340 = vst [vmem:[#allocation27_spill] sm:$0xff] %v3455_v16  ;;  %v3460_v18 = vmul.f32 %v3445_v48, %v3455_v16 }
 0x28a   :  { %v366_v19 = vmul.f32 0.4, %v365_v17 }
 0x28b   :  { %5341 = vst [vmem:[#allocation28_spill] sm:$0xff] %v3460_v18  ;;  %v3464_v9 = vadd.f32 %v3460_v18, %v3416_v52  ;;  %v330_v21 = vmul.f32 %v3460_v18, %v3339_v7 }
 0x28c   :  { %v367_v22 = vmul.f32 %v366_v19, %v3288_v5  ;;  %v436_v23 = vsel %vm56_vm1, %v366_v19, 0.0  ;;  %v413_v36 = vadd.f32 %v366_v19, %v3302_v15  ;;  %v418_v39 = vmul.f32 %v417_v34, %v366_v19 }
 0x28d   :  { %v331_v24 = vadd.f32 %v330_v21, %v3423_v62  ;;  %v410_v26 = vmax.f32 %v3464_v9, 1e-09  ;;  %v437_v12 = vsel %vm116_vm0, %v436_v23, 0.0 }
 0x28e   :  { %v368_v29 = vadd.f32 %v367_v22, %v3286_v4  ;;  %438 = vadd.xlane.f32.xlu1 %v437_v12  ;;  %v420_v46 = vadd.f32 %v419_v40, %v418_v39 }
 0x28f   :  { %2777 = vrcp.f32 %v410_v26  ;;  %v3476_v52 = vmin.f32 %v331_v24, %v3297_v13  ;;  %v448_v24 = vstv %s2633_s15  ;;  %s2654_s15 = sld [smem:[#allocation6 + $0x2c]] }
 0x290   :  { %v369_v31 = vmax.f32 %v368_v29, 1e-09  ;;  %v444_v29 = vstv %s2634_s16  ;;  %s2655_s16 = sld [smem:[#allocation6 + $0x2d]] }
 0x291   :  { %v408_v32 = vsub.f32 %v3297_v13, %v3476_v52 }
 0x292   :  { %2779 = vrcp.f32 %v369_v31 }
 0x293   :  { %v409_v33 = vmax.f32 %v408_v32, 0.0 }
 0x299   :  { %v2778_v62 = vpop.eup %2777 }
 0x29a   :  { %v412_v35 = vmul.f32 %v2778_v62, %v409_v33 }
 0x29c   :  { %v2780_v37 = vpop.eup %2779  ;;  %v414_v38 = vmul.f32 %v413_v36, %v412_v35  ;;  %v3499_v36 = vstv %s2635_s17  ;;  %s2677_s17 = sld [smem:[#allocation6 + $0x48]] }
 0x29d   :  { %v371_v41 = vmul.f32 %v2780_v37, %v3451_v57 }
 0x29e   :  { %v415_v43 = vadd.f32 1.0, %v414_v38 }
 0x29f   :  { %v372_v44 = vmax.f32 %v371_v41, 1e-09 }
 0x2a0   :  { %v416_v45 = vmul.f32 %v415_v43, %v3308_v27 }
 0x2a1   :  { %2781 = vlog2.f32 %v372_v44 }
 0x2a2   :  { %v421_v47 = vmin.f32 %v420_v46, %v416_v45 }
 0x2a4   :  { %v422_v49 = vmax.f32 %v421_v47, 0.0 }
 0x2a6   :  { %v423_v53 = vsel %vm56_vm1, %v422_v49, 0.0 }
 0x2a7   :  { %v424_v54 = vsel %vm116_vm0, %v423_v53, 0.0  ;;  %v434_v56 = vsub.f32 %v419_v40, %v423_v53 }
 0x2a8   :  { %425 = vadd.xlane.f32.xlu0 %v424_v54 }
 0x2a9   :  { %v435_v23 = vmax.f32 %v434_v56, 0.0 }
 0x2ab   :  { %v2782_v58 = vpop.eup %2781 }
 0x2ac   :  { %v374_v59 = vmul.f32 0.6931472, %v2782_v58 }
 0x2ae   :  { %v375_v0 = vmul.f32 0.6666667, %v374_v59 }
 0x2b0   :  { %v376_v11 = vmul.f32 1.442695, %v375_v0 }
 0x2b2   :  { %2783 = vpow2.f32 %v376_v11 }
 0x2bc   :  { %v2784_v2 = vpop.eup %2783 }
 0x2bd   :  { %v378_v6 = vmul.f32 %v2784_v2, %v3451_v57 }
 0x2bf   :  { %v379_v14 = vmul.f32 %v378_v6, %v3314_v42 }
 0x2c1   :  { %v3490_v20 = vsel %vm56_vm1, %v379_v14, 0.0 }
 0x2c2   :  { %5342 = vst [vmem:[#allocation29_spill] sm:$0xff] %v3490_v20  ;;  %446 = vrot.lane.b32.xlu1 %v3490_v20, %s3193_s19 }
 0x31b   :  { %v439_v17 = vpop.xlane.xlu1 %438 }
 0x31c   :  { %v440_v19 = vmul.f32 0.0625, %v439_v17  ;;  %v518_v17 = vstv %s2641_s18  ;;  %s2678_s18 = sld [smem:[#allocation6 + $0x49]] }
 0x31e   :  { %v441_v21 = vmul.f32 2.5, %v440_v19 }
 0x320   :  { %v442_v22 = vadd.f32 %v441_v21, %v3286_v4 }
 0x322   :  { %v443_v26 = vmul.f32 %v442_v22, %v435_v23 }
 0x324   :  { %v445_v33 = vadd.f32 %v444_v29, %v443_v26 }
 0x334   :  { %v447_v12 = vpop.permute.xlu1 %446 }
 0x335   :  { %v449_v31 = vsel %vm57_vm2, %v448_v24, %v447_v12  ;;  %v426_v35 = vpop.xlane.xlu0 %425 }
 0x336   :  { %v450_v32 = vsub.f32 %v449_v31, %v3490_v20  ;;  %v3502_v38 = vmul.f32 0.0625, %v426_v35  ;;  %v520_v31 = vstv %s2637_s2  ;;  %s2661_s2 = sld [smem:[#allocation6 + $0x34]] }
 0x338   :  { %v451_v62 = vmul.f32 %v450_v32, %v3325_v55  ;;  %5343 = vst [vmem:[#allocation30_spill] sm:$0xff] %v3502_v38  ;;  %v3507_v41 = vmul.f32 %v3499_v36, %v3502_v38 }
 0x33a   :  { %v452_v34 = vadd.f32 %v451_v62, %v445_v33  ;;  %5344 = vst [vmem:[#allocation31_spill] sm:$0xff] %v3507_v41  ;;  %v3516_v45 = vadd.f32 %v3507_v41, %v3464_v9  ;;  %v431_v47 = vmul.f32 %v3507_v41, %v3339_v7 }
 0x33c   :  { %v453_v37 = vmul.f32 %v452_v34, %v3499_v36  ;;  %v511_v49 = vmax.f32 %v3516_v45, 1e-09  ;;  %v432_v53 = vadd.f32 %v431_v47, %v3476_v52 }
 0x33e   :  { %v454_v39 = vadd.f32 %v453_v37, %v3451_v57  ;;  %v3524_v54 = vmin.f32 %v432_v53, %v3297_v13 }
 0x340   :  { %v455_v40 = vmax.f32 %v454_v39, 0.0  ;;  %v509_v0 = vsub.f32 %v3297_v13, %v3524_v54 }
 0x342   :  { %v3511_v43 = vsel %vm56_vm1, %v455_v40, 0.0  ;;  %v510_v14 = vmax.f32 %v509_v0, 0.0 }
 0x343   :  { %v457_v44 = vmul.f32 5.0, %v3511_v43 }
 0x345   :  { %v458_v46 = vadd.f32 %v457_v44, %v3343_v8 }
 0x347   :  { %2785 = vrsqrt.f32 %v458_v46  ;;  %vm461_vm9 = vcmp.eq.f32.partialorder %v458_v46, inf  ;;  %v464_v9 = vand.u32 2147483648, %v458_v46  ;;  %vm463_vm10 = vcmp.eq.f32.partialorder %v458_v46, 0.0 }
 0x348   :  { %2787 = vrcp.f32 %v511_v49 }
 0x351   :  { %v2786_v56 = vpop.eup %2785 }
 0x352   :  { %v460_v58 = vmul.f32 %v2786_v56, %v458_v46  ;;  %v2788_v6 = vpop.eup %2787 }
 0x353   :  { %v513_v22 = vmul.f32 %v2788_v6, %v510_v14 }
 0x354   :  { %v462_v59 = vsel %vm461_vm9, %v458_v46, %v460_v58 }
 0x355   :  { %v465_v11 = vsel %vm463_vm10, %v464_v9, %v462_v59 }
 0x356   :  { %v466_v2 = vsub.f32 %v465_v11, %v3286_v4 }
 0x358   :  { %v467_v52 = vmul.f32 0.4, %v466_v2 }
 0x35a   :  { %v537_v19 = vsel %vm56_vm1, %v467_v52, 0.0  ;;  %v468_v21 = vmul.f32 %v467_v52, %v3288_v5  ;;  %v514_v23 = vadd.f32 %v467_v52, %v3302_v15  ;;  %v519_v29 = vmul.f32 %v518_v17, %v467_v52 }
 0x35b   :  { %v538_v24 = vsel %vm116_vm0, %v537_v19, 0.0 }
 0x35c   :  { %539 = vadd.xlane.f32.xlu1 %v538_v24  ;;  %v469_v26 = vadd.f32 %v468_v21, %v3286_v4  ;;  %v515_v12 = vmul.f32 %v514_v23, %v513_v22  ;;  %v521_v34 = vadd.f32 %v520_v31, %v519_v29  ;;  %v549_v21 = vstv %s2638_s20  ;;  %s2657_s20 = sld [smem:[#allocation6 + $0x30]] }
 0x35d   :  { %v545_v24 = vstv %s2639_s21  ;;  %s2658_s21 = sld [smem:[#allocation6 + $0x31]] }
 0x35e   :  { %v470_v32 = vmax.f32 %v469_v26, 1e-09  ;;  %v516_v33 = vadd.f32 1.0, %v515_v12 }
 0x360   :  { %2789 = vrcp.f32 %v470_v32  ;;  %v517_v62 = vmul.f32 %v516_v33, %v3308_v27 }
 0x362   :  { %v522_v35 = vmin.f32 %v521_v34, %v517_v62  ;;  %v3553_v62 = vstv %s2640_s22  ;;  %s2659_s22 = sld [smem:[#allocation6 + $0x32]] }
 0x364   :  { %v523_v37 = vmax.f32 %v522_v35, 0.0 }
 0x366   :  { %v524_v39 = vsel %vm56_vm1, %v523_v37, 0.0 }
 0x367   :  { %v525_v40 = vsel %vm116_vm0, %v524_v39, 0.0  ;;  %v535_v44 = vsub.f32 %v520_v31, %v524_v39 }
 0x368   :  { %526 = vadd.xlane.f32.xlu1 %v525_v40 }
 0x369   :  { %v536_v19 = vmax.f32 %v535_v44, 0.0 }
 0x36a   :  { %v2790_v46 = vpop.eup %2789 }
 0x36b   :  { %v472_v47 = vmul.f32 %v2790_v46, %v3511_v43 }
 0x36d   :  { %v473_v49 = vmax.f32 %v472_v47, 1e-09 }
 0x36f   :  { %2791 = vlog2.f32 %v473_v49 }
 0x379   :  { %v2792_v53 = vpop.eup %2791 }
 0x37a   :  { %v475_v56 = vmul.f32 0.6931472, %v2792_v53 }
 0x37c   :  { %v476_v58 = vmul.f32 0.6666667, %v475_v56 }
 0x37e   :  { %v477_v9 = vmul.f32 1.442695, %v476_v58 }
 0x380   :  { %2793 = vpow2.f32 %v477_v9 }
 0x38a   :  { %v2794_v59 = vpop.eup %2793 }
 0x38b   :  { %v479_v0 = vmul.f32 %v2794_v59, %v3511_v43 }
 0x38d   :  { %v480_v11 = vmul.f32 %v479_v0, %v3314_v42 }
 0x38f   :  { %v3544_v2 = vsel %vm56_vm1, %v480_v11, 0.0 }
 0x390   :  { %547 = vrot.lane.b32.xlu0 %v3544_v2, %s3193_s19 }
 0x3e9   :  { %v540_v6 = vpop.xlane.xlu1 %539 }
 0x3ea   :  { %v541_v52 = vmul.f32 0.0625, %v540_v6 }
 0x3ec   :  { %v542_v14 = vmul.f32 2.5, %v541_v52 }
 0x3ee   :  { %v543_v17 = vadd.f32 %v542_v14, %v3286_v4 }
 0x3f0   :  { %v544_v22 = vmul.f32 %v543_v17, %v536_v19 }
 0x3f2   :  { %v546_v29 = vadd.f32 %v545_v24, %v544_v22 }
 0x3f5   :  { %v527_v32 = vpop.xlane.xlu1 %526 }
 0x3f6   :  { %v3556_v35 = vmul.f32 0.0625, %v527_v32 }
 0x3f8   :  { %5345 = vst [vmem:[#allocation32_spill] sm:$0xff] %v3556_v35  ;;  %v3561_v40 = vmul.f32 %v3553_v62, %v3556_v35 }
 0x3fa   :  { %5346 = vst [vmem:[#allocation33_spill] sm:$0xff] %v3561_v40  ;;  %v3570_v47 = vadd.f32 %v3561_v40, %v3516_v45  ;;  %v532_v53 = vmul.f32 %v3561_v40, %v3339_v7 }
 0x3fc   :  { %v612_v56 = vmax.f32 %v3570_v47, 1e-09  ;;  %v533_v58 = vadd.f32 %v532_v53, %v3524_v54 }
 0x3fe   :  { %v3578_v9 = vmin.f32 %v533_v58, %v3297_v13 }
 0x400   :  { %v610_v6 = vsub.f32 %v3297_v13, %v3578_v9 }
 0x402   :  { %v548_v23 = vpop.permute.xlu0 %547  ;;  %v611_v19 = vmax.f32 %v610_v6, 0.0 }
 0x403   :  { %v550_v26 = vsel %vm57_vm2, %v549_v21, %v548_v23  ;;  %v619_v21 = vstv %s2646_s23  ;;  %s2660_s23 = sld [smem:[#allocation6 + $0x33]] }
 0x404   :  { %v551_v12 = vsub.f32 %v550_v26, %v3544_v2 }
 0x406   :  { %v552_v31 = vmul.f32 %v551_v12, %v3325_v55 }
 0x408   :  { %v553_v33 = vadd.f32 %v552_v31, %v546_v29 }
 0x40a   :  { %v554_v34 = vmul.f32 %v553_v33, %v3553_v62  ;;  %v621_v33 = vstv %s2642_s24  ;;  %s2666_s24 = sld [smem:[#allocation6 + $0x3a]] }
 0x40c   :  { %v555_v37 = vadd.f32 %v554_v34, %v3511_v43 }
 0x40e   :  { %v556_v39 = vmax.f32 %v555_v37, 0.0 }
 0x410   :  { %v3565_v44 = vsel %vm56_vm1, %v556_v39, 0.0 }
 0x411   :  { %v558_v46 = vmul.f32 5.0, %v3565_v44 }
 0x413   :  { %v559_v49 = vadd.f32 %v558_v46, %v3343_v8 }
 0x415   :  { %2795 = vrsqrt.f32 %v559_v49  ;;  %vm562_vm11 = vcmp.eq.f32.partialorder %v559_v49, inf  ;;  %v565_v45 = vand.u32 2147483648, %v559_v49  ;;  %vm564_vm12 = vcmp.eq.f32.partialorder %v559_v49, 0.0 }
 0x416   :  { %2797 = vrcp.f32 %v612_v56 }
 0x41f   :  { %v2796_v59 = vpop.eup %2795 }
 0x420   :  { %v561_v0 = vmul.f32 %v2796_v59, %v559_v49  ;;  %v2798_v17 = vpop.eup %2797 }
 0x421   :  { %v614_v24 = vmul.f32 %v2798_v17, %v611_v19 }
 0x422   :  { %v563_v11 = vsel %vm562_vm11, %v559_v49, %v561_v0 }
 0x423   :  { %v566_v52 = vsel %vm564_vm12, %v565_v45, %v563_v11 }
 0x424   :  { %v567_v14 = vsub.f32 %v566_v52, %v3286_v4 }
 0x426   :  { %v568_v54 = vmul.f32 0.4, %v567_v14 }
 0x428   :  { %v638_v22 = vsel %vm56_vm1, %v568_v54, 0.0  ;;  %v569_v23 = vmul.f32 %v568_v54, %v3288_v5  ;;  %v615_v26 = vadd.f32 %v568_v54, %v3302_v15  ;;  %v620_v32 = vmul.f32 %v619_v21, %v568_v54 }
 0x429   :  { %v639_v12 = vsel %vm116_vm0, %v638_v22, 0.0 }
 0x42a   :  { %640 = vadd.xlane.f32.xlu1 %v639_v12  ;;  %v570_v29 = vadd.f32 %v569_v23, %v3286_v4  ;;  %v616_v31 = vmul.f32 %v615_v26, %v614_v24  ;;  %v622_v46 = vadd.f32 %v621_v33, %v620_v32 }
 0x42c   :  { %v571_v34 = vmax.f32 %v570_v29, 1e-09  ;;  %v617_v37 = vadd.f32 1.0, %v616_v31  ;;  %v650_v31 = vstv %s2643_s25  ;;  %s2662_s25 = sld [smem:[#allocation6 + $0x36]] }
 0x42e   :  { %2799 = vrcp.f32 %v571_v34  ;;  %v618_v39 = vmul.f32 %v617_v37, %v3308_v27  ;;  %v646_v34 = vstv %s2644_s1  ;;  %s2663_s1 = sld [smem:[#allocation6 + $0x37]] }
 0x430   :  { %v623_v49 = vmin.f32 %v622_v46, %v618_v39 }
 0x432   :  { %v624_v53 = vmax.f32 %v623_v49, 0.0 }
 0x434   :  { %v625_v56 = vsel %vm56_vm1, %v624_v53, 0.0 }
 0x435   :  { %v626_v58 = vsel %vm116_vm0, %v625_v56, 0.0  ;;  %v636_v59 = vsub.f32 %v621_v33, %v625_v56 }
 0x436   :  { %627 = vadd.xlane.f32.xlu0 %v626_v58  ;;  %v3607_v58 = vstv %s2645_s26  ;;  %s2664_s26 = sld [smem:[#allocation6 + $0x38]] }
 0x437   :  { %v637_v29 = vmax.f32 %v636_v59, 0.0 }
 0x438   :  { %v2800_v0 = vpop.eup %2799 }
 0x439   :  { %v573_v45 = vmul.f32 %v2800_v0, %v3565_v44 }
 0x43b   :  { %v574_v11 = vmax.f32 %v573_v45, 1e-09 }
 0x43d   :  { %2801 = vlog2.f32 %v574_v11 }
 0x447   :  { %v2802_v6 = vpop.eup %2801 }
 0x448   :  { %v576_v52 = vmul.f32 0.6931472, %v2802_v6 }
 0x44a   :  { %v577_v14 = vmul.f32 0.6666667, %v576_v52 }
 0x44c   :  { %v578_v17 = vmul.f32 1.442695, %v577_v14 }
 0x44e   :  { %2803 = vpow2.f32 %v578_v17 }
 0x458   :  { %v2804_v54 = vpop.eup %2803 }
 0x459   :  { %v580_v19 = vmul.f32 %v2804_v54, %v3565_v44 }
 0x45b   :  { %v581_v21 = vmul.f32 %v580_v19, %v3314_v42 }
 0x45d   :  { %v3598_v22 = vsel %vm56_vm1, %v581_v21, 0.0 }
 0x45e   :  { %648 = vrot.lane.b32.xlu1 %v3598_v22, %s3193_s19 }
 0x4b7   :  { %v641_v23 = vpop.xlane.xlu1 %640 }
 0x4b8   :  { %v642_v24 = vmul.f32 0.0625, %v641_v23 }
 0x4ba   :  { %v643_v26 = vmul.f32 2.5, %v642_v24 }
 0x4bc   :  { %v644_v12 = vadd.f32 %v643_v26, %v3286_v4 }
 0x4be   :  { %v645_v32 = vmul.f32 %v644_v12, %v637_v29 }
 0x4c0   :  { %v647_v46 = vadd.f32 %v646_v34, %v645_v32 }
 0x4c3   :  { %v628_v53 = vpop.xlane.xlu0 %627 }
 0x4c4   :  { %v3610_v59 = vmul.f32 0.0625, %v628_v53 }
 0x4c6   :  { %5347 = vst [vmem:[#allocation34_spill] sm:$0xff] %v3610_v59  ;;  %v3615_v11 = vmul.f32 %v3607_v58, %v3610_v59 }
 0x4c8   :  { %5348 = vst [vmem:[#allocation35_spill] sm:$0xff] %v3615_v11  ;;  %v3624_v14 = vadd.f32 %v3615_v11, %v3570_v47  ;;  %v633_v54 = vmul.f32 %v3615_v11, %v3339_v7 }
 0x4ca   :  { %v713_v19 = vmax.f32 %v3624_v14, 1e-09  ;;  %v634_v21 = vadd.f32 %v633_v54, %v3578_v9  ;;  %v3639_v9 = vld [vmem:[%s5232_s4] sm:$0x1] }
 0x4cc   :  { %v3632_v23 = vmin.f32 %v634_v21, %v3297_v13 }
 0x4ce   :  { %v711_v29 = vsub.f32 %v3297_v13, %v3632_v23 }
 0x4d0   :  { %v649_v33 = vpop.permute.xlu1 %648 }
 0x4d1   :  { %v651_v37 = vsel %vm57_vm2, %v650_v31, %v649_v33 }
 0x4d2   :  { %v652_v39 = vsub.f32 %v651_v37, %v3598_v22  ;;  %v712_v37 = vmax.f32 %v711_v29, 0.0 }
 0x4d4   :  { %v653_v49 = vmul.f32 %v652_v39, %v3325_v55  ;;  %v720_v39 = vstv %s2651_s27  ;;  %s2665_s27 = sld [smem:[#allocation6 + $0x39]] }
 0x4d6   :  { %v654_v56 = vadd.f32 %v653_v49, %v647_v46 }
 0x4d8   :  { %v655_v4 = vmul.f32 %v654_v56, %v3607_v58 }
 0x4da   :  { %v656_v0 = vadd.f32 %v655_v4, %v3565_v44 }
 0x4dc   :  { %v657_v45 = vmax.f32 %v656_v0, 0.0 }
 0x4de   :  { %v3619_v6 = vsel %vm56_vm1, %v657_v45, 0.0 }
 0x4df   :  { %v659_v52 = vmul.f32 5.0, %v3619_v6 }
 0x4e1   :  { %v660_v17 = vadd.f32 %v659_v52, %v3343_v8 }
 0x4e3   :  { %2805 = vrsqrt.f32 %v660_v17  ;;  %vm663_vm13 = vcmp.eq.f32.partialorder %v660_v17, inf  ;;  %v666_v47 = vand.u32 2147483648, %v660_v17  ;;  %vm665_vm14 = vcmp.eq.f32.partialorder %v660_v17, 0.0 }
 0x4e4   :  { %2807 = vrcp.f32 %v713_v19 }
 0x4ed   :  { %v2806_v24 = vpop.eup %2805 }
 0x4ee   :  { %v662_v26 = vmul.f32 %v2806_v24, %v660_v17  ;;  %v2808_v33 = vpop.eup %2807 }
 0x4ef   :  { %v715_v53 = vmul.f32 %v2808_v33, %v712_v37 }
 0x4f0   :  { %v664_v12 = vsel %vm663_vm13, %v660_v17, %v662_v26  ;;  %v722_v17 = vstv %s2647_s0  ;;  %s2671_s0 = sld [smem:[#allocation6 + $0x40]] }
 0x4f1   :  { %v667_v31 = vsel %vm665_vm14, %v666_v47, %v664_v12 }
 0x4f2   :  { %v668_v32 = vsub.f32 %v667_v31, %v3639_v9 }
 0x4f4   :  { %v669_v34 = vmul.f32 0.4, %v668_v32 }
 0x4f6   :  { %v739_v46 = vsel %vm56_vm1, %v669_v34, 0.0  ;;  %v670_v49 = vmul.f32 %v669_v34, %v3288_v5  ;;  %v716_v56 = vadd.f32 %v669_v34, %v3302_v15  ;;  %v721_v52 = vmul.f32 %v720_v39, %v669_v34 }
 0x4f7   :  { %v740_v4 = vsel %vm116_vm0, %v739_v46, 0.0 }
 0x4f8   :  { %741 = vadd.xlane.f32.xlu1 %v740_v4  ;;  %v671_v0 = vadd.f32 %v3639_v9, %v670_v49  ;;  %v717_v45 = vmul.f32 %v716_v56, %v715_v53  ;;  %v723_v24 = vadd.f32 %v722_v17, %v721_v52 }
 0x4fa   :  { %v672_v54 = vmax.f32 %v671_v0, 1e-09  ;;  %v718_v19 = vadd.f32 1.0, %v717_v45 }
 0x4fc   :  { %2809 = vrcp.f32 %v672_v54  ;;  %v719_v21 = vmul.f32 %v718_v19, %v3308_v27 }
 0x4fe   :  { %v724_v26 = vmin.f32 %v723_v24, %v719_v21  ;;  %v751_v21 = vstv %s2648_s30  ;;  %s2669_s30 = sld [smem:[#allocation6 + $0x3e]] }
 0x500   :  { %v725_v47 = vmax.f32 %v724_v26, 0.0 }
 0x502   :  { %v726_v12 = vsel %vm56_vm1, %v725_v47, 0.0  ;;  %v747_v47 = vstv %s2649_s11  ;;  %s2670_s11 = sld [smem:[#allocation6 + $0x3f]] }
 0x503   :  { %v727_v29 = vsel %vm116_vm0, %v726_v12, 0.0  ;;  %v737_v31 = vsub.f32 %v722_v17, %v726_v12 }
 0x504   :  { %728 = vadd.xlane.f32.xlu1 %v727_v29 }
 0x505   :  { %v738_v19 = vmax.f32 %v737_v31, 0.0 }
 0x506   :  { %v2810_v32 = vpop.eup %2809 }
 0x507   :  { %v674_v33 = vmul.f32 %v2810_v32, %v3619_v6 }
 0x509   :  { %v675_v34 = vmax.f32 %v674_v33, 1e-09 }
 0x50b   :  { %2811 = vlog2.f32 %v675_v34 }
 0x515   :  { %v2812_v37 = vpop.eup %2811 }
 0x516   :  { %v677_v39 = vmul.f32 0.6931472, %v2812_v37 }
 0x518   :  { %v678_v46 = vmul.f32 0.6666667, %v677_v39  ;;  %v3666_v39 = vstv %s2650_s12  ;;  %s2676_s12 = sld [smem:[#allocation6 + $0x46]] }
 0x51a   :  { %v679_v49 = vmul.f32 1.442695, %v678_v46 }
 0x51c   :  { %2813 = vpow2.f32 %v679_v49 }
 0x526   :  { %v2814_v53 = vpop.eup %2813 }
 0x527   :  { %v681_v56 = vmul.f32 %v2814_v53, %v3619_v6 }
 0x529   :  { %v682_v4 = vmul.f32 %v681_v56, %v3314_v42 }
 0x52b   :  { %v3657_v0 = vsel %vm56_vm1, %v682_v4, 0.0 }
 0x52c   :  { %749 = vrot.lane.b32.xlu0 %v3657_v0, %s3193_s19 }
 0x585   :  { %v742_v45 = vpop.xlane.xlu1 %741 }
 0x586   :  { %v743_v52 = vmul.f32 0.0625, %v742_v45 }
 0x588   :  { %v744_v17 = vmul.f32 2.5, %v743_v52 }
 0x58a   :  { %v745_v54 = vadd.f32 %v3639_v9, %v744_v17 }
 0x58c   :  { %v746_v24 = vmul.f32 %v745_v54, %v738_v19 }
 0x58e   :  { %v748_v32 = vadd.f32 %v747_v47, %v746_v24 }
 0x591   :  { %v729_v34 = vpop.xlane.xlu1 %728 }
 0x592   :  { %v3669_v31 = vmul.f32 0.0625, %v729_v34 }
 0x594   :  { %5349 = vst [vmem:[#allocation36_spill] sm:$0xff] %v3669_v31  ;;  %v3674_v56 = vmul.f32 %v3666_v39, %v3669_v31 }
 0x596   :  { %5350 = vst [vmem:[#allocation37_spill] sm:$0xff] %v3674_v56  ;;  %v3683_v45 = vadd.f32 %v3674_v56, %v3624_v14  ;;  %v734_v17 = vmul.f32 %v3674_v56, %v3339_v7 }
 0x598   :  { %v814_v54 = vmax.f32 %v3683_v45, 1e-09  ;;  %v735_v19 = vadd.f32 %v734_v17, %v3632_v23 }
 0x59e   :  { %v750_v26 = vpop.permute.xlu0 %749 }
 0x59f   :  { %v752_v12 = vsel %vm57_vm2, %v751_v21, %v750_v26  ;;  %v3691_v21 = vmin.f32 %v735_v19, %v3297_v13 }
 0x5a0   :  { %v753_v29 = vsub.f32 %v752_v12, %v3657_v0 }
 0x5a1   :  { %v812_v12 = vsub.f32 %v3297_v13, %v3691_v21 }
 0x5a2   :  { %v754_v33 = vmul.f32 %v753_v29, %v3325_v55 }
 0x5a3   :  { %v813_v34 = vmax.f32 %v812_v12, 0.0 }
 0x5a4   :  { %v755_v37 = vadd.f32 %v754_v33, %v748_v32 }
 0x5a6   :  { %v756_v46 = vmul.f32 %v755_v37, %v3666_v39  ;;  %v821_v37 = vstv %s2656_s13  ;;  %s2672_s13 = sld [smem:[#allocation6 + $0x42]] }
 0x5a8   :  { %v757_v49 = vadd.f32 %v756_v46, %v3619_v6 }
 0x5aa   :  { %v758_v53 = vmax.f32 %v757_v49, 0.0 }
 0x5ac   :  { %v3678_v4 = vsel %vm56_vm1, %v758_v53, 0.0 }
 0x5ad   :  { %v760_v55 = vmul.f32 5.0, %v3678_v4 }
 0x5af   :  { %v761_v52 = vadd.f32 %v760_v55, %v3343_v8 }
 0x5b1   :  { %2815 = vrsqrt.f32 %v761_v52  ;;  %vm764_vm15 = vcmp.eq.f32.partialorder %v761_v52, inf  ;;  %v767_v14 = vand.u32 2147483648, %v761_v52  ;;  %vm766_vm3 = vcmp.eq.f32.partialorder %v761_v52, 0.0 }
 0x5b2   :  { %2817 = vrcp.f32 %v814_v54 }
 0x5bb   :  { %v2816_v24 = vpop.eup %2815 }
 0x5bc   :  { %v763_v26 = vmul.f32 %v2816_v24, %v761_v52  ;;  %v2818_v33 = vpop.eup %2817  ;;  %v823_v24 = vstv %s2652_s3  ;;  %s2673_s3 = sld [smem:[#allocation6 + $0x43]] }
 0x5bd   :  { %v816_v53 = vmul.f32 %v2818_v33, %v813_v34 }
 0x5be   :  { %v765_v47 = vsel %vm764_vm15, %v761_v52, %v763_v26 }
 0x5bf   :  { %v768_v29 = vsel %vm766_vm3, %v767_v14, %v765_v47 }
 0x5c0   :  { %v769_v32 = vsub.f32 %v768_v29, %v3639_v9 }
 0x5c2   :  { %v770_v23 = vmul.f32 0.4, %v769_v32 }
 0x5c4   :  { %v840_v46 = vsel %vm56_vm1, %v770_v23, 0.0  ;;  %v771_v49 = vmul.f32 %v770_v23, %v3288_v5  ;;  %v817_v55 = vadd.f32 %v770_v23, %v3302_v15  ;;  %v822_v19 = vmul.f32 %v821_v37, %v770_v23 }
 0x5c5   :  { %v841_v52 = vsel %vm116_vm0, %v840_v46, 0.0 }
 0x5c6   :  { %842 = vadd.xlane.f32.xlu0 %v841_v52  ;;  %v772_v17 = vadd.f32 %v3639_v9, %v771_v49  ;;  %v818_v54 = vmul.f32 %v817_v55, %v816_v53  ;;  %v824_v12 = vadd.f32 %v823_v24, %v822_v19 }
 0x5c8   :  { %v773_v26 = vmax.f32 %v772_v17, 1e-09  ;;  %v819_v14 = vadd.f32 1.0, %v818_v54 }
 0x5ca   :  { %2819 = vrcp.f32 %v773_v26  ;;  %v820_v47 = vmul.f32 %v819_v14, %v3308_v27 }
 0x5cc   :  { %v825_v29 = vmin.f32 %v824_v12, %v820_v47 }
 0x5ce   :  { %v826_v32 = vmax.f32 %v825_v29, 0.0  ;;  %v852_v29 = vstv %s2653_s14  ;;  %s2674_s14 = sld [smem:[#allocation6 + $0x44]] }
 0x5d0   :  { %v827_v33 = vsel %vm56_vm1, %v826_v32, 0.0 }
 0x5d1   :  { %v838_v34 = vsub.f32 %v823_v24, %v827_v33 }
 0x5d3   :  { %v839_v12 = vmax.f32 %v838_v34, 0.0 }
 0x5d4   :  { %v2820_v56 = vpop.eup %2819 }
 0x5d5   :  { %v775_v46 = vmul.f32 %v2820_v56, %v3678_v4  ;;  %v828_v56 = vsel %vm116_vm0, %v827_v33, 0.0 }
 0x5d7   :  { %v776_v52 = vmax.f32 %v775_v46, 1e-09 }
 0x5d9   :  { %2821 = vlog2.f32 %v776_v52  ;;  %v848_v52 = vstv %s2654_s15  ;;  %s2675_s15 = sld [smem:[#allocation6 + $0x45]] }
 0x5e3   :  { %v2822_v49 = vpop.eup %2821 }
 0x5e4   :  { %v778_v23 = vmul.f32 0.6931472, %v2822_v49 }
 0x5e6   :  { %v779_v37 = vmul.f32 0.6666667, %v778_v23 }
 0x5e8   :  { %v780_v53 = vmul.f32 1.442695, %v779_v37  ;;  %v3722_v37 = vld [vmem:[%s5233_s5] sm:$0x1] }
 0x5ea   :  { %2823 = vpow2.f32 %v780_v53 }
 0x5f4   :  { %v2824_v55 = vpop.eup %2823 }
 0x5f5   :  { %v782_v17 = vmul.f32 %v2824_v55, %v3678_v4  ;;  %v3725_v55 = vstv %s2655_s16  ;;  %s2681_s16 = sld [smem:[#allocation6 + $0x4c]] }
 0x5f7   :  { %v783_v54 = vmul.f32 %v782_v17, %v3314_v42 }
 0x5f9   :  { %v3710_v19 = vsel %vm56_vm1, %v783_v54, 0.0 }
 0x5fa   :  { %850 = vrot.lane.b32.xlu1 %v3710_v19, %s3193_s19 }
 0x61e   :  { %829 = vadd.xlane.f32.xlu1 %v828_v56 }
 0x653   :  { %v843_v24 = vpop.xlane.xlu0 %842 }
 0x654   :  { %v844_v26 = vmul.f32 0.0625, %v843_v24 }
 0x656   :  { %v845_v14 = vmul.f32 2.5, %v844_v26 }
 0x658   :  { %v846_v47 = vadd.f32 %v3639_v9, %v845_v14 }
 0x65a   :  { %v847_v32 = vmul.f32 %v846_v47, %v839_v12 }
 0x65c   :  { %v849_v33 = vadd.f32 %v848_v52, %v847_v32 }
 0x66c   :  { %v851_v46 = vpop.permute.xlu1 %850 }
 0x66d   :  { %v853_v49 = vsel %vm57_vm2, %v852_v29, %v851_v46 }
 0x66e   :  { %v854_v23 = vsub.f32 %v853_v49, %v3710_v19 }
 0x670   :  { %v855_v53 = vmul.f32 %v3722_v37, %v854_v23 }
 0x672   :  { %v856_v34 = vadd.f32 %v855_v53, %v849_v33 }
 0x674   :  { %v857_v17 = vmul.f32 %v856_v34, %v3725_v55 }
 0x676   :  { %v858_v54 = vadd.f32 %v857_v17, %v3678_v4 }
 0x678   :  { %v859_v56 = vmax.f32 %v858_v54, 0.0 }
 0x67a   :  { %v3731_v24 = vsel %vm56_vm1, %v859_v56, 0.0 }
 0x67b   :  { %v861_v26 = vmul.f32 5.0, %v3731_v24 }
 0x67d   :  { %v862_v14 = vadd.f32 %v861_v26, %v3343_v8 }
 0x67f   :  { %2825 = vrsqrt.f32 %v862_v14  ;;  %vm865_vm4 = vcmp.eq.f32.partialorder %v862_v14, inf  ;;  %v868_v29 = vand.u32 2147483648, %v862_v14  ;;  %vm867_vm5 = vcmp.eq.f32.partialorder %v862_v14, 0.0 }
 0x689   :  { %v2826_v47 = vpop.eup %2825 }
 0x68a   :  { %v864_v12 = vmul.f32 %v2826_v47, %v862_v14 }
 0x68c   :  { %v866_v32 = vsel %vm865_vm4, %v862_v14, %v864_v12 }
 0x68d   :  { %v869_v46 = vsel %vm867_vm5, %v868_v29, %v866_v32 }
 0x68e   :  { %v870_v52 = vsub.f32 %v869_v46, %v3639_v9 }
 0x690   :  { %v871_v49 = vmul.f32 0.4, %v870_v52 }
 0x692   :  { %v941_v23 = vsel %vm56_vm1, %v871_v49, 0.0  ;;  %v872_v33 = vmul.f32 %v871_v49, %v3288_v5 }
 0x693   :  { %v942_v53 = vsel %vm116_vm0, %v941_v23, 0.0 }
 0x694   :  { %943 = vadd.xlane.f32.xlu0 %v942_v53  ;;  %v873_v34 = vadd.f32 %v3639_v9, %v872_v33 }
 0x696   :  { %v874_v17 = vmax.f32 %v873_v34, 1e-09 }
 0x698   :  { %2827 = vrcp.f32 %v874_v17 }
 0x6a2   :  { %v2828_v54 = vpop.eup %2827 }
 0x6a3   :  { %v876_v56 = vmul.f32 %v2828_v54, %v3731_v24 }
 0x6a5   :  { %v877_v26 = vmax.f32 %v876_v56, 1e-09 }
 0x6a7   :  { %2829 = vlog2.f32 %v877_v26  ;;  %v922_v26 = vstv %s2661_s2  ;;  %s2679_s2 = sld [smem:[#allocation6 + $0x4a]] }
 0x6ab   :  { %v830_v14 = vpop.xlane.xlu1 %829 }
 0x6ac   :  { %v3742_v47 = vmul.f32 0.0625, %v830_v14 }
 0x6ae   :  { %5351 = vst [vmem:[#allocation38_spill] sm:$0xff] %v3742_v47  ;;  %v3746_v12 = vmul.f32 %v3725_v55, %v3742_v47 }
 0x6b0   :  { %5352 = vst [vmem:[#allocation39_spill] sm:$0xff] %v3746_v12  ;;  %v3750_v29 = vadd.f32 %v3746_v12, %v3683_v45  ;;  %v835_v32 = vmul.f32 %v3746_v12, %v3339_v7 }
 0x6b1   :  { %v2830_v46 = vpop.eup %2829 }
 0x6b2   :  { %v836_v52 = vadd.f32 %v835_v32, %v3691_v21  ;;  %v915_v23 = vmax.f32 %v3750_v29, 1e-09  ;;  %v879_v33 = vmul.f32 0.6931472, %v2830_v46  ;;  %v918_v21 = vadd.f32 %v871_v49, %v3302_v15 }
 0x6b3   :  { %v923_v46 = vmul.f32 %v922_v26, %v871_v49 }
 0x6b4   :  { %2831 = vrcp.f32 %v915_v23  ;;  %v880_v53 = vmul.f32 0.6666667, %v879_v33  ;;  %v3757_v34 = vmin.f32 %v836_v52, %v3297_v13  ;;  %v924_v33 = vstv %s2657_s20  ;;  %s2699_s20 = sld [smem:[#allocation6 + $0x62]] }
 0x6b5   :  { %v925_v40 = vadd.f32 %v924_v33, %v923_v46  ;;  %v953_v46 = vstv %s2658_s21  ;;  %s2700_s21 = sld [smem:[#allocation6 + $0x63]] }
 0x6b6   :  { %v881_v17 = vmul.f32 1.442695, %v880_v53  ;;  %v913_v45 = vsub.f32 %v3297_v13, %v3757_v34 }
 0x6b8   :  { %2833 = vpow2.f32 %v881_v17  ;;  %v914_v54 = vmax.f32 %v913_v45, 0.0 }
 0x6be   :  { %v2832_v56 = vpop.eup %2831 }
 0x6bf   :  { %v917_v14 = vmul.f32 %v2832_v56, %v914_v54 }
 0x6c1   :  { %v919_v32 = vmul.f32 %v918_v21, %v917_v14 }
 0x6c2   :  { %v2834_v23 = vpop.eup %2833 }
 0x6c3   :  { %v883_v52 = vmul.f32 %v2834_v23, %v3731_v24  ;;  %v920_v31 = vadd.f32 1.0, %v919_v32 }
 0x6c5   :  { %v884_v53 = vmul.f32 %v883_v52, %v3314_v42  ;;  %v921_v17 = vmul.f32 %v920_v31, %v3308_v27 }
 0x6c7   :  { %v3767_v45 = vsel %vm56_vm1, %v884_v53, 0.0  ;;  %v926_v35 = vmin.f32 %v925_v40, %v921_v17 }
 0x6c8   :  { %951 = vrot.lane.b32.xlu0 %v3767_v45, %s3193_s19 }
 0x6c9   :  { %v927_v54 = vmax.f32 %v926_v35, 0.0  ;;  %v949_v35 = vstv %s2659_s22  ;;  %s2680_s22 = sld [smem:[#allocation6 + $0x4b]] }
 0x6cb   :  { %v928_v49 = vsel %vm56_vm1, %v927_v54, 0.0 }
 0x6cc   :  { %v929_v56 = vsel %vm116_vm0, %v928_v49, 0.0  ;;  %v939_v26 = vsub.f32 %v924_v33, %v928_v49  ;;  %v3779_v49 = vstv %s2660_s23  ;;  %s2686_s23 = sld [smem:[#allocation6 + $0x52]] }
 0x6cd   :  { %930 = vadd.xlane.f32.xlu1 %v929_v56  ;;  %5353 = vst [vmem:[#allocation40_spill] sm:$0xff] %v3779_v49 }
 0x6ce   :  { %v940_v40 = vmax.f32 %v939_v26, 0.0 }
 0x721   :  { %v944_v14 = vpop.xlane.xlu0 %943 }
 0x722   :  { %v945_v21 = vmul.f32 0.0625, %v944_v14 }
 0x724   :  { %v946_v31 = vmul.f32 2.5, %v945_v21 }
 0x726   :  { %v947_v32 = vadd.f32 %v3639_v9, %v946_v31 }
 0x728   :  { %v948_v23 = vmul.f32 %v947_v32, %v940_v40 }
 0x72a   :  { %v950_v33 = vadd.f32 %v949_v35, %v948_v23 }
 0x73a   :  { %v952_v52 = vpop.permute.xlu0 %951 }
 0x73b   :  { %v954_v53 = vsel %vm57_vm2, %v953_v46, %v952_v52 }
 0x73c   :  { %v955_v17 = vsub.f32 %v954_v53, %v3767_v45 }
 0x73e   :  { %v956_v54 = vmul.f32 %v3722_v37, %v955_v17 }
 0x740   :  { %v957_v56 = vadd.f32 %v956_v54, %v950_v33 }
 0x742   :  { %v958_v14 = vmul.f32 %v957_v56, %v3779_v49 }
 0x744   :  { %v959_v21 = vadd.f32 %v958_v14, %v3731_v24 }
 0x746   :  { %v960_v26 = vmax.f32 %v959_v21, 0.0 }
 0x748   :  { %v3785_v31 = vsel %vm56_vm1, %v960_v26, 0.0 }
 0x749   :  { %5354 = vst [vmem:[#allocation41_spill] sm:$0xff] %v3785_v31  ;;  %v962_v32 = vmul.f32 5.0, %v3785_v31 }
 0x74b   :  { %v963_v40 = vadd.f32 %v962_v32, %v3343_v8 }
 0x74d   :  { %2835 = vrsqrt.f32 %v963_v40  ;;  %vm966_vm6 = vcmp.eq.f32.partialorder %v963_v40, inf  ;;  %v969_v52 = vand.u32 2147483648, %v963_v40  ;;  %vm968_vm7 = vcmp.eq.f32.partialorder %v963_v40, 0.0 }
 0x757   :  { %v2836_v46 = vpop.eup %2835 }
 0x758   :  { %v965_v23 = vmul.f32 %v2836_v46, %v963_v40 }
 0x75a   :  { %v931_v35 = vpop.xlane.xlu1 %930  ;;  %v967_v53 = vsel %vm966_vm6, %v963_v40, %v965_v23 }
 0x75b   :  { %v3789_v17 = vmul.f32 0.0625, %v931_v35  ;;  %v970_v33 = vsel %vm968_vm7, %v969_v52, %v967_v53 }
 0x75c   :  { %v971_v54 = vsub.f32 %v970_v33, %v3639_v9 }
 0x75d   :  { %5355 = vst [vmem:[#allocation42_spill] sm:$0xff] %v3789_v17  ;;  %v3794_v56 = vmul.f32 %v3779_v49, %v3789_v17 }
 0x75e   :  { %v972_v14 = vmul.f32 0.4, %v971_v54 }
 0x75f   :  { %5356 = vst [vmem:[#allocation43_spill] sm:$0xff] %v3794_v56  ;;  %v3798_v21 = vadd.f32 %v3794_v56, %v3750_v29  ;;  %v936_v26 = vmul.f32 %v3794_v56, %v3339_v7 }
 0x760   :  { %v1042_v32 = vsel %vm56_vm1, %v972_v14, 0.0  ;;  %v973_v40 = vmul.f32 %v972_v14, %v3288_v5 }
 0x761   :  { %v937_v46 = vadd.f32 %v936_v26, %v3757_v34  ;;  %v1016_v23 = vmax.f32 %v3798_v21, 1e-09  ;;  %v1043_v52 = vsel %vm116_vm0, %v1042_v32, 0.0  ;;  %v1023_v26 = vstv %s2666_s24  ;;  %s2682_s24 = sld [smem:[#allocation6 + $0x4e]] }
 0x762   :  { %1044 = vadd.xlane.f32.xlu0 %v1043_v52  ;;  %v974_v35 = vadd.f32 %v3639_v9, %v973_v40  ;;  %v1019_v32 = vadd.f32 %v972_v14, %v3302_v15  ;;  %v1024_v40 = vmul.f32 %v1023_v26, %v972_v14 }
 0x763   :  { %2837 = vrcp.f32 %v1016_v23  ;;  %v3810_v29 = vmin.f32 %v937_v46, %v3297_v13  ;;  %v1025_v46 = vstv %s2662_s25  ;;  %s2683_s25 = sld [smem:[#allocation6 + $0x4f]] }
 0x764   :  { %v975_v53 = vmax.f32 %v974_v35, 1e-09  ;;  %v1026_v16 = vadd.f32 %v1025_v46, %v1024_v40 }
 0x765   :  { %v1014_v33 = vsub.f32 %v3297_v13, %v3810_v29 }
 0x766   :  { %2839 = vrcp.f32 %v975_v53 }
 0x767   :  { %v1015_v54 = vmax.f32 %v1014_v33, 0.0 }
 0x76d   :  { %v2838_v34 = vpop.eup %2837 }
 0x76e   :  { %v1018_v56 = vmul.f32 %v2838_v34, %v1015_v54 }
 0x770   :  { %v2840_v52 = vpop.eup %2839  ;;  %v1020_v17 = vmul.f32 %v1019_v32, %v1018_v56 }
 0x771   :  { %v977_v23 = vmul.f32 %v2840_v52, %v3785_v31  ;;  %v1054_v52 = vstv %s2663_s1  ;;  %s2684_s1 = sld [smem:[#allocation6 + $0x50]] }
 0x772   :  { %v1021_v18 = vadd.f32 1.0, %v1020_v17 }
 0x773   :  { %v978_v35 = vmax.f32 %v977_v23, 1e-09 }
 0x774   :  { %v1022_v53 = vmul.f32 %v1021_v18, %v3308_v27 }
 0x775   :  { %2841 = vlog2.f32 %v978_v35 }
 0x776   :  { %v1027_v3 = vmin.f32 %v1026_v16, %v1022_v53 }
 0x778   :  { %v1028_v63 = vmax.f32 %v1027_v3, 0.0 }
 0x77a   :  { %v1029_v33 = vsel %vm56_vm1, %v1028_v63, 0.0 }
 0x77b   :  { %v1040_v54 = vsub.f32 %v1025_v46, %v1029_v33  ;;  %v1030_v63 = vsel %vm116_vm0, %v1029_v33, 0.0  ;;  %v1050_v46 = vstv %s2664_s26  ;;  %s2685_s26 = sld [smem:[#allocation6 + $0x51]] }
 0x77d   :  { %v1041_v32 = vmax.f32 %v1040_v54, 0.0 }
 0x77f   :  { %v2842_v34 = vpop.eup %2841 }
 0x780   :  { %v980_v12 = vmul.f32 0.6931472, %v2842_v34 }
 0x782   :  { %v981_v47 = vmul.f32 0.6666667, %v980_v12 }
 0x784   :  { %v982_v56 = vmul.f32 1.442695, %v981_v47 }
 0x786   :  { %2843 = vpow2.f32 %v982_v56  ;;  %v3833_v56 = vstv %s2665_s27  ;;  %s2691_s27 = sld [smem:[#allocation6 + $0x58]] }
 0x790   :  { %v2844_v14 = vpop.eup %2843 }
 0x791   :  { %v984_v26 = vmul.f32 %v2844_v14, %v3785_v31 }
 0x793   :  { %v985_v17 = vmul.f32 %v984_v26, %v3314_v42 }
 0x795   :  { %v3823_v18 = vsel %vm56_vm1, %v985_v17, 0.0 }
 0x796   :  { %5357 = vst [vmem:[#allocation44_spill] sm:$0xff] %v3823_v18  ;;  %1052 = vrot.lane.b32.xlu1 %v3823_v18, %s3193_s19 }
 0x7ba   :  { %1031 = vadd.xlane.f32.xlu1 %v1030_v63 }
 0x7ef   :  { %v1045_v3 = vpop.xlane.xlu0 %1044 }
 0x7f0   :  { %v1046_v16 = vmul.f32 0.0625, %v1045_v3 }
 0x7f2   :  { %v1047_v47 = vmul.f32 2.5, %v1046_v16 }
 0x7f4   :  { %v1048_v12 = vadd.f32 %v3639_v9, %v1047_v47 }
 0x7f6   :  { %v1049_v40 = vmul.f32 %v1048_v12, %v1041_v32 }
 0x7f8   :  { %v1051_v33 = vadd.f32 %v1050_v46, %v1049_v40 }
 0x808   :  { %v1053_v23 = vpop.permute.xlu1 %1052 }
 0x809   :  { %v1055_v35 = vsel %vm57_vm2, %v1054_v52, %v1053_v23 }
 0x80a   :  { %v1056_v53 = vsub.f32 %v1055_v35, %v3823_v18 }
 0x80c   :  { %v1057_v34 = vmul.f32 %v3722_v37, %v1056_v53 }
 0x80e   :  { %v1058_v14 = vadd.f32 %v1057_v34, %v1051_v33 }
 0x810   :  { %v1059_v26 = vmul.f32 %v1058_v14, %v3833_v56 }
 0x812   :  { %v1060_v17 = vadd.f32 %v1059_v26, %v3785_v31 }
 0x814   :  { %v1061_v54 = vmax.f32 %v1060_v17, 0.0 }
 0x816   :  { %v3839_v63 = vsel %vm56_vm1, %v1061_v54, 0.0 }
 0x817   :  { %v1063_v3 = vmul.f32 5.0, %v3839_v63 }
 0x819   :  { %v1064_v16 = vadd.f32 %v1063_v3, %v3343_v8 }
 0x81b   :  { %2845 = vrsqrt.f32 %v1064_v16  ;;  %vm1067_vm8 = vcmp.eq.f32.partialorder %v1064_v16, inf  ;;  %v1070_v32 = vand.u32 2147483648, %v1064_v16  ;;  %vm1069_vm9 = vcmp.eq.f32.partialorder %v1064_v16, 0.0 }
 0x825   :  { %v2846_v47 = vpop.eup %2845 }
 0x826   :  { %v1066_v12 = vmul.f32 %v2846_v47, %v1064_v16 }
 0x828   :  { %v1068_v52 = vsel %vm1067_vm8, %v1064_v16, %v1066_v12 }
 0x829   :  { %v1071_v40 = vsel %vm1069_vm9, %v1070_v32, %v1068_v52 }
 0x82a   :  { %v1072_v23 = vsub.f32 %v1071_v40, %v3639_v9 }
 0x82c   :  { %v1073_v46 = vmul.f32 0.4, %v1072_v23 }
 0x82e   :  { %v1143_v35 = vsel %vm56_vm1, %v1073_v46, 0.0  ;;  %v1074_v53 = vmul.f32 %v1073_v46, %v3288_v5 }
 0x82f   :  { %v1144_v33 = vsel %vm116_vm0, %v1143_v35, 0.0 }
 0x830   :  { %1145 = vadd.xlane.f32.xlu0 %v1144_v33  ;;  %v1075_v34 = vadd.f32 %v3639_v9, %v1074_v53 }
 0x832   :  { %v1076_v14 = vmax.f32 %v1075_v34, 1e-09 }
 0x834   :  { %2847 = vrcp.f32 %v1076_v14 }
 0x83e   :  { %v2848_v26 = vpop.eup %2847 }
 0x83f   :  { %v1078_v17 = vmul.f32 %v2848_v26, %v3839_v63 }
 0x841   :  { %v1079_v54 = vmax.f32 %v1078_v17, 1e-09  ;;  %v1124_v17 = vstv %s2671_s0  ;;  %s2687_s0 = sld [smem:[#allocation6 + $0x54]] }
 0x843   :  { %2849 = vlog2.f32 %v1079_v54 }
 0x847   :  { %v1032_v3 = vpop.xlane.xlu1 %1031 }
 0x848   :  { %v3850_v16 = vmul.f32 0.0625, %v1032_v3 }
 0x84a   :  { %5358 = vst [vmem:[#allocation45_spill] sm:$0xff] %v3850_v16  ;;  %v3854_v47 = vmul.f32 %v3833_v56, %v3850_v16 }
 0x84c   :  { %5359 = vst [vmem:[#allocation46_spill] sm:$0xff] %v3854_v47  ;;  %v3858_v12 = vadd.f32 %v3854_v47, %v3798_v21  ;;  %v1037_v32 = vmul.f32 %v3854_v47, %v3339_v7 }
 0x84d   :  { %v2850_v52 = vpop.eup %2849 }
 0x84e   :  { %v1038_v40 = vadd.f32 %v1037_v32, %v3810_v29  ;;  %v1117_v23 = vmax.f32 %v3858_v12, 1e-09  ;;  %v1081_v35 = vmul.f32 0.6931472, %v2850_v52  ;;  %v1120_v29 = vadd.f32 %v1073_v46, %v3302_v15 }
 0x84f   :  { %v1125_v32 = vmul.f32 %v1124_v17, %v1073_v46 }
 0x850   :  { %2851 = vrcp.f32 %v1117_v23  ;;  %v1082_v53 = vmul.f32 0.6666667, %v1081_v35  ;;  %v3865_v33 = vmin.f32 %v1038_v40, %v3297_v13  ;;  %v1126_v23 = vstv %s2667_s28  ;;  %s2688_s28 = sld [smem:[#allocation6 + $0x55]] }
 0x851   :  { %v1127_v47 = vadd.f32 %v1126_v23, %v1125_v32 }
 0x852   :  { %v1083_v34 = vmul.f32 1.442695, %v1082_v53  ;;  %v1115_v21 = vsub.f32 %v3297_v13, %v3865_v33 }
 0x854   :  { %2853 = vpow2.f32 %v1083_v34  ;;  %v1116_v14 = vmax.f32 %v1115_v21, 0.0 }
 0x85a   :  { %v2852_v26 = vpop.eup %2851 }
 0x85b   :  { %v1119_v54 = vmul.f32 %v2852_v26, %v1116_v14 }
 0x85d   :  { %v1121_v3 = vmul.f32 %v1120_v29, %v1119_v54 }
 0x85e   :  { %v2854_v52 = vpop.eup %2853 }
 0x85f   :  { %v1085_v40 = vmul.f32 %v2854_v52, %v3839_v63  ;;  %v1122_v35 = vadd.f32 1.0, %v1121_v3  ;;  %v1155_v52 = vstv %s2668_s29  ;;  %s2689_s29 = sld [smem:[#allocation6 + $0x56]] }
 0x861   :  { %v1086_v53 = vmul.f32 %v1085_v40, %v3314_v42  ;;  %v1123_v34 = vmul.f32 %v1122_v35, %v3308_v27 }
 0x863   :  { %v3875_v21 = vsel %vm56_vm1, %v1086_v53, 0.0  ;;  %v1128_v16 = vmin.f32 %v1127_v47, %v1123_v34 }
 0x864   :  { %1153 = vrot.lane.b32.xlu0 %v3875_v21, %s3193_s19 }
 0x865   :  { %v1129_v14 = vmax.f32 %v1128_v16, 0.0  ;;  %v1151_v16 = vstv %s2669_s30  ;;  %s2690_s30 = sld [smem:[#allocation6 + $0x57]] }
 0x867   :  { %v1130_v46 = vsel %vm56_vm1, %v1129_v14, 0.0 }
 0x868   :  { %v1131_v26 = vsel %vm116_vm0, %v1130_v46, 0.0  ;;  %v1141_v17 = vsub.f32 %v1126_v23, %v1130_v46  ;;  %v3887_v46 = vstv %s2670_s11  ;;  %s4781_s11 = sld [smem:[#allocation6 + $0x8a]] }
 0x869   :  { %1132 = vadd.xlane.f32.xlu1 %v1131_v26  ;;  %5360 = vst [vmem:[#allocation47_spill] sm:$0xff] %v3887_v46 }
 0x86a   :  { %v1142_v47 = vmax.f32 %v1141_v17, 0.0 }
 0x8bd   :  { %v1146_v54 = vpop.xlane.xlu0 %1145 }
 0x8be   :  { %v1147_v29 = vmul.f32 0.0625, %v1146_v54 }
 0x8c0   :  { %v1148_v3 = vmul.f32 2.5, %v1147_v29 }
 0x8c2   :  { %v1149_v32 = vadd.f32 %v3639_v9, %v1148_v3 }
 0x8c4   :  { %v1150_v40 = vmul.f32 %v1149_v32, %v1142_v47 }
 0x8c6   :  { %v1152_v23 = vadd.f32 %v1151_v16, %v1150_v40 }
 0x8d6   :  { %v1154_v35 = vpop.permute.xlu0 %1153 }
 0x8d7   :  { %v1156_v53 = vsel %vm57_vm2, %v1155_v52, %v1154_v35 }
 0x8d8   :  { %v1157_v34 = vsub.f32 %v1156_v53, %v3875_v21 }
 0x8da   :  { %v1158_v14 = vmul.f32 %v3722_v37, %v1157_v34 }
 0x8dc   :  { %v1159_v26 = vadd.f32 %v1158_v14, %v1152_v23 }
 0x8de   :  { %v1160_v54 = vmul.f32 %v1159_v26, %v3887_v46 }
 0x8e0   :  { %v1161_v29 = vadd.f32 %v1160_v54, %v3839_v63 }
 0x8e2   :  { %v1162_v17 = vmax.f32 %v1161_v29, 0.0 }
 0x8e4   :  { %v3893_v3 = vsel %vm56_vm1, %v1162_v17, 0.0 }
 0x8e5   :  { %5361 = vst [vmem:[#allocation48_spill] sm:$0xff] %v3893_v3  ;;  %v1164_v32 = vmul.f32 5.0, %v3893_v3 }
 0x8e7   :  { %v1165_v47 = vadd.f32 %v1164_v32, %v3343_v8 }
 0x8e9   :  { %2855 = vrsqrt.f32 %v1165_v47  ;;  %vm1168_vm10 = vcmp.eq.f32.partialorder %v1165_v47, inf  ;;  %v1171_v35 = vand.u32 2147483648, %v1165_v47  ;;  %vm1170_vm11 = vcmp.eq.f32.partialorder %v1165_v47, 0.0 }
 0x8f3   :  { %v2856_v52 = vpop.eup %2855 }
 0x8f4   :  { %v1167_v40 = vmul.f32 %v2856_v52, %v1165_v47 }
 0x8f6   :  { %v1133_v16 = vpop.xlane.xlu1 %1132  ;;  %v1169_v53 = vsel %vm1168_vm10, %v1165_v47, %v1167_v40 }
 0x8f7   :  { %v3897_v34 = vmul.f32 0.0625, %v1133_v16  ;;  %v1172_v23 = vsel %vm1170_vm11, %v1171_v35, %v1169_v53 }
 0x8f8   :  { %v1173_v14 = vsub.f32 %v1172_v23, %v3639_v9 }
 0x8f9   :  { %5362 = vst [vmem:[#allocation49_spill] sm:$0xff] %v3897_v34  ;;  %v3902_v26 = vmul.f32 %v3887_v46, %v3897_v34 }
 0x8fa   :  { %v1174_v54 = vmul.f32 0.4, %v1173_v14 }
 0x8fb   :  { %5363 = vst [vmem:[#allocation50_spill] sm:$0xff] %v3902_v26  ;;  %v3906_v29 = vadd.f32 %v3902_v26, %v3858_v12  ;;  %v1138_v17 = vmul.f32 %v3902_v26, %v3339_v7 }
 0x8fc   :  { %v1244_v32 = vsel %vm56_vm1, %v1174_v54, 0.0  ;;  %v1175_v47 = vmul.f32 %v1174_v54, %v3288_v5 }
 0x8fd   :  { %v1139_v52 = vadd.f32 %v1138_v17, %v3865_v33  ;;  %v1218_v40 = vmax.f32 %v3906_v29, 1e-09  ;;  %v1245_v35 = vsel %vm116_vm0, %v1244_v32, 0.0  ;;  %v1225_v17 = vstv %s2676_s12  ;;  %s2716_s12 = sld [smem:[#allocation6 + $0x76]] }
 0x8fe   :  { %1246 = vadd.xlane.f32.xlu0 %v1245_v35  ;;  %v1176_v16 = vadd.f32 %v3639_v9, %v1175_v47  ;;  %v1221_v32 = vadd.f32 %v1174_v54, %v3302_v15  ;;  %v1226_v47 = vmul.f32 %v1225_v17, %v1174_v54 }
 0x8ff   :  { %2857 = vrcp.f32 %v1218_v40  ;;  %v3918_v12 = vmin.f32 %v1139_v52, %v3297_v13  ;;  %v1227_v52 = vstv %s2672_s13  ;;  %s2696_s13 = sld [smem:[#allocation6 + $0x5e]] }
 0x900   :  { %v1177_v53 = vmax.f32 %v1176_v16, 1e-09  ;;  %v1228_v59 = vadd.f32 %v1227_v52, %v1226_v47 }
 0x901   :  { %v1216_v23 = vsub.f32 %v3297_v13, %v3918_v12 }
 0x902   :  { %2859 = vrcp.f32 %v1177_v53 }
 0x903   :  { %v1217_v14 = vmax.f32 %v1216_v23, 0.0 }
 0x909   :  { %v2858_v33 = vpop.eup %2857 }
 0x90a   :  { %v1220_v26 = vmul.f32 %v2858_v33, %v1217_v14 }
 0x90c   :  { %v2860_v35 = vpop.eup %2859  ;;  %v1222_v34 = vmul.f32 %v1221_v32, %v1220_v26 }
 0x90d   :  { %v1179_v40 = vmul.f32 %v2860_v35, %v3893_v3  ;;  %v1256_v35 = vstv %s2673_s3  ;;  %s2692_s3 = sld [smem:[#allocation6 + $0x5a]] }
 0x90e   :  { %v1223_v11 = vadd.f32 1.0, %v1222_v34 }
 0x90f   :  { %v1180_v16 = vmax.f32 %v1179_v40, 1e-09 }
 0x910   :  { %v1224_v53 = vmul.f32 %v1223_v11, %v3308_v27 }
 0x911   :  { %2861 = vlog2.f32 %v1180_v16 }
 0x912   :  { %v1229_v41 = vmin.f32 %v1228_v59, %v1224_v53 }
 0x914   :  { %v1230_v38 = vmax.f32 %v1229_v41, 0.0 }
 0x916   :  { %v1231_v23 = vsel %vm56_vm1, %v1230_v38, 0.0 }
 0x917   :  { %v1242_v14 = vsub.f32 %v1227_v52, %v1231_v23  ;;  %v1232_v38 = vsel %vm116_vm0, %v1231_v23, 0.0  ;;  %v1252_v52 = vstv %s2674_s14  ;;  %s2693_s14 = sld [smem:[#allocation6 + $0x5b]] }
 0x919   :  { %v1243_v32 = vmax.f32 %v1242_v14, 0.0 }
 0x91b   :  { %v2862_v33 = vpop.eup %2861 }
 0x91c   :  { %v1182_v51 = vmul.f32 0.6931472, %v2862_v33 }
 0x91e   :  { %v1183_v50 = vmul.f32 0.6666667, %v1182_v51 }
 0x920   :  { %v1184_v26 = vmul.f32 1.442695, %v1183_v50 }
 0x922   :  { %2863 = vpow2.f32 %v1184_v26  ;;  %v3941_v26 = vstv %s2675_s15  ;;  %s2694_s15 = sld [smem:[#allocation6 + $0x5c]] }
 0x92c   :  { %v2864_v54 = vpop.eup %2863 }
 0x92d   :  { %v1186_v17 = vmul.f32 %v2864_v54, %v3893_v3 }
 0x92f   :  { %v1187_v34 = vmul.f32 %v1186_v17, %v3314_v42 }
 0x931   :  { %v3931_v11 = vsel %vm56_vm1, %v1187_v34, 0.0 }
 0x932   :  { %5364 = vst [vmem:[#allocation51_spill] sm:$0xff] %v3931_v11  ;;  %1254 = vrot.lane.b32.xlu1 %v3931_v11, %s3193_s19 }
 0x956   :  { %1233 = vadd.xlane.f32.xlu1 %v1232_v38 }
 0x98b   :  { %v1247_v41 = vpop.xlane.xlu0 %1246 }
 0x98c   :  { %v1248_v59 = vmul.f32 0.0625, %v1247_v41 }
 0x98e   :  { %v1249_v50 = vmul.f32 2.5, %v1248_v59 }
 0x990   :  { %v1250_v51 = vadd.f32 %v3639_v9, %v1249_v50 }
 0x992   :  { %v1251_v47 = vmul.f32 %v1250_v51, %v1243_v32 }
 0x994   :  { %v1253_v23 = vadd.f32 %v1252_v52, %v1251_v47 }
 0x9a4   :  { %v1255_v40 = vpop.permute.xlu1 %1254 }
 0x9a5   :  { %v1257_v16 = vsel %vm57_vm2, %v1256_v35, %v1255_v40 }
 0x9a6   :  { %v1258_v53 = vsub.f32 %v1257_v16, %v3931_v11 }
 0x9a8   :  { %v1259_v33 = vmul.f32 %v3722_v37, %v1258_v53 }
 0x9aa   :  { %v1260_v54 = vadd.f32 %v1259_v33, %v1253_v23 }
 0x9ac   :  { %v1261_v17 = vmul.f32 %v1260_v54, %v3941_v26 }
 0x9ae   :  { %v1262_v34 = vadd.f32 %v1261_v17, %v3893_v3 }
 0x9b0   :  { %v1263_v14 = vmax.f32 %v1262_v34, 0.0 }
 0x9b2   :  { %v3947_v38 = vsel %vm56_vm1, %v1263_v14, 0.0 }
 0x9b3   :  { %v1265_v41 = vmul.f32 5.0, %v3947_v38 }
 0x9b5   :  { %v1266_v59 = vadd.f32 %v1265_v41, %v3343_v8 }
 0x9b7   :  { %2865 = vrsqrt.f32 %v1266_v59  ;;  %vm1269_vm12 = vcmp.eq.f32.partialorder %v1266_v59, inf  ;;  %v1272_v32 = vand.u32 2147483648, %v1266_v59  ;;  %vm1271_vm13 = vcmp.eq.f32.partialorder %v1266_v59, 0.0 }
 0x9c1   :  { %v2866_v50 = vpop.eup %2865 }
 0x9c2   :  { %v1268_v51 = vmul.f32 %v2866_v50, %v1266_v59 }
 0x9c4   :  { %v1270_v35 = vsel %vm1269_vm12, %v1266_v59, %v1268_v51 }
 0x9c5   :  { %v1273_v47 = vsel %vm1271_vm13, %v1272_v32, %v1270_v35 }
 0x9c6   :  { %v1274_v40 = vsub.f32 %v1273_v47, %v3639_v9 }
 0x9c8   :  { %v1275_v52 = vmul.f32 0.4, %v1274_v40 }
 0x9ca   :  { %v1345_v16 = vsel %vm56_vm1, %v1275_v52, 0.0  ;;  %v1276_v53 = vmul.f32 %v1275_v52, %v3288_v5 }
 0x9cb   :  { %v1346_v23 = vsel %vm116_vm0, %v1345_v16, 0.0 }
 0x9cc   :  { %1347 = vadd.xlane.f32.xlu0 %v1346_v23  ;;  %v1277_v33 = vadd.f32 %v3639_v9, %v1276_v53 }
 0x9ce   :  { %v1278_v54 = vmax.f32 %v1277_v33, 1e-09 }
 0x9d0   :  { %2867 = vrcp.f32 %v1278_v54 }
 0x9da   :  { %v2868_v17 = vpop.eup %2867 }
 0x9db   :  { %v1280_v34 = vmul.f32 %v2868_v17, %v3947_v38  ;;  %v1326_v17 = vstv %s2681_s16  ;;  %s2695_s16 = sld [smem:[#allocation6 + $0x5d]] }
 0x9dd   :  { %v1281_v14 = vmax.f32 %v1280_v34, 1e-09 }
 0x9df   :  { %2869 = vlog2.f32 %v1281_v14 }
 0x9e3   :  { %v1234_v41 = vpop.xlane.xlu1 %1233 }
 0x9e4   :  { %v3958_v59 = vmul.f32 0.0625, %v1234_v41  ;;  %v1327_v41 = vmul.f32 %v1326_v17, %v1275_v52 }
 0x9e6   :  { %5365 = vst [vmem:[#allocation52_spill] sm:$0xff] %v3958_v59  ;;  %v3962_v50 = vmul.f32 %v3941_v26, %v3958_v59 }
 0x9e8   :  { %5366 = vst [vmem:[#allocation53_spill] sm:$0xff] %v3962_v50  ;;  %v3966_v51 = vadd.f32 %v3962_v50, %v3906_v29  ;;  %v1239_v9 = vmul.f32 %v3962_v50, %v3339_v7 }
 0x9e9   :  { %v2870_v32 = vpop.eup %2869 }
 0x9ea   :  { %v1240_v35 = vadd.f32 %v1239_v9, %v3918_v12  ;;  %v1319_v47 = vmax.f32 %v3966_v51, 1e-09  ;;  %v1283_v40 = vmul.f32 0.6931472, %v2870_v32  ;;  %v1322_v12 = vadd.f32 %v1275_v52, %v3302_v15 }
 0x9eb   :  { %v1328_v32 = vstv %s2677_s17  ;;  %s2701_s17 = sld [smem:[#allocation6 + $0x64]] }
 0x9ec   :  { %2871 = vrcp.f32 %v1319_v47  ;;  %v1284_v16 = vmul.f32 0.6666667, %v1283_v40  ;;  %v3973_v53 = vmin.f32 %v1240_v35, %v3297_v13 }
 0x9ee   :  { %v1285_v23 = vmul.f32 1.442695, %v1284_v16  ;;  %v1317_v29 = vsub.f32 %v3297_v13, %v3973_v53 }
 0x9f0   :  { %2873 = vpow2.f32 %v1285_v23  ;;  %v1318_v33 = vmax.f32 %v1317_v29, 0.0  ;;  %v1329_v23 = vadd.f32 %v1328_v32, %v1327_v41  ;;  %v3993_v41 = vld [vmem:[%s5232_s4] sm:$0x1] }
 0x9f6   :  { %v2872_v54 = vpop.eup %2871 }
 0x9f7   :  { %v1321_v34 = vmul.f32 %v2872_v54, %v1318_v33 }
 0x9f9   :  { %v1323_v14 = vmul.f32 %v1322_v12, %v1321_v34 }
 0x9fa   :  { %v2874_v9 = vpop.eup %2873 }
 0x9fb   :  { %v1287_v35 = vmul.f32 %v2874_v9, %v3947_v38  ;;  %v1324_v47 = vadd.f32 1.0, %v1323_v14 }
 0x9fd   :  { %v1288_v40 = vmul.f32 %v1287_v35, %v3314_v42  ;;  %v1325_v16 = vmul.f32 %v1324_v47, %v3308_v27  ;;  %v1357_v35 = vstv %s2678_s18  ;;  %s2697_s18 = sld [smem:[#allocation6 + $0x60]] }
 0x9ff   :  { %v3983_v29 = vsel %vm56_vm1, %v1288_v40, 0.0  ;;  %v1330_v50 = vmin.f32 %v1329_v23, %v1325_v16  ;;  %v1353_v16 = vstv %s2679_s2  ;;  %s2698_s2 = sld [smem:[#allocation6 + $0x61]] }
 0xa00   :  { %1355 = vrot.lane.b32.xlu0 %v3983_v29, %s3193_s19 }
 0xa01   :  { %v1331_v33 = vmax.f32 %v1330_v50, 0.0 }
 0xa03   :  { %v1332_v52 = vsel %vm56_vm1, %v1331_v33, 0.0 }
 0xa04   :  { %v1333_v54 = vsel %vm116_vm0, %v1332_v52, 0.0  ;;  %v1343_v17 = vsub.f32 %v1328_v32, %v1332_v52 }
 0xa05   :  { %1334 = vadd.xlane.f32.xlu1 %v1333_v54  ;;  %v4000_v54 = vstv %s2680_s22  ;;  %s2706_s22 = sld [smem:[#allocation6 + $0x6a]] }
 0xa06   :  { %v1344_v50 = vmax.f32 %v1343_v17, 0.0  ;;  %5367 = vst [vmem:[#allocation54_spill] sm:$0xff] %v4000_v54 }
 0xa59   :  { %v1348_v34 = vpop.xlane.xlu0 %1347 }
 0xa5a   :  { %v1349_v12 = vmul.f32 0.0625, %v1348_v34 }
 0xa5c   :  { %v1350_v14 = vmul.f32 2.5, %v1349_v12 }
 0xa5e   :  { %v1351_v9 = vadd.f32 %v3993_v41, %v1350_v14 }
 0xa60   :  { %v1352_v47 = vmul.f32 %v1351_v9, %v1344_v50 }
 0xa62   :  { %v1354_v33 = vadd.f32 %v1353_v16, %v1352_v47 }
 0xa72   :  { %v1356_v40 = vpop.permute.xlu0 %1355 }
 0xa73   :  { %v1358_v32 = vsel %vm57_vm2, %v1357_v35, %v1356_v40 }
 0xa74   :  { %v1359_v23 = vsub.f32 %v1358_v32, %v3983_v29 }
 0xa76   :  { %v1360_v52 = vmul.f32 %v3722_v37, %v1359_v23 }
 0xa78   :  { %v1361_v34 = vadd.f32 %v1360_v52, %v1354_v33 }
 0xa7a   :  { %v1362_v12 = vmul.f32 %v1361_v34, %v4000_v54 }
 0xa7c   :  { %v1363_v14 = vadd.f32 %v1362_v12, %v3947_v38 }
 0xa7e   :  { %v1364_v17 = vmax.f32 %v1363_v14, 0.0 }
 0xa80   :  { %v4006_v9 = vsel %vm56_vm1, %v1364_v17, 0.0 }
 0xa81   :  { %5368 = vst [vmem:[#allocation55_spill] sm:$0xff] %v4006_v9  ;;  %v1366_v50 = vmul.f32 5.0, %v4006_v9 }
 0xa83   :  { %v1367_v35 = vadd.f32 %v1366_v50, %v3343_v8 }
 0xa85   :  { %2875 = vrsqrt.f32 %v1367_v35  ;;  %vm1370_vm14 = vcmp.eq.f32.partialorder %v1367_v35, inf  ;;  %v1373_v16 = vand.u32 2147483648, %v1367_v35  ;;  %vm1372_vm15 = vcmp.eq.f32.partialorder %v1367_v35, 0.0 }
 0xa8f   :  { %v2876_v47 = vpop.eup %2875 }
 0xa90   :  { %v1369_v40 = vmul.f32 %v2876_v47, %v1367_v35 }
 0xa92   :  { %v1335_v32 = vpop.xlane.xlu1 %1334  ;;  %v1371_v23 = vsel %vm1370_vm14, %v1367_v35, %v1369_v40 }
 0xa93   :  { %v4010_v33 = vmul.f32 0.0625, %v1335_v32  ;;  %v1374_v52 = vsel %vm1372_vm15, %v1373_v16, %v1371_v23 }
 0xa94   :  { %v1375_v34 = vsub.f32 %v1374_v52, %v3993_v41 }
 0xa95   :  { %5369 = vst [vmem:[#allocation56_spill] sm:$0xff] %v4010_v33  ;;  %v4015_v12 = vmul.f32 %v4000_v54, %v4010_v33 }
 0xa96   :  { %v1376_v14 = vmul.f32 0.4, %v1375_v34 }
 0xa97   :  { %5370 = vst [vmem:[#allocation57_spill] sm:$0xff] %v4015_v12  ;;  %v4019_v17 = vadd.f32 %v4015_v12, %v3966_v51  ;;  %v1340_v50 = vmul.f32 %v4015_v12, %v3339_v7 }
 0xa98   :  { %v1446_v35 = vsel %vm56_vm1, %v1376_v14, 0.0  ;;  %v1377_v47 = vmul.f32 %v1376_v14, %v3288_v5 }
 0xa99   :  { %v1341_v40 = vadd.f32 %v1340_v50, %v3973_v53  ;;  %v1420_v16 = vmax.f32 %v4019_v17, 1e-09  ;;  %v1447_v32 = vsel %vm116_vm0, %v1446_v35, 0.0  ;;  %v1427_v50 = vstv %s2686_s23  ;;  %s2702_s23 = sld [smem:[#allocation6 + $0x66]] }
 0xa9a   :  { %1448 = vadd.xlane.f32.xlu0 %v1447_v32  ;;  %v1378_v23 = vadd.f32 %v3993_v41, %v1377_v47  ;;  %v1423_v35 = vadd.f32 %v1376_v14, %v3302_v15  ;;  %v1428_v47 = vmul.f32 %v1427_v50, %v1376_v14 }
 0xa9b   :  { %2877 = vrcp.f32 %v1420_v16  ;;  %v4031_v51 = vmin.f32 %v1341_v40, %v3297_v13  ;;  %v1429_v40 = vstv %s2682_s24  ;;  %s2703_s24 = sld [smem:[#allocation6 + $0x67]] }
 0xa9c   :  { %v1379_v52 = vmax.f32 %v1378_v23, 1e-09  ;;  %v1430_v46 = vadd.f32 %v1429_v40, %v1428_v47 }
 0xa9d   :  { %v1418_v34 = vsub.f32 %v3297_v13, %v4031_v51 }
 0xa9e   :  { %2879 = vrcp.f32 %v1379_v52 }
 0xa9f   :  { %v1419_v12 = vmax.f32 %v1418_v34, 0.0 }
 0xaa5   :  { %v2878_v53 = vpop.eup %2877 }
 0xaa6   :  { %v1422_v33 = vmul.f32 %v2878_v53, %v1419_v12 }
 0xaa8   :  { %v2880_v32 = vpop.eup %2879  ;;  %v1424_v59 = vmul.f32 %v1423_v35, %v1422_v33 }
 0xaa9   :  { %v1381_v16 = vmul.f32 %v2880_v32, %v4006_v9  ;;  %v1458_v32 = vstv %s2683_s25  ;;  %s2704_s25 = sld [smem:[#allocation6 + $0x68]] }
 0xaaa   :  { %v1425_v54 = vadd.f32 1.0, %v1424_v59 }
 0xaab   :  { %v1382_v23 = vmax.f32 %v1381_v16, 1e-09 }
 0xaac   :  { %v1426_v52 = vmul.f32 %v1425_v54, %v3308_v27 }
 0xaad   :  { %2881 = vlog2.f32 %v1382_v23 }
 0xaae   :  { %v1431_v11 = vmin.f32 %v1430_v46, %v1426_v52 }
 0xab0   :  { %v1432_v49 = vmax.f32 %v1431_v11, 0.0 }
 0xab2   :  { %v1433_v34 = vsel %vm56_vm1, %v1432_v49, 0.0 }
 0xab3   :  { %v1444_v12 = vsub.f32 %v1429_v40, %v1433_v34  ;;  %v1434_v49 = vsel %vm116_vm0, %v1433_v34, 0.0  ;;  %v1454_v40 = vstv %s2684_s1  ;;  %s2705_s1 = sld [smem:[#allocation6 + $0x69]] }
 0xab5   :  { %v1445_v35 = vmax.f32 %v1444_v12, 0.0 }
 0xab7   :  { %v2882_v53 = vpop.eup %2881 }
 0xab8   :  { %v1384_v61 = vmul.f32 0.6931472, %v2882_v53 }
 0xaba   :  { %v1385_v18 = vmul.f32 0.6666667, %v1384_v61 }
 0xabc   :  { %v1386_v33 = vmul.f32 1.442695, %v1385_v18 }
 0xabe   :  { %2883 = vpow2.f32 %v1386_v33  ;;  %v4054_v33 = vstv %s2685_s26  ;;  %s2711_s26 = sld [smem:[#allocation6 + $0x70]] }
 0xabf   :  { %5372 = vst [vmem:[#allocation59_spill] sm:$0xff] %v4054_v33 }
 0xac8   :  { %v2884_v14 = vpop.eup %2883 }
 0xac9   :  { %v1388_v50 = vmul.f32 %v2884_v14, %v4006_v9 }
 0xacb   :  { %v1389_v59 = vmul.f32 %v1388_v50, %v3314_v42 }
 0xacd   :  { %v4044_v54 = vsel %vm56_vm1, %v1389_v59, 0.0 }
 0xace   :  { %5371 = vst [vmem:[#allocation58_spill] sm:$0xff] %v4044_v54  ;;  %1456 = vrot.lane.b32.xlu1 %v4044_v54, %s3193_s19 }
 0xaf2   :  { %1435 = vadd.xlane.f32.xlu1 %v1434_v49 }
 0xb27   :  { %v1449_v46 = vpop.xlane.xlu0 %1448 }
 0xb28   :  { %v1450_v11 = vmul.f32 0.0625, %v1449_v46 }
 0xb2a   :  { %v1451_v61 = vmul.f32 2.5, %v1450_v11 }
 0xb2c   :  { %v1452_v18 = vadd.f32 %v3993_v41, %v1451_v61 }
 0xb2e   :  { %v1453_v47 = vmul.f32 %v1452_v18, %v1445_v35 }
 0xb30   :  { %v1455_v34 = vadd.f32 %v1454_v40, %v1453_v47 }
 0xb40   :  { %v1457_v16 = vpop.permute.xlu1 %1456 }
 0xb41   :  { %v1459_v23 = vsel %vm57_vm2, %v1458_v32, %v1457_v16 }
 0xb42   :  { %v1460_v52 = vsub.f32 %v1459_v23, %v4044_v54 }
 0xb44   :  { %v1461_v53 = vmul.f32 %v3722_v37, %v1460_v52 }
 0xb46   :  { %v1462_v14 = vadd.f32 %v1461_v53, %v1455_v34 }
 0xb48   :  { %v1463_v50 = vmul.f32 %v1462_v14, %v4054_v33 }
 0xb4a   :  { %v1464_v59 = vadd.f32 %v1463_v50, %v4006_v9 }
 0xb4c   :  { %v1465_v12 = vmax.f32 %v1464_v59, 0.0 }
 0xb4e   :  { %v4060_v49 = vsel %vm56_vm1, %v1465_v12, 0.0 }
 0xb4f   :  { %v1467_v46 = vmul.f32 5.0, %v4060_v49 }
 0xb51   :  { %v1468_v11 = vadd.f32 %v1467_v46, %v3343_v8 }
 0xb53   :  { %2885 = vrsqrt.f32 %v1468_v11  ;;  %vm1471_vm3 = vcmp.eq.f32.partialorder %v1468_v11, inf  ;;  %v1474_v37 = vand.u32 2147483648, %v1468_v11  ;;  %vm1473_vm4 = vcmp.eq.f32.partialorder %v1468_v11, 0.0 }
 0xb5d   :  { %v2886_v61 = vpop.eup %2885 }
 0xb5e   :  { %v1470_v18 = vmul.f32 %v2886_v61, %v1468_v11 }
 0xb60   :  { %v1472_v35 = vsel %vm1471_vm3, %v1468_v11, %v1470_v18 }
 0xb61   :  { %v1475_v32 = vsel %vm1473_vm4, %v1474_v37, %v1472_v35 }
 0xb62   :  { %v1476_v47 = vsub.f32 %v1475_v32, %v3993_v41 }
 0xb64   :  { %v1477_v16 = vmul.f32 0.4, %v1476_v47 }
 0xb66   :  { %v1547_v40 = vsel %vm56_vm1, %v1477_v16, 0.0  ;;  %v1478_v23 = vmul.f32 %v1477_v16, %v3288_v5 }
 0xb67   :  { %v1548_v52 = vsel %vm116_vm0, %v1547_v40, 0.0 }
 0xb68   :  { %1549 = vadd.xlane.f32.xlu0 %v1548_v52  ;;  %v1479_v34 = vadd.f32 %v3993_v41, %v1478_v23 }
 0xb6a   :  { %v1480_v53 = vmax.f32 %v1479_v34, 1e-09 }
 0xb6c   :  { %2887 = vrcp.f32 %v1480_v53 }
 0xb76   :  { %v2888_v14 = vpop.eup %2887 }
 0xb77   :  { %v1482_v50 = vmul.f32 %v2888_v14, %v4060_v49  ;;  %v1528_v14 = vstv %s2691_s27  ;;  %s2707_s27 = sld [smem:[#allocation6 + $0x6c]] }
 0xb79   :  { %v1483_v59 = vmax.f32 %v1482_v50, 1e-09 }
 0xb7b   :  { %2889 = vlog2.f32 %v1483_v59 }
 0xb7f   :  { %v1436_v12 = vpop.xlane.xlu1 %1435 }
 0xb80   :  { %v4071_v46 = vmul.f32 0.0625, %v1436_v12  ;;  %v1529_v12 = vmul.f32 %v1528_v14, %v1477_v16 }
 0xb82   :  { %5373 = vst [vmem:[#allocation60_spill] sm:$0xff] %v4071_v46  ;;  %v4075_v11 = vmul.f32 %v4054_v33, %v4071_v46 }
 0xb84   :  { %5374 = vst [vmem:[#allocation61_spill] sm:$0xff] %v4075_v11  ;;  %v4079_v61 = vadd.f32 %v4075_v11, %v4019_v17  ;;  %v1441_v18 = vmul.f32 %v4075_v11, %v3339_v7 }
 0xb85   :  { %v2890_v37 = vpop.eup %2889 }
 0xb86   :  { %v1442_v35 = vadd.f32 %v1441_v18, %v4031_v51  ;;  %v1521_v32 = vmax.f32 %v4079_v61, 1e-09  ;;  %v1485_v47 = vmul.f32 0.6931472, %v2890_v37  ;;  %v1524_v51 = vadd.f32 %v1477_v16, %v3302_v15 }
 0xb87   :  { %v1530_v37 = vstv %s2687_s0  ;;  %s2708_s0 = sld [smem:[#allocation6 + $0x6d]] }
 0xb88   :  { %2891 = vrcp.f32 %v1521_v32  ;;  %v1486_v40 = vmul.f32 0.6666667, %v1485_v47  ;;  %v4086_v23 = vmin.f32 %v1442_v35, %v3297_v13 }
 0xb8a   :  { %v1487_v52 = vmul.f32 1.442695, %v1486_v40  ;;  %v1519_v17 = vsub.f32 %v3297_v13, %v4086_v23 }
 0xb8c   :  { %2893 = vpow2.f32 %v1487_v52  ;;  %v1520_v34 = vmax.f32 %v1519_v17, 0.0  ;;  %v1531_v52 = vadd.f32 %v1530_v37, %v1529_v12 }
 0xb92   :  { %v2892_v53 = vpop.eup %2891 }
 0xb93   :  { %v1523_v50 = vmul.f32 %v2892_v53, %v1520_v34 }
 0xb95   :  { %v1525_v59 = vmul.f32 %v1524_v51, %v1523_v50 }
 0xb96   :  { %v2894_v18 = vpop.eup %2893 }
 0xb97   :  { %v1489_v35 = vmul.f32 %v2894_v18, %v4060_v49  ;;  %v1526_v32 = vadd.f32 1.0, %v1525_v59 }
 0xb99   :  { %v1490_v47 = vmul.f32 %v1489_v35, %v3314_v42  ;;  %v1527_v40 = vmul.f32 %v1526_v32, %v3308_v27  ;;  %v1559_v35 = vstv %s2688_s28  ;;  %s2709_s28 = sld [smem:[#allocation6 + $0x6e]] }
 0xb9b   :  { %v4096_v17 = vsel %vm56_vm1, %v1490_v47, 0.0  ;;  %v1532_v11 = vmin.f32 %v1531_v52, %v1527_v40 }
 0xb9c   :  { %1557 = vrot.lane.b32.xlu0 %v4096_v17, %s3193_s19 }
 0xb9d   :  { %v1533_v34 = vmax.f32 %v1532_v11, 0.0  ;;  %v1555_v11 = vstv %s2689_s29  ;;  %s2710_s29 = sld [smem:[#allocation6 + $0x6f]] }
 0xb9f   :  { %v1534_v16 = vsel %vm56_vm1, %v1533_v34, 0.0  ;;  %v4110_v34 = vld [vmem:[%s5233_s5] sm:$0x1] }
 0xba0   :  { %v1535_v53 = vsel %vm116_vm0, %v1534_v16, 0.0  ;;  %v1545_v14 = vsub.f32 %v1530_v37, %v1534_v16 }
 0xba1   :  { %1536 = vadd.xlane.f32.xlu1 %v1535_v53  ;;  %v4113_v53 = vstv %s2690_s30  ;;  %s2730_s30 = sld [smem:[#allocation6 + $0x87]] }
 0xba2   :  { %v1546_v18 = vmax.f32 %v1545_v14, 0.0  ;;  %5375 = vst [vmem:[#allocation62_spill] sm:$0xff] %v4113_v53 }
 0xbf5   :  { %v1550_v50 = vpop.xlane.xlu0 %1549 }
 0xbf6   :  { %v1551_v51 = vmul.f32 0.0625, %v1550_v50 }
 0xbf8   :  { %v1552_v59 = vmul.f32 2.5, %v1551_v51 }
 0xbfa   :  { %v1553_v12 = vadd.f32 %v3993_v41, %v1552_v59 }
 0xbfc   :  { %v1554_v32 = vmul.f32 %v1553_v12, %v1546_v18 }
 0xbfe   :  { %v1556_v37 = vadd.f32 %v1555_v11, %v1554_v32 }
 0xc0e   :  { %v1558_v47 = vpop.permute.xlu0 %1557 }
 0xc0f   :  { %v1560_v40 = vsel %vm57_vm2, %v1559_v35, %v1558_v47 }
 0xc10   :  { %v1561_v52 = vsub.f32 %v1560_v40, %v4096_v17 }
 0xc12   :  { %v1562_v16 = vmul.f32 %v4110_v34, %v1561_v52 }
 0xc14   :  { %v1563_v14 = vadd.f32 %v1562_v16, %v1556_v37 }
 0xc16   :  { %v1564_v50 = vmul.f32 %v1563_v14, %v4113_v53 }
 0xc18   :  { %v1565_v51 = vadd.f32 %v1564_v50, %v4060_v49 }
 0xc1a   :  { %v1566_v59 = vmax.f32 %v1565_v51, 0.0 }
 0xc1c   :  { %v4119_v12 = vsel %vm56_vm1, %v1566_v59, 0.0 }
 0xc1d   :  { %5376 = vst [vmem:[#allocation63_spill] sm:$0xff] %v4119_v12  ;;  %v1568_v18 = vmul.f32 5.0, %v4119_v12 }
 0xc1f   :  { %v1569_v35 = vadd.f32 %v1568_v18, %v3343_v8 }
 0xc21   :  { %2895 = vrsqrt.f32 %v1569_v35  ;;  %vm1572_vm5 = vcmp.eq.f32.partialorder %v1569_v35, inf  ;;  %v1575_v11 = vand.u32 2147483648, %v1569_v35  ;;  %vm1574_vm6 = vcmp.eq.f32.partialorder %v1569_v35, 0.0 }
 0xc2b   :  { %v2896_v32 = vpop.eup %2895 }
 0xc2c   :  { %v1571_v47 = vmul.f32 %v2896_v32, %v1569_v35 }
 0xc2e   :  { %v1537_v40 = vpop.xlane.xlu1 %1536  ;;  %v1573_v52 = vsel %vm1572_vm5, %v1569_v35, %v1571_v47 }
 0xc2f   :  { %v4123_v37 = vmul.f32 0.0625, %v1537_v40  ;;  %v1576_v16 = vsel %vm1574_vm6, %v1575_v11, %v1573_v52 }
 0xc30   :  { %v1577_v14 = vsub.f32 %v1576_v16, %v3993_v41 }
 0xc31   :  { %5377 = vst [vmem:[#allocation64_spill] sm:$0xff] %v4123_v37  ;;  %v4128_v50 = vmul.f32 %v4113_v53, %v4123_v37 }
 0xc32   :  { %v1578_v51 = vmul.f32 0.4, %v1577_v14 }
 0xc33   :  { %5378 = vst [vmem:[#allocation65_spill] sm:$0xff] %v4128_v50  ;;  %v4132_v59 = vadd.f32 %v4128_v50, %v4079_v61  ;;  %v1542_v18 = vmul.f32 %v4128_v50, %v3339_v7 }
 0xc34   :  { %v1648_v35 = vsel %vm56_vm1, %v1578_v51, 0.0  ;;  %v1579_v32 = vmul.f32 %v1578_v51, %v3288_v5 }
 0xc35   :  { %v1543_v47 = vadd.f32 %v1542_v18, %v4086_v23  ;;  %v1622_v11 = vmax.f32 %v4132_v59, 1e-09  ;;  %v1649_v40 = vsel %vm116_vm0, %v1648_v35, 0.0  ;;  %v1629_v18 = vstv %s2696_s13  ;;  %s2712_s13 = sld [smem:[#allocation6 + $0x72]] }
 0xc36   :  { %1650 = vadd.xlane.f32.xlu0 %v1649_v40  ;;  %v1580_v52 = vadd.f32 %v3993_v41, %v1579_v32  ;;  %v1625_v35 = vadd.f32 %v1578_v51, %v3302_v15  ;;  %v1630_v32 = vmul.f32 %v1629_v18, %v1578_v51 }
 0xc37   :  { %2897 = vrcp.f32 %v1622_v11  ;;  %v4144_v61 = vmin.f32 %v1543_v47, %v3297_v13  ;;  %v1631_v47 = vstv %s2692_s3  ;;  %s2713_s3 = sld [smem:[#allocation6 + $0x73]] }
 0xc38   :  { %v1581_v16 = vmax.f32 %v1580_v52, 1e-09  ;;  %v1632_v54 = vadd.f32 %v1631_v47, %v1630_v32 }
 0xc39   :  { %v1620_v14 = vsub.f32 %v3297_v13, %v4144_v61 }
 0xc3a   :  { %2899 = vrcp.f32 %v1581_v16 }
 0xc3b   :  { %v1621_v50 = vmax.f32 %v1620_v14, 0.0 }
 0xc41   :  { %v2898_v23 = vpop.eup %2897 }
 0xc42   :  { %v1624_v37 = vmul.f32 %v2898_v23, %v1621_v50 }
 0xc44   :  { %v2900_v40 = vpop.eup %2899  ;;  %v1626_v46 = vmul.f32 %v1625_v35, %v1624_v37 }
 0xc45   :  { %v1583_v11 = vmul.f32 %v2900_v40, %v4119_v12  ;;  %v1660_v40 = vstv %s2693_s14  ;;  %s2714_s14 = sld [smem:[#allocation6 + $0x74]] }
 0xc46   :  { %v1627_v53 = vadd.f32 1.0, %v1626_v46 }
 0xc47   :  { %v1584_v52 = vmax.f32 %v1583_v11, 1e-09 }
 0xc48   :  { %v1628_v16 = vmul.f32 %v1627_v53, %v3308_v27 }
 0xc49   :  { %2901 = vlog2.f32 %v1584_v52 }
 0xc4a   :  { %v1633_v60 = vmin.f32 %v1632_v54, %v1628_v16 }
 0xc4c   :  { %v1634_v9 = vmax.f32 %v1633_v60, 0.0 }
 0xc4e   :  { %v1635_v14 = vsel %vm56_vm1, %v1634_v9, 0.0 }
 0xc4f   :  { %v1646_v50 = vsub.f32 %v1631_v47, %v1635_v14  ;;  %v1636_v60 = vsel %vm116_vm0, %v1635_v14, 0.0  ;;  %v1656_v47 = vstv %s2694_s15  ;;  %s2715_s15 = sld [smem:[#allocation6 + $0x75]] }
 0xc51   :  { %v1647_v35 = vmax.f32 %v1646_v50, 0.0 }
 0xc53   :  { %v2902_v23 = vpop.eup %2901 }
 0xc54   :  { %v1586_v3 = vmul.f32 0.6931472, %v2902_v23 }
 0xc56   :  { %v1587_v31 = vmul.f32 0.6666667, %v1586_v3 }
 0xc58   :  { %v1588_v37 = vmul.f32 1.442695, %v1587_v31 }
 0xc5a   :  { %2903 = vpow2.f32 %v1588_v37  ;;  %v4167_v37 = vstv %s2695_s16  ;;  %s2721_s16 = sld [smem:[#allocation6 + $0x7c]] }
 0xc5b   :  { %5380 = vst [vmem:[#allocation67_spill] sm:$0xff] %v4167_v37 }
 0xc64   :  { %v2904_v51 = vpop.eup %2903 }
 0xc65   :  { %v1590_v18 = vmul.f32 %v2904_v51, %v4119_v12 }
 0xc67   :  { %v1591_v46 = vmul.f32 %v1590_v18, %v3314_v42 }
 0xc69   :  { %v4157_v53 = vsel %vm56_vm1, %v1591_v46, 0.0 }
 0xc6a   :  { %5379 = vst [vmem:[#allocation66_spill] sm:$0xff] %v4157_v53  ;;  %1658 = vrot.lane.b32.xlu1 %v4157_v53, %s3193_s19 }
 0xc8e   :  { %1637 = vadd.xlane.f32.xlu1 %v1636_v60 }
 0xcc3   :  { %v1651_v9 = vpop.xlane.xlu0 %1650 }
 0xcc4   :  { %v1652_v54 = vmul.f32 0.0625, %v1651_v9 }
 0xcc6   :  { %v1653_v31 = vmul.f32 2.5, %v1652_v54 }
 0xcc8   :  { %v1654_v3 = vadd.f32 %v3993_v41, %v1653_v31 }
 0xcca   :  { %v1655_v32 = vmul.f32 %v1654_v3, %v1647_v35 }
 0xccc   :  { %v1657_v14 = vadd.f32 %v1656_v47, %v1655_v32 }
 0xcdc   :  { %v1659_v11 = vpop.permute.xlu1 %1658 }
 0xcdd   :  { %v1661_v52 = vsel %vm57_vm2, %v1660_v40, %v1659_v11 }
 0xcde   :  { %v1662_v16 = vsub.f32 %v1661_v52, %v4157_v53 }
 0xce0   :  { %v1663_v23 = vmul.f32 %v4110_v34, %v1662_v16 }
 0xce2   :  { %v1664_v51 = vadd.f32 %v1663_v23, %v1657_v14 }
 0xce4   :  { %v1665_v18 = vmul.f32 %v1664_v51, %v4167_v37 }
 0xce6   :  { %v1666_v46 = vadd.f32 %v1665_v18, %v4119_v12 }
 0xce8   :  { %v1667_v50 = vmax.f32 %v1666_v46, 0.0 }
 0xcea   :  { %v4173_v60 = vsel %vm56_vm1, %v1667_v50, 0.0 }
 0xceb   :  { %v1669_v9 = vmul.f32 5.0, %v4173_v60 }
 0xced   :  { %v1670_v54 = vadd.f32 %v1669_v9, %v3343_v8 }
 0xcef   :  { %2905 = vrsqrt.f32 %v1670_v54  ;;  %vm1673_vm7 = vcmp.eq.f32.partialorder %v1670_v54, inf  ;;  %v1676_v35 = vand.u32 2147483648, %v1670_v54  ;;  %vm1675_vm8 = vcmp.eq.f32.partialorder %v1670_v54, 0.0 }
 0xcf9   :  { %v2906_v31 = vpop.eup %2905 }
 0xcfa   :  { %v1672_v3 = vmul.f32 %v2906_v31, %v1670_v54 }
 0xcfc   :  { %v1674_v40 = vsel %vm1673_vm7, %v1670_v54, %v1672_v3 }
 0xcfd   :  { %v1677_v32 = vsel %vm1675_vm8, %v1676_v35, %v1674_v40 }
 0xcfe   :  { %v1678_v11 = vsub.f32 %v1677_v32, %v3993_v41 }
 0xd00   :  { %v1679_v47 = vmul.f32 0.4, %v1678_v11 }
 0xd02   :  { %v1749_v52 = vsel %vm56_vm1, %v1679_v47, 0.0  ;;  %v1680_v16 = vmul.f32 %v1679_v47, %v3288_v5 }
 0xd03   :  { %v1750_v14 = vsel %vm116_vm0, %v1749_v52, 0.0 }
 0xd04   :  { %1751 = vadd.xlane.f32.xlu0 %v1750_v14  ;;  %v1681_v23 = vadd.f32 %v3993_v41, %v1680_v16 }
 0xd06   :  { %v1682_v51 = vmax.f32 %v1681_v23, 1e-09 }
 0xd08   :  { %2907 = vrcp.f32 %v1682_v51 }
 0xd12   :  { %v2908_v18 = vpop.eup %2907 }
 0xd13   :  { %v1684_v46 = vmul.f32 %v2908_v18, %v4173_v60 }
 0xd15   :  { %v1685_v50 = vmax.f32 %v1684_v46, 1e-09  ;;  %v1730_v46 = vstv %s2701_s17  ;;  %s2717_s17 = sld [smem:[#allocation6 + $0x78]] }
 0xd17   :  { %2909 = vlog2.f32 %v1685_v50 }
 0xd1b   :  { %v1638_v9 = vpop.xlane.xlu1 %1637 }
 0xd1c   :  { %v4184_v54 = vmul.f32 0.0625, %v1638_v9 }
 0xd1e   :  { %5381 = vst [vmem:[#allocation68_spill] sm:$0xff] %v4184_v54  ;;  %v4188_v31 = vmul.f32 %v4167_v37, %v4184_v54 }
 0xd20   :  { %5382 = vst [vmem:[#allocation69_spill] sm:$0xff] %v4188_v31  ;;  %v4192_v3 = vadd.f32 %v4188_v31, %v4132_v59  ;;  %v1643_v35 = vmul.f32 %v4188_v31, %v3339_v7 }
 0xd21   :  { %v2910_v40 = vpop.eup %2909 }
 0xd22   :  { %v1644_v32 = vadd.f32 %v1643_v35, %v4144_v61  ;;  %v1723_v11 = vmax.f32 %v4192_v3, 1e-09  ;;  %v1687_v52 = vmul.f32 0.6931472, %v2910_v40  ;;  %v1726_v61 = vadd.f32 %v1679_v47, %v3302_v15 }
 0xd23   :  { %v1731_v35 = vmul.f32 %v1730_v46, %v1679_v47 }
 0xd24   :  { %2911 = vrcp.f32 %v1723_v11  ;;  %v1688_v16 = vmul.f32 0.6666667, %v1687_v52  ;;  %v4199_v14 = vmin.f32 %v1644_v32, %v3297_v13  ;;  %v1732_v11 = vstv %s2697_s18  ;;  %s2718_s18 = sld [smem:[#allocation6 + $0x79]] }
 0xd25   :  { %v1733_v31 = vadd.f32 %v1732_v11, %v1731_v35 }
 0xd26   :  { %v1689_v23 = vmul.f32 1.442695, %v1688_v16  ;;  %v1721_v59 = vsub.f32 %v3297_v13, %v4199_v14 }
 0xd28   :  { %2913 = vpow2.f32 %v1689_v23  ;;  %v1722_v51 = vmax.f32 %v1721_v59, 0.0 }
 0xd2e   :  { %v2912_v18 = vpop.eup %2911 }
 0xd2f   :  { %v1725_v50 = vmul.f32 %v2912_v18, %v1722_v51 }
 0xd31   :  { %v1727_v9 = vmul.f32 %v1726_v61, %v1725_v50 }
 0xd32   :  { %v2914_v40 = vpop.eup %2913 }
 0xd33   :  { %v1691_v32 = vmul.f32 %v2914_v40, %v4173_v60  ;;  %v1728_v52 = vadd.f32 1.0, %v1727_v9  ;;  %v1761_v40 = vstv %s2698_s2  ;;  %s2719_s2 = sld [smem:[#allocation6 + $0x7a]] }
 0xd35   :  { %v1692_v16 = vmul.f32 %v1691_v32, %v3314_v42  ;;  %v1729_v23 = vmul.f32 %v1728_v52, %v3308_v27 }
 0xd37   :  { %v4209_v59 = vsel %vm56_vm1, %v1692_v16, 0.0  ;;  %v1734_v54 = vmin.f32 %v1733_v31, %v1729_v23 }
 0xd38   :  { %5383 = vst [vmem:[#allocation70_spill] sm:$0xff] %v4209_v59  ;;  %1759 = vrot.lane.b32.xlu0 %v4209_v59, %s3193_s19 }
 0xd39   :  { %v1735_v51 = vmax.f32 %v1734_v54, 0.0  ;;  %v1757_v54 = vstv %s2699_s20  ;;  %s2720_s20 = sld [smem:[#allocation6 + $0x7b]] }
 0xd3b   :  { %v1736_v47 = vsel %vm56_vm1, %v1735_v51, 0.0 }
 0xd3c   :  { %v1737_v18 = vsel %vm116_vm0, %v1736_v47, 0.0  ;;  %v1747_v46 = vsub.f32 %v1732_v11, %v1736_v47  ;;  %v4221_v47 = vstv %s2700_s21  ;;  %s2726_s21 = sld [smem:[#allocation6 + $0x82]] }
 0xd3d   :  { %1738 = vadd.xlane.f32.xlu1 %v1737_v18  ;;  %5384 = vst [vmem:[#allocation71_spill] sm:$0xff] %v4221_v47 }
 0xd3e   :  { %v1748_v31 = vmax.f32 %v1747_v46, 0.0 }
 0xd91   :  { %v1752_v50 = vpop.xlane.xlu0 %1751 }
 0xd92   :  { %v1753_v61 = vmul.f32 0.0625, %v1752_v50 }
 0xd94   :  { %v1754_v9 = vmul.f32 2.5, %v1753_v61 }
 0xd96   :  { %v1755_v35 = vadd.f32 %v3993_v41, %v1754_v9 }
 0xd98   :  { %v1756_v32 = vmul.f32 %v1755_v35, %v1748_v31 }
 0xd9a   :  { %v1758_v11 = vadd.f32 %v1757_v54, %v1756_v32 }
 0xdaa   :  { %v1760_v52 = vpop.permute.xlu0 %1759 }
 0xdab   :  { %v1762_v16 = vsel %vm57_vm2, %v1761_v40, %v1760_v52 }
 0xdac   :  { %v1763_v23 = vsub.f32 %v1762_v16, %v4209_v59 }
 0xdae   :  { %v1764_v51 = vmul.f32 %v4110_v34, %v1763_v23 }
 0xdb0   :  { %v1765_v18 = vadd.f32 %v1764_v51, %v1758_v11 }
 0xdb2   :  { %v1766_v50 = vmul.f32 %v1765_v18, %v4221_v47 }
 0xdb4   :  { %v1767_v61 = vadd.f32 %v1766_v50, %v4173_v60 }
 0xdb6   :  { %v1768_v46 = vmax.f32 %v1767_v61, 0.0 }
 0xdb8   :  { %v4227_v9 = vsel %vm56_vm1, %v1768_v46, 0.0 }
 0xdb9   :  { %5385 = vst [vmem:[#allocation72_spill] sm:$0xff] %v4227_v9  ;;  %v1770_v35 = vmul.f32 5.0, %v4227_v9 }
 0xdbb   :  { %v1771_v31 = vadd.f32 %v1770_v35, %v3343_v8 }
 0xdbd   :  { %2915 = vrsqrt.f32 %v1771_v31  ;;  %vm1774_vm9 = vcmp.eq.f32.partialorder %v1771_v31, inf  ;;  %v1777_v52 = vand.u32 2147483648, %v1771_v31  ;;  %vm1776_vm10 = vcmp.eq.f32.partialorder %v1771_v31, 0.0 }
 0xdc7   :  { %v2916_v40 = vpop.eup %2915 }
 0xdc8   :  { %v1773_v32 = vmul.f32 %v2916_v40, %v1771_v31 }
 0xdca   :  { %v1739_v54 = vpop.xlane.xlu1 %1738  ;;  %v1775_v16 = vsel %vm1774_vm9, %v1771_v31, %v1773_v32 }
 0xdcb   :  { %v4231_v23 = vmul.f32 0.0625, %v1739_v54  ;;  %v1778_v11 = vsel %vm1776_vm10, %v1777_v52, %v1775_v16  ;;  %vm287_vm10 = vcmp.gt.f32.partialorder %v3397_v30, 1e-09 }
 0xdcc   :  { %v1779_v51 = vsub.f32 %v1778_v11, %v3993_v41 }
 0xdcd   :  { %5386 = vst [vmem:[#allocation73_spill] sm:$0xff] %v4231_v23  ;;  %v4236_v18 = vmul.f32 %v4221_v47, %v4231_v23 }
 0xdce   :  { %v1780_v50 = vmul.f32 0.4, %v1779_v51 }
 0xdcf   :  { %5387 = vst [vmem:[#allocation74_spill] sm:$0xff] %v4236_v18  ;;  %v4240_v61 = vadd.f32 %v4236_v18, %v4192_v3  ;;  %v1744_v46 = vmul.f32 %v4236_v18, %v3339_v7 }
 0xdd0   :  { %v1850_v35 = vsel %vm56_vm1, %v1780_v50, 0.0  ;;  %v1781_v31 = vmul.f32 %v1780_v50, %v3288_v5 }
 0xdd1   :  { %v1745_v40 = vadd.f32 %v1744_v46, %v4199_v14  ;;  %v1824_v32 = vmax.f32 %v4240_v61, 1e-09  ;;  %v1851_v52 = vsel %vm116_vm0, %v1850_v35, 0.0  ;;  %v1831_v46 = vstv %s2706_s22  ;;  %s2722_s22 = sld [smem:[#allocation6 + $0x7e]] }
 0xdd2   :  { %1852 = vadd.xlane.f32.xlu0 %v1851_v52  ;;  %v1782_v54 = vadd.f32 %v3993_v41, %v1781_v31  ;;  %v1827_v35 = vadd.f32 %v1780_v50, %v3302_v15  ;;  %v1832_v31 = vmul.f32 %v1831_v46, %v1780_v50 }
 0xdd3   :  { %2917 = vrcp.f32 %v1824_v32  ;;  %v4252_v3 = vmin.f32 %v1745_v40, %v3297_v13  ;;  %v1833_v40 = vstv %s2702_s23  ;;  %s2723_s23 = sld [smem:[#allocation6 + $0x7f]] }
 0xdd4   :  { %v1783_v16 = vmax.f32 %v1782_v54, 1e-09  ;;  %v1834_v53 = vadd.f32 %v1833_v40, %v1832_v31 }
 0xdd5   :  { %v1822_v11 = vsub.f32 %v3297_v13, %v4252_v3 }
 0xdd6   :  { %2919 = vrcp.f32 %v1783_v16 }
 0xdd7   :  { %v1823_v51 = vmax.f32 %v1822_v11, 0.0 }
 0xddd   :  { %v2918_v14 = vpop.eup %2917 }
 0xdde   :  { %v1826_v18 = vmul.f32 %v2918_v14, %v1823_v51 }
 0xde0   :  { %v2920_v52 = vpop.eup %2919  ;;  %v1828_v23 = vmul.f32 %v1827_v35, %v1826_v18 }
 0xde1   :  { %v1785_v32 = vmul.f32 %v2920_v52, %v4227_v9  ;;  %v1862_v52 = vstv %s2703_s24  ;;  %s2724_s24 = sld [smem:[#allocation6 + $0x80]] }
 0xde2   :  { %v1829_v47 = vadd.f32 1.0, %v1828_v23 }
 0xde3   :  { %v1786_v54 = vmax.f32 %v1785_v32, 1e-09 }
 0xde4   :  { %v1830_v16 = vmul.f32 %v1829_v47, %v3308_v27 }
 0xde5   :  { %2921 = vlog2.f32 %v1786_v54 }
 0xde6   :  { %v1835_v12 = vmin.f32 %v1834_v53, %v1830_v16 }
 0xde8   :  { %v1836_v10 = vmax.f32 %v1835_v12, 0.0 }
 0xdea   :  { %v1837_v11 = vsel %vm56_vm1, %v1836_v10, 0.0 }
 0xdeb   :  { %v1848_v51 = vsub.f32 %v1833_v40, %v1837_v11  ;;  %v1838_v10 = vsel %vm116_vm0, %v1837_v11, 0.0  ;;  %v1858_v40 = vstv %s2704_s25  ;;  %s2725_s25 = sld [smem:[#allocation6 + $0x81]] }
 0xded   :  { %v1849_v35 = vmax.f32 %v1848_v51, 0.0 }
 0xdef   :  { %v2922_v14 = vpop.eup %2921 }
 0xdf0   :  { %v1788_v37 = vmul.f32 0.6931472, %v2922_v14 }
 0xdf2   :  { %v1789_v33 = vmul.f32 0.6666667, %v1788_v37 }
 0xdf4   :  { %v1790_v18 = vmul.f32 1.442695, %v1789_v33 }
 0xdf6   :  { %2923 = vpow2.f32 %v1790_v18  ;;  %v4275_v18 = vstv %s2705_s1 }
 0xdf7   :  { %5389 = vst [vmem:[#allocation76_spill] sm:$0xff] %v4275_v18 }
 0xe00   :  { %v2924_v50 = vpop.eup %2923 }
 0xe01   :  { %v1792_v46 = vmul.f32 %v2924_v50, %v4227_v9 }
 0xe03   :  { %v1793_v23 = vmul.f32 %v1792_v46, %v3314_v42 }
 0xe05   :  { %v4265_v47 = vsel %vm56_vm1, %v1793_v23, 0.0 }
 0xe06   :  { %5388 = vst [vmem:[#allocation75_spill] sm:$0xff] %v4265_v47  ;;  %1860 = vrot.lane.b32.xlu1 %v4265_v47, %s3193_s19 }
 0xe2a   :  { %1839 = vadd.xlane.f32.xlu1 %v1838_v10 }
 0xe5f   :  { %v1853_v12 = vpop.xlane.xlu0 %1852 }
 0xe60   :  { %v1854_v53 = vmul.f32 0.0625, %v1853_v12 }
 0xe62   :  { %v1855_v33 = vmul.f32 2.5, %v1854_v53 }
 0xe64   :  { %v1856_v37 = vadd.f32 %v3993_v41, %v1855_v33 }
 0xe66   :  { %v1857_v31 = vmul.f32 %v1856_v37, %v1849_v35 }
 0xe68   :  { %v1859_v11 = vadd.f32 %v1858_v40, %v1857_v31 }
 0xe78   :  { %v1861_v32 = vpop.permute.xlu1 %1860 }
 0xe79   :  { %v1863_v54 = vsel %vm57_vm2, %v1862_v52, %v1861_v32 }
 0xe7a   :  { %v1864_v16 = vsub.f32 %v1863_v54, %v4265_v47 }
 0xe7c   :  { %v1865_v14 = vmul.f32 %v4110_v34, %v1864_v16 }
 0xe7e   :  { %v1866_v50 = vadd.f32 %v1865_v14, %v1859_v11 }
 0xe80   :  { %v1867_v46 = vmul.f32 %v1866_v50, %v4275_v18 }
 0xe82   :  { %v1868_v23 = vadd.f32 %v1867_v46, %v4227_v9 }
 0xe84   :  { %v1869_v51 = vmax.f32 %v1868_v23, 0.0 }
 0xe86   :  { %v4281_v10 = vsel %vm56_vm1, %v1869_v51, 0.0 }
 0xe87   :  { %v1871_v12 = vmul.f32 5.0, %v4281_v10 }
 0xe89   :  { %v1872_v53 = vadd.f32 %v1871_v12, %v3343_v8 }
 0xe8b   :  { %2925 = vrsqrt.f32 %v1872_v53  ;;  %vm1875_vm11 = vcmp.eq.f32.partialorder %v1872_v53, inf  ;;  %v1878_v35 = vand.u32 2147483648, %v1872_v53  ;;  %vm1877_vm12 = vcmp.eq.f32.partialorder %v1872_v53, 0.0 }
 0xe95   :  { %v2926_v33 = vpop.eup %2925 }
 0xe96   :  { %v1874_v37 = vmul.f32 %v2926_v33, %v1872_v53 }
 0xe98   :  { %v1876_v52 = vsel %vm1875_vm11, %v1872_v53, %v1874_v37  ;;  %vm388_vm11 = vcmp.gt.f32.partialorder %v3451_v57, 1e-09 }
 0xe99   :  { %v1879_v31 = vsel %vm1877_vm12, %v1878_v35, %v1876_v52  ;;  %vm489_vm12 = vcmp.gt.f32.partialorder %v3511_v43, 1e-09 }
 0xe9a   :  { %v1880_v32 = vsub.f32 %v1879_v31, %v3993_v41 }
 0xe9c   :  { %v1881_v40 = vmul.f32 0.4, %v1880_v32 }
 0xe9e   :  { %v1951_v54 = vsel %vm56_vm1, %v1881_v40, 0.0  ;;  %v1882_v16 = vmul.f32 %v1881_v40, %v3288_v5 }
 0xe9f   :  { %v1952_v11 = vsel %vm116_vm0, %v1951_v54, 0.0 }
 0xea0   :  { %1953 = vadd.xlane.f32.xlu0 %v1952_v11  ;;  %v1883_v14 = vadd.f32 %v3993_v41, %v1882_v16 }
 0xea2   :  { %v1884_v50 = vmax.f32 %v1883_v14, 1e-09 }
 0xea4   :  { %2927 = vrcp.f32 %v1884_v50 }
 0xeae   :  { %v2928_v46 = vpop.eup %2927 }
 0xeaf   :  { %v1886_v23 = vmul.f32 %v2928_v46, %v4281_v10 }
 0xeb1   :  { %v1887_v51 = vmax.f32 %v1886_v23, 1e-09  ;;  %v1932_v23 = vstv %s2711_s26 }
 0xeb3   :  { %2929 = vlog2.f32 %v1887_v51 }
 0xeb7   :  { %v1840_v12 = vpop.xlane.xlu1 %1839 }
 0xeb8   :  { %v4292_v53 = vmul.f32 0.0625, %v1840_v12 }
 0xeba   :  { %5390 = vst [vmem:[#allocation77_spill] sm:$0xff] %v4292_v53  ;;  %v4296_v33 = vmul.f32 %v4275_v18, %v4292_v53 }
 0xebc   :  { %5391 = vst [vmem:[#allocation78_spill] sm:$0xff] %v4296_v33  ;;  %v4300_v37 = vadd.f32 %v4296_v33, %v4240_v61  ;;  %v1845_v35 = vmul.f32 %v4296_v33, %v3339_v7 }
 0xebd   :  { %v2930_v52 = vpop.eup %2929 }
 0xebe   :  { %v1846_v31 = vadd.f32 %v1845_v35, %v4252_v3  ;;  %v1925_v32 = vmax.f32 %v4300_v37, 1e-09  ;;  %v1889_v54 = vmul.f32 0.6931472, %v2930_v52  ;;  %v1928_v3 = vadd.f32 %v1881_v40, %v3302_v15 }
 0xebf   :  { %v1933_v35 = vmul.f32 %v1932_v23, %v1881_v40 }
 0xec0   :  { %2931 = vrcp.f32 %v1925_v32  ;;  %v1890_v16 = vmul.f32 0.6666667, %v1889_v54  ;;  %v4307_v11 = vmin.f32 %v1846_v31, %v3297_v13  ;;  %v1934_v32 = vstv %s2707_s27  ;;  %s2731_s27 = sld [smem:[#allocation6 + $0x88]] }
 0xec1   :  { %v1935_v33 = vadd.f32 %v1934_v32, %v1933_v35 }
 0xec2   :  { %v1891_v14 = vmul.f32 1.442695, %v1890_v16  ;;  %v1923_v61 = vsub.f32 %v3297_v13, %v4307_v11 }
 0xec4   :  { %2933 = vpow2.f32 %v1891_v14  ;;  %v1924_v50 = vmax.f32 %v1923_v61, 0.0 }
 0xeca   :  { %v2932_v46 = vpop.eup %2931 }
 0xecb   :  { %v1927_v51 = vmul.f32 %v2932_v46, %v1924_v50 }
 0xecd   :  { %v1929_v12 = vmul.f32 %v1928_v3, %v1927_v51 }
 0xece   :  { %v2934_v52 = vpop.eup %2933 }
 0xecf   :  { %v1893_v31 = vmul.f32 %v2934_v52, %v4281_v10  ;;  %v1930_v54 = vadd.f32 1.0, %v1929_v12  ;;  %v1963_v52 = vstv %s2708_s0  ;;  %s2727_s0 = sld [smem:[#allocation6 + $0x84]] }
 0xed1   :  { %v1894_v16 = vmul.f32 %v1893_v31, %v3314_v42  ;;  %v1931_v14 = vmul.f32 %v1930_v54, %v3308_v27 }
 0xed3   :  { %v4317_v61 = vsel %vm56_vm1, %v1894_v16, 0.0  ;;  %v1936_v53 = vmin.f32 %v1935_v33, %v1931_v14 }
 0xed4   :  { %5392 = vst [vmem:[#allocation79_spill] sm:$0xff] %v4317_v61  ;;  %1961 = vrot.lane.b32.xlu0 %v4317_v61, %s3193_s19 }
 0xed5   :  { %v1937_v50 = vmax.f32 %v1936_v53, 0.0  ;;  %v1959_v53 = vstv %s2709_s28  ;;  %s2728_s28 = sld [smem:[#allocation6 + $0x85]] }
 0xed7   :  { %v1938_v40 = vsel %vm56_vm1, %v1937_v50, 0.0 }
 0xed8   :  { %v1939_v46 = vsel %vm116_vm0, %v1938_v40, 0.0  ;;  %v1949_v23 = vsub.f32 %v1934_v32, %v1938_v40  ;;  %v4329_v40 = vstv %s2710_s29  ;;  %s2729_s29 = sld [smem:[#allocation6 + $0x86]] }
 0xed9   :  { %1940 = vadd.xlane.f32.xlu1 %v1939_v46  ;;  %5393 = vst [vmem:[#allocation80_spill] sm:$0xff] %v4329_v40 }
 0xeda   :  { %v1950_v33 = vmax.f32 %v1949_v23, 0.0 }
 0xf2d   :  { %v1954_v51 = vpop.xlane.xlu0 %1953 }
 0xf2e   :  { %v1955_v3 = vmul.f32 0.0625, %v1954_v51 }
 0xf30   :  { %v1956_v12 = vmul.f32 2.5, %v1955_v3 }
 0xf32   :  { %v1957_v35 = vadd.f32 %v3993_v41, %v1956_v12 }
 0xf34   :  { %v1958_v31 = vmul.f32 %v1957_v35, %v1950_v33 }
 0xf36   :  { %v1960_v32 = vadd.f32 %v1959_v53, %v1958_v31 }
 0xf46   :  { %v1962_v54 = vpop.permute.xlu0 %1961 }
 0xf47   :  { %v1964_v16 = vsel %vm57_vm2, %v1963_v52, %v1962_v54 }
 0xf48   :  { %v1965_v14 = vsub.f32 %v1964_v16, %v4317_v61 }
 0xf4a   :  { %v1966_v50 = vmul.f32 %v4110_v34, %v1965_v14 }
 0xf4c   :  { %v1967_v46 = vadd.f32 %v1966_v50, %v1960_v32  ;;  %v4344_v32 = vld [vmem:[%s5232_s4] sm:$0x1] }
 0xf4e   :  { %v1968_v51 = vmul.f32 %v1967_v46, %v4329_v40 }
 0xf50   :  { %v1969_v41 = vadd.f32 %v1968_v51, %v4281_v10 }
 0xf52   :  { %v1970_v23 = vmax.f32 %v1969_v41, 0.0 }
 0xf54   :  { %v4335_v3 = vsel %vm56_vm1, %v1970_v23, 0.0 }
 0xf55   :  { %v1972_v12 = vmul.f32 5.0, %v4335_v3 }
 0xf57   :  { %v1973_v35 = vadd.f32 %v1972_v12, %v3343_v8 }
 0xf59   :  { %2935 = vrsqrt.f32 %v1973_v35  ;;  %vm1976_vm13 = vcmp.eq.f32.partialorder %v1973_v35, inf  ;;  %v1979_v31 = vand.u32 2147483648, %v1973_v35  ;;  %vm1978_vm14 = vcmp.eq.f32.partialorder %v1973_v35, 0.0 }
 0xf63   :  { %v2936_v33 = vpop.eup %2935 }
 0xf64   :  { %v1975_v52 = vmul.f32 %v2936_v33, %v1973_v35 }
 0xf66   :  { %v1941_v54 = vpop.xlane.xlu1 %1940  ;;  %v1977_v53 = vsel %vm1976_vm13, %v1973_v35, %v1975_v52  ;;  %vm590_vm13 = vcmp.gt.f32.partialorder %v3565_v44, 1e-09 }
 0xf67   :  { %v4339_v16 = vmul.f32 0.0625, %v1941_v54  ;;  %v1980_v14 = vsel %vm1978_vm14, %v1979_v31, %v1977_v53  ;;  %vm691_vm14 = vcmp.gt.f32.partialorder %v3619_v6, 1e-09 }
 0xf68   :  { %v1981_v50 = vsub.f32 %v1980_v14, %v4344_v32 }
 0xf69   :  { %5394 = vst [vmem:[#allocation81_spill] sm:$0xff] %v4339_v16  ;;  %v4349_v46 = vmul.f32 %v4329_v40, %v4339_v16 }
 0xf6a   :  { %v1982_v51 = vmul.f32 0.4, %v1981_v50 }
 0xf6b   :  { %5395 = vst [vmem:[#allocation82_spill] sm:$0xff] %v4349_v46  ;;  %v4353_v41 = vadd.f32 %v4349_v46, %v4300_v37  ;;  %v1946_v23 = vmul.f32 %v4349_v46, %v3339_v7 }
 0xf6c   :  { %v2052_v12 = vsel %vm56_vm1, %v1982_v51, 0.0  ;;  %v1983_v35 = vmul.f32 %v1982_v51, %v3288_v5 }
 0xf6d   :  { %v1947_v33 = vadd.f32 %v1946_v23, %v4307_v11  ;;  %v2026_v52 = vmax.f32 %v4353_v41, 1e-09  ;;  %v2053_v31 = vsel %vm116_vm0, %v2052_v12, 0.0  ;;  %v2033_v23 = vstv %s2716_s12  ;;  %s2733_s12 = sld [smem:[#allocation6 + $0x8b]] }
 0xf6e   :  { %2054 = vadd.xlane.f32.xlu0 %v2053_v31  ;;  %v1984_v54 = vadd.f32 %v4344_v32, %v1983_v35  ;;  %v2029_v12 = vadd.f32 %v1982_v51, %v3302_v15  ;;  %v2034_v35 = vmul.f32 %v2033_v23, %v1982_v51 }
 0xf6f   :  { %2937 = vrcp.f32 %v2026_v52  ;;  %v4365_v37 = vmin.f32 %v1947_v33, %v3297_v13  ;;  %v2035_v33 = vstv %s2712_s13  ;;  %s2734_s13 = sld [smem:[#allocation6 + $0x8c]] }
 0xf70   :  { %v1985_v53 = vmax.f32 %v1984_v54, 1e-09  ;;  %v2036_v9 = vadd.f32 %v2035_v33, %v2034_v35 }
 0xf71   :  { %v2024_v14 = vsub.f32 %v3297_v13, %v4365_v37 }
 0xf72   :  { %2939 = vrcp.f32 %v1985_v53 }
 0xf73   :  { %v2025_v50 = vmax.f32 %v2024_v14, 0.0 }
 0xf79   :  { %v2938_v11 = vpop.eup %2937 }
 0xf7a   :  { %v2028_v46 = vmul.f32 %v2938_v11, %v2025_v50 }
 0xf7c   :  { %v2940_v31 = vpop.eup %2939  ;;  %v2030_v16 = vmul.f32 %v2029_v12, %v2028_v46 }
 0xf7d   :  { %v1987_v52 = vmul.f32 %v2940_v31, %v4335_v3  ;;  %v2064_v31 = vstv %s2713_s3 }
 0xf7e   :  { %v2031_v47 = vadd.f32 1.0, %v2030_v16 }
 0xf7f   :  { %v1988_v54 = vmax.f32 %v1987_v52, 1e-09 }
 0xf80   :  { %v2032_v53 = vmul.f32 %v2031_v47, %v3308_v27 }
 0xf81   :  { %2941 = vlog2.f32 %v1988_v54 }
 0xf82   :  { %v2037_v40 = vmin.f32 %v2036_v9, %v2032_v53 }
 0xf84   :  { %v2038_v18 = vmax.f32 %v2037_v40, 0.0 }
 0xf86   :  { %v2039_v14 = vsel %vm56_vm1, %v2038_v18, 0.0 }
 0xf87   :  { %v2050_v50 = vsub.f32 %v2035_v33, %v2039_v14  ;;  %v2040_v9 = vsel %vm116_vm0, %v2039_v14, 0.0  ;;  %v2060_v33 = vstv %s2714_s14 }
 0xf89   :  { %v2051_v12 = vmax.f32 %v2050_v50, 0.0 }
 0xf8b   :  { %v2942_v11 = vpop.eup %2941 }
 0xf8c   :  { %v1990_v61 = vmul.f32 0.6931472, %v2942_v11 }
 0xf8e   :  { %v1991_v59 = vmul.f32 0.6666667, %v1990_v61 }
 0xf90   :  { %v1992_v46 = vmul.f32 1.442695, %v1991_v59 }
 0xf92   :  { %2943 = vpow2.f32 %v1992_v46  ;;  %v4388_v46 = vstv %s2715_s15  ;;  %s2735_s15 = sld [smem:[#allocation6 + $0x8d]] }
 0xf93   :  { %5397 = vst [vmem:[#allocation84_spill] sm:$0xff] %v4388_v46 }
 0xf9c   :  { %v2944_v51 = vpop.eup %2943 }
 0xf9d   :  { %v1994_v23 = vmul.f32 %v2944_v51, %v4335_v3 }
 0xf9f   :  { %v1995_v16 = vmul.f32 %v1994_v23, %v3314_v42 }
 0xfa1   :  { %v4378_v47 = vsel %vm56_vm1, %v1995_v16, 0.0 }
 0xfa2   :  { %5396 = vst [vmem:[#allocation83_spill] sm:$0xff] %v4378_v47  ;;  %2062 = vrot.lane.b32.xlu1 %v4378_v47, %s3193_s19 }
 0xfc6   :  { %2041 = vadd.xlane.f32.xlu1 %v2040_v9 }
 0xffb   :  { %v2055_v18 = vpop.xlane.xlu0 %2054 }
 0xffc   :  { %v2056_v40 = vmul.f32 0.0625, %v2055_v18 }
 0xffe   :  { %v2057_v59 = vmul.f32 2.5, %v2056_v40 }
0x1000   :  { %v2058_v61 = vadd.f32 %v4344_v32, %v2057_v59 }
0x1002   :  { %v2059_v35 = vmul.f32 %v2058_v61, %v2051_v12 }
0x1004   :  { %v2061_v14 = vadd.f32 %v2060_v33, %v2059_v35 }
0x1014   :  { %v2063_v52 = vpop.permute.xlu1 %2062 }
0x1015   :  { %v2065_v54 = vsel %vm57_vm2, %v2064_v31, %v2063_v52 }
0x1016   :  { %v2066_v53 = vsub.f32 %v2065_v54, %v4378_v47 }
0x1018   :  { %v2067_v11 = vmul.f32 %v4110_v34, %v2066_v53 }
0x101a   :  { %v2068_v51 = vadd.f32 %v2067_v11, %v2061_v14 }
0x101c   :  { %v2069_v23 = vmul.f32 %v2068_v51, %v4388_v46 }
0x101e   :  { %v2070_v16 = vadd.f32 %v2069_v23, %v4335_v3 }
0x1020   :  { %v2071_v50 = vmax.f32 %v2070_v16, 0.0 }
0x1022   :  { %v4394_v9 = vsel %vm56_vm1, %v2071_v50, 0.0 }
0x1023   :  { %5398 = vst [vmem:[#allocation85_spill] sm:$0xff] %v4394_v9  ;;  %v2073_v18 = vmul.f32 5.0, %v4394_v9 }
0x1025   :  { %v2074_v40 = vadd.f32 %v2073_v18, %v3343_v8 }
0x1027   :  { %2945 = vrsqrt.f32 %v2074_v40  ;;  %vm2077_vm15 = vcmp.eq.f32.partialorder %v2074_v40, inf  ;;  %v2080_v12 = vand.u32 2147483648, %v2074_v40  ;;  %vm2079_vm3 = vcmp.eq.f32.partialorder %v2074_v40, 0.0 }
0x1031   :  { %v2946_v59 = vpop.eup %2945 }
0x1032   :  { %v2076_v61 = vmul.f32 %v2946_v59, %v2074_v40 }
0x1034   :  { %v2078_v31 = vsel %vm2077_vm15, %v2074_v40, %v2076_v61  ;;  %vm792_vm15 = vcmp.gt.f32.partialorder %v3678_v4, 1e-09 }
0x1035   :  { %v2081_v35 = vsel %vm2079_vm3, %v2080_v12, %v2078_v31  ;;  %vm893_vm3 = vcmp.gt.f32.partialorder %v3731_v24, 1e-09 }
0x1036   :  { %v2082_v52 = vsub.f32 %v2081_v35, %v4344_v32 }
0x1038   :  { %v2083_v33 = vmul.f32 0.4, %v2082_v52 }
0x103a   :  { %v2153_v54 = vsel %vm56_vm1, %v2083_v33, 0.0  ;;  %v2084_v53 = vmul.f32 %v2083_v33, %v3288_v5 }
0x103b   :  { %v2154_v14 = vsel %vm116_vm0, %v2153_v54, 0.0 }
0x103c   :  { %2155 = vadd.xlane.f32.xlu0 %v2154_v14  ;;  %v2085_v11 = vadd.f32 %v4344_v32, %v2084_v53 }
0x103e   :  { %v2086_v51 = vmax.f32 %v2085_v11, 1e-09 }
0x1040   :  { %2947 = vrcp.f32 %v2086_v51 }
0x104a   :  { %v2948_v23 = vpop.eup %2947 }
0x104b   :  { %v2088_v16 = vmul.f32 %v2948_v23, %v4394_v9 }
0x104d   :  { %v2089_v50 = vmax.f32 %v2088_v16, 1e-09  ;;  %v2134_v16 = vstv %s2721_s16 }
0x104f   :  { %2949 = vlog2.f32 %v2089_v50 }
0x1053   :  { %v2042_v18 = vpop.xlane.xlu1 %2041 }
0x1054   :  { %v4405_v40 = vmul.f32 0.0625, %v2042_v18 }
0x1056   :  { %5399 = vst [vmem:[#allocation86_spill] sm:$0xff] %v4405_v40  ;;  %v4409_v59 = vmul.f32 %v4388_v46, %v4405_v40 }
0x1058   :  { %5400 = vst [vmem:[#allocation87_spill] sm:$0xff] %v4409_v59  ;;  %v4413_v61 = vadd.f32 %v4409_v59, %v4353_v41  ;;  %v2047_v12 = vmul.f32 %v4409_v59, %v3339_v7 }
0x1059   :  { %v2950_v31 = vpop.eup %2949 }
0x105a   :  { %v2048_v35 = vadd.f32 %v2047_v12, %v4365_v37  ;;  %v2127_v52 = vmax.f32 %v4413_v61, 1e-09  ;;  %v2091_v54 = vmul.f32 0.6931472, %v2950_v31  ;;  %v2130_v37 = vadd.f32 %v2083_v33, %v3302_v15 }
0x105b   :  { %v2135_v12 = vmul.f32 %v2134_v16, %v2083_v33 }
0x105c   :  { %2951 = vrcp.f32 %v2127_v52  ;;  %v2092_v53 = vmul.f32 0.6666667, %v2091_v54  ;;  %v4420_v14 = vmin.f32 %v2048_v35, %v3297_v13  ;;  %v2136_v52 = vstv %s2717_s17 }
0x105d   :  { %v2137_v59 = vadd.f32 %v2136_v52, %v2135_v12 }
0x105e   :  { %v2093_v11 = vmul.f32 1.442695, %v2092_v53  ;;  %v2125_v41 = vsub.f32 %v3297_v13, %v4420_v14 }
0x1060   :  { %2953 = vpow2.f32 %v2093_v11  ;;  %v2126_v51 = vmax.f32 %v2125_v41, 0.0 }
0x1066   :  { %v2952_v23 = vpop.eup %2951 }
0x1067   :  { %v2129_v50 = vmul.f32 %v2952_v23, %v2126_v51 }
0x1069   :  { %v2131_v18 = vmul.f32 %v2130_v37, %v2129_v50 }
0x106a   :  { %v2954_v31 = vpop.eup %2953 }
0x106b   :  { %v2095_v35 = vmul.f32 %v2954_v31, %v4394_v9  ;;  %v2132_v54 = vadd.f32 1.0, %v2131_v18  ;;  %v2165_v31 = vstv %s2718_s18 }
0x106d   :  { %v2096_v53 = vmul.f32 %v2095_v35, %v3314_v42  ;;  %v2133_v11 = vmul.f32 %v2132_v54, %v3308_v27 }
0x106f   :  { %v4430_v41 = vsel %vm56_vm1, %v2096_v53, 0.0  ;;  %v2138_v40 = vmin.f32 %v2137_v59, %v2133_v11 }
0x1070   :  { %5401 = vst [vmem:[#allocation88_spill] sm:$0xff] %v4430_v41  ;;  %2163 = vrot.lane.b32.xlu0 %v4430_v41, %s3193_s19 }
0x1071   :  { %v2139_v51 = vmax.f32 %v2138_v40, 0.0  ;;  %v2161_v40 = vstv %s2719_s2 }
0x1073   :  { %v2140_v33 = vsel %vm56_vm1, %v2139_v51, 0.0 }
0x1074   :  { %v2141_v23 = vsel %vm116_vm0, %v2140_v33, 0.0  ;;  %v2151_v16 = vsub.f32 %v2136_v52, %v2140_v33  ;;  %v4442_v33 = vstv %s2720_s20 }
0x1075   :  { %2142 = vadd.xlane.f32.xlu1 %v2141_v23  ;;  %5402 = vst [vmem:[#allocation89_spill] sm:$0xff] %v4442_v33 }
0x1076   :  { %v2152_v59 = vmax.f32 %v2151_v16, 0.0 }
0x10c9   :  { %v2156_v50 = vpop.xlane.xlu0 %2155 }
0x10ca   :  { %v2157_v37 = vmul.f32 0.0625, %v2156_v50 }
0x10cc   :  { %v2158_v18 = vmul.f32 2.5, %v2157_v37 }
0x10ce   :  { %v2159_v12 = vadd.f32 %v4344_v32, %v2158_v18 }
0x10d0   :  { %v2160_v35 = vmul.f32 %v2159_v12, %v2152_v59 }
0x10d2   :  { %v2162_v52 = vadd.f32 %v2161_v40, %v2160_v35 }
0x10e2   :  { %v2164_v54 = vpop.permute.xlu0 %2163 }
0x10e3   :  { %v2166_v53 = vsel %vm57_vm2, %v2165_v31, %v2164_v54 }
0x10e4   :  { %v2167_v11 = vsub.f32 %v2166_v53, %v4430_v41 }
0x10e6   :  { %v2168_v51 = vmul.f32 %v4110_v34, %v2167_v11 }
0x10e8   :  { %v2169_v23 = vadd.f32 %v2168_v51, %v2162_v52 }
0x10ea   :  { %v2170_v50 = vmul.f32 %v2169_v23, %v4442_v33 }
0x10ec   :  { %v2171_v37 = vadd.f32 %v2170_v50, %v4394_v9 }
0x10ee   :  { %v2172_v16 = vmax.f32 %v2171_v37, 0.0 }
0x10f0   :  { %v4448_v18 = vsel %vm56_vm1, %v2172_v16, 0.0 }
0x10f1   :  { %v2174_v12 = vmul.f32 5.0, %v4448_v18 }
0x10f3   :  { %v2175_v59 = vadd.f32 %v2174_v12, %v3343_v8 }
0x10f5   :  { %2955 = vrsqrt.f32 %v2175_v59  ;;  %vm2178_vm4 = vcmp.eq.f32.partialorder %v2175_v59, inf  ;;  %v2181_v34 = vand.u32 2147483648, %v2175_v59  ;;  %vm2180_vm5 = vcmp.eq.f32.partialorder %v2175_v59, 0.0 }
0x10ff   :  { %v2956_v31 = vpop.eup %2955 }
0x1100   :  { %v2177_v35 = vmul.f32 %v2956_v31, %v2175_v59 }
0x1102   :  { %v2143_v54 = vpop.xlane.xlu1 %2142  ;;  %v2179_v40 = vsel %vm2178_vm4, %v2175_v59, %v2177_v35  ;;  %vm1095_vm4 = vcmp.gt.f32.partialorder %v3839_v63, 1e-09 }
0x1103   :  { %v4452_v53 = vmul.f32 0.0625, %v2143_v54  ;;  %v2182_v11 = vsel %vm2180_vm5, %v2181_v34, %v2179_v40  ;;  %vm1297_vm5 = vcmp.gt.f32.partialorder %v3947_v38, 1e-09 }
0x1104   :  { %v2183_v52 = vsub.f32 %v2182_v11, %v4344_v32 }
0x1105   :  { %5403 = vst [vmem:[#allocation90_spill] sm:$0xff] %v4452_v53  ;;  %v4457_v51 = vmul.f32 %v4442_v33, %v4452_v53 }
0x1106   :  { %v2184_v23 = vmul.f32 0.4, %v2183_v52  ;;  %v2235_v52 = vstv %s2726_s21 }
0x1107   :  { %5404 = vst [vmem:[#allocation91_spill] sm:$0xff] %v4457_v51  ;;  %v4461_v50 = vadd.f32 %v4457_v51, %v4413_v61  ;;  %v2148_v37 = vmul.f32 %v4457_v51, %v3339_v7 }
0x1108   :  { %v2254_v16 = vsel %vm56_vm1, %v2184_v23, 0.0  ;;  %v2185_v12 = vmul.f32 %v2184_v23, %v3288_v5 }
0x1109   :  { %v2149_v59 = vadd.f32 %v2148_v37, %v4420_v14  ;;  %v2228_v31 = vmax.f32 %v4461_v50, 1e-09  ;;  %v2255_v35 = vsel %vm116_vm0, %v2254_v16, 0.0  ;;  %v2231_v16 = vadd.f32 %v2184_v23, %v3302_v15 }
0x110a   :  { %2256 = vadd.xlane.f32.xlu0 %v2255_v35  ;;  %v2186_v34 = vadd.f32 %v4344_v32, %v2185_v12  ;;  %v2236_v12 = vmul.f32 %v2235_v52, %v2184_v23 }
0x110b   :  { %2957 = vrcp.f32 %v2228_v31  ;;  %v4473_v61 = vmin.f32 %v2149_v59, %v3297_v13  ;;  %v2237_v59 = vstv %s2722_s22 }
0x110c   :  { %v2187_v54 = vmax.f32 %v2186_v34, 1e-09  ;;  %v2238_v46 = vadd.f32 %v2237_v59, %v2236_v12 }
0x110d   :  { %v2226_v40 = vsub.f32 %v3297_v13, %v4473_v61 }
0x110e   :  { %2959 = vrcp.f32 %v2187_v54 }
0x110f   :  { %v2227_v11 = vmax.f32 %v2226_v40, 0.0 }
0x1115   :  { %v2958_v14 = vpop.eup %2957 }
0x1116   :  { %v2230_v37 = vmul.f32 %v2958_v14, %v2227_v11 }
0x1118   :  { %v2960_v35 = vpop.eup %2959  ;;  %v2232_v51 = vmul.f32 %v2231_v16, %v2230_v37 }
0x1119   :  { %v2189_v31 = vmul.f32 %v2960_v35, %v4448_v18  ;;  %v2266_v35 = vstv %s2723_s23 }
0x111a   :  { %v2233_v53 = vadd.f32 1.0, %v2232_v51 }
0x111b   :  { %v2190_v34 = vmax.f32 %v2189_v31, 1e-09 }
0x111c   :  { %v2234_v54 = vmul.f32 %v2233_v53, %v3308_v27 }
0x111d   :  { %2961 = vlog2.f32 %v2190_v34 }
0x111e   :  { %v2239_v41 = vmin.f32 %v2238_v46, %v2234_v54 }
0x1120   :  { %v2240_v9 = vmax.f32 %v2239_v41, 0.0 }
0x1122   :  { %v2241_v40 = vsel %vm56_vm1, %v2240_v9, 0.0 }
0x1123   :  { %v2252_v11 = vsub.f32 %v2237_v59, %v2241_v40  ;;  %v2242_v46 = vsel %vm116_vm0, %v2241_v40, 0.0  ;;  %v2262_v59 = vstv %s2724_s24 }
0x1125   :  { %v2253_v16 = vmax.f32 %v2252_v11, 0.0 }
0x1127   :  { %v2962_v14 = vpop.eup %2961 }
0x1128   :  { %v2192_v33 = vmul.f32 0.6931472, %v2962_v14  ;;  %v4498_v14 = vld [vmem:[%s5233_s5] sm:$0x1] }
0x112a   :  { %v2193_v47 = vmul.f32 0.6666667, %v2192_v33 }
0x112c   :  { %v2194_v37 = vmul.f32 1.442695, %v2193_v47 }
0x112e   :  { %2963 = vpow2.f32 %v2194_v37 }
0x1138   :  { %v2964_v23 = vpop.eup %2963 }
0x1139   :  { %v2196_v52 = vmul.f32 %v2964_v23, %v4448_v18  ;;  %v4501_v23 = vstv %s2725_s25 }
0x113a   :  { %5405 = vst [vmem:[#allocation92_spill] sm:$0xff] %v4501_v23 }
0x113b   :  { %v2197_v51 = vmul.f32 %v2196_v52, %v3314_v42 }
0x113d   :  { %v4486_v53 = vsel %vm56_vm1, %v2197_v51, 0.0 }
0x113e   :  { %2264 = vrot.lane.b32.xlu1 %v4486_v53, %s3193_s19 }
0x1162   :  { %2243 = vadd.xlane.f32.xlu1 %v2242_v46 }
0x1197   :  { %v2257_v9 = vpop.xlane.xlu0 %2256 }
0x1198   :  { %v2258_v41 = vmul.f32 0.0625, %v2257_v9 }
0x119a   :  { %v2259_v47 = vmul.f32 2.5, %v2258_v41 }
0x119c   :  { %v2260_v33 = vadd.f32 %v4344_v32, %v2259_v47 }
0x119e   :  { %v2261_v12 = vmul.f32 %v2260_v33, %v2253_v16 }
0x11a0   :  { %v2263_v40 = vadd.f32 %v2262_v59, %v2261_v12 }
0x11b0   :  { %v2265_v31 = vpop.permute.xlu1 %2264 }
0x11b1   :  { %v2267_v34 = vsel %vm57_vm2, %v2266_v35, %v2265_v31 }
0x11b2   :  { %v2268_v54 = vsub.f32 %v2267_v34, %v4486_v53 }
0x11b4   :  { %v2269_v37 = vmul.f32 %v4498_v14, %v2268_v54 }
0x11b6   :  { %v2270_v11 = vadd.f32 %v2269_v37, %v2263_v40 }
0x11b8   :  { %v2271_v52 = vmul.f32 %v2270_v11, %v4501_v23 }
0x11ba   :  { %v2272_v51 = vadd.f32 %v2271_v52, %v4448_v18 }
0x11bc   :  { %v2273_v46 = vmax.f32 %v2272_v51, 0.0 }
0x11be   :  { %v4507_v9 = vsel %vm56_vm1, %v2273_v46, 0.0 }
0x11bf   :  { %v2275_v41 = vmul.f32 5.0, %v4507_v9 }
0x11c1   :  { %v2276_v47 = vadd.f32 %v2275_v41, %v3343_v8 }
0x11c3   :  { %2965 = vrsqrt.f32 %v2276_v47  ;;  %vm2279_vm6 = vcmp.eq.f32.partialorder %v2276_v47, inf  ;;  %v2282_v35 = vand.u32 2147483648, %v2276_v47  ;;  %vm2281_vm7 = vcmp.eq.f32.partialorder %v2276_v47, 0.0 }
0x11cd   :  { %v2966_v33 = vpop.eup %2965 }
0x11ce   :  { %v2278_v16 = vmul.f32 %v2966_v33, %v2276_v47 }
0x11d0   :  { %v2280_v12 = vsel %vm2279_vm6, %v2276_v47, %v2278_v16  ;;  %vm1499_vm6 = vcmp.gt.f32.partialorder %v4060_v49, 1e-09 }
0x11d1   :  { %v2283_v31 = vsel %vm2281_vm7, %v2282_v35, %v2280_v12  ;;  %vm1701_vm7 = vcmp.gt.f32.partialorder %v4173_v60, 1e-09 }
0x11d2   :  { %v2284_v59 = vsub.f32 %v2283_v31, %v4344_v32 }
0x11d4   :  { %v2285_v34 = vmul.f32 0.4, %v2284_v59 }
0x11d6   :  { %v2355_v54 = vsel %vm56_vm1, %v2285_v34, 0.0  ;;  %v2286_v40 = vmul.f32 %v2285_v34, %v3288_v5 }
0x11d7   :  { %v2356_v37 = vsel %vm116_vm0, %v2355_v54, 0.0 }
0x11d8   :  { %2357 = vadd.xlane.f32.xlu0 %v2356_v37  ;;  %v2287_v11 = vadd.f32 %v4344_v32, %v2286_v40 }
0x11da   :  { %v2288_v52 = vmax.f32 %v2287_v11, 1e-09 }
0x11dc   :  { %2967 = vrcp.f32 %v2288_v52 }
0x11e6   :  { %v2968_v51 = vpop.eup %2967 }
0x11e7   :  { %v2290_v46 = vmul.f32 %v2968_v51, %v4507_v9 }
0x11e9   :  { %v2291_v41 = vmax.f32 %v2290_v46, 1e-09 }
0x11eb   :  { %2969 = vlog2.f32 %v2291_v41  ;;  %v2336_v41 = vstv %s2731_s27 }
0x11ef   :  { %v2244_v47 = vpop.xlane.xlu1 %2243 }
0x11f0   :  { %v4518_v33 = vmul.f32 0.0625, %v2244_v47 }
0x11f2   :  { %5406 = vst [vmem:[#allocation93_spill] sm:$0xff] %v4518_v33  ;;  %v4522_v16 = vmul.f32 %v4501_v23, %v4518_v33 }
0x11f4   :  { %5407 = vst [vmem:[#allocation94_spill] sm:$0xff] %v4522_v16  ;;  %v4526_v35 = vadd.f32 %v4522_v16, %v4461_v50  ;;  %v2249_v12 = vmul.f32 %v4522_v16, %v3339_v7 }
0x11f5   :  { %v2970_v31 = vpop.eup %2969 }
0x11f6   :  { %v2250_v59 = vadd.f32 %v2249_v12, %v4473_v61  ;;  %v2329_v54 = vmax.f32 %v4526_v35, 1e-09  ;;  %v2293_v40 = vmul.f32 0.6931472, %v2970_v31  ;;  %v2332_v61 = vadd.f32 %v2285_v34, %v3302_v15 }
0x11f7   :  { %v2337_v31 = vmul.f32 %v2336_v41, %v2285_v34 }
0x11f8   :  { %2971 = vrcp.f32 %v2329_v54  ;;  %v2294_v37 = vmul.f32 0.6666667, %v2293_v40  ;;  %v4533_v11 = vmin.f32 %v2250_v59, %v3297_v13  ;;  %v2338_v40 = vstv %s2727_s0 }
0x11f9   :  { %v2339_v33 = vadd.f32 %v2338_v40, %v2337_v31  ;;  %v2367_v31 = vstv %s2728_s28 }
0x11fa   :  { %v2295_v52 = vmul.f32 1.442695, %v2294_v37  ;;  %v2327_v50 = vsub.f32 %v3297_v13, %v4533_v11 }
0x11fc   :  { %2973 = vpow2.f32 %v2295_v52  ;;  %v2328_v51 = vmax.f32 %v2327_v50, 0.0 }
0x1202   :  { %v2972_v46 = vpop.eup %2971 }
0x1203   :  { %v2331_v47 = vmul.f32 %v2972_v46, %v2328_v51 }
0x1205   :  { %v2333_v12 = vmul.f32 %v2332_v61, %v2331_v47 }
0x1206   :  { %v2974_v54 = vpop.eup %2973 }
0x1207   :  { %v2297_v59 = vmul.f32 %v2974_v54, %v4507_v9  ;;  %v2334_v16 = vadd.f32 1.0, %v2333_v12 }
0x1209   :  { %v2298_v37 = vmul.f32 %v2297_v59, %v3314_v42  ;;  %v2335_v52 = vmul.f32 %v2334_v16, %v3308_v27 }
0x120b   :  { %v4543_v50 = vsel %vm56_vm1, %v2298_v37, 0.0  ;;  %v2340_v23 = vmin.f32 %v2339_v33, %v2335_v52 }
0x120c   :  { %2365 = vrot.lane.b32.xlu0 %v4543_v50, %s3193_s19 }
0x120d   :  { %v2341_v51 = vmax.f32 %v2340_v23, 0.0  ;;  %v2363_v23 = vstv %s2729_s29 }
0x120f   :  { %v2342_v34 = vsel %vm56_vm1, %v2341_v51, 0.0 }
0x1210   :  { %v2343_v46 = vsel %vm116_vm0, %v2342_v34, 0.0  ;;  %v2353_v41 = vsub.f32 %v2338_v40, %v2342_v34  ;;  %v4555_v34 = vstv %s2730_s30 }
0x1211   :  { %2344 = vadd.xlane.f32.xlu1 %v2343_v46 }
0x1212   :  { %v2354_v33 = vmax.f32 %v2353_v41, 0.0 }
0x1265   :  { %v2358_v47 = vpop.xlane.xlu0 %2357 }
0x1266   :  { %v2359_v61 = vmul.f32 0.0625, %v2358_v47 }
0x1268   :  { %v2360_v16 = vmul.f32 2.5, %v2359_v61  ;;  %v284_v61 = vmax.f32 %v3397_v30, 1e-09 }
0x126a   :  { %v2361_v12 = vadd.f32 %v4344_v32, %v2360_v16  ;;  %2975 = vrcp.f32 %v284_v61 }
0x126c   :  { %v2362_v54 = vmul.f32 %v2361_v12, %v2354_v33  ;;  %v385_v12 = vmax.f32 %v3451_v57, 1e-09 }
0x126e   :  { %v2364_v40 = vadd.f32 %v2363_v23, %v2362_v54  ;;  %2977 = vrcp.f32 %v385_v12  ;;  %v587_v23 = vmax.f32 %v3565_v44, 1e-09 }
0x127e   :  { %v2366_v59 = vpop.permute.xlu0 %2365 }
0x127f   :  { %v2368_v37 = vsel %vm57_vm2, %v2367_v31, %v2366_v59  ;;  %v486_v59 = vmax.f32 %v3511_v43, 1e-09 }
0x1280   :  { %v2369_v52 = vsub.f32 %v2368_v37, %v4543_v50  ;;  %v2976_v37 = vpop.eup %2975 }
0x1282   :  { %v2370_v51 = vmul.f32 %v4498_v14, %v2369_v52  ;;  %v286_v52 = vmul.f32 %v2976_v37, %v3433_v28 }
0x1284   :  { %v2371_v46 = vadd.f32 %v2370_v51, %v2364_v40  ;;  %v688_v40 = vmax.f32 %v3619_v6, 1e-09  ;;  %v2978_v51 = vpop.eup %2977 }
0x1285   :  { %v387_v61 = vmul.f32 %v2978_v51, %v3490_v20 }
0x1286   :  { %v2372_v47 = vmul.f32 %v2371_v46, %v4555_v34  ;;  %v288_v46 = vmul.f32 %v286_v52, %v3391_v25  ;;  %v890_v52 = vmax.f32 %v3731_v24, 1e-09  ;;  %v5408_v24 = vld [vmem:[#allocation70_spill] sm:$0xff] }
0x1287   :  { %v389_v25 = vmul.f32 %v387_v61, %v3445_v48 }
0x1288   :  { %v2373_v41 = vadd.f32 %v2372_v47, %v4507_v9  ;;  %v289_v37 = vmul.f32 %v4498_v14, %v288_v46 }
0x1289   :  { %v390_v46 = vmul.f32 %v4498_v14, %v389_v25 }
0x128a   :  { %v2374_v16 = vmax.f32 %v2373_v41, 0.0  ;;  %v789_v41 = vmax.f32 %v3678_v4, 1e-09 }
0x128c   :  { %v4563_v33 = vsel %vm56_vm1, %v2374_v16, 0.0 }
0x128d   :  { %v2376_v31 = vmul.f32 5.0, %v4563_v33 }
0x128f   :  { %v2377_v54 = vadd.f32 %v2376_v31, %v3343_v8 }
0x1291   :  { %2979 = vrsqrt.f32 %v2377_v54  ;;  %vm2380_vm8 = vcmp.eq.f32.partialorder %v2377_v54, inf  ;;  %v2383_v12 = vand.u32 2147483648, %v2377_v54  ;;  %vm2382_vm9 = vcmp.eq.f32.partialorder %v2377_v54, 0.0 }
0x1292   :  { %2981 = vrcp.f32 %v486_v59 }
0x1293   :  { %2983 = vrcp.f32 %v587_v23 }
0x1294   :  { %2985 = vrcp.f32 %v688_v40 }
0x1295   :  { %2987 = vrcp.f32 %v789_v41  ;;  %v1092_v41 = vmax.f32 %v3839_v63, 1e-09 }
0x1296   :  { %2989 = vrcp.f32 %v890_v52 }
0x1297   :  { %2991 = vrcp.f32 %v1092_v41 }
0x129b   :  { %v2980_v47 = vpop.eup %2979 }
0x129c   :  { %v2379_v16 = vmul.f32 %v2980_v47, %v2377_v54  ;;  %v2982_v31 = vpop.eup %2981 }
0x129d   :  { %v488_v23 = vmul.f32 %v2982_v31, %v3544_v2  ;;  %v2984_v20 = vpop.eup %2983  ;;  %v391_v31 = vsel %vm388_vm11, %v390_v46, 0.0  ;;  %vm58_vm11 = vcmp.eq.s32.totalorder %v3271_v1, 15 }
0x129e   :  { %v2381_v59 = vsel %vm2380_vm8, %v2377_v54, %v2379_v16  ;;  %v589_v47 = vmul.f32 %v2984_v20, %v3598_v22  ;;  %v290_v54 = vsel %vm287_vm10, %v289_v37, 0.0  ;;  %v2986_v30 = vpop.eup %2985  ;;  %v392_v57 = vsel %vm56_vm1, %v391_v31, 0.0 }
0x129f   :  { %v2384_v8 = vsel %vm2382_vm9, %v2383_v12, %v2381_v59  ;;  %v490_v16 = vmul.f32 %v488_v23, %v3499_v36  ;;  %v291_v12 = vsel %vm56_vm1, %v290_v54, 0.0  ;;  %v690_v36 = vmul.f32 %v2986_v30, %v3657_v0  ;;  %v2988_v52 = vpop.eup %2987 }
0x12a0   :  { %v2385_v51 = vsub.f32 %v2384_v8, %v4344_v32  ;;  %v591_v37 = vmul.f32 %v589_v47, %v3553_v62  ;;  %v1294_v23 = vmax.f32 %v3947_v38, 1e-09  ;;  %v1496_v47 = vmax.f32 %v4060_v49, 1e-09  ;;  %v2990_v41 = vpop.eup %2989  ;;  %v5412_v38 = vld [vmem:[#allocation83_spill] sm:$0xff] }
0x12a1   :  { %v491_v59 = vmul.f32 %v4498_v14, %v490_v16  ;;  %v692_v62 = vmul.f32 %v690_v36, %v3607_v58  ;;  %v393_v16 = vsel %vm116_vm0, %v392_v57, -inf  ;;  %v892_v43 = vmul.f32 %v2990_v41, %v3767_v45 }
0x12a2   :  { %v4579_v40 = vmul.f32 0.4, %v2385_v51  ;;  %v292_v51 = vsel %vm116_vm0, %v291_v12, -inf  ;;  %v592_v46 = vmul.f32 %v4498_v14, %v591_v37  ;;  %v1698_v58 = vmax.f32 %v4173_v60, 1e-09  ;;  %v2992_v12 = vpop.eup %2991  ;;  %v5415_v60 = vld [vmem:[#allocation89_spill] sm:$0xff] }
0x12a3   :  { %v492_v54 = vsel %vm489_vm12, %v491_v59, 0.0  ;;  %v693_v30 = vmul.f32 %v4498_v14, %v692_v62  ;;  %v894_v59 = vmul.f32 %v892_v43, %v3725_v55  ;;  %v2001_v62 = vmax.f32 %v4335_v3, 1e-09 }
0x12a4   :  { %v2456_v48 = vsel %vm56_vm1, %v4579_v40, 0.0  ;;  %v2387_v8 = vmul.f32 %v4579_v40, %v3288_v5  ;;  %v2203_v43 = vmax.f32 %v4448_v18, 1e-09  ;;  %vm1903_vm8 = vcmp.gt.f32.partialorder %v4281_v10, 1e-09 }
0x12a5   :  { %v2457_v61 = vsel %vm116_vm0, %v2456_v48, 0.0  ;;  %v493_v48 = vsel %vm56_vm1, %v492_v54, 0.0  ;;  %v694_v31 = vsel %vm691_vm14, %v693_v30, 0.0  ;;  %v895_v55 = vmul.f32 %v4498_v14, %v894_v59 }
0x12a6   :  { %2458 = vadd.xlane.f32.xlu0 %v2457_v61  ;;  %v2388_v20 = vadd.f32 %v4344_v32, %v2387_v8  ;;  %v791_v32 = vmul.f32 %v2988_v52, %v3710_v19  ;;  %v593_v61 = vsel %vm590_vm13, %v592_v46, 0.0  ;;  %v695_v6 = vsel %vm56_vm1, %v694_v31, 0.0 }
0x12a7   :  { %v594_v36 = vsel %vm56_vm1, %v593_v61, 0.0  ;;  %v696_v4 = vsel %vm116_vm0, %v695_v6, -inf  ;;  %vm2004_vm9 = vcmp.gt.f32.partialorder %v4335_v3, 1e-09  ;;  %vm2206_vm10 = vcmp.gt.f32.partialorder %v4448_v18, 1e-09 }
0x12a8   :  { %v2389_v25 = vmax.f32 %v2388_v20, 1e-09  ;;  %v793_v8 = vmul.f32 %v791_v32, %v3666_v39  ;;  %v494_v20 = vsel %vm116_vm0, %v493_v48, -inf  ;;  %v1094_v39 = vmul.f32 %v2992_v12, %v3875_v21 }
0x12a9   :  { %v896_v48 = vsel %vm893_vm3, %v895_v55, 0.0  ;;  %vm2408_vm3 = vcmp.gt.f32.partialorder %v4563_v33, 1e-09 }
0x12aa   :  { %2993 = vrcp.f32 %v2389_v25  ;;  %293 = vmax.xlane.f32.xlu0 %v292_v51  ;;  %v794_v44 = vmul.f32 %v4498_v14, %v793_v8  ;;  %v595_v25 = vsel %vm116_vm0, %v594_v36, -inf  ;;  %v1096_v54 = vmul.f32 %v1094_v39, %v3833_v56 }
0x12ab   :  { %2995 = vrcp.f32 %v1294_v23  ;;  %v1900_v23 = vmax.f32 %v4281_v10, 1e-09 }
0x12ac   :  { %2997 = vrcp.f32 %v1496_v47  ;;  %v795_v32 = vsel %vm792_vm15, %v794_v44, 0.0  ;;  %v1097_v8 = vmul.f32 %v4498_v14, %v1096_v54  ;;  %v5409_v44 = vld [vmem:[#allocation59_spill] sm:$0xff] }
0x12ad   :  { %2999 = vrcp.f32 %v1698_v58  ;;  %v897_v58 = vsel %vm56_vm1, %v896_v48, 0.0 }
0x12ae   :  { %394 = vmax.xlane.f32.xlu0 %v393_v16  ;;  %3001 = vrcp.f32 %v1900_v23  ;;  %v796_v16 = vsel %vm56_vm1, %v795_v32, 0.0  ;;  %v1098_v12 = vsel %vm1095_vm4, %v1097_v8, 0.0  ;;  %v5410_v23 = vld [vmem:[#allocation79_spill] sm:$0xff] }
0x12af   :  { %v797_v61 = vsel %vm116_vm0, %v796_v16, -inf  ;;  %v1099_v59 = vsel %vm56_vm1, %v1098_v12, 0.0  ;;  %v5413_v16 = vld [vmem:[#allocation76_spill] sm:$0xff] }
0x12b2   :  { %495 = vmax.xlane.f32.xlu0 %v494_v20 }
0x12b4   :  { %v2994_v37 = vpop.eup %2993 }
0x12b5   :  { %v2391_v52 = vmul.f32 %v2994_v37, %v4563_v33  ;;  %v2996_v51 = vpop.eup %2995 }
0x12b6   :  { %596 = vmax.xlane.f32.xlu0 %v595_v25  ;;  %v1296_v57 = vmul.f32 %v2996_v51, %v3983_v29  ;;  %v2998_v47 = vpop.eup %2997  ;;  %v5411_v51 = vld [vmem:[#allocation67_spill] sm:$0xff] }
0x12b7   :  { %v2392_v46 = vmax.f32 %v2391_v52, 1e-09  ;;  %v1498_v41 = vmul.f32 %v2998_v47, %v4096_v17  ;;  %v3000_v30 = vpop.eup %2999 }
0x12b8   :  { %v1298_v56 = vmul.f32 %v1296_v57, %v3941_v26  ;;  %v1700_v20 = vmul.f32 %v3000_v30, %v5408_v24  ;;  %v898_v26 = vsel %vm116_vm0, %v897_v58, -inf  ;;  %v3002_v31 = vpop.eup %3001  ;;  %v1100_v57 = vsel %vm116_vm0, %v1099_v59, -inf  ;;  %v5414_v58 = vld [vmem:[#allocation80_spill] sm:$0xff] }
0x12b9   :  { %3003 = vlog2.f32 %v2392_v46  ;;  %v1500_v39 = vmul.f32 %v1498_v41, %v5409_v44  ;;  %v1902_v63 = vmul.f32 %v3002_v31, %v5410_v23 }
0x12ba   :  { %697 = vmax.xlane.f32.xlu0 %v696_v4  ;;  %3005 = vrcp.f32 %v2001_v62  ;;  %v1299_v36 = vmul.f32 %v4498_v14, %v1298_v56  ;;  %v1702_v6 = vmul.f32 %v1700_v20, %v5411_v51 }
0x12bb   :  { %3007 = vrcp.f32 %v2203_v43  ;;  %v1501_v52 = vmul.f32 %v4498_v14, %v1500_v39  ;;  %v1904_v41 = vmul.f32 %v1902_v63, %v5413_v16  ;;  %v5417_v16 = vld [vmem:[#allocation41_spill] sm:$0xff] }
0x12bc   :  { %v1300_v25 = vsel %vm1297_vm5, %v1299_v36, 0.0  ;;  %v1703_v47 = vmul.f32 %v4498_v14, %v1702_v6  ;;  %vm994_vm13 = vcmp.gt.f32.partialorder %v5417_v16, 1e-09 }
0x12bd   :  { %v1301_v54 = vsel %vm56_vm1, %v1300_v25, 0.0  ;;  %v1502_v4 = vsel %vm1499_vm6, %v1501_v52, 0.0  ;;  %v1905_v30 = vmul.f32 %v4498_v14, %v1904_v41  ;;  %v991_v41 = vmax.f32 %v5417_v16, 1e-09 }
0x12be   :  { %798 = vmax.xlane.f32.xlu0 %v797_v61  ;;  %v1302_v8 = vsel %vm116_vm0, %v1301_v54, -inf  ;;  %v1503_v43 = vsel %vm56_vm1, %v1502_v4, 0.0  ;;  %v1704_v61 = vsel %vm1701_vm7, %v1703_v47, 0.0  ;;  %v280_v47 = vsel %vm58_vm11, %v3433_v28, 0.0 }
0x12bf   :  { %v1504_v12 = vsel %vm116_vm0, %v1503_v43, -inf  ;;  %v1705_v36 = vsel %vm56_vm1, %v1704_v61, 0.0  ;;  %v1906_v44 = vsel %vm1903_vm8, %v1905_v30, 0.0  ;;  %v5418_v43 = vld [vmem:[#allocation48_spill] sm:$0xff]  ;;  %v684_v30 = vsel %vm58_vm11, %v3657_v0, 0.0  ;;  %v5421_v0 = vld [vmem:[#allocation63_spill] sm:$0xff] }
0x12c0   :  { %v1706_v31 = vsel %vm116_vm0, %v1705_v36, -inf  ;;  %v1907_v59 = vsel %vm56_vm1, %v1906_v44, 0.0  ;;  %v685_v44 = vsel %vm116_vm0, %v684_v30, 0.0  ;;  %v2304_v16 = vmax.f32 %v4507_v9, 1e-09 }
0x12c1   :  { %v1908_v52 = vsel %vm116_vm0, %v1907_v59, -inf  ;;  %v2405_v59 = vmax.f32 %v4563_v33, 1e-09  ;;  %vm1196_vm14 = vcmp.gt.f32.partialorder %v5418_v43, 1e-09 }
0x12c2   :  { %899 = vmax.xlane.f32.xlu0 %v898_v26  ;;  %vm1600_vm4 = vcmp.gt.f32.partialorder %v5421_v0, 1e-09  ;;  %vm2307_vm7 = vcmp.gt.f32.partialorder %v4507_v9, 1e-09 }
0x12c3   :  { %v3004_v37 = vpop.eup %3003 }
0x12c4   :  { %v2394_v32 = vmul.f32 0.6931472, %v3004_v37  ;;  %v3006_v55 = vpop.eup %3005 }
0x12c5   :  { %v2003_v62 = vmul.f32 %v3006_v55, %v5412_v38  ;;  %v3008_v56 = vpop.eup %3007  ;;  %v2345_v55 = vpop.xlane.xlu1 %2344 }
0x12c6   :  { %1101 = vmax.xlane.f32.xlu0 %v1100_v57  ;;  %v2395_v46 = vmul.f32 0.6666667, %v2394_v32  ;;  %v2205_v49 = vmul.f32 %v3008_v56, %v4486_v53  ;;  %v4696_v18 = vmul.f32 0.0625, %v2345_v55  ;;  %v482_v56 = vsel %vm58_vm11, %v3544_v2, 0.0 }
0x12c7   :  { %v2005_v20 = vmul.f32 %v2003_v62, %v5414_v58  ;;  %v483_v61 = vsel %vm116_vm0, %v482_v56, 0.0  ;;  %v5419_v58 = vld [vmem:[#allocation55_spill] sm:$0xff] }
0x12c8   :  { %v2396_v48 = vmul.f32 1.442695, %v2395_v46  ;;  %v2207_v26 = vmul.f32 %v2205_v49, %v5415_v60  ;;  %v5416_v46 = vld [vmem:[#allocation23_spill] sm:$0xff]  ;;  %v1193_v49 = vmax.f32 %v5418_v43, 1e-09  ;;  %v886_v60 = vsel %vm58_vm11, %v3767_v45, 0.0 }
0x12c9   :  { %v2006_v39 = vmul.f32 %v4498_v14, %v2005_v20  ;;  %v181_v62 = vmax.f32 %v5416_v46, 1e-09  ;;  %v1395_v20 = vmax.f32 %v5419_v58, 1e-09  ;;  %vm184_vm12 = vcmp.gt.f32.partialorder %v5416_v46, 1e-09 }
0x12ca   :  { %1303 = vmax.xlane.f32.xlu0 %v1302_v8  ;;  %3009 = vpow2.f32 %v2396_v48  ;;  %v2208_v63 = vmul.f32 %v4498_v14, %v2207_v26  ;;  %v4706_v48 = vmul.f32 %v4555_v34, %v4696_v18  ;;  %v281_v8 = vsel %vm116_vm0, %v280_v47, 0.0  ;;  %v5426_v47 = vld [vmem:[#allocation51_spill] sm:$0xff]  ;;  %v5434_v43 = vld [vmem:[#allocation88_spill] sm:$0xff] }
0x12cb   :  { %v2007_v37 = vsel %vm2004_vm9, %v2006_v39, 0.0  ;;  %3011 = vrcp.f32 %v181_v62  ;;  %v1597_v26 = vmax.f32 %v5421_v0, 1e-09  ;;  %vm1398_vm15 = vcmp.gt.f32.partialorder %v5419_v58, 1e-09 }
0x12cc   :  { %v2008_v51 = vsel %vm56_vm1, %v2007_v37, 0.0  ;;  %v2209_v32 = vsel %vm2206_vm10, %v2208_v63, 0.0  ;;  %3013 = vrcp.f32 %v991_v41  ;;  %v4715_v28 = vadd.f32 %v4706_v48, %v4526_v35  ;;  %v5420_v35 = vld [vmem:[#allocation24_spill] sm:$0xff] }
0x12cd   :  { %v2009_v57 = vsel %vm116_vm0, %v2008_v51, -inf  ;;  %v2210_v54 = vsel %vm56_vm1, %v2209_v32, 0.0  ;;  %3015 = vrcp.f32 %v1193_v49  ;;  %v2350_v2 = vmul.f32 %v4706_v48, %v3339_v7  ;;  %v5423_v51 = vld [vmem:[#allocation19_spill] sm:$0xff] }
0x12ce   :  { %1505 = vmax.xlane.f32.xlu0 %v1504_v12  ;;  %v2211_v4 = vsel %vm116_vm0, %v2210_v54, -inf  ;;  %v2430_v36 = vmax.f32 %v4715_v28, 1e-09  ;;  %3017 = vrcp.f32 %v1395_v20  ;;  %v887_v63 = vsel %vm116_vm0, %v886_v60, 0.0 }
0x12cf   :  { %v1290_v54 = vsel %vm58_vm11, %v3983_v29, 0.0  ;;  %v1492_v29 = vsel %vm58_vm11, %v4096_v17, 0.0  ;;  %vm194_vm10 = vcmp.eq.s32.totalorder %v3271_v1, 1 }
0x12d0   :  { %3019 = vrcp.f32 %v2430_v36  ;;  %v1291_v49 = vsel %vm116_vm0, %v1290_v54, 0.0  ;;  %v5428_v36 = vld [vmem:[#allocation47_spill] sm:$0xff]  ;;  %v2433_v54 = vadd.f32 %v4579_v40, %v3302_v15 }
0x12d1   :  { %3021 = vrcp.f32 %v1597_v26 }
0x12d2   :  { %1707 = vmax.xlane.f32.xlu0 %v1706_v31  ;;  %v2351_v31 = vadd.f32 %v2350_v2, %v4533_v11  ;;  %3023 = vrcp.f32 %v2405_v59  ;;  %v1493_v59 = vsel %vm116_vm0, %v1492_v29, 0.0 }
0x12d4   :  { %v3010_v25 = vpop.eup %3009  ;;  %v4741_v11 = vmin.f32 %v2351_v31, %v3297_v13 }
0x12d5   :  { %v2398_v10 = vmul.f32 %v3010_v25, %v4563_v33  ;;  %v3012_v12 = vpop.eup %3011  ;;  %v5422_v25 = vld [vmem:[#allocation44_spill] sm:$0xff] }
0x12d6   :  { %1909 = vmax.xlane.f32.xlu0 %v1908_v52  ;;  %v183_v39 = vmul.f32 %v3012_v12, %v5420_v35  ;;  %v3014_v37 = vpop.eup %3013 }
0x12d7   :  { %v2399_v6 = vmul.f32 %v2398_v10, %v3314_v42  ;;  %v993_v52 = vmul.f32 %v3014_v37, %v5422_v25  ;;  %v1088_v10 = vsel %vm58_vm11, %v3875_v21, 0.0  ;;  %v3016_v55 = vpop.eup %3015  ;;  %v5425_v21 = vld [vmem:[#allocation40_spill] sm:$0xff]  ;;  %v1694_v37 = vsel %vm58_vm11, %v5408_v24, 0.0 }
0x12d8   :  { %v185_v45 = vmul.f32 %v183_v39, %v5423_v51  ;;  %v1195_v41 = vmul.f32 %v3016_v55, %v5426_v47  ;;  %v3018_v56 = vpop.eup %3017  ;;  %v5429_v39 = vld [vmem:[#allocation85_spill] sm:$0xff] }
0x12d9   :  { %v4688_v3 = vsel %vm56_vm1, %v2399_v6, 0.0  ;;  %v5424_v6 = vld [vmem:[#allocation72_spill] sm:$0xff]  ;;  %v2102_v60 = vmax.f32 %v5429_v39, 1e-09  ;;  %vm2105_vm6 = vcmp.gt.f32.partialorder %v5429_v39, 1e-09 }
0x12da   :  { %2466 = vrot.lane.b32.xlu1 %v4688_v3, %s3193_s19  ;;  %2010 = vmax.xlane.f32.xlu0 %v2009_v57  ;;  %v1799_v32 = vmax.f32 %v5424_v6, 1e-09  ;;  %v1089_v57 = vsel %vm116_vm0, %v1088_v10, 0.0  ;;  %v186_v62 = vmul.f32 %v4498_v14, %v185_v45  ;;  %v3020_v12 = vpop.eup %3019  ;;  %s4765_s19 = sld [smem:[#allocation6 + $0x8e]]  ;;  %v5431_v45 = vld [vmem:[#allocation66_spill] sm:$0xff] }
0x12db   :  { %v3022_v31 = vpop.eup %3021  ;;  %vm1802_vm5 = vcmp.gt.f32.partialorder %v5424_v6, 1e-09 }
0x12dc   :  { %3025 = vrcp.f32 %v1799_v32  ;;  %v187_v20 = vsel %vm184_vm12, %v186_v62, 0.0  ;;  %v3024_v17 = vpop.eup %3023  ;;  %v1599_v32 = vmul.f32 %v3022_v31, %v5431_v45  ;;  %v1695_v62 = vsel %vm116_vm0, %v1694_v37, 0.0 }
0x12dd   :  { %v188_v46 = vsel %vm56_vm1, %v187_v20, 0.0  ;;  %3027 = vrcp.f32 %v2102_v60  ;;  %v5433_v20 = vld [vmem:[#allocation62_spill] sm:$0xff]  ;;  %vm197_vm12 = vcmp.eq.s32.totalorder %v3271_v1, 2 }
0x12de   :  { %2212 = vmax.xlane.f32.xlu0 %v2211_v4  ;;  %v995_v4 = vmul.f32 %v993_v52, %v5425_v21  ;;  %v5430_v52 = vld [vmem:[#allocation54_spill] sm:$0xff]  ;;  %v189_v24 = vsel %vm116_vm0, %v188_v46, -inf  ;;  %3029 = vrcp.f32 %v2304_v16  ;;  %v5435_v46 = vld [vmem:[#allocation71_spill] sm:$0xff] }
0x12e0   :  { %v996_v2 = vmul.f32 %v4498_v14, %v995_v4 }
0x12e2   :  { %282 = vadd.xlane.f32.xlu0 %v281_v8  ;;  %v2428_v8 = vsub.f32 %v3297_v13, %v4741_v11 }
0x12e4   :  { %v2429_v26 = vmax.f32 %v2428_v8, 0.0 }
0x12e6   :  { %484 = vadd.xlane.f32.xlu0 %v483_v61  ;;  %v5427_v61 = vld [vmem:[#allocation58_spill] sm:$0xff]  ;;  %v2432_v51 = vmul.f32 %v3020_v12, %v2429_v26  ;;  %v3026_v4 = vpop.eup %3025 }
0x12e7   :  { %v1397_v30 = vmul.f32 %v3018_v56, %v5427_v61  ;;  %v5432_v56 = vld [vmem:[#allocation75_spill] sm:$0xff] }
0x12e8   :  { %v2434_v8 = vmul.f32 %v2433_v54, %v2432_v51  ;;  %v3028_v51 = vpop.eup %3027 }
0x12e9   :  { %v1399_v10 = vmul.f32 %v1397_v30, %v5430_v52 }
0x12ea   :  { %686 = vadd.xlane.f32.xlu0 %v685_v44  ;;  %v1197_v44 = vmul.f32 %v1195_v41, %v5428_v36  ;;  %v1896_v41 = vsel %vm58_vm11, %v5410_v23, 0.0  ;;  %v2437_v23 = vstv %s4765_s19  ;;  %v2435_v26 = vadd.f32 1.0, %v2434_v8 }
0x12eb   :  { %v1400_v15 = vmul.f32 %v4498_v14, %v1399_v10  ;;  %v1897_v12 = vsel %vm116_vm0, %v1896_v41, 0.0  ;;  %v2438_v58 = vmul.f32 %v2437_v23, %v4579_v40  ;;  %v2439_v10 = vstv %s4781_s11  ;;  %v5437_v23 = vld [vmem:[#allocation92_spill] sm:$0xff] }
0x12ec   :  { %v1198_v55 = vmul.f32 %v4498_v14, %v1197_v44  ;;  %v2098_v44 = vsel %vm58_vm11, %v5434_v43, 0.0  ;;  %v2436_v40 = vmul.f32 %v2435_v26, %v3308_v27 }
0x12ed   :  { %v1401_v60 = vsel %vm1398_vm15, %v1400_v15, 0.0  ;;  %v2099_v37 = vsel %vm116_vm0, %v2098_v44, 0.0 }
0x12ee   :  { %888 = vadd.xlane.f32.xlu0 %v887_v63  ;;  %v997_v63 = vsel %vm994_vm13, %v996_v2, 0.0  ;;  %v1199_v30 = vsel %vm1196_vm14, %v1198_v55, 0.0  ;;  %v1601_v2 = vmul.f32 %v1599_v32, %v5433_v20  ;;  %v1402_v52 = vsel %vm56_vm1, %v1401_v60, 0.0 }
0x12ef   :  { %v998_v21 = vsel %vm56_vm1, %v997_v63, 0.0  ;;  %v2300_v32 = vsel %vm58_vm11, %v4543_v50, 0.0 }
0x12f0   :  { %v999_v36 = vsel %vm116_vm0, %v998_v21, -inf  ;;  %v1403_v21 = vsel %vm116_vm0, %v1402_v52, -inf  ;;  %v583_v52 = vsel %vm58_vm11, %v3598_v22, 0.0  ;;  %v1189_v22 = vsel %vm58_vm11, %v5426_v47, 0.0 }
0x12f2   :  { %1090 = vadd.xlane.f32.xlu0 %v1089_v57  ;;  %v2407_v57 = vmul.f32 %v3024_v17, %v4688_v3 }
0x12f4   :  { %v2409_v29 = vmul.f32 %v2407_v57, %v4555_v34  ;;  %v1200_v34 = vsel %vm56_vm1, %v1199_v30, 0.0  ;;  %v2104_v57 = vmul.f32 %v3028_v51, %v5434_v43  ;;  %v584_v51 = vsel %vm116_vm0, %v583_v52, 0.0 }
0x12f5   :  { %v1201_v63 = vsel %vm116_vm0, %v1200_v34, -inf }
0x12f6   :  { %1292 = vadd.xlane.f32.xlu0 %v1291_v49  ;;  %v1801_v49 = vmul.f32 %v3026_v4, %v5432_v56  ;;  %v2410_v31 = vmul.f32 %v4498_v14, %v2409_v29  ;;  %v3030_v4 = vpop.eup %3029 }
0x12f7   :  { %v2306_v15 = vmul.f32 %v3030_v4, %v4543_v50  ;;  %v1795_v4 = vsel %vm58_vm11, %v5432_v56, 0.0  ;;  %v2199_v56 = vsel %vm58_vm11, %v4486_v53, 0.0 }
0x12f8   :  { %v1803_v17 = vmul.f32 %v1801_v49, %v5435_v46  ;;  %v2411_v55 = vsel %vm2408_vm3, %v2410_v31, 0.0  ;;  %v5436_v49 = vld [vmem:[#allocation84_spill] sm:$0xff] }
0x12f9   :  { %v2412_v0 = vsel %vm56_vm1, %v2411_v55, 0.0  ;;  %v2106_v30 = vmul.f32 %v2104_v57, %v5436_v49  ;;  %v2308_v6 = vmul.f32 %v2306_v15, %v5437_v23 }
0x12fa   :  { %1494 = vadd.xlane.f32.xlu0 %v1493_v59  ;;  %v1602_v59 = vmul.f32 %v4498_v14, %v1601_v2  ;;  %v1804_v54 = vmul.f32 %v4498_v14, %v1803_v17  ;;  %v2413_v29 = vsel %vm116_vm0, %v2412_v0, -inf  ;;  %v177_v17 = vsel %vm58_vm11, %v5420_v35, 0.0 }
0x12fb   :  { %v2309_v34 = vmul.f32 %v4498_v14, %v2308_v6  ;;  %v785_v35 = vsel %vm58_vm11, %v3710_v19, 0.0  ;;  %v1391_v19 = vsel %vm58_vm11, %v5427_v61, 0.0  ;;  %v2401_v6 = vsel %vm58_vm11, %v4688_v3, 0.0 }
0x12fc   :  { %v1603_v16 = vsel %vm1600_vm4, %v1602_v59, 0.0  ;;  %v1805_v8 = vsel %vm1802_vm5, %v1804_v54, 0.0 }
0x12fd   :  { %v1604_v27 = vsel %vm56_vm1, %v1603_v16, 0.0  ;;  %v1806_v2 = vsel %vm56_vm1, %v1805_v8, 0.0  ;;  %v2310_v31 = vsel %vm2307_vm7, %v2309_v34, 0.0  ;;  %v1190_v16 = vsel %vm116_vm0, %v1189_v22, 0.0 }
0x12fe   :  { %1696 = vadd.xlane.f32.xlu0 %v1695_v62  ;;  %190 = vmax.xlane.f32.xlu1 %v189_v24  ;;  %v2440_v62 = vadd.f32 %v2439_v10, %v2438_v58  ;;  %v2301_v24 = vsel %vm116_vm0, %v2300_v32, 0.0  ;;  %v1605_v20 = vsel %vm116_vm0, %v1604_v27, -inf  ;;  %v1807_v43 = vsel %vm116_vm0, %v1806_v2, -inf  ;;  %v4895_v2 = vld [vmem:[%s5232_s4] sm:$0x1]  ;;  %s2617_s4 = sld [smem:[#allocation2 + $0x9]] }
0x12ff   :  { %v2311_v46 = vsel %vm56_vm1, %v2310_v31, 0.0  ;;  %v178_v58 = vsel %vm116_vm0, %v177_v17, 0.0  ;;  %v786_v32 = vsel %vm116_vm0, %v785_v35, 0.0  ;;  %v2464_v34 = vstv %s2734_s13 }
0x1300   :  { %v2441_v41 = vmin.f32 %v2440_v62, %v2436_v40  ;;  %v2312_v39 = vsel %vm116_vm0, %v2311_v46, -inf  ;;  %v987_v40 = vsel %vm58_vm11, %v5422_v25, 0.0  ;;  %v1392_v62 = vsel %vm116_vm0, %v1391_v19, 0.0 }
0x1301   :  { %v988_v57 = vsel %vm116_vm0, %v987_v40, 0.0  ;;  %v1593_v25 = vsel %vm58_vm11, %v5431_v45, 0.0  ;;  %v1997_v45 = vsel %vm58_vm11, %v5412_v38, 0.0 }
0x1302   :  { %1898 = vadd.xlane.f32.xlu0 %v1897_v12  ;;  %1000 = vmax.xlane.f32.xlu1 %v999_v36  ;;  %v2442_v12 = vmax.f32 %v2441_v41, 0.0  ;;  %v2107_v36 = vmul.f32 %v4498_v14, %v2106_v30  ;;  %v1594_v47 = vsel %vm116_vm0, %v1593_v25, 0.0  ;;  %v1796_v41 = vsel %vm116_vm0, %v1795_v4, 0.0 }
0x1303   :  { %v1998_v30 = vsel %vm116_vm0, %v1997_v45, 0.0 }
0x1304   :  { %v2443_v50 = vsel %vm56_vm1, %v2442_v12, 0.0  ;;  %v2108_v44 = vsel %vm2105_vm6, %v2107_v36, 0.0  ;;  %v2200_v36 = vsel %vm116_vm0, %v2199_v56, 0.0 }
0x1305   :  { %v2444_v60 = vsel %vm116_vm0, %v2443_v50, 0.0  ;;  %v2109_v26 = vsel %vm56_vm1, %v2108_v44, 0.0 }
0x1306   :  { %2100 = vadd.xlane.f32.xlu0 %v2099_v37  ;;  %1202 = vmax.xlane.f32.xlu1 %v1201_v63  ;;  %v2110_v59 = vsel %vm116_vm0, %v2109_v26, -inf  ;;  %v5438_v37 = vld [vmem:[#allocation29_spill] sm:$0xff]  ;;  %v2402_v26 = vsel %vm116_vm0, %v2401_v6, 0.0 }
0x1307   :  { %v381_v9 = vsel %vm58_vm11, %v5438_v37, 0.0 }
0x1308   :  { %v382_v63 = vsel %vm116_vm0, %v381_v9, 0.0 }
0x130a   :  { %2302 = vadd.xlane.f32.xlu0 %v2301_v24  ;;  %1404 = vmax.xlane.f32.xlu1 %v1403_v21 }
0x130e   :  { %2414 = vmax.xlane.f32.xlu0 %v2413_v29  ;;  %1606 = vmax.xlane.f32.xlu1 %v1605_v20  ;;  %v2454_v29 = vsub.f32 %v2439_v10, %v2443_v50  ;;  %v2468_v10 = vstv %s2733_s12 }
0x1310   :  { %v2455_v23 = vmax.f32 %v2454_v29, 0.0 }
0x1312   :  { %1808 = vmax.xlane.f32.xlu1 %v1807_v43 }
0x1316   :  { %2445 = vadd.xlane.f32.xlu1 %v2444_v60 }
0x131a   :  { %2111 = vmax.xlane.f32.xlu1 %v2110_v59 }
0x131e   :  { %2313 = vmax.xlane.f32.xlu1 %v2312_v39 }
0x1322   :  { %179 = vadd.xlane.f32.xlu1 %v178_v58  ;;  %v4907_v58 = vstv %s2735_s15 }
0x1326   :  { %383 = vadd.xlane.f32.xlu1 %v382_v63 }
0x132a   :  { %585 = vadd.xlane.f32.xlu1 %v584_v51 }
0x132e   :  { %787 = vadd.xlane.f32.xlu1 %v786_v32 }
0x1332   :  { %989 = vadd.xlane.f32.xlu1 %v988_v57 }
0x1333   :  { %v2459_v55 = vpop.xlane.xlu0 %2458 }
0x1334   :  { %v2460_v61 = vmul.f32 0.0625, %v2459_v55  ;;  %v5439_v55 = vld [vmem:[#allocation22_spill] sm:$0xff] }
0x1336   :  { %1191 = vadd.xlane.f32.xlu1 %v1190_v16  ;;  %v2461_v8 = vmul.f32 2.5, %v2460_v61 }
0x1337   :  { %v294_v54 = vpop.xlane.xlu0 %293 }
0x1338   :  { %v2462_v38 = vadd.f32 %v4895_v2, %v2461_v8  ;;  %v5440_v8 = vld [vmem:[#allocation25_spill] sm:$0xff] }
0x133a   :  { %1393 = vadd.xlane.f32.xlu1 %v1392_v62  ;;  %v2463_v43 = vmul.f32 %v2462_v38, %v2455_v23 }
0x133b   :  { %v395_v24 = vpop.xlane.xlu0 %394 }
0x133c   :  { %v295_v21 = vmax.f32 %v395_v24, %v294_v54  ;;  %v2465_v46 = vadd.f32 %v2464_v34, %v2463_v43 }
0x133e   :  { %1595 = vadd.xlane.f32.xlu1 %v1594_v47 }
0x133f   :  { %v496_v0 = vpop.xlane.xlu0 %495 }
0x1340   :  { %v396_v27 = vmax.f32 %v295_v21, %v496_v0 }
0x1342   :  { %1797 = vadd.xlane.f32.xlu1 %v1796_v41 }
0x1343   :  { %v597_v15 = vpop.xlane.xlu0 %596 }
0x1344   :  { %v497_v49 = vmax.f32 %v396_v27, %v597_v15 }
0x1346   :  { %1999 = vadd.xlane.f32.xlu1 %v1998_v30 }
0x1347   :  { %v698_v20 = vpop.xlane.xlu0 %697 }
0x1348   :  { %v598_v12 = vmax.f32 %v497_v49, %v698_v20  ;;  %v297_v49 = vsel %vm194_vm10, %v5440_v8, 0.0  ;;  %v5441_v20 = vld [vmem:[#allocation26_spill] sm:$0xff]  ;;  %v5451_v8 = vld [vmem:[#allocation53_spill] sm:$0xff] }
0x1349   :  { %v299_v38 = vsel %vm197_vm12, %v5441_v20, 0.0 }
0x134a   :  { %2201 = vadd.xlane.f32.xlu1 %v2200_v36 }
0x134b   :  { %v799_v53 = vpop.xlane.xlu0 %798 }
0x134c   :  { %v699_v50 = vmax.f32 %v598_v12, %v799_v53  ;;  %v2467_v44 = vpop.permute.xlu1 %2466 }
0x134d   :  { %v2469_v60 = vsel %vm57_vm2, %v2468_v10, %v2467_v44  ;;  %v5442_v10 = vld [vmem:[#allocation30_spill] sm:$0xff]  ;;  %v5443_v44 = vld [vmem:[#allocation31_spill] sm:$0xff] }
0x134e   :  { %v2470_v31 = vsub.f32 %v2469_v60, %v4688_v3  ;;  %2403 = vadd.xlane.f32.xlu1 %v2402_v26  ;;  %v499_v6 = vsel %vm194_vm10, %v5442_v10, 0.0  ;;  %v501_v34 = vsel %vm197_vm12, %v5443_v44, 0.0 }
0x134f   :  { %v900_v59 = vpop.xlane.xlu0 %899 }
0x1350   :  { %v2471_v39 = vmul.f32 %v4498_v14, %v2470_v31  ;;  %v800_v17 = vmax.f32 %v699_v50, %v900_v59  ;;  %v5444_v31 = vld [vmem:[#allocation34_spill] sm:$0xff] }
0x1351   :  { %v701_v59 = vsel %vm194_vm10, %v5444_v31, 0.0 }
0x1352   :  { %v2472_v37 = vadd.f32 %v2471_v39, %v2465_v46 }
0x1353   :  { %v1102_v9 = vpop.xlane.xlu0 %1101 }
0x1354   :  { %v901_v63 = vmax.f32 %v800_v17, %v1102_v9  ;;  %v2473_v52 = vmul.f32 %v2472_v37, %v4907_v58 }
0x1356   :  { %v2474_v51 = vadd.f32 %v2473_v52, %v4563_v33 }
0x1357   :  { %v1304_v35 = vpop.xlane.xlu0 %1303 }
0x1358   :  { %v1002_v32 = vmax.f32 %v901_v63, %v1304_v35  ;;  %v2475_v40 = vmax.f32 %v2474_v51, 0.0  ;;  %v5446_v63 = vld [vmem:[#allocation38_spill] sm:$0xff] }
0x1359   :  { %v903_v52 = vsel %vm194_vm10, %v5446_v63, 0.0 }
0x135a   :  { %v4913_v3 = vsel %vm56_vm1, %v2475_v40, 0.0 }
0x135b   :  { %v1506_v57 = vpop.xlane.xlu0 %1505  ;;  %v2477_v14 = vmul.f32 5.0, %v4913_v3  ;;  %2524 = vst [vmem:[#allocation7] sm:$0x1] %v4913_v3  ;;  %vm2509_vm13 = vcmp.gt.f32.partialorder %v4913_v3, 1e-09 }
0x135c   :  { %v1103_v22 = vmax.f32 %v1002_v32, %v1506_v57  ;;  %v5447_v32 = vld [vmem:[#allocation39_spill] sm:$0xff] }
0x135d   :  { %v2478_v16 = vadd.f32 %v2477_v14, %v5439_v55  ;;  %v905_v40 = vsel %vm197_vm12, %v5447_v32, 0.0 }
0x135f   :  { %v1708_v19 = vpop.xlane.xlu0 %1707  ;;  %3031 = vrsqrt.f32 %v2478_v16  ;;  %vm2481_vm8 = vcmp.eq.f32.partialorder %v2478_v16, inf  ;;  %v2484_v0 = vand.u32 2147483648, %v2478_v16  ;;  %vm2483_vm9 = vcmp.eq.f32.partialorder %v2478_v16, 0.0 }
0x1360   :  { %v1204_v54 = vmax.f32 %v1103_v22, %v1708_v19  ;;  %v5448_v22 = vld [vmem:[#allocation45_spill] sm:$0xff] }
0x1361   :  { %v1105_v55 = vsel %vm194_vm10, %v5448_v22, 0.0 }
0x1363   :  { %v1910_v62 = vpop.xlane.xlu0 %1909 }
0x1364   :  { %v1305_v33 = vmax.f32 %v1204_v54, %v1910_v62  ;;  %v5449_v62 = vld [vmem:[#allocation46_spill] sm:$0xff] }
0x1367   :  { %v2011_v25 = vpop.xlane.xlu0 %2010 }
0x1368   :  { %v4918_v24 = vmax.f32 %v1305_v33, %v2011_v25  ;;  %v1107_v33 = vsel %vm197_vm12, %v5449_v62, 0.0 }
0x1369   :  { %v3032_v21 = vpop.eup %3031 }
0x136a   :  { %v2480_v47 = vmul.f32 %v3032_v21, %v2478_v16 }
0x136b   :  { %v4920_v4 = vpop.xlane.xlu0 %2212 }
0x136c   :  { %v1507_v61 = vmax.f32 %v4918_v24, %v4920_v4  ;;  %v2482_v27 = vsel %vm2481_vm8, %v2478_v16, %v2480_v47 }
0x136d   :  { %v2485_v41 = vsel %vm2483_vm9, %v2484_v0, %v2482_v27  ;;  %v5450_v0 = vld [vmem:[#allocation52_spill] sm:$0xff] }
0x136e   :  { %v2486_v45 = vsub.f32 %v2485_v41, %v4895_v2  ;;  %v1307_v27 = vsel %vm194_vm10, %v5450_v0, 0.0  ;;  %v5460_v0 = vld [vmem:[#allocation93_spill] sm:$0xff] }
0x136f   :  { %v283_v15 = vpop.xlane.xlu0 %282 }
0x1370   :  { %v296_v30 = vsel %vm57_vm2, %v283_v15, 0.0  ;;  %v2487_v29 = vmul.f32 0.4, %v2486_v45 }
0x1371   :  { %v298_v56 = vadd.f32 %v297_v49, %v296_v30  ;;  %v1309_v49 = vsel %vm197_vm12, %v5451_v8, 0.0  ;;  %v5461_v8 = vld [vmem:[#allocation94_spill] sm:$0xff] }
0x1372   :  { %v2488_v12 = vmul.f32 %v2487_v29, %v3288_v5  ;;  %2525 = vst [vmem:[#allocation8] sm:$0x1] %v2487_v29 }
0x1373   :  { %v300_v36 = vadd.f32 %v299_v38, %v298_v56  ;;  %v485_v23 = vpop.xlane.xlu0 %484  ;;  %v5452_v56 = vld [vmem:[#allocation60_spill] sm:$0xff] }
0x1374   :  { %v498_v53 = vsel %vm57_vm2, %v485_v23, 0.0  ;;  %v2489_v43 = vadd.f32 %v4895_v2, %v2488_v12  ;;  %v5445_v2 = vld [vmem:[#allocation35_spill] sm:$0xff]  ;;  %v1509_v20 = vsel %vm194_vm10, %v5452_v56, 0.0  ;;  %v5453_v23 = vld [vmem:[#allocation61_spill] sm:$0xff] }
0x1375   :  { %301 = vst [vmem:[#allocation11 + $0x1] sm:$0x1] %v300_v36  ;;  %v500_v50 = vadd.f32 %v499_v6, %v498_v53  ;;  %v703_v17 = vsel %vm197_vm12, %v5445_v2, 0.0  ;;  %v91_v36 = vstv %s2617_s4  ;;  %v1511_v10 = vsel %vm197_vm12, %v5453_v23, 0.0 }
0x1376   :  { %v2490_v60 = vmax.f32 %v2489_v43, 1e-09 }
0x1377   :  { %v502_v5 = vadd.f32 %v501_v34, %v500_v50  ;;  %v687_v26 = vpop.xlane.xlu0 %686  ;;  %v5454_v50 = vld [vmem:[#allocation68_spill] sm:$0xff] }
0x1378   :  { %v700_v46 = vsel %vm57_vm2, %v687_v26, 0.0  ;;  %3033 = vrcp.f32 %v2490_v60  ;;  %v1711_v44 = vsel %vm194_vm10, %v5454_v50, 0.0  ;;  %v5455_v26 = vld [vmem:[#allocation69_spill] sm:$0xff] }
0x1379   :  { %503 = vst [vmem:[#allocation11 + $0x3] sm:$0x1] %v502_v5  ;;  %v702_v39 = vadd.f32 %v701_v59, %v700_v46  ;;  %v1713_v31 = vsel %vm197_vm12, %v5455_v26, 0.0 }
0x137b   :  { %v704_v37 = vadd.f32 %v703_v17, %v702_v39  ;;  %v889_v9 = vpop.xlane.xlu0 %888  ;;  %v5456_v17 = vld [vmem:[#allocation77_spill] sm:$0xff] }
0x137c   :  { %v902_v51 = vsel %vm57_vm2, %v889_v9, 0.0 }
0x137d   :  { %705 = vst [vmem:[#allocation11 + $0x5] sm:$0x1] %v704_v37  ;;  %v904_v35 = vadd.f32 %v903_v52, %v902_v51  ;;  %v1913_v37 = vsel %vm194_vm10, %v5456_v17, 0.0 }
0x137f   :  { %v906_v57 = vadd.f32 %v905_v40, %v904_v35  ;;  %v1091_v14 = vpop.xlane.xlu0 %1090  ;;  %v5457_v35 = vld [vmem:[#allocation78_spill] sm:$0xff] }
0x1380   :  { %v1104_v16 = vsel %vm57_vm2, %v1091_v14, 0.0  ;;  %v1915_v32 = vsel %vm197_vm12, %v5457_v35, 0.0 }
0x1381   :  { %907 = vst [vmem:[#allocation11 + $0x7] sm:$0x1] %v906_v57  ;;  %v1106_v19 = vadd.f32 %v1105_v55, %v1104_v16  ;;  %v5458_v57 = vld [vmem:[#allocation86_spill] sm:$0xff] }
0x1382   :  { %v3034_v54 = vpop.eup %3033  ;;  %v2115_v14 = vsel %vm194_vm10, %v5458_v57, 0.0 }
0x1383   :  { %v1108_v25 = vadd.f32 %v1107_v33, %v1106_v19  ;;  %v1293_v21 = vpop.xlane.xlu0 %1292  ;;  %v2492_v47 = vmul.f32 %v3034_v54, %v4913_v3  ;;  %v5459_v54 = vld [vmem:[#allocation87_spill] sm:$0xff] }
0x1384   :  { %v1306_v41 = vsel %vm57_vm2, %v1293_v21, 0.0  ;;  %v2117_v62 = vsel %vm197_vm12, %v5459_v54, 0.0 }
0x1385   :  { %1109 = vst [vmem:[#allocation11 + $0x9] sm:$0x1] %v1108_v25  ;;  %v1308_v45 = vadd.f32 %v1307_v27, %v1306_v41  ;;  %v2493_v15 = vmax.f32 %v2492_v47, 1e-09  ;;  %v2317_v27 = vsel %vm194_vm10, %v5460_v0, 0.0 }
0x1387   :  { %v1310_v30 = vadd.f32 %v1309_v49, %v1308_v45  ;;  %v1495_v29 = vpop.xlane.xlu0 %1494  ;;  %3035 = vlog2.f32 %v2493_v15  ;;  %v2319_v49 = vsel %vm197_vm12, %v5461_v8, 0.0 }
0x1388   :  { %v1508_v38 = vsel %vm57_vm2, %v1495_v29, 0.0 }
0x1389   :  { %1311 = vst [vmem:[#allocation11 + $0xb] sm:$0x1] %v1310_v30  ;;  %v1510_v12 = vadd.f32 %v1509_v20, %v1508_v38  ;;  %v2506_v30 = vmax.f32 %v4913_v3, 1e-09 }
0x138b   :  { %v1512_v6 = vadd.f32 %v1511_v10, %v1510_v12  ;;  %v1697_v53 = vpop.xlane.xlu0 %1696  ;;  %v191_v43 = vpop.xlane.xlu1 %190 }
0x138c   :  { %v1710_v34 = vsel %vm57_vm2, %v1697_v53, 0.0  ;;  %v192_v60 = vmax.f32 %v91_v36, %v191_v43 }
0x138d   :  { %1513 = vst [vmem:[#allocation11 + $0xd] sm:$0x1] %v1512_v6  ;;  %v1712_v5 = vadd.f32 %v1711_v44, %v1710_v34 }
0x138e   :  { %v1608_v59 = vmax.f32 %v1507_v61, %v192_v60 }
0x138f   :  { %v1714_v46 = vadd.f32 %v1713_v31, %v1712_v5  ;;  %v1899_v39 = vpop.xlane.xlu0 %1898  ;;  %v1001_v2 = vpop.xlane.xlu1 %1000 }
0x1390   :  { %v1912_v9 = vsel %vm57_vm2, %v1899_v39, 0.0  ;;  %v1709_v63 = vmax.f32 %v1608_v59, %v1001_v2 }
0x1391   :  { %v3036_v52 = vpop.eup %3035  ;;  %1715 = vst [vmem:[#allocation11 + $0xf] sm:$0x1] %v1714_v46  ;;  %v1914_v51 = vadd.f32 %v1913_v37, %v1912_v9  ;;  %v5462_v9 = vld [vmem:[#allocation20_spill] sm:$0xff] }
0x1392   :  { %v2495_v24 = vmul.f32 0.6931472, %v3036_v52 }
0x1393   :  { %v1916_v4 = vadd.f32 %v1915_v32, %v1914_v51  ;;  %v2101_v61 = vpop.xlane.xlu0 %2100  ;;  %v1203_v40 = vpop.xlane.xlu1 %1202 }
0x1394   :  { %v2114_v22 = vsel %vm57_vm2, %v2101_v61, 0.0  ;;  %v1810_v55 = vmax.f32 %v1709_v63, %v1203_v40  ;;  %v2496_v16 = vmul.f32 0.6666667, %v2495_v24  ;;  %v195_v63 = vsel %vm194_vm10, %v5462_v9, 0.0  ;;  %v5463_v24 = vld [vmem:[#allocation21_spill] sm:$0xff]  ;;  %v5464_v40 = vld [vmem:[#allocation27_spill] sm:$0xff] }
0x1395   :  { %1917 = vst [vmem:[#allocation11 + $0x11] sm:$0x1] %v1916_v4  ;;  %v2116_v19 = vadd.f32 %v2115_v14, %v2114_v22  ;;  %v198_v4 = vsel %vm197_vm12, %v5463_v24, 0.0  ;;  %v398_v57 = vsel %vm194_vm10, %v5464_v40, 0.0 }
0x1396   :  { %v2497_v33 = vmul.f32 1.442695, %v2496_v16 }
0x1397   :  { %v2118_v25 = vadd.f32 %v2117_v62, %v2116_v19  ;;  %v2303_v21 = vpop.xlane.xlu0 %2302  ;;  %v1405_v47 = vpop.xlane.xlu1 %1404  ;;  %v5466_v62 = vld [vmem:[#allocation32_spill] sm:$0xff] }
0x1398   :  { %v2316_v41 = vsel %vm57_vm2, %v2303_v21, 0.0  ;;  %v1911_v45 = vmax.f32 %v1810_v55, %v1405_v47  ;;  %3037 = vpow2.f32 %v2497_v33  ;;  %v5465_v55 = vld [vmem:[#allocation28_spill] sm:$0xff]  ;;  %v600_v33 = vsel %vm194_vm10, %v5466_v62, 0.0  ;;  %v5467_v47 = vld [vmem:[#allocation33_spill] sm:$0xff] }
0x1399   :  { %2119 = vst [vmem:[#allocation11 + $0x13] sm:$0x1] %v2118_v25  ;;  %v2318_v15 = vadd.f32 %v2317_v27, %v2316_v41  ;;  %3039 = vrcp.f32 %v2506_v30  ;;  %v400_v16 = vsel %vm197_vm12, %v5465_v55, 0.0  ;;  %v602_v0 = vsel %vm197_vm12, %v5467_v47, 0.0  ;;  %v5469_v30 = vld [vmem:[#allocation37_spill] sm:$0xff] }
0x139b   :  { %v2320_v29 = vadd.f32 %v2319_v49, %v2318_v15  ;;  %v2415_v56 = vpop.xlane.xlu0 %2414  ;;  %v1607_v20 = vpop.xlane.xlu1 %1606 }
0x139c   :  { %v2012_v38 = vmax.f32 %v1911_v45, %v2415_v56  ;;  %v5468_v45 = vld [vmem:[#allocation36_spill] sm:$0xff] }
0x139d   :  { %2321 = vst [vmem:[#allocation11 + $0x15] sm:$0x1] %v2320_v29  ;;  %v802_v15 = vsel %vm194_vm10, %v5468_v45, 0.0  ;;  %v804_v29 = vsel %vm197_vm12, %v5469_v30, 0.0 }
0x139e   :  { %v2113_v12 = vmax.f32 %v2012_v38, %v1607_v20  ;;  %v5470_v38 = vld [vmem:[#allocation42_spill] sm:$0xff] }
0x139f   :  { %v1809_v36 = vpop.xlane.xlu1 %1808 }
0x13a0   :  { %v2214_v23 = vmax.f32 %v2113_v12, %v1809_v36  ;;  %v1004_v12 = vsel %vm194_vm10, %v5470_v38, 0.0 }
0x13a2   :  { %v3038_v10 = vpop.eup %3037 }
0x13a3   :  { %v5022_v6 = vpop.xlane.xlu1 %2445  ;;  %v2499_v53 = vmul.f32 %v3038_v10, %v4913_v3  ;;  %v3040_v34 = vpop.eup %3039  ;;  %v5471_v10 = vld [vmem:[#allocation43_spill] sm:$0xff] }
0x13a5   :  { %v2500_v43 = vmul.f32 %v2499_v53, %v3314_v42  ;;  %v3048_v42 = vld [vmem:[%s5233_s5] sm:$0x1]  ;;  %v1006_v53 = vsel %vm197_vm12, %v5471_v10, 0.0  ;;  %s3194_s5 = smov [#allocation8]  }
0x13a6   :  { %s2553_s18 = sshll.u32 %s3194_s5, 4  ;;  %s2554_s18 = int_to_ptr.vmem [resolvable:$true] %s2553_s18 }
0x13a7   :  { %v2112_v50 = vpop.xlane.xlu1 %2111  ;;  %v2501_v44 = vsel %vm56_vm1, %v2500_v43, 0.0  ;;  %s3071_s2 = scalar_lea.vmem %s2554_s18, 16  ;;  %s3075_s20 = scalar_lea.vmem %s2554_s18, 32 }
0x13a8   :  { %v2315_v60 = vmax.f32 %v2214_v23, %v2112_v50  ;;  %v2502_v5 = vsel %vm58_vm11, %v2501_v44, 0.0  ;;  %2526 = vst [vmem:[#allocation10] sm:$0x1] %v2501_v44  ;;  %v2508_v31 = vmul.f32 %v3040_v34, %v2501_v44  ;;  %v5472_v44 = vld [vmem:[#allocation49_spill] sm:$0xff]  ;;  %p3072_p8 = scmp.ne.s32.totalorder %s2554_s18, %s3071_s2  ;;  %p3076_p9 = scmp.lt.s32.totalorder %s2554_s18, %s2554_s18 }
0x13a9   :  { %v2503_v26 = vsel %vm116_vm0, %v2502_v5, 0.0  ;;  %v1206_v34 = vsel %vm194_vm10, %v5472_v44, 0.0  ;;  %p3077_p10 = scmp.lt.s32.totalorder %s3075_s20, %s3071_s2 }
0x13aa   :  { %2504 = vadd.xlane.f32.xlu0 %v2503_v26  ;;  %v2510_v46 = vmul.f32 %v2508_v31, %v4907_v58 }
0x13ab   :  { %v2314_v59 = vpop.xlane.xlu1 %2313  ;;  %p3078_p11 = por %p3077_p10, %p3076_p9 }
0x13ac   :  { %v5032_v39 = vmax.f32 %v2315_v60, %v2314_v59  ;;  %v2511_v2 = vmul.f32 %v3048_v42, %v2510_v46 }
0x13ad   :  { %p3079_p12 = pnand %p3078_p11, %p3072_p8 }
0x13ae   :  { %v2512_v37 = vsel %vm2509_vm13, %v2511_v2, 0.0 }
0x13af   :  { %v180_v17 = vpop.xlane.xlu1 %179  ;;  %v2513_v51 = vsel %vm56_vm1, %v2512_v37, 0.0 }
0x13b0   :  { %v193_v52 = vsel %vm57_vm2, %v180_v17, 0.0  ;;  %v2514_v32 = vsel %vm116_vm0, %v2513_v51, -inf }
0x13b1   :  { %v196_v35 = vadd.f32 %v195_v63, %v193_v52  ;;  %2515 = vmax.xlane.f32.xlu1 %v2514_v32 }
0x13b3   :  { %v199_v3 = vadd.f32 %v198_v4, %v196_v35  ;;  %v384_v61 = vpop.xlane.xlu1 %383 }
0x13b4   :  { %v397_v14 = vsel %vm57_vm2, %v384_v61, 0.0 }
0x13b5   :  { %200 = vst [vmem:[#allocation11] sm:$0x1] %v199_v3  ;;  %v399_v22 = vadd.f32 %v398_v57, %v397_v14 }
0x13b7   :  { %v401_v19 = vadd.f32 %v400_v16, %v399_v22  ;;  %v586_v54 = vpop.xlane.xlu1 %585 }
0x13b8   :  { %v599_v25 = vsel %vm57_vm2, %v586_v54, 0.0 }
0x13b9   :  { %402 = vst [vmem:[#allocation11 + $0x2] sm:$0x1] %v401_v19  ;;  %v601_v21 = vadd.f32 %v600_v33, %v599_v25 }
0x13bb   :  { %v603_v27 = vadd.f32 %v602_v0, %v601_v21  ;;  %v788_v41 = vpop.xlane.xlu1 %787 }
0x13bc   :  { %v801_v8 = vsel %vm57_vm2, %v788_v41, 0.0 }
0x13bd   :  { %604 = vst [vmem:[#allocation11 + $0x4] sm:$0x1] %v603_v27  ;;  %v803_v49 = vadd.f32 %v802_v15, %v801_v8 }
0x13bf   :  { %v805_v56 = vadd.f32 %v804_v29, %v803_v49  ;;  %v990_v20 = vpop.xlane.xlu1 %989 }
0x13c0   :  { %v1003_v36 = vsel %vm57_vm2, %v990_v20, 0.0 }
0x13c1   :  { %806 = vst [vmem:[#allocation11 + $0x6] sm:$0x1] %v805_v56  ;;  %v1005_v23 = vadd.f32 %v1004_v12, %v1003_v36 }
0x13c3   :  { %v1007_v43 = vadd.f32 %v1006_v53, %v1005_v23  ;;  %v1192_v50 = vpop.xlane.xlu1 %1191 }
0x13c4   :  { %v1205_v60 = vsel %vm57_vm2, %v1192_v50, 0.0 }
0x13c5   :  { %1008 = vst [vmem:[#allocation11 + $0x8] sm:$0x1] %v1007_v43  ;;  %v1207_v5 = vadd.f32 %v1206_v34, %v1205_v60 }
0x13c6   :  { %3082 = shalt.err (!%p3079_p12)
}
0x13c7   :  { %s3083_s23 = scalar_lea.hbm %s5235_s7, 16 }
0x13c8   :  { %p3084_p13 = scmp.ne.s32.totalorder %s5235_s7, %s3083_s23  ;;  %p3087_p0 = scmp.lt.u32.totalorder %s3083_s23, %s5235_s7 }
0x13ca   :  { %p3089_p1 = pnand %p3087_p0, %p3084_p13 }
0x13cc   :  { %3092 = shalt.err (!%p3089_p1)
}
0x13cd   :  { %2556 = dma.vmem_to_hbm [thread:$0]  %s2554_s18, 16, %s5235_s7, [#allocation9]   ;;  %v5473_v26 = vld [vmem:[#allocation50_spill] sm:$0xff]  ;;  %v1394_v46 = vpop.xlane.xlu1 %1393  ;;  %v5474_v42 = vld [vmem:[#allocation56_spill] sm:$0xff]  ;;  %v5475_v9 = vld [vmem:[#allocation57_spill] sm:$0xff] }
0x13ce   :  { %v1208_v31 = vsel %vm197_vm12, %v5473_v26, 0.0  ;;  %v1408_v2 = vsel %vm194_vm10, %v5474_v42, 0.0  ;;  %v1407_v17 = vsel %vm57_vm2, %v1394_v46, 0.0  ;;  %s3195_s28 = smov [#allocation7]   ;;  %s3196_s30 = smov [#allocation10]   ;;  %v1410_v63 = vsel %vm197_vm12, %v5475_v9, 0.0 }
0x13cf   :  { %v1209_v59 = vadd.f32 %v1208_v31, %v1207_v5  ;;  %s2543_s29 = sshll.u32 %s3195_s28, 4  ;;  %s2563_s19 = sshll.u32 %s3196_s30, 4  ;;  %v1409_v37 = vadd.f32 %v1408_v2, %v1407_v17  ;;  %s2544_s29 = int_to_ptr.vmem [resolvable:$true] %s2543_s29  ;;  %s5106_s19 = int_to_ptr.vmem [resolvable:$true] %s2563_s19 }
0x13d0   :  { %s3093_s7 = scalar_lea.vmem %s2544_s29, 16  ;;  %s3097_s11 = scalar_lea.vmem %s2544_s29, 32 }
0x13d1   :  { %1210 = vst [vmem:[#allocation11 + $0xa] sm:$0x1] %v1209_v59  ;;  %p3094_p2 = scmp.ne.s32.totalorder %s2544_s29, %s3093_s7  ;;  %p3098_p3 = scmp.lt.s32.totalorder %s2544_s29, %s2544_s29 }
0x13d2   :  { %p3099_p4 = scmp.lt.s32.totalorder %s3097_s11, %s3093_s7 }
0x13d4   :  { %p3100_p5 = por %p3099_p4, %p3098_p3 }
0x13d6   :  { %p3101_p6 = pnand %p3100_p5, %p3094_p2 }
0x13d8   :  { %3104 = shalt.err (!%p3101_p6)
}
0x13d9   :  { %s3105_s3 = scalar_lea.hbm %s5234_s6, 16 }
0x13da   :  { %p3106_p7 = scmp.ne.s32.totalorder %s5234_s6, %s3105_s3  ;;  %p3109_p8 = scmp.lt.u32.totalorder %s3105_s3, %s5234_s6 }
0x13dc   :  { %p3111_p9 = pnand %p3109_p8, %p3106_p7 }
0x13de   :  { %3114 = shalt.err (!%p3111_p9)
}
0x13df   :  { %2546 = dma.vmem_to_hbm [thread:$0]  %s2544_s29, 16, %s5234_s6, [#allocation3]   ;;  %v1411_v52 = vadd.f32 %v1410_v63, %v1409_v37  ;;  %v1596_v51 = vpop.xlane.xlu1 %1595 }
0x13e0   :  { %s3115_s18 = scalar_lea.vmem %s5106_s19, 16  ;;  %s3119_s2 = scalar_lea.vmem %s5106_s19, 32 }
0x13e1   :  { %p3116_p10 = scmp.ne.s32.totalorder %s5106_s19, %s3115_s18  ;;  %p3120_p11 = scmp.lt.s32.totalorder %s5106_s19, %s5106_s19 }
0x13e2   :  { %p3121_p12 = scmp.lt.s32.totalorder %s3119_s2, %s3115_s18 }
0x13e4   :  { %p3122_p13 = por %p3121_p12, %p3120_p11 }
0x13e6   :  { %p3123_p0 = pnand %p3122_p13, %p3116_p10 }
0x13e8   :  { %3126 = shalt.err (!%p3123_p0)
}
0x13e9   :  { %s3127_s22 = scalar_lea.hbm %s5236_s8, 16 }
0x13ea   :  { %p3128_p1 = scmp.ne.s32.totalorder %s5236_s8, %s3127_s22  ;;  %p3131_p2 = scmp.lt.u32.totalorder %s3127_s22, %s5236_s8 }
0x13ec   :  { %p3133_p3 = pnand %p3131_p2, %p3128_p1 }
0x13ee   :  { %3136 = shalt.err (!%p3133_p3)
}
0x13ef   :  { %2566 = dma.vmem_to_hbm [thread:$0]  %s5106_s19, 16, %s5236_s8, [#allocation9]   ;;  %v5476_v35 = vld [vmem:[#allocation64_spill] sm:$0xff]  ;;  %v1609_v24 = vsel %vm57_vm2, %v1596_v51, 0.0  ;;  %1412 = vst [vmem:[#allocation11 + $0xc] sm:$0x1] %v1411_v52  ;;  %v1798_v57 = vpop.xlane.xlu1 %1797 }
0x13f0   :  { %v1610_v32 = vsel %vm194_vm10, %v5476_v35, 0.0  ;;  %v5477_v3 = vld [vmem:[#allocation65_spill] sm:$0xff]  ;;  %v1811_v55 = vsel %vm57_vm2, %v1798_v57, 0.0  ;;  %v5479_v19 = vld [vmem:[#allocation74_spill] sm:$0xff]  ;;  %v5483_v56 = vld [vmem:[#allocation91_spill] sm:$0xff]  ;;  %v2418_v36 = vsel %vm194_vm10, %v4696_v18, 0.0 }
0x13f1   :  { %v1611_v4 = vadd.f32 %v1610_v32, %v1609_v24  ;;  %v1612_v61 = vsel %vm197_vm12, %v5477_v3, 0.0  ;;  %v5478_v14 = vld [vmem:[#allocation73_spill] sm:$0xff]  ;;  %v1814_v54 = vsel %vm197_vm12, %v5479_v19, 0.0  ;;  %v5481_v27 = vld [vmem:[#allocation82_spill] sm:$0xff]  ;;  %v2218_v20 = vsel %vm197_vm12, %v5483_v56, 0.0  ;;  %s5185_s8 = sld [smem:[#allocation2 + $0x8]] }
0x13f2   :  { %v1812_v22 = vsel %vm194_vm10, %v5478_v14, 0.0  ;;  %v5480_v25 = vld [vmem:[#allocation81_spill] sm:$0xff]  ;;  %v2016_v41 = vsel %vm197_vm12, %v5481_v27, 0.0  ;;  %v5482_v8 = vld [vmem:[#allocation90_spill] sm:$0xff]  ;;  %v2420_v53 = vsel %vm197_vm12, %v4706_v48, 0.0  ;;  %v2447_v50 = vmul.f32 0.0625, %v5022_v6 }
0x13f3   :  { %v1613_v40 = vadd.f32 %v1612_v61, %v1611_v4  ;;  %v1813_v16 = vadd.f32 %v1812_v22, %v1811_v55  ;;  %v2000_v33 = vpop.xlane.xlu1 %1999  ;;  %v2014_v21 = vsel %vm194_vm10, %v5480_v25, 0.0  ;;  %v2216_v49 = vsel %vm194_vm10, %v5482_v8, 0.0  ;;  %s3197_s27 = smov [#allocation11]  }
0x13f4   :  { %v2013_v47 = vsel %vm57_vm2, %v2000_v33, 0.0  ;;  %v2449_v44 = vmul.f32 %v4907_v58, %v2447_v50  ;;  %s2572_s0 = sshll.u32 %s3197_s27, 4  ;;  %v2519_v58 = vsel %vm194_vm10, %v2447_v50, 0.0  ;;  %s2573_s0 = int_to_ptr.vmem [resolvable:$true] %s2572_s0 }
0x13f5   :  { %1614 = vst [vmem:[#allocation11 + $0xe] sm:$0x1] %v1613_v40  ;;  %v1815_v62 = vadd.f32 %v1814_v54, %v1813_v16  ;;  %v2015_v0 = vadd.f32 %v2014_v21, %v2013_v47  ;;  %s3137_s28 = scalar_lea.vmem %s2573_s0, 384  ;;  %p3142_p5 = scmp.lt.s32.totalorder %s2573_s0, %s2573_s0 }
0x13f6   :  { %v2451_v34 = vmul.f32 %v2449_v44, %v3339_v7  ;;  %v2450_v48 = vadd.f32 %v2449_v44, %v4715_v28  ;;  %v2521_v7 = vsel %vm197_vm12, %v2449_v44, 0.0  ;;  %p3138_p4 = scmp.ne.s32.totalorder %s2573_s0, %s3137_s28  ;;  %p3143_p6 = scmp.lt.s32.totalorder %s3137_s28, %s3137_s28 }
0x13f7   :  { %1816 = vst [vmem:[#allocation11 + $0x10] sm:$0x1] %v1815_v62  ;;  %v2017_v45 = vadd.f32 %v2016_v41, %v2015_v0  ;;  %v2202_v15 = vpop.xlane.xlu1 %2201  ;;  %v2530_v31 = vstv %s5185_s8 }
0x13f8   :  { %v2215_v30 = vsel %vm57_vm2, %v2202_v15, 0.0  ;;  %v2452_v60 = vadd.f32 %v2451_v34, %v4741_v11  ;;  %v2528_v59 = vsel %vm194_vm10, %v2450_v48, 0.0  ;;  %p3144_p7 = por %p3143_p6, %p3142_p5 }
0x13f9   :  { %2018 = vst [vmem:[#allocation11 + $0x12] sm:$0x1] %v2017_v45  ;;  %v2217_v29 = vadd.f32 %v2216_v49, %v2215_v30 }
0x13fa   :  { %v2453_v18 = vmin.f32 %v2452_v60, %v3297_v13  ;;  %p3145_p8 = pnand %p3144_p7, %p3138_p4 }
0x13fb   :  { %v2219_v38 = vadd.f32 %v2218_v20, %v2217_v29  ;;  %v2404_v12 = vpop.xlane.xlu1 %2403 }
0x13fc   :  { %v2417_v23 = vsel %vm57_vm2, %v2404_v12, 0.0  ;;  %v2527_v11 = vsel %vm57_vm2, %v2453_v18, 0.0 }
0x13fd   :  { %2220 = vst [vmem:[#allocation11 + $0x14] sm:$0x1] %v2219_v38  ;;  %v2419_v10 = vadd.f32 %v2418_v36, %v2417_v23  ;;  %v2529_v28 = vadd.f32 %v2528_v59, %v2527_v11 }
0x13ff   :  { %v2421_v43 = vadd.f32 %v2420_v53, %v2419_v10 }
0x1401   :  { %2422 = vst [vmem:[#allocation11 + $0x16] sm:$0x1] %v2421_v43 }
0x1437   :  { %v2505_v5 = vpop.xlane.xlu0 %2504 }
0x1438   :  { %v2518_v26 = vsel %vm57_vm2, %v2505_v5, 0.0 }
0x1439   :  { %v2520_v6 = vadd.f32 %v2519_v58, %v2518_v26 }
0x143b   :  { %v2522_v13 = vadd.f32 %v2521_v7, %v2520_v6 }
0x143d   :  { %2523 = vst [vmem:[#allocation11 + $0x17] sm:$0x1] %v2522_v13 }
0x143e   :  { %3148 = shalt.err (!%p3145_p8)
}
0x143f   :  { %s3149_s19 = scalar_lea.hbm %s5237_s9, 384 }
0x1440   :  { %p3150_p9 = scmp.ne.s32.totalorder %s5237_s9, %s3149_s19  ;;  %p3153_p10 = scmp.lt.u32.totalorder %s3149_s19, %s5237_s9 }
0x1442   :  { %p3155_p11 = pnand %p3153_p10, %p3150_p9 }
0x1444   :  { %3158 = shalt.err (!%p3155_p11)
}
0x1445   :  { %s3198_s3 = smov 128   ;;  %s3199_s14 = smov 8   ;;  %v2531_v46 = vsel %vm197_vm12, %v2530_v31, 0.0  ;;  %vm2533_vm0 = vcmp.eq.s32.totalorder %v3271_v1, 3  ;;  %v2516_v42 = vpop.xlane.xlu1 %2515 }
0x1446   :  { %2578 = dma.vmem_to_hbm [thread:$0]  %s2573_s0, 384, %s5237_s9, [#allocation12], %s3198_s3, %s3198_s3, %s3199_s14   ;;  %v2517_v2 = vmax.f32 %v5032_v39, %v2516_v42  ;;  %v2532_v17 = vadd.f32 %v2531_v46, %v2529_v28 }
0x1447   :  { %s3200_s16 = smov [#allocation13]  }
0x1448   :  { %s2585_s17 = sshll.u32 %s3200_s16, 4  ;;  %v2534_v37 = vsel %vm2533_vm0, %v2517_v2, 0.0  ;;  %s2586_s17 = int_to_ptr.vmem [resolvable:$true] %s2585_s17 }
0x1449   :  { %v2535_v9 = vadd.f32 %v2534_v37, %v2532_v17  ;;  %s3159_s5 = scalar_lea.vmem %s2586_s17, 16  ;;  %s3163_s18 = scalar_lea.vmem %s2586_s17, 32 }
0x144a   :  { %p3160_p12 = scmp.ne.s32.totalorder %s2586_s17, %s3159_s5  ;;  %p3164_p13 = scmp.lt.s32.totalorder %s2586_s17, %s2586_s17 }
0x144b   :  { %2536 = vst [vmem:[#allocation13] sm:$0x1] %v2535_v9  ;;  %p3165_p0 = scmp.lt.s32.totalorder %s3163_s18, %s3159_s5 }
0x144d   :  { %p3166_p1 = por %p3165_p0, %p3164_p13 }
0x144f   :  { %p3167_p2 = pnand %p3166_p1, %p3160_p12 }
0x1451   :  { %3170 = shalt.err (!%p3167_p2)
}
0x1452   :  { %s3171_s20 = scalar_lea.hbm %s5238_s10, 16 }
0x1453   :  { %p3172_p3 = scmp.ne.s32.totalorder %s5238_s10, %s3171_s20  ;;  %p3175_p4 = scmp.lt.u32.totalorder %s3171_s20, %s5238_s10 }
0x1455   :  { %p3177_p5 = pnand %p3175_p4, %p3172_p3 }
0x1457   :  { %3180 = shalt.err (!%p3177_p5)
}
0x1458   :  { %2588 = dma.vmem_to_hbm [thread:$0]  %s2586_s17, 16, %s5238_s10, [#allocation12]  }
0x1459   :  { %3185 = dma.done.wait [#allocation3], 16  }
0x145a   :  { %3186 = vsyncadd [#allocation3], 4294967280 }
0x145b   :  { %3187 = dma.done.wait [#allocation9], 32  }
0x145c   :  { %3188 = vsyncadd [#allocation9], 4294967264 }
0x145d   :  { %3189 = dma.done.wait [#allocation12], 400  }
0x145e   :  { %3190 = vsyncadd [#allocation12], 4294966896 }
0x145f   :  { %2604 = vsyncpa [#allocation3], 1 }
0x1460   :  { %2605 = vsyncpa [#allocation9], 1 }
0x1461   :  { %2606 = vsyncpa [#allocation12], 1 }
0x1462   :  { %2607 = vsyncpa [#allocation4], 1 }
0x1463   :  { %2608 = vsyncpa [#allocation5], 1 }

</bundles_post_ra>
